<compile_context>
chip_gen: v6e
topology: v6e:2x2x1
jax: 0.10.0
libtpu: 0.0.40
codegen_flags: <defaults>
</compile_context>

<pallas_src>
import jax
import jax.numpy as jnp
from jax.experimental import pallas as pl
from jax.experimental.pallas import tpu as pltpu


_NC_LANES = 128   # lane-aligned width of the one-hot / label table (>= num_classes)
_ROW_TILE = 128   # batch tile granularity


def _round_up(x, m):
    return (x + m - 1) // m * m


# ----------------------------- Pallas kernel ---------------------------------
def _discriminator_mlp_kernel(x_ref, lbl_ref, w1_ref, embw1_ref, b1_ref,
                              w2_ref, b2_ref, w3_ref, b3_ref, o_ref):
    tm = x_ref.shape[0]
    nc = embw1_ref.shape[0]

    # Layer 1: image matmul (bf16 MXU, f32 acc) + label contribution via a
    # one-hot (tm, 128) @ (128, 512) matmul against embedding@W1_label table.
    h1 = jnp.dot(x_ref[...], w1_ref[...], preferred_element_type=jnp.float32)
    lane_ids = jax.lax.broadcasted_iota(jnp.int32, (tm, nc), 1)
    onehot = jnp.where(lane_ids == lbl_ref[...], 1.0, 0.0).astype(jnp.bfloat16)
    h1 = h1 + jnp.dot(onehot, embw1_ref[...],
                      preferred_element_type=jnp.float32)
    h1 = h1 + b1_ref[...]
    h1 = jnp.maximum(h1, 0.2 * h1)          # LeakyReLU(0.2), f32 (v5e-safe)

    # Layer 2: Linear(512 -> 256) + LeakyReLU(0.2).
    h2 = jnp.dot(h1.astype(jnp.bfloat16), w2_ref[...],
                 preferred_element_type=jnp.float32)
    h2 = h2 + b2_ref[...]
    h2 = jnp.maximum(h2, 0.2 * h2)

    # Layer 3: Linear(256 -> 1) + Sigmoid, produced as a lane-dense (1, tm) row
    # via dot_general(w3_row, h2^T) so the output store/writeback is ~4 B/row.
    logits = jax.lax.dot_general(
        w3_ref[...], h2.astype(jnp.bfloat16),
        dimension_numbers=(((1,), (1,)), ((), ())),
        preferred_element_type=jnp.float32)                  # (1, tm)
    logits = logits + b3_ref[...]                            # (1, 1) broadcast
    o_ref[...] = jax.nn.sigmoid(logits)[None, :, :].astype(o_ref.dtype)


# ----------------------------- spec helpers ----------------------------------
_Buffered = getattr(pl, "Buffered", None)
_SINGLE_BUFFER_WEIGHTS = [_Buffered is not None]


def _make_in_specs(tm, d_pad, h1_dim, h2_dim, single_buffer_weights):
    wkw = {}
    if single_buffer_weights and _Buffered is not None:
        wkw = dict(pipeline_mode=_Buffered(1))   # resident weights: 1 buffer
    const = lambda i: (0, 0)
    return [
        pl.BlockSpec((tm, d_pad), lambda i: (i, 0)),          # x tile (bf16)
        pl.BlockSpec((tm, 1), lambda i: (i, 0)),              # labels (int32)
        pl.BlockSpec((d_pad, h1_dim), const, **wkw),          # w1 (image rows)
        pl.BlockSpec((_NC_LANES, h1_dim), const, **wkw),      # embedding@w1 table
        pl.BlockSpec((1, h1_dim), const, **wkw),              # b1 (f32)
        pl.BlockSpec((h1_dim, h2_dim), const, **wkw),         # w2 (bf16)
        pl.BlockSpec((1, h2_dim), const, **wkw),              # b2 (f32)
        pl.BlockSpec((1, h2_dim), const, **wkw),              # w3 row (bf16)
        pl.BlockSpec((1, 1), const, **wkw),                   # b3 (f32)
    ]


# ----------------------------- Pallas wrapper ---------------------------------
def discriminator_mlp(flat_img, labels, embedding, w1, b1, w2, b2, w3, b3,
                      *, tm_max=512):
    """3-layer conditional-discriminator head, batch-tiled Pallas call.

    flat_img: (N, D) f32 flattened images; labels: (N,) int.
    w1: (D + num_classes, 512), w2: (512, 256), w3: (256, 1); biases (1, out).
    Returns (N, 1) f32 sigmoid probabilities.
    """
    n, d = flat_img.shape
    num_classes = embedding.shape[0]
    h1_dim = w1.shape[1]
    h2_dim = w2.shape[1]
    assert num_classes <= _NC_LANES

    # Batch tile: multiple of 128; aim for >= 2 grid steps so the "parallel"
    # batch axis can shard across both TensorCores on v7x.
    tm_max = max(_ROW_TILE, (tm_max // _ROW_TILE) * _ROW_TILE)
    tm = min(tm_max, max(_ROW_TILE, _round_up(-(-n // 2), _ROW_TILE)))
    n_pad = _round_up(n, tm)
    grid = (n_pad // tm,)

    # Single fused producer pass: f32 image -> batch/lane padded bf16 x.
    d_pad = _round_up(d, 128)
    x_p = jnp.zeros((n_pad, d_pad), jnp.bfloat16).at[:n, :d].set(
        flat_img.astype(jnp.bfloat16))
    if n_pad == n:
        lbl_p = labels.astype(jnp.int32).reshape(n, 1)
    else:
        lbl_p = jnp.zeros((n_pad, 1), jnp.int32).at[:n, 0].set(
            labels.astype(jnp.int32))

    # Fold the label-embedding path into a per-class layer-1 table (10, 512).
    emb_w1 = jnp.zeros((_NC_LANES, h1_dim), jnp.bfloat16).at[:num_classes, :].set(
        (embedding @ w1[d:, :]).astype(jnp.bfloat16))
    w1_img = jnp.zeros((d_pad, h1_dim), jnp.bfloat16).at[:d, :].set(
        w1[:d, :].astype(jnp.bfloat16))
    w2_b = w2.astype(jnp.bfloat16)
    w3_row = w3.reshape(1, h2_dim).astype(jnp.bfloat16)
    b1_r = b1.reshape(1, h1_dim).astype(jnp.float32)
    b2_r = b2.reshape(1, h2_dim).astype(jnp.float32)
    b3_r = b3.reshape(1, 1).astype(jnp.float32)

    flops = 2 * n_pad * (d_pad * h1_dim + _NC_LANES * h1_dim
                         + h1_dim * h2_dim + h2_dim)
    bytes_accessed = (x_p.size * 2 + lbl_p.size * 4
                      + (w1_img.size + emb_w1.size + w2_b.size + w3_row.size) * 2
                      + (h1_dim + h2_dim + 1) * 4
                      + n_pad * 4)

    def run(single_buffer_weights):
        out = pl.pallas_call(
            _discriminator_mlp_kernel,
            out_shape=jax.ShapeDtypeStruct((grid[0], 1, tm), jnp.float32),
            grid_spec=pltpu.PrefetchScalarGridSpec(
                num_scalar_prefetch=0,
                grid=grid,
                in_specs=_make_in_specs(tm, d_pad, h1_dim, h2_dim,
                                        single_buffer_weights),
                out_specs=pl.BlockSpec((1, 1, tm), lambda i: (i, 0, 0)),
            ),
            compiler_params=pltpu.CompilerParams(
                dimension_semantics=("parallel",)),
            cost_estimate=pl.CostEstimate(
                flops=flops, transcendentals=n_pad,
                bytes_accessed=bytes_accessed),
        )(x_p, lbl_p, w1_img, emb_w1, b1_r, w2_b, b2_r, w3_row, b3_r)
        return jax.block_until_ready(out)

    if _SINGLE_BUFFER_WEIGHTS[0]:
        try:
            out = run(True)
        except Exception:
            # pl.Buffered(1) not supported by this pipeline -> default buffering.
            _SINGLE_BUFFER_WEIGHTS[0] = False
            out = run(False)
    else:
        out = run(False)

    # (grid, 1, tm) -> (n_pad, 1): contiguous reshape; the slice reads 4*n bytes.
    return out.reshape(n_pad, 1)[:n]


# ----------------------------- Module wrapper ---------------------------------
def make_discriminator_params(image_size=28, channels=1, num_classes=10,
                              seed=0):
    """Deterministic synthetic init mimicking the PyTorch module's shapes."""
    in_dim = channels * image_size * image_size + num_classes
    dims = [(in_dim, 512), (512, 256), (256, 1)]
    key = jax.random.PRNGKey(seed)
    keys = jax.random.split(key, 2 * len(dims) + 1)

    params = {
        # nn.Embedding(num_classes, num_classes)
        "embedding": jax.random.normal(
            keys[0], (num_classes, num_classes), dtype=jnp.float32)
    }
    for i, (fan_in, fan_out) in enumerate(dims):
        bound = 1.0 / jnp.sqrt(jnp.float32(fan_in))
        params[f"w{i+1}"] = jax.random.uniform(
            keys[2 * i + 1], (fan_in, fan_out), jnp.float32, -bound, bound)
        params[f"b{i+1}"] = jax.random.uniform(
            keys[2 * i + 2], (1, fan_out), jnp.float32, -bound, bound)
    return params


def discriminator_forward(params, image_nchw, labels, *, tm_max=512):
    """Matches Discriminator.forward: flatten, embed labels, concat, MLP."""
    n = image_nchw.shape[0]
    flat = image_nchw.reshape(n, -1).astype(jnp.float32)   # (N, C*H*W)
    return discriminator_mlp(
        flat, labels, params["embedding"],
        params["w1"], params["b1"],
        params["w2"], params["b2"],
        params["w3"], params["b3"],
        tm_max=tm_max,
    )


# ----------------------------- References (pure JAX) --------------------------
def _reference_forward_f32(params, image_nchw, labels):
    n = image_nchw.shape[0]
    flat = image_nchw.reshape(n, -1).astype(jnp.float32)
    cond = jnp.take(params["embedding"], labels, axis=0)
    x = jnp.concatenate([flat, cond], axis=-1)
    h = x @ params["w1"] + params["b1"]
    h = jnp.where(h > 0, h, 0.2 * h)
    h = h @ params["w2"] + params["b2"]
    h = jnp.where(h > 0, h, 0.2 * h)
    h = h @ params["w3"] + params["b3"]
    return jax.nn.sigmoid(h)


def _reference_forward_kernel_precision(params, image_nchw, labels):
    """Mirror of the kernel's bf16-input / f32-accumulation recipe."""
    n = image_nchw.shape[0]
    flat = image_nchw.reshape(n, -1)
    d = flat.shape[1]
    w1 = params["w1"]
    h = jnp.dot(flat.astype(jnp.bfloat16), w1[:d, :].astype(jnp.bfloat16),
                preferred_element_type=jnp.float32)
    emb_w1 = (params["embedding"] @ w1[d:, :]).astype(jnp.bfloat16)  # (10, 512)
    h = h + emb_w1[labels].astype(jnp.float32)
    h = h + params["b1"]
    h = jnp.maximum(h, 0.2 * h)
    h = jnp.dot(h.astype(jnp.bfloat16), params["w2"].astype(jnp.bfloat16),
                preferred_element_type=jnp.float32) + params["b2"]
    h = jnp.maximum(h, 0.2 * h)
    h = jnp.dot(h.astype(jnp.bfloat16), params["w3"].astype(jnp.bfloat16),
                preferred_element_type=jnp.float32) + params["b3"]
    return jax.nn.sigmoid(h)


if __name__ == "__main__":
    image_size, channels, num_classes = 28, 1, 10
    params = make_discriminator_params(image_size, channels, num_classes, seed=0)

    key = jax.random.PRNGKey(0)
    k_img, k_lbl = jax.random.split(key)

    # Small deterministic inputs (single grid step).
    batch = 2
    images = jax.random.normal(
        k_img, (batch, channels, image_size, image_size), dtype=jnp.float32)
    labels = jax.random.randint(k_lbl, (batch,), 0, num_classes, dtype=jnp.int32)

    out = discriminator_forward(params, images, labels)
    out = jax.block_until_ready(out)
    assert out.shape == (batch, 1), out.shape

    ref_k = _reference_forward_kernel_precision(params, images, labels)
    ref_f = _reference_forward_f32(params, images, labels)
    assert jnp.allclose(out, ref_k, atol=1e-3, rtol=1e-3), (out, ref_k)
    assert jnp.allclose(out, ref_f, atol=2e-2, rtol=2e-2), (out, ref_f)

    # Second run exercising 2 grid steps + a padded partial last tile.
    batch2 = 200
    images2 = jax.random.normal(
        jax.random.PRNGKey(1),
        (batch2, channels, image_size, image_size), dtype=jnp.float32)
    labels2 = jax.random.randint(
        jax.random.PRNGKey(2), (batch2,), 0, num_classes, dtype=jnp.int32)
    out2 = discriminator_forward(params, images2, labels2, tm_max=128)  # grid=(2,)
    out2 = jax.block_until_ready(out2)
    ref2 = _reference_forward_kernel_precision(params, images2, labels2)
    assert out2.shape == (batch2, 1), out2.shape
    assert jnp.allclose(out2, ref2, atol=1e-3, rtol=1e-3), (out2, ref2)

    print("KERNEL_OK")
</pallas_src>

<mosaic_0001>
module attributes {stable_mosaic.version = 11 : i64} {
  func.func @_discriminator_mlp_kernel(%arg0: i32, %arg1: memref<128x896xbf16, #tpu.memory_space<vmem>>, %arg2: memref<128x1xi32, #tpu.memory_space<vmem>>, %arg3: memref<896x512xbf16, #tpu.memory_space<vmem>>, %arg4: memref<128x512xbf16, #tpu.memory_space<vmem>>, %arg5: memref<1x512xf32, #tpu.memory_space<vmem>>, %arg6: memref<512x256xbf16, #tpu.memory_space<vmem>>, %arg7: memref<1x256xf32, #tpu.memory_space<vmem>>, %arg8: memref<1x256xbf16, #tpu.memory_space<vmem>>, %arg9: memref<1x1xf32, #tpu.memory_space<vmem>>, %arg10: memref<1x1x128xf32, #tpu.memory_space<vmem>>) attributes {dimension_semantics = [#tpu.dimension_semantics<parallel>], iteration_bounds = array<i64: 1>, scalar_prefetch = 0 : i64, scratch_operands = 0 : i64, tpu.core_type = #tpu.core_type<tc>, window_params = [{transform_indices = @transform_0, window_bounds = array<i64: 128, 896>}, {transform_indices = @transform_1, window_bounds = array<i64: 128, 1>}, {pipeline_mode = #tpu.pipeline_mode<synchronous>, transform_indices = @transform_2, window_bounds = array<i64: 896, 512>}, {pipeline_mode = #tpu.pipeline_mode<synchronous>, transform_indices = @transform_3, window_bounds = array<i64: 128, 512>}, {pipeline_mode = #tpu.pipeline_mode<synchronous>, transform_indices = @transform_4, window_bounds = array<i64: 1, 512>}, {pipeline_mode = #tpu.pipeline_mode<synchronous>, transform_indices = @transform_5, window_bounds = array<i64: 512, 256>}, {pipeline_mode = #tpu.pipeline_mode<synchronous>, transform_indices = @transform_6, window_bounds = array<i64: 1, 256>}, {pipeline_mode = #tpu.pipeline_mode<synchronous>, transform_indices = @transform_7, window_bounds = array<i64: 1, 256>}, {pipeline_mode = #tpu.pipeline_mode<synchronous>, transform_indices = @transform_8, window_bounds = array<i64: 1, 1>}, {transform_indices = @transform_9, window_bounds = array<i64: 1, 1, 128>}]} {
    %c0 = arith.constant 0 : index
    %c0_0 = arith.constant 0 : index
    %0 = vector.load %arg1[%c0, %c0_0] : memref<128x896xbf16, #tpu.memory_space<vmem>>, vector<128x896xbf16>
    %c0_1 = arith.constant 0 : index
    %c0_2 = arith.constant 0 : index
    %1 = vector.load %arg3[%c0_1, %c0_2] : memref<896x512xbf16, #tpu.memory_space<vmem>>, vector<896x512xbf16>
    %cst = arith.constant dense<0.000000e+00> : vector<128x512xf32>
    %2 = tpu.matmul %0, %1, %cst {dimension_numbers = #tpu.dot_dimension_numbers<[1], [0], [0], [1], [0, 0, 1, 1], [], []>} : vector<128x896xbf16>, vector<896x512xbf16>, vector<128x512xf32> -> vector<128x512xf32>
    %3 = tpu.iota {dimensions = array<i32: 1>} : vector<128x128xi32>
    %c0_3 = arith.constant 0 : index
    %c0_4 = arith.constant 0 : index
    %4 = vector.load %arg2[%c0_3, %c0_4] : memref<128x1xi32, #tpu.memory_space<vmem>>, vector<128x1xi32>
    %5 = vector.broadcast %4 : vector<128x1xi32> to vector<128x128xi32>
    %6 = arith.cmpi eq, %3, %5 : vector<128x128xi32>
    %cst_5 = arith.constant 1.000000e+00 : f32
    %cst_6 = arith.constant 0.000000e+00 : f32
    %7 = vector.broadcast %cst_5 : f32 to vector<128x128xf32>
    %8 = vector.broadcast %cst_6 : f32 to vector<128x128xf32>
    %9 = arith.select %6, %7, %8 : vector<128x128xi1>, vector<128x128xf32>
    %10 = arith.truncf %9 : vector<128x128xf32> to vector<128x128xbf16>
    %c0_7 = arith.constant 0 : index
    %c0_8 = arith.constant 0 : index
    %11 = vector.load %arg4[%c0_7, %c0_8] : memref<128x512xbf16, #tpu.memory_space<vmem>>, vector<128x512xbf16>
    %cst_9 = arith.constant dense<0.000000e+00> : vector<128x512xf32>
    %12 = tpu.matmul %10, %11, %cst_9 {dimension_numbers = #tpu.dot_dimension_numbers<[1], [0], [0], [1], [0, 0, 1, 1], [], []>} : vector<128x128xbf16>, vector<128x512xbf16>, vector<128x512xf32> -> vector<128x512xf32>
    %13 = arith.addf %2, %12 : vector<128x512xf32>
    %c0_10 = arith.constant 0 : index
    %c0_11 = arith.constant 0 : index
    %14 = vector.load %arg5[%c0_10, %c0_11] : memref<1x512xf32, #tpu.memory_space<vmem>>, vector<1x512xf32>
    %15 = vector.broadcast %14 : vector<1x512xf32> to vector<128x512xf32>
    %16 = arith.addf %13, %15 : vector<128x512xf32>
    %cst_12 = arith.constant 2.000000e-01 : f32
    %17 = vector.broadcast %cst_12 : f32 to vector<128x512xf32>
    %18 = arith.mulf %17, %16 : vector<128x512xf32>
    %19 = arith.maximumf %16, %18 : vector<128x512xf32>
    %20 = arith.truncf %19 : vector<128x512xf32> to vector<128x512xbf16>
    %c0_13 = arith.constant 0 : index
    %c0_14 = arith.constant 0 : index
    %21 = vector.load %arg6[%c0_13, %c0_14] : memref<512x256xbf16, #tpu.memory_space<vmem>>, vector<512x256xbf16>
    %cst_15 = arith.constant dense<0.000000e+00> : vector<128x256xf32>
    %22 = tpu.matmul %20, %21, %cst_15 {dimension_numbers = #tpu.dot_dimension_numbers<[1], [0], [0], [1], [0, 0, 1, 1], [], []>} : vector<128x512xbf16>, vector<512x256xbf16>, vector<128x256xf32> -> vector<128x256xf32>
    %c0_16 = arith.constant 0 : index
    %c0_17 = arith.constant 0 : index
    %23 = vector.load %arg7[%c0_16, %c0_17] : memref<1x256xf32, #tpu.memory_space<vmem>>, vector<1x256xf32>
    %24 = vector.broadcast %23 : vector<1x256xf32> to vector<128x256xf32>
    %25 = arith.addf %22, %24 : vector<128x256xf32>
    %cst_18 = arith.constant 2.000000e-01 : f32
    %26 = vector.broadcast %cst_18 : f32 to vector<128x256xf32>
    %27 = arith.mulf %26, %25 : vector<128x256xf32>
    %28 = arith.maximumf %25, %27 : vector<128x256xf32>
    %c0_19 = arith.constant 0 : index
    %c0_20 = arith.constant 0 : index
    %29 = vector.load %arg8[%c0_19, %c0_20] : memref<1x256xbf16, #tpu.memory_space<vmem>>, vector<1x256xbf16>
    %30 = arith.truncf %28 : vector<128x256xf32> to vector<128x256xbf16>
    %cst_21 = arith.constant dense<0.000000e+00> : vector<1x128xf32>
    %31 = tpu.matmul %29, %30, %cst_21 {dimension_numbers = #tpu.dot_dimension_numbers<[1], [1], [0], [0], [0, 0, 1, 0], [], []>} : vector<1x256xbf16>, vector<128x256xbf16>, vector<1x128xf32> -> vector<1x128xf32>
    %c0_22 = arith.constant 0 : index
    %c0_23 = arith.constant 0 : index
    %32 = vector.load %arg9[%c0_22, %c0_23] : memref<1x1xf32, #tpu.memory_space<vmem>>, vector<1x1xf32>
    %33 = vector.broadcast %32 : vector<1x1xf32> to vector<1x128xf32>
    %34 = arith.addf %31, %33 : vector<1x128xf32>
    %35 = arith.negf %34 : vector<1x128xf32>
    %36 = math.exp %35 : vector<1x128xf32>
    %cst_24 = arith.constant 1.000000e+00 : f32
    %37 = vector.broadcast %cst_24 : f32 to vector<1x128xf32>
    %38 = arith.addf %37, %36 : vector<1x128xf32>
    %39 = arith.divf %37, %38 : vector<1x128xf32>
    %40 = vector.shape_cast %39 : vector<1x128xf32> to vector<1x1x128xf32>
    %c0_25 = arith.constant 0 : index
    %c0_26 = arith.constant 0 : index
    %c0_27 = arith.constant 0 : index
    %41 = vector.load %arg10[%c0_25, %c0_26, %c0_27] : memref<1x1x128xf32, #tpu.memory_space<vmem>>, vector<1x1x128xf32>
    tpu.vector_store %arg10[%c0_25, %c0_26, %c0_27], %40 {strides = array<i32>} : memref<1x1x128xf32, #tpu.memory_space<vmem>>, vector<1x1x128xf32>,
    return
  }
  func.func @transform_0(%arg0: i32) -> (i32, i32) {
    %c0_i32 = arith.constant 0 : i32
    %c0_i32_0 = arith.constant 0 : i32
    return %arg0, %c0_i32 : i32, i32
  }
  func.func @transform_1(%arg0: i32) -> (i32, i32) {
    %c0_i32 = arith.constant 0 : i32
    %c0_i32_0 = arith.constant 0 : i32
    return %arg0, %c0_i32 : i32, i32
  }
  func.func @transform_2(%arg0: i32) -> (i32, i32) {
    %c0_i32 = arith.constant 0 : i32
    %c0_i32_0 = arith.constant 0 : i32
    %c0_i32_1 = arith.constant 0 : i32
    return %c0_i32, %c0_i32_0 : i32, i32
  }
  func.func @transform_3(%arg0: i32) -> (i32, i32) {
    %c0_i32 = arith.constant 0 : i32
    %c0_i32_0 = arith.constant 0 : i32
    %c0_i32_1 = arith.constant 0 : i32
    return %c0_i32, %c0_i32_0 : i32, i32
  }
  func.func @transform_4(%arg0: i32) -> (i32, i32) {
    %c0_i32 = arith.constant 0 : i32
    %c0_i32_0 = arith.constant 0 : i32
    %c0_i32_1 = arith.constant 0 : i32
    return %c0_i32, %c0_i32_0 : i32, i32
  }
  func.func @transform_5(%arg0: i32) -> (i32, i32) {
    %c0_i32 = arith.constant 0 : i32
    %c0_i32_0 = arith.constant 0 : i32
    %c0_i32_1 = arith.constant 0 : i32
    return %c0_i32, %c0_i32_0 : i32, i32
  }
  func.func @transform_6(%arg0: i32) -> (i32, i32) {
    %c0_i32 = arith.constant 0 : i32
    %c0_i32_0 = arith.constant 0 : i32
    %c0_i32_1 = arith.constant 0 : i32
    return %c0_i32, %c0_i32_0 : i32, i32
  }
  func.func @transform_7(%arg0: i32) -> (i32, i32) {
    %c0_i32 = arith.constant 0 : i32
    %c0_i32_0 = arith.constant 0 : i32
    %c0_i32_1 = arith.constant 0 : i32
    return %c0_i32, %c0_i32_0 : i32, i32
  }
  func.func @transform_8(%arg0: i32) -> (i32, i32) {
    %c0_i32 = arith.constant 0 : i32
    %c0_i32_0 = arith.constant 0 : i32
    %c0_i32_1 = arith.constant 0 : i32
    return %c0_i32, %c0_i32_0 : i32, i32
  }
  func.func @transform_9(%arg0: i32) -> (i32, i32, i32) {
    %c0_i32 = arith.constant 0 : i32
    %c0_i32_0 = arith.constant 0 : i32
    %c0_i32_1 = arith.constant 0 : i32
    return %arg0, %c0_i32, %c0_i32_0 : i32, i32, i32
  }
}

module attributes {stable_mosaic.version = 11 : i64} {
  func.func @_discriminator_mlp_kernel(%arg0: i32, %arg1: memref<128x896xbf16, #tpu.memory_space<vmem>>, %arg2: memref<128x1xi32, #tpu.memory_space<vmem>>, %arg3: memref<896x512xbf16, #tpu.memory_space<vmem>>, %arg4: memref<128x512xbf16, #tpu.memory_space<vmem>>, %arg5: memref<1x512xf32, #tpu.memory_space<vmem>>, %arg6: memref<512x256xbf16, #tpu.memory_space<vmem>>, %arg7: memref<1x256xf32, #tpu.memory_space<vmem>>, %arg8: memref<1x256xbf16, #tpu.memory_space<vmem>>, %arg9: memref<1x1xf32, #tpu.memory_space<vmem>>, %arg10: memref<1x1x128xf32, #tpu.memory_space<vmem>>) attributes {dimension_semantics = [#tpu.dimension_semantics<parallel>], iteration_bounds = array<i64: 1>, scalar_prefetch = 0 : i64, scratch_operands = 0 : i64, tpu.core_type = #tpu.core_type<tc>, window_params = [{transform_indices = @transform_0, window_bounds = array<i64: 128, 896>}, {transform_indices = @transform_1, window_bounds = array<i64: 128, 1>}, {pipeline_mode = #tpu.pipeline_mode<synchronous>, transform_indices = @transform_2, window_bounds = array<i64: 896, 512>}, {pipeline_mode = #tpu.pipeline_mode<synchronous>, transform_indices = @transform_3, window_bounds = array<i64: 128, 512>}, {pipeline_mode = #tpu.pipeline_mode<synchronous>, transform_indices = @transform_4, window_bounds = array<i64: 1, 512>}, {pipeline_mode = #tpu.pipeline_mode<synchronous>, transform_indices = @transform_5, window_bounds = array<i64: 512, 256>}, {pipeline_mode = #tpu.pipeline_mode<synchronous>, transform_indices = @transform_6, window_bounds = array<i64: 1, 256>}, {pipeline_mode = #tpu.pipeline_mode<synchronous>, transform_indices = @transform_7, window_bounds = array<i64: 1, 256>}, {pipeline_mode = #tpu.pipeline_mode<synchronous>, transform_indices = @transform_8, window_bounds = array<i64: 1, 1>}, {transform_indices = @transform_9, window_bounds = array<i64: 1, 1, 128>}]} {
    %c0 = arith.constant 0 : index
    %c0_0 = arith.constant 0 : index
    %0 = vector.load %arg1[%c0, %c0_0] : memref<128x896xbf16, #tpu.memory_space<vmem>>, vector<128x896xbf16>
    %c0_1 = arith.constant 0 : index
    %c0_2 = arith.constant 0 : index
    %1 = vector.load %arg3[%c0_1, %c0_2] : memref<896x512xbf16, #tpu.memory_space<vmem>>, vector<896x512xbf16>
    %cst = arith.constant dense<0.000000e+00> : vector<128x512xf32>
    %2 = tpu.matmul %0, %1, %cst {dimension_numbers = #tpu.dot_dimension_numbers<[1], [0], [0], [1], [0, 0, 1, 1], [], []>} : vector<128x896xbf16>, vector<896x512xbf16>, vector<128x512xf32> -> vector<128x512xf32>
    %3 = tpu.iota {dimensions = array<i32: 1>} : vector<128x128xi32>
    %c0_3 = arith.constant 0 : index
    %c0_4 = arith.constant 0 : index
    %4 = vector.load %arg2[%c0_3, %c0_4] : memref<128x1xi32, #tpu.memory_space<vmem>>, vector<128x1xi32>
    %5 = vector.broadcast %4 : vector<128x1xi32> to vector<128x128xi32>
    %6 = arith.cmpi eq, %3, %5 : vector<128x128xi32>
    %cst_5 = arith.constant 1.000000e+00 : f32
    %cst_6 = arith.constant 0.000000e+00 : f32
    %7 = vector.broadcast %cst_5 : f32 to vector<128x128xf32>
    %8 = vector.broadcast %cst_6 : f32 to vector<128x128xf32>
    %9 = arith.select %6, %7, %8 : vector<128x128xi1>, vector<128x128xf32>
    %10 = arith.truncf %9 : vector<128x128xf32> to vector<128x128xbf16>
    %c0_7 = arith.constant 0 : index
    %c0_8 = arith.constant 0 : index
    %11 = vector.load %arg4[%c0_7, %c0_8] : memref<128x512xbf16, #tpu.memory_space<vmem>>, vector<128x512xbf16>
    %cst_9 = arith.constant dense<0.000000e+00> : vector<128x512xf32>
    %12 = tpu.matmul %10, %11, %cst_9 {dimension_numbers = #tpu.dot_dimension_numbers<[1], [0], [0], [1], [0, 0, 1, 1], [], []>} : vector<128x128xbf16>, vector<128x512xbf16>, vector<128x512xf32> -> vector<128x512xf32>
    %13 = arith.addf %2, %12 : vector<128x512xf32>
    %c0_10 = arith.constant 0 : index
    %c0_11 = arith.constant 0 : index
    %14 = vector.load %arg5[%c0_10, %c0_11] : memref<1x512xf32, #tpu.memory_space<vmem>>, vector<1x512xf32>
    %15 = vector.broadcast %14 : vector<1x512xf32> to vector<128x512xf32>
    %16 = arith.addf %13, %15 : vector<128x512xf32>
    %cst_12 = arith.constant 2.000000e-01 : f32
    %17 = vector.broadcast %cst_12 : f32 to vector<128x512xf32>
    %18 = arith.mulf %17, %16 : vector<128x512xf32>
    %19 = arith.maximumf %16, %18 : vector<128x512xf32>
    %20 = arith.truncf %19 : vector<128x512xf32> to vector<128x512xbf16>
    %c0_13 = arith.constant 0 : index
    %c0_14 = arith.constant 0 : index
    %21 = vector.load %arg6[%c0_13, %c0_14] : memref<512x256xbf16, #tpu.memory_space<vmem>>, vector<512x256xbf16>
    %cst_15 = arith.constant dense<0.000000e+00> : vector<128x256xf32>
    %22 = tpu.matmul %20, %21, %cst_15 {dimension_numbers = #tpu.dot_dimension_numbers<[1], [0], [0], [1], [0, 0, 1, 1], [], []>} : vector<128x512xbf16>, vector<512x256xbf16>, vector<128x256xf32> -> vector<128x256xf32>
    %c0_16 = arith.constant 0 : index
    %c0_17 = arith.constant 0 : index
    %23 = vector.load %arg7[%c0_16, %c0_17] : memref<1x256xf32, #tpu.memory_space<vmem>>, vector<1x256xf32>
    %24 = vector.broadcast %23 : vector<1x256xf32> to vector<128x256xf32>
    %25 = arith.addf %22, %24 : vector<128x256xf32>
    %cst_18 = arith.constant 2.000000e-01 : f32
    %26 = vector.broadcast %cst_18 : f32 to vector<128x256xf32>
    %27 = arith.mulf %26, %25 : vector<128x256xf32>
    %28 = arith.maximumf %25, %27 : vector<128x256xf32>
    %c0_19 = arith.constant 0 : index
    %c0_20 = arith.constant 0 : index
    %29 = vector.load %arg8[%c0_19, %c0_20] : memref<1x256xbf16, #tpu.memory_space<vmem>>, vector<1x256xbf16>
    %30 = arith.truncf %28 : vector<128x256xf32> to vector<128x256xbf16>
    %cst_21 = arith.constant dense<0.000000e+00> : vector<1x128xf32>
    %31 = tpu.matmul %29, %30, %cst_21 {dimension_numbers = #tpu.dot_dimension_numbers<[1], [1], [0], [0], [0, 0, 1, 0], [], []>} : vector<1x256xbf16>, vector<128x256xbf16>, vector<1x128xf32> -> vector<1x128xf32>
    %c0_22 = arith.constant 0 : index
    %c0_23 = arith.constant 0 : index
    %32 = vector.load %arg9[%c0_22, %c0_23] : memref<1x1xf32, #tpu.memory_space<vmem>>, vector<1x1xf32>
    %33 = vector.broadcast %32 : vector<1x1xf32> to vector<1x128xf32>
    %34 = arith.addf %31, %33 : vector<1x128xf32>
    %35 = arith.negf %34 : vector<1x128xf32>
    %36 = math.exp %35 : vector<1x128xf32>
    %cst_24 = arith.constant 1.000000e+00 : f32
    %37 = vector.broadcast %cst_24 : f32 to vector<1x128xf32>
    %38 = arith.addf %37, %36 : vector<1x128xf32>
    %39 = arith.divf %37, %38 : vector<1x128xf32>
    %40 = vector.shape_cast %39 : vector<1x128xf32> to vector<1x1x128xf32>
    %c0_25 = arith.constant 0 : index
    %c0_26 = arith.constant 0 : index
    %c0_27 = arith.constant 0 : index
    %41 = vector.load %arg10[%c0_25, %c0_26, %c0_27] : memref<1x1x128xf32, #tpu.memory_space<vmem>>, vector<1x1x128xf32>
    tpu.vector_store %arg10[%c0_25, %c0_26, %c0_27], %40 {strides = array<i32>} : memref<1x1x128xf32, #tpu.memory_space<vmem>>, vector<1x1x128xf32>,
    return
  }
  func.func @transform_0(%arg0: i32) -> (i32, i32) {
    %c0_i32 = arith.constant 0 : i32
    %c0_i32_0 = arith.constant 0 : i32
    return %arg0, %c0_i32 : i32, i32
  }
  func.func @transform_1(%arg0: i32) -> (i32, i32) {
    %c0_i32 = arith.constant 0 : i32
    %c0_i32_0 = arith.constant 0 : i32
    return %arg0, %c0_i32 : i32, i32
  }
  func.func @transform_2(%arg0: i32) -> (i32, i32) {
    %c0_i32 = arith.constant 0 : i32
    %c0_i32_0 = arith.constant 0 : i32
    %c0_i32_1 = arith.constant 0 : i32
    return %c0_i32, %c0_i32_0 : i32, i32
  }
  func.func @transform_3(%arg0: i32) -> (i32, i32) {
    %c0_i32 = arith.constant 0 : i32
    %c0_i32_0 = arith.constant 0 : i32
    %c0_i32_1 = arith.constant 0 : i32
    return %c0_i32, %c0_i32_0 : i32, i32
  }
  func.func @transform_4(%arg0: i32) -> (i32, i32) {
    %c0_i32 = arith.constant 0 : i32
    %c0_i32_0 = arith.constant 0 : i32
    %c0_i32_1 = arith.constant 0 : i32
    return %c0_i32, %c0_i32_0 : i32, i32
  }
  func.func @transform_5(%arg0: i32) -> (i32, i32) {
    %c0_i32 = arith.constant 0 : i32
    %c0_i32_0 = arith.constant 0 : i32
    %c0_i32_1 = arith.constant 0 : i32
    return %c0_i32, %c0_i32_0 : i32, i32
  }
  func.func @transform_6(%arg0: i32) -> (i32, i32) {
    %c0_i32 = arith.constant 0 : i32
    %c0_i32_0 = arith.constant 0 : i32
    %c0_i32_1 = arith.constant 0 : i32
    return %c0_i32, %c0_i32_0 : i32, i32
  }
  func.func @transform_7(%arg0: i32) -> (i32, i32) {
    %c0_i32 = arith.constant 0 : i32
    %c0_i32_0 = arith.constant 0 : i32
    %c0_i32_1 = arith.constant 0 : i32
    return %c0_i32, %c0_i32_0 : i32, i32
  }
  func.func @transform_8(%arg0: i32) -> (i32, i32) {
    %c0_i32 = arith.constant 0 : i32
    %c0_i32_0 = arith.constant 0 : i32
    %c0_i32_1 = arith.constant 0 : i32
    return %c0_i32, %c0_i32_0 : i32, i32
  }
  func.func @transform_9(%arg0: i32) -> (i32, i32, i32) {
    %c0_i32 = arith.constant 0 : i32
    %c0_i32_0 = arith.constant 0 : i32
    %c0_i32_1 = arith.constant 0 : i32
    return %arg0, %c0_i32, %c0_i32_0 : i32, i32, i32
  }
}

</mosaic_0001>

<bundles_post_ra>
// kernel: tpu_custom_call.1
= control target key start
LH: loop header
LB: loop body
LE: loop exit
PB: predicated region body
PF: predicated region fallthrough
CT: control target
= control target key end

     0   :  { %s6461_s0 = inlined_call_operand.hbm [shape: bf16[128,896], index: 0, kind: input, shape index: {}]   ;;  %s6462_s1 = inlined_call_operand.vmem [shape: s32[128,1], index: 1, kind: input, shape index: {}]   ;;  %s6463_s2 = inlined_call_operand.hbm [shape: bf16[896,512], index: 2, kind: input, shape index: {}]   ;;  %s6464_s3 = inlined_call_operand.hbm [shape: bf16[128,512], index: 3, kind: input, shape index: {}]   ;;  %s6465_s4 = inlined_call_operand.vmem [shape: f32[1,512], index: 4, kind: input, shape index: {}]   ;;  %s6466_s5 = inlined_call_operand.hbm [shape: bf16[512,256], index: 5, kind: input, shape index: {}]   ;;  %s6467_s6 = inlined_call_operand.vmem [shape: f32[1,256], index: 6, kind: input, shape index: {}]   ;;  %s6468_s7 = inlined_call_operand.vmem [shape: bf16[1,256], index: 7, kind: input, shape index: {}]   ;;  %s6469_s8 = inlined_call_operand.<no memory space> [shape: f32[1,1], index: 8, kind: input, shape index: {}]   ;;  %s6470_s9 = inlined_call_operand.hbm [shape: f32[1,1,128], index: 9, kind: output, shape index: {}]  }
   0x1   :  { %v14_v0 = vstv %s6469_s8 }
   0x2   :  { %15 = vst [vmem:[#allocation2] sm:$0x1] %v14_v0 }
   0x3   :  { %16 = vsyncpa [#allocation4], 0 }
   0x4   :  { %17 = vsyncpa [#allocation7], 0 }
   0x5   :  { %18 = vsyncpa [#allocation10], 0 }
   0x6   :  { %19 = vsyncpa [#allocation5], 0  ;;  %s5361_s11 = smov [#allocation6]  }
   0x7   :  { %s39_s12 = sshll.u32 %s5361_s11, 4  ;;  %s40_s12 = int_to_ptr.vmem [resolvable:$true] %s39_s12 }
   0x8   :  { %s5261_s13 = scalar_lea.vmem %s40_s12, 28672  ;;  %p5266_p1 = scmp.lt.s32.totalorder %s40_s12, %s40_s12 }
   0x9   :  { %p5262_p0 = scmp.ne.s32.totalorder %s40_s12, %s5261_s13  ;;  %p5267_p2 = scmp.lt.s32.totalorder %s5261_s13, %s5261_s13 }
   0xb   :  { %p5268_p3 = por %p5267_p2, %p5266_p1 }
   0xd   :  { %p5269_p4 = pnand %p5268_p3, %p5262_p0 }
   0xf   :  { %5272 = shalt.err (!%p5269_p4)
}
  0x10   :  { %s5362_s14 = smov 256   ;;  %s5363_s15 = smov 16  }
  0x11   :  { %45 = dma.hbm_to_vmem [thread:$0]  %s6463_s2, 28672, %s40_s12, [#allocation7], %s5362_s14, %s5362_s14, %s5363_s15  }
  0x12   :  { %s5364_s17 = smov [#allocation3]  }
  0x13   :  { %s25_s18 = sshll.u32 %s5364_s17, 4  ;;  %s26_s18 = int_to_ptr.vmem [resolvable:$true] %s25_s18 }
  0x14   :  { %s5281_s19 = scalar_lea.vmem %s26_s18, 7168  ;;  %p5286_p6 = scmp.lt.s32.totalorder %s26_s18, %s26_s18 }
  0x15   :  { %p5282_p5 = scmp.ne.s32.totalorder %s26_s18, %s5281_s19  ;;  %p5287_p7 = scmp.lt.s32.totalorder %s5281_s19, %s5281_s19 }
  0x17   :  { %p5288_p8 = por %p5287_p7, %p5286_p6 }
  0x19   :  { %p5289_p9 = pnand %p5288_p8, %p5282_p5 }
  0x1b   :  { %5292 = shalt.err (!%p5289_p9)
}
  0x1c   :  { %s5365_s20 = smov 448   ;;  %s5366_s21 = smov 28  }
  0x1d   :  { %31 = dma.hbm_to_vmem [thread:$0]  %s6461_s0, 7168, %s26_s18, [#allocation4], %s5365_s20, %s5365_s20, %s5366_s21  }
  0x1e   :  { %s5367_s24 = smov [#allocation8]   ;;  %s5368_s26 = smov [#allocation9]  }
  0x1f   :  { %s51_s25 = sshll.u32 %s5367_s24, 4  ;;  %s65_s2 = sshll.u32 %s5368_s26, 4  ;;  %s52_s25 = int_to_ptr.vmem [resolvable:$true] %s51_s25  ;;  %s66_s2 = int_to_ptr.vmem [resolvable:$true] %s65_s2 }
  0x20   :  { %s5301_s27 = scalar_lea.vmem %s52_s25, 4096  ;;  %p5306_p11 = scmp.lt.s32.totalorder %s52_s25, %s52_s25 }
  0x21   :  { %p5302_p10 = scmp.ne.s32.totalorder %s52_s25, %s5301_s27  ;;  %p5307_p12 = scmp.lt.s32.totalorder %s5301_s27, %s5301_s27 }
  0x23   :  { %p5308_p13 = por %p5307_p12, %p5306_p11 }
  0x25   :  { %p5309_p0 = pnand %p5308_p13, %p5302_p10 }
  0x27   :  { %5312 = shalt.err (!%p5309_p0)
}
  0x28   :  { %57 = dma.hbm_to_vmem [thread:$0]  %s6464_s3, 4096, %s52_s25, [#allocation7], %s5362_s14, %s5362_s14, %s5363_s15  }
  0x29   :  { %s5321_s0 = scalar_lea.vmem %s66_s2, 8192  ;;  %p5326_p2 = scmp.lt.s32.totalorder %s66_s2, %s66_s2 }
  0x2a   :  { %p5322_p1 = scmp.ne.s32.totalorder %s66_s2, %s5321_s0  ;;  %p5327_p3 = scmp.lt.s32.totalorder %s5321_s0, %s5321_s0 }
  0x2c   :  { %p5328_p4 = por %p5327_p3, %p5326_p2 }
  0x2e   :  { %p5329_p5 = pnand %p5328_p4, %p5322_p1 }
  0x30   :  { %5332 = shalt.err (!%p5329_p5)
}
  0x31   :  { %s5369_s30 = smov 128   ;;  %s5370_s10 = smov 8  }
  0x32   :  { %71 = dma.hbm_to_vmem [thread:$0]  %s6466_s5, 8192, %s66_s2, [#allocation10], %s5369_s30, %s5369_s30, %s5370_s10  }
  0x33   :  { %5353 = dma.done.wait [#allocation4], 7168  }
  0x34   :  { %5354 = vsyncadd [#allocation4], 4294960128 }
  0x35   :  { %5355 = dma.done.wait [#allocation7], 32768  }
  0x36   :  { %5356 = vsyncadd [#allocation7], 4294934528 }
  0x37   :  { %5357 = dma.done.wait [#allocation10], 8192  }
  0x38   :  { %5358 = vsyncadd [#allocation10], 4294959104  ;;  %v6472_v1 = vmov 0   ;;  %v383_v2 = vld [vmem:[%s6462_s1 + $0x10] sm:$0xff]  ;;  %v381_v3 = vld [vmem:[%s6462_s1] sm:$0xff]  ;;  %v6471_v53 = vlaneseq }
  0x39   :  { %4688 = vset.pattern.permute.xlu1 %v6472_v1  ;;  %4687 = vset.pattern.permute.xlu0 %v6472_v1  ;;  %v384_v4 = vld [vmem:[%s6462_s1 + $0x18] sm:$0xff]  ;;  %v382_v5 = vld [vmem:[%s6462_s1 + $0x8] sm:$0xff]  ;;  %v385_v7 = vld [vmem:[%s6462_s1 + $0x20] sm:$0xff]  ;;  %v5372_v62 = vmov 1.0|1.0  }
  0x3a   :  { %709 = vmatprep.mubr.bf16.mxu0 %v6472_v1  ;;  %822 = vmatprep.mubr.bf16.mxu1 %v6472_v1  ;;  %v386_v6 = vld [vmem:[%s6462_s1 + $0x28] sm:$0xff]  ;;  %v4693_v10 = vld [vmem:[#allocation8 + $0xe0] ss:$16 sps:$4 sm:$0xff]   ;;  %v388_v11 = vld [vmem:[%s6462_s1 + $0x38] sm:$0xff]  ;;  %v5499_v55 = vand.u32 127, %v6471_v53 }
  0x3b   :  { %404 = vperm.xlu1 %4688, %v383_v2   ;;  %398 = vperm.xlu0 %4687, %v381_v3   ;;  %v4689_v8 = vld [vmem:[#allocation8 + $0xe4] ss:$16 sps:$4 sm:$0xff]   ;;  %v4691_v9 = vld [vmem:[#allocation8 + $0xec] ss:$16 sps:$4 sm:$0xff]   ;;  %v4694_v13 = vld [vmem:[#allocation8 + $0xe8] ss:$16 sps:$4 sm:$0xff]  }
  0x3c   :  { %v387_v12 = vld [vmem:[%s6462_s1 + $0x30] sm:$0xff]  ;;  %677 = vmatprep.subr.bf16.mxu0 %v4689_v8  ;;  %790 = vmatprep.subr.bf16.mxu1 %v4691_v9  ;;  %v4700_v17 = vld [vmem:[#allocation8 + $0xc8] ss:$16 sps:$4 sm:$0xff]   ;;  %v389_v21 = vld [vmem:[%s6462_s1 + $0x40] sm:$0xff] }
  0x3d   :  { %v4695_v14 = vld [vmem:[#allocation8 + $0xc4] ss:$16 sps:$4 sm:$0xff]   ;;  %678 = vmatpush1.bf16.msra.mxu0 %v4693_v10  ;;  %v4697_v15 = vld [vmem:[#allocation8 + $0xcc] ss:$16 sps:$4 sm:$0xff]   ;;  %v4699_v16 = vld [vmem:[#allocation8 + $0xc0] ss:$16 sps:$4 sm:$0xff]   ;;  %791 = vmatpush1.bf16.msra.mxu1 %v4694_v13 }
  0x3e   :  { %679 = vmatprep.subr.bf16.mxu0 %v4695_v14  ;;  %v4701_v18 = vld [vmem:[#allocation8 + $0xa4] ss:$16 sps:$4 sm:$0xff]   ;;  %792 = vmatprep.subr.bf16.mxu1 %v4697_v15  ;;  %v4703_v19 = vld [vmem:[#allocation8 + $0xac] ss:$16 sps:$4 sm:$0xff]   ;;  %v4705_v22 = vld [vmem:[#allocation8 + $0xa0] ss:$16 sps:$4 sm:$0xff]  }
  0x3f   :  { %407 = vperm.xlu1 %4688, %v384_v4   ;;  %401 = vperm.xlu0 %4687, %v382_v5   ;;  %v390_v20 = vld [vmem:[%s6462_s1 + $0x48] sm:$0xff]  ;;  %v392_v26 = vld [vmem:[%s6462_s1 + $0x58] sm:$0xff]  ;;  %v391_v27 = vld [vmem:[%s6462_s1 + $0x50] sm:$0xff] }
  0x40   :  { %v4706_v23 = vld [vmem:[#allocation8 + $0xa8] ss:$16 sps:$4 sm:$0xff]   ;;  %v4707_v24 = vld [vmem:[#allocation8 + $0x84] ss:$16 sps:$4 sm:$0xff]   ;;  %v4709_v25 = vld [vmem:[#allocation8 + $0x8c] ss:$16 sps:$4 sm:$0xff]  }
  0x41   :  { %680 = vmatpush1.bf16.msra.mxu0 %v4699_v16  ;;  %793 = vmatpush1.bf16.msra.mxu1 %v4700_v17  ;;  %v4711_v28 = vld [vmem:[#allocation8 + $0x80] ss:$16 sps:$4 sm:$0xff]   ;;  %v4712_v29 = vld [vmem:[#allocation8 + $0x88] ss:$16 sps:$4 sm:$0xff]   ;;  %v4713_v30 = vld [vmem:[#allocation8 + $0x64] ss:$16 sps:$4 sm:$0xff]  }
  0x42   :  { %681 = vmatprep.subr.bf16.mxu0 %v4701_v18  ;;  %794 = vmatprep.subr.bf16.mxu1 %v4703_v19  ;;  %v4715_v31 = vld [vmem:[#allocation8 + $0x6c] ss:$16 sps:$4 sm:$0xff]   ;;  %v4717_v34 = vld [vmem:[#allocation8 + $0x60] ss:$16 sps:$4 sm:$0xff]   ;;  %v4718_v35 = vld [vmem:[#allocation8 + $0x68] ss:$16 sps:$4 sm:$0xff]  }
  0x43   :  { %413 = vperm.xlu1 %4688, %v386_v6   ;;  %410 = vperm.xlu0 %4687, %v385_v7   ;;  %v394_v32 = vld [vmem:[%s6462_s1 + $0x68] sm:$0xff]  ;;  %v393_v33 = vld [vmem:[%s6462_s1 + $0x60] sm:$0xff]  ;;  %v396_v38 = vld [vmem:[%s6462_s1 + $0x78] sm:$0xff] }
  0x44   :  { %v4719_v36 = vld [vmem:[#allocation8 + $0x44] ss:$16 sps:$4 sm:$0xff]   ;;  %v4721_v37 = vld [vmem:[#allocation8 + $0x4c] ss:$16 sps:$4 sm:$0xff]   ;;  %v4723_v40 = vld [vmem:[#allocation8 + $0x40] ss:$16 sps:$4 sm:$0xff]  }
  0x45   :  { %682 = vmatpush1.bf16.msra.mxu0 %v4705_v22  ;;  %795 = vmatpush1.bf16.msra.mxu1 %v4706_v23  ;;  %v395_v39 = vld [vmem:[%s6462_s1 + $0x70] sm:$0xff]  ;;  %v4724_v41 = vld [vmem:[#allocation8 + $0x48] ss:$16 sps:$4 sm:$0xff]   ;;  %v4164_v44 = vld [vmem:[#allocation2] sm:$0x1] }
  0x46   :  { %683 = vmatprep.subr.bf16.mxu0 %v4707_v24  ;;  %796 = vmatprep.subr.bf16.mxu1 %v4709_v25  ;;  %v4725_v42 = vld [vmem:[#allocation8 + $0x24] ss:$16 sps:$4 sm:$0xff]   ;;  %v4727_v43 = vld [vmem:[#allocation8 + $0x2c] ss:$16 sps:$4 sm:$0xff]   ;;  %v4729_v45 = vld [vmem:[#allocation8 + $0x20] ss:$16 sps:$4 sm:$0xff]  }
  0x47   :  { %419 = vperm.xlu1 %4688, %v388_v11   ;;  %416 = vperm.xlu0 %4687, %v387_v12   ;;  %v4730_v46 = vld [vmem:[#allocation8 + $0x28] ss:$16 sps:$4 sm:$0xff]   ;;  %v4731_v47 = vld [vmem:[#allocation8 + $0x4] ss:$16 sps:$4 sm:$0xff]   ;;  %v4733_v48 = vld [vmem:[#allocation8 + $0xc] ss:$16 sps:$4 sm:$0xff]  }
  0x48   :  { %v4735_v49 = vld [vmem:[#allocation8] ss:$16 sps:$4 sm:$0xff]   ;;  %v4736_v50 = vld [vmem:[#allocation8 + $0x8] ss:$16 sps:$4 sm:$0xff]   ;;  %v4739_v51 = vld [vmem:[#allocation6 + $0xe4] ss:$16 sps:$4 sm:$0xff]  }
  0x49   :  { %684 = vmatpush1.bf16.msra.mxu0 %v4711_v28  ;;  %797 = vmatpush1.bf16.msra.mxu1 %v4712_v29  ;;  %v4742_v52 = vld [vmem:[#allocation6 + $0x2e4] ss:$16 sps:$4 sm:$0xff]   ;;  %v4737_v58 = vld [vmem:[#allocation6 + $0xe0] ss:$16 sps:$4 sm:$0xff]   ;;  %v5056_v53 = vld [vmem:[#allocation6 + $0x368] ss:$16 sps:$4 sm:$0xff]  }
  0x4a   :  { %685 = vmatprep.subr.bf16.mxu0 %v4713_v30  ;;  %798 = vmatprep.subr.bf16.mxu1 %v4715_v31  ;;  %v4740_v59 = vld [vmem:[#allocation6 + $0x2e0] ss:$16 sps:$4 sm:$0xff]   ;;  %v4745_v60 = vld [vmem:[#allocation6 + $0xc4] ss:$16 sps:$4 sm:$0xff]  }
  0x4b   :  { %425 = vperm.xlu1 %4688, %v390_v20   ;;  %422 = vperm.xlu0 %4687, %v389_v21   ;;  %v4748_v61 = vld [vmem:[#allocation6 + $0x2c4] ss:$16 sps:$4 sm:$0xff]   ;;  %v4743_v63 = vld [vmem:[#allocation6 + $0xc0] ss:$16 sps:$4 sm:$0xff]  }
  0x4c   :  { %v4746_v0 = vld [vmem:[#allocation6 + $0x2c0] ss:$16 sps:$4 sm:$0xff]   ;;  %v4751_v2 = vld [vmem:[#allocation6 + $0xa4] ss:$16 sps:$4 sm:$0xff]  }
  0x4d   :  { %686 = vmatpush1.bf16.msra.mxu0 %v4717_v34  ;;  %799 = vmatpush1.bf16.msra.mxu1 %v4718_v35  ;;  %v4754_v3 = vld [vmem:[#allocation6 + $0x2a4] ss:$16 sps:$4 sm:$0xff]   ;;  %v4749_v5 = vld [vmem:[#allocation6 + $0xa0] ss:$16 sps:$4 sm:$0xff]  }
  0x4e   :  { %687 = vmatprep.subr.bf16.mxu0 %v4719_v36  ;;  %800 = vmatprep.subr.bf16.mxu1 %v4721_v37  ;;  %v4752_v6 = vld [vmem:[#allocation6 + $0x2a0] ss:$16 sps:$4 sm:$0xff]   ;;  %v4757_v7 = vld [vmem:[#allocation6 + $0x84] ss:$16 sps:$4 sm:$0xff]  }
  0x4f   :  { %431 = vperm.xlu1 %4688, %v392_v26   ;;  %428 = vperm.xlu0 %4687, %v391_v27   ;;  %v4760_v8 = vld [vmem:[#allocation6 + $0x284] ss:$16 sps:$4 sm:$0xff]   ;;  %v4755_v11 = vld [vmem:[#allocation6 + $0x80] ss:$16 sps:$4 sm:$0xff]  }
  0x50   :  { %v4758_v12 = vld [vmem:[#allocation6 + $0x280] ss:$16 sps:$4 sm:$0xff]   ;;  %v4763_v13 = vld [vmem:[#allocation6 + $0x64] ss:$16 sps:$4 sm:$0xff]  }
  0x51   :  { %688 = vmatpush1.bf16.msra.mxu0 %v4723_v40  ;;  %801 = vmatpush1.bf16.msra.mxu1 %v4724_v41  ;;  %v4766_v14 = vld [vmem:[#allocation6 + $0x264] ss:$16 sps:$4 sm:$0xff]   ;;  %v4761_v15 = vld [vmem:[#allocation6 + $0x60] ss:$16 sps:$4 sm:$0xff]  }
  0x52   :  { %689 = vmatprep.subr.bf16.mxu0 %v4725_v42  ;;  %802 = vmatprep.subr.bf16.mxu1 %v4727_v43  ;;  %v4764_v16 = vld [vmem:[#allocation6 + $0x260] ss:$16 sps:$4 sm:$0xff]   ;;  %v4769_v17 = vld [vmem:[#allocation6 + $0x44] ss:$16 sps:$4 sm:$0xff]  }
  0x53   :  { %437 = vperm.xlu1 %4688, %v394_v32   ;;  %434 = vperm.xlu0 %4687, %v393_v33   ;;  %v4772_v18 = vld [vmem:[#allocation6 + $0x244] ss:$16 sps:$4 sm:$0xff]   ;;  %v4767_v21 = vld [vmem:[#allocation6 + $0x40] ss:$16 sps:$4 sm:$0xff]  }
  0x54   :  { %v4770_v22 = vld [vmem:[#allocation6 + $0x240] ss:$16 sps:$4 sm:$0xff]   ;;  %v4775_v23 = vld [vmem:[#allocation6 + $0x24] ss:$16 sps:$4 sm:$0xff]  }
  0x55   :  { %690 = vmatpush1.bf16.msra.mxu0 %v4729_v45  ;;  %803 = vmatpush1.bf16.msra.mxu1 %v4730_v46  ;;  %v4778_v24 = vld [vmem:[#allocation6 + $0x224] ss:$16 sps:$4 sm:$0xff]   ;;  %v4773_v25 = vld [vmem:[#allocation6 + $0x20] ss:$16 sps:$4 sm:$0xff]  }
  0x56   :  { %691 = vmatprep.subr.bf16.mxu0 %v4731_v47  ;;  %804 = vmatprep.subr.bf16.mxu1 %v4733_v48  ;;  %v4776_v26 = vld [vmem:[#allocation6 + $0x220] ss:$16 sps:$4 sm:$0xff]   ;;  %v4781_v27 = vld [vmem:[#allocation6 + $0x4] ss:$16 sps:$4 sm:$0xff]  }
  0x57   :  { %443 = vperm.xlu1 %4688, %v396_v38   ;;  %440 = vperm.xlu0 %4687, %v395_v39   ;;  %v4784_v28 = vld [vmem:[#allocation6 + $0x204] ss:$16 sps:$4 sm:$0xff]   ;;  %v4779_v31 = vld [vmem:[#allocation6] ss:$16 sps:$4 sm:$0xff]  }
  0x58   :  { %v4782_v32 = vld [vmem:[#allocation6 + $0x200] ss:$16 sps:$4 sm:$0xff]   ;;  %v4787_v33 = vld [vmem:[#allocation6 + $0x1e4] ss:$16 sps:$4 sm:$0xff]  }
  0x59   :  { %692 = vmatpush1.bf16.msra.mxu0 %v4735_v49  ;;  %805 = vmatpush1.bf16.msra.mxu1 %v4736_v50  ;;  %v4790_v34 = vld [vmem:[#allocation6 + $0x3e4] ss:$16 sps:$4 sm:$0xff]   ;;  %v4785_v35 = vld [vmem:[#allocation6 + $0x1e0] ss:$16 sps:$4 sm:$0xff]  }
  0x5a   :  { %2311 = vmatprep.subr.bf16.mxu0 %v4739_v51  ;;  %2424 = vmatprep.subr.bf16.mxu1 %v4742_v52  ;;  %v4788_v36 = vld [vmem:[#allocation6 + $0x3e0] ss:$16 sps:$4 sm:$0xff]   ;;  %v4793_v37 = vld [vmem:[#allocation6 + $0x1c4] ss:$16 sps:$4 sm:$0xff]  }
  0x5b   :  { %4167 = vperm.xlu0 %4687, %v4164_v44   ;;  %v4796_v38 = vld [vmem:[#allocation6 + $0x3c4] ss:$16 sps:$4 sm:$0xff]   ;;  %v4791_v41 = vld [vmem:[#allocation6 + $0x1c0] ss:$16 sps:$4 sm:$0xff]  }
  0x5c   :  { %v4794_v42 = vld [vmem:[#allocation6 + $0x3c0] ss:$16 sps:$4 sm:$0xff]   ;;  %v4799_v43 = vld [vmem:[#allocation6 + $0x1a4] ss:$16 sps:$4 sm:$0xff]  }
  0x5d   :  { %v4802_v44 = vld [vmem:[#allocation6 + $0x3a4] ss:$16 sps:$4 sm:$0xff]   ;;  %v4797_v45 = vld [vmem:[#allocation6 + $0x1a0] ss:$16 sps:$4 sm:$0xff]  }
  0x5e   :  { %v4800_v46 = vld [vmem:[#allocation6 + $0x3a0] ss:$16 sps:$4 sm:$0xff]   ;;  %v4805_v47 = vld [vmem:[#allocation6 + $0x184] ss:$16 sps:$4 sm:$0xff]  }
  0x5f   :  { %v4808_v48 = vld [vmem:[#allocation6 + $0x384] ss:$16 sps:$4 sm:$0xff]   ;;  %v4803_v51 = vld [vmem:[#allocation6 + $0x180] ss:$16 sps:$4 sm:$0xff]  }
  0x60   :  { %v4806_v52 = vld [vmem:[#allocation6 + $0x380] ss:$16 sps:$4 sm:$0xff]  }
  0xb6   :  { %v399_v54 = vpop.permute.xlu0 %398  ;;  %v405_v57 = vpop.permute.xlu1 %404 }
  0xb7   :  { %vm445_vm1 = vcmp.eq.s32.totalorder %v5499_v55, %v399_v54  ;;  %vm447_vm3 = vcmp.eq.s32.totalorder %v5499_v55, %v405_v57  ;;  %v4811_v54 = vld [vmem:[#allocation6 + $0x164] ss:$16 sps:$4 sm:$0xff]   ;;  %v4809_v57 = vld [vmem:[#allocation6 + $0x160] ss:$16 sps:$4 sm:$0xff]  }
  0xba   :  { %v402_v56 = vpop.permute.xlu0 %401  ;;  %v408_v4 = vpop.permute.xlu1 %407 }
  0xbb   :  { %vm446_vm0 = vcmp.eq.s32.totalorder %v5499_v55, %v402_v56  ;;  %vm448_vm4 = vcmp.eq.s32.totalorder %v5499_v55, %v408_v4  ;;  %v4814_v56 = vld [vmem:[#allocation6 + $0x364] ss:$16 sps:$4 sm:$0xff]  }
  0xbc   :  { %vm4295_vm2 = vmpackc.low %vm446_vm0, %vm445_vm1  ;;  %v4826_v4 = vld [vmem:[#allocation6 + $0x324] ss:$16 sps:$4 sm:$0xff]  }
  0xbd   :  { %4296 = vmatmul.mubr.msk.bf16.vlgmr.msra.gmra.mxu0 %vm4295_vm2, %v5372_v62  ;;  %4312 = vmatmul.mubr.msk.bf16.vlgmr.msra.gmra.mxu1 %vm4295_vm2, %v5372_v62  ;;  %vm4297_vm5 = vmpackc.low %vm448_vm4, %vm447_vm3 }
  0xbe   :  { %2312 = vmatpush1.bf16.msra.mxu0 %v4737_v58  ;;  %2425 = vmatpush1.bf16.msra.mxu1 %v4740_v59  ;;  %v414_v9 = vpop.permute.xlu1 %413  ;;  %v411_v10 = vpop.permute.xlu0 %410  ;;  %v4812_v58 = vld [vmem:[#allocation6 + $0x360] ss:$16 sps:$4 sm:$0xff]   ;;  %v4817_v59 = vld [vmem:[#allocation6 + $0x144] ss:$16 sps:$4 sm:$0xff]  }
  0xbf   :  { %2313 = vmatprep.subr.bf16.mxu0 %v4745_v60  ;;  %2426 = vmatprep.subr.bf16.mxu1 %v4748_v61  ;;  %vm450_vm6 = vcmp.eq.s32.totalorder %v5499_v55, %v414_v9  ;;  %vm449_vm7 = vcmp.eq.s32.totalorder %v5499_v55, %v411_v10  ;;  %v4820_v60 = vld [vmem:[#allocation6 + $0x344] ss:$16 sps:$4 sm:$0xff]   ;;  %v5547_v10 = vld [vmem:[#allocation3 + $0xc] ss:$28 sps:$4 sm:$0xff]  }
  0xc0   :  { %719 = vmatprep.mubr.bf16.mxu0 %v6472_v1  ;;  %832 = vmatprep.mubr.bf16.mxu1 %v6472_v1  ;;  %vm4299_vm8 = vmpackc.low %vm450_vm6, %vm449_vm7  ;;  %v5545_v9 = vld [vmem:[#allocation3 + $0x4] ss:$28 sps:$4 sm:$0xff]  }
  0xc2   :  { %2314 = vmatpush1.bf16.msra.mxu0 %v4743_v63  ;;  %2427 = vmatpush1.bf16.msra.mxu1 %v4746_v0  ;;  %v420_v19 = vpop.permute.xlu1 %419  ;;  %v417_v20 = vpop.permute.xlu0 %416  ;;  %v4815_v0 = vld [vmem:[#allocation6 + $0x140] ss:$16 sps:$4 sm:$0xff]  }
  0xc3   :  { %2315 = vmatprep.subr.bf16.mxu0 %v4751_v2  ;;  %2428 = vmatprep.subr.bf16.mxu1 %v4754_v3  ;;  %vm452_vm9 = vcmp.eq.s32.totalorder %v5499_v55, %v420_v19  ;;  %vm451_vm10 = vcmp.eq.s32.totalorder %v5499_v55, %v417_v20  ;;  %v4818_v2 = vld [vmem:[#allocation6 + $0x340] ss:$16 sps:$4 sm:$0xff]   ;;  %v4823_v3 = vld [vmem:[#allocation6 + $0x124] ss:$16 sps:$4 sm:$0xff]  }
  0xc4   :  { %vm4301_vm11 = vmpackc.low %vm452_vm9, %vm451_vm10  ;;  %v5559_v19 = vld [vmem:[#allocation3 + $0x44] ss:$28 sps:$4 sm:$0xff]  }
  0xc5   :  { %4298 = vmatmul.mubr.msk.bf16.gmra.mxu0 %vm4297_vm5, %v5372_v62  ;;  %4314 = vmatmul.mubr.msk.bf16.gmra.mxu1 %vm4297_vm5, %v5372_v62  ;;  %v4845_v20 = vld [vmem:[#allocation6 + $0x4c0] ss:$16 sps:$4 sm:$0xff]  }
  0xc6   :  { %2316 = vmatpush1.bf16.msra.mxu0 %v4749_v5  ;;  %2429 = vmatpush1.bf16.msra.mxu1 %v4752_v6  ;;  %v426_v29 = vpop.permute.xlu1 %425  ;;  %v423_v30 = vpop.permute.xlu0 %422  ;;  %v4821_v5 = vld [vmem:[#allocation6 + $0x120] ss:$16 sps:$4 sm:$0xff]  }
  0xc7   :  { %2317 = vmatprep.subr.bf16.mxu0 %v4757_v7  ;;  %2430 = vmatprep.subr.bf16.mxu1 %v4760_v8  ;;  %vm454_vm12 = vcmp.eq.s32.totalorder %v5499_v55, %v426_v29  ;;  %vm453_vm13 = vcmp.eq.s32.totalorder %v5499_v55, %v423_v30  ;;  %v4824_v6 = vld [vmem:[#allocation6 + $0x320] ss:$16 sps:$4 sm:$0xff]   ;;  %v4829_v7 = vld [vmem:[#allocation6 + $0x104] ss:$16 sps:$4 sm:$0xff]   ;;  %v5571_v30 = vld [vmem:[#allocation3 + $0x7c] ss:$28 sps:$4 sm:$0xff]  }
  0xc8   :  { %729 = vmatprep.mubr.bf16.mxu0 %v6472_v1  ;;  %842 = vmatprep.mubr.bf16.mxu1 %v6472_v1  ;;  %vm4303_vm14 = vmpackc.low %vm454_vm12, %vm453_vm13  ;;  %v4832_v8 = vld [vmem:[#allocation6 + $0x304] ss:$16 sps:$4 sm:$0xff]  }
  0xc9   :  { %v4862_v29 = vld [vmem:[#allocation6 + $0x484] ss:$16 sps:$4 sm:$0xff]  }
  0xca   :  { %2318 = vmatpush1.bf16.msra.mxu0 %v4755_v11  ;;  %2431 = vmatpush1.bf16.msra.mxu1 %v4758_v12  ;;  %v432_v39 = vpop.permute.xlu1 %431  ;;  %v429_v40 = vpop.permute.xlu0 %428  ;;  %v4830_v11 = vld [vmem:[#allocation6 + $0x300] ss:$16 sps:$4 sm:$0xff]  }
  0xcb   :  { %2319 = vmatprep.subr.bf16.mxu0 %v4763_v13  ;;  %2432 = vmatprep.subr.bf16.mxu1 %v4766_v14  ;;  %vm456_vm15 = vcmp.eq.s32.totalorder %v5499_v55, %v432_v39  ;;  %vm455_vm0 = vcmp.eq.s32.totalorder %v5499_v55, %v429_v40  ;;  %v5551_v12 = vld [vmem:[#allocation3] ss:$28 sps:$4 sm:$0xff]   ;;  %v5553_v13 = vld [vmem:[#allocation3 + $0x8] ss:$28 sps:$4 sm:$0xff]  }
  0xcc   :  { %vm4305_vm1 = vmpackc.low %vm456_vm15, %vm455_vm0  ;;  %v4841_v14 = vld [vmem:[#allocation6 + $0x4e4] ss:$16 sps:$4 sm:$0xff]   ;;  %v4887_v39 = vld [vmem:[#allocation6 + $0x680] ss:$16 sps:$4 sm:$0xff]  }
  0xcd   :  { %4300 = vmatmul.mubr.msk.bf16.gmra.mxu0 %vm4299_vm8, %v5372_v62  ;;  %4316 = vmatmul.mubr.msk.bf16.gmra.mxu1 %vm4299_vm8, %v5372_v62  ;;  %v4877_v40 = vld [vmem:[#allocation6 + $0x444] ss:$16 sps:$4 sm:$0xff]  }
  0xce   :  { %2320 = vmatpush1.bf16.msra.mxu0 %v4761_v15  ;;  %2433 = vmatpush1.bf16.msra.mxu1 %v4764_v16  ;;  %v438_v49 = vpop.permute.xlu1 %437  ;;  %v435_v50 = vpop.permute.xlu0 %434  ;;  %v4844_v15 = vld [vmem:[#allocation6 + $0x6e4] ss:$16 sps:$4 sm:$0xff]   ;;  %v4839_v16 = vld [vmem:[#allocation6 + $0x4e0] ss:$16 sps:$4 sm:$0xff]  }
  0xcf   :  { %2321 = vmatprep.subr.bf16.mxu0 %v4769_v17  ;;  %2434 = vmatprep.subr.bf16.mxu1 %v4772_v18  ;;  %vm458_vm2 = vcmp.eq.s32.totalorder %v5499_v55, %v438_v49  ;;  %vm457_vm3 = vcmp.eq.s32.totalorder %v5499_v55, %v435_v50  ;;  %v4842_v17 = vld [vmem:[#allocation6 + $0x6e0] ss:$16 sps:$4 sm:$0xff]   ;;  %v4847_v18 = vld [vmem:[#allocation6 + $0x4c4] ss:$16 sps:$4 sm:$0xff]  }
  0xd0   :  { %739 = vmatprep.mubr.bf16.mxu0 %v6472_v1  ;;  %852 = vmatprep.mubr.bf16.mxu1 %v6472_v1  ;;  %vm4307_vm4 = vmpackc.low %vm458_vm2, %vm457_vm3  ;;  %v4884_v49 = vld [vmem:[#allocation6 + $0x420] ss:$16 sps:$4 sm:$0xff]  }
  0xd1   :  { %v5593_v50 = vld [vmem:[#allocation3 + $0xe4] ss:$28 sps:$4 sm:$0xff]  }
  0xd2   :  { %2322 = vmatpush1.bf16.msra.mxu0 %v4767_v21  ;;  %2435 = vmatpush1.bf16.msra.mxu1 %v4770_v22  ;;  %v444_v61 = vpop.permute.xlu1 %443  ;;  %v441_v63 = vpop.permute.xlu0 %440  ;;  %v4857_v21 = vld [vmem:[#allocation6 + $0x6c0] ss:$16 sps:$4 sm:$0xff]   ;;  %v4859_v22 = vld [vmem:[#allocation6 + $0x6c4] ss:$16 sps:$4 sm:$0xff]  }
  0xd3   :  { %2323 = vmatprep.subr.bf16.mxu0 %v4775_v23  ;;  %2436 = vmatprep.subr.bf16.mxu1 %v4778_v24  ;;  %vm460_vm5 = vcmp.eq.s32.totalorder %v5499_v55, %v444_v61  ;;  %vm459_vm6 = vcmp.eq.s32.totalorder %v5499_v55, %v441_v63  ;;  %v4827_v55 = vld [vmem:[#allocation6 + $0x100] ss:$16 sps:$4 sm:$0xff]   ;;  %v5564_v23 = vld [vmem:[#allocation3 + $0x38] ss:$28 sps:$4 sm:$0xff]  }
  0xd4   :  { %vm4309_vm7 = vmpackc.low %vm460_vm5, %vm459_vm6  ;;  %v5566_v24 = vld [vmem:[#allocation3 + $0x40] ss:$28 sps:$4 sm:$0xff]  }
  0xd5   :  { %4302 = vmatmul.mubr.msk.bf16.gmra.mxu0 %vm4301_vm11, %v5372_v62  ;;  %4318 = vmatmul.mubr.msk.bf16.gmra.mxu1 %vm4301_vm11, %v5372_v62  ;;  %v4899_v61 = vld [vmem:[#allocation6 + $0x5e0] ss:$16 sps:$4 sm:$0xff]   ;;  %v5605_v63 = vld [vmem:[#allocation3 + $0x11c] ss:$28 sps:$4 sm:$0xff]  }
  0xd6   :  { %2324 = vmatpush1.bf16.msra.mxu0 %v4773_v25  ;;  %2437 = vmatpush1.bf16.msra.mxu1 %v4776_v26  ;;  %v4856_v25 = vld [vmem:[#allocation6 + $0x4a4] ss:$16 sps:$4 sm:$0xff]  }
  0xd7   :  { %2325 = vmatprep.subr.bf16.mxu0 %v4781_v27  ;;  %2438 = vmatprep.subr.bf16.mxu1 %v4784_v28  ;;  %v4874_v26 = vld [vmem:[#allocation6 + $0x6a4] ss:$16 sps:$4 sm:$0xff]   ;;  %v4854_v27 = vld [vmem:[#allocation6 + $0x4a0] ss:$16 sps:$4 sm:$0xff]  }
  0xd8   :  { %749 = vmatprep.mubr.bf16.mxu0 %v6472_v1  ;;  %862 = vmatprep.mubr.bf16.mxu1 %v6472_v1  ;;  %v5569_v28 = vld [vmem:[#allocation3 + $0x74] ss:$28 sps:$4 sm:$0xff]  }
  0xda   :  { %2326 = vmatpush1.bf16.msra.mxu0 %v4779_v31  ;;  %2439 = vmatpush1.bf16.msra.mxu1 %v4782_v32  ;;  %v4872_v31 = vld [vmem:[#allocation6 + $0x6a0] ss:$16 sps:$4 sm:$0xff]  }
  0xdb   :  { %2327 = vmatprep.subr.bf16.mxu0 %v4787_v33  ;;  %2440 = vmatprep.subr.bf16.mxu1 %v4790_v34  ;;  %v4860_v32 = vld [vmem:[#allocation6 + $0x480] ss:$16 sps:$4 sm:$0xff]   ;;  %v4889_v33 = vld [vmem:[#allocation6 + $0x684] ss:$16 sps:$4 sm:$0xff]  }
  0xdc   :  { %v5577_v34 = vld [vmem:[#allocation3 + $0x70] ss:$28 sps:$4 sm:$0xff]  }
  0xdd   :  { %4304 = vmatmul.mubr.msk.bf16.gmra.mxu0 %vm4303_vm14, %v5372_v62  ;;  %4320 = vmatmul.mubr.msk.bf16.gmra.mxu1 %vm4303_vm14, %v5372_v62 }
  0xde   :  { %2328 = vmatpush2.bf16.msra.mxu0 %v4785_v35  ;;  %2441 = vmatpush2.bf16.msra.mxu1 %v4788_v36  ;;  %v5579_v35 = vld [vmem:[#allocation3 + $0x78] ss:$28 sps:$4 sm:$0xff]  }
  0xdf   :  { %2329 = vmatprep.subr.bf16.mxu0 %v4793_v37  ;;  %2442 = vmatprep.subr.bf16.mxu1 %v4796_v38  ;;  %v4871_v36 = vld [vmem:[#allocation6 + $0x464] ss:$16 sps:$4 sm:$0xff]   ;;  %v4869_v37 = vld [vmem:[#allocation6 + $0x460] ss:$16 sps:$4 sm:$0xff]   ;;  %v5581_v38 = vld [vmem:[#allocation3 + $0xac] ss:$28 sps:$4 sm:$0xff]  }
  0xe0   :  { %759 = vmatprep.mubr.bf16.mxu0 %v6472_v1  ;;  %872 = vmatprep.mubr.bf16.mxu1 %v6472_v1 }
  0xe2   :  { %2330 = vmatpush2.bf16.msra.mxu0 %v4791_v41  ;;  %2443 = vmatpush2.bf16.msra.mxu1 %v4794_v42  ;;  %v5583_v41 = vld [vmem:[#allocation3 + $0xb4] ss:$28 sps:$4 sm:$0xff]  }
  0xe3   :  { %2331 = vmatprep.subr.bf16.mxu0 %v4799_v43  ;;  %2444 = vmatprep.subr.bf16.mxu1 %v4802_v44  ;;  %v4902_v42 = vld [vmem:[#allocation6 + $0x660] ss:$16 sps:$4 sm:$0xff]   ;;  %v4904_v43 = vld [vmem:[#allocation6 + $0x664] ss:$16 sps:$4 sm:$0xff]  }
  0xe4   :  { %v4875_v44 = vld [vmem:[#allocation6 + $0x440] ss:$16 sps:$4 sm:$0xff]  }
  0xe5   :  { %4306 = vmatmul.mubr.msk.bf16.gmra.mxu0 %vm4305_vm1, %v5372_v62  ;;  %4322 = vmatmul.mubr.msk.bf16.gmra.mxu1 %vm4305_vm1, %v5372_v62 }
  0xe6   :  { %2332 = vmatpush2.bf16.msra.mxu0 %v4797_v45  ;;  %2445 = vmatpush2.bf16.msra.mxu1 %v4800_v46  ;;  %v4919_v45 = vld [vmem:[#allocation6 + $0x644] ss:$16 sps:$4 sm:$0xff]  }
  0xe7   :  { %2333 = vmatprep.subr.bf16.mxu0 %v4805_v47  ;;  %2446 = vmatprep.subr.bf16.mxu1 %v4808_v48  ;;  %v5589_v46 = vld [vmem:[#allocation3 + $0xa8] ss:$28 sps:$4 sm:$0xff]   ;;  %v5591_v47 = vld [vmem:[#allocation3 + $0xb0] ss:$28 sps:$4 sm:$0xff]  }
  0xe8   :  { %769 = vmatprep.mubr.bf16.mxu0 %v6472_v1  ;;  %882 = vmatprep.mubr.bf16.mxu1 %v6472_v1  ;;  %v4886_v48 = vld [vmem:[#allocation6 + $0x424] ss:$16 sps:$4 sm:$0xff]  }
  0xea   :  { %2334 = vmatpush2.bf16.msra.mxu0 %v4803_v51  ;;  %2447 = vmatpush2.bf16.msra.mxu1 %v4806_v52  ;;  %v4892_v51 = vld [vmem:[#allocation6 + $0x404] ss:$16 sps:$4 sm:$0xff]   ;;  %v5595_v52 = vld [vmem:[#allocation3 + $0xec] ss:$28 sps:$4 sm:$0xff]  }
  0xeb   :  { %2335 = vmatprep.subr.bf16.mxu0 %v4811_v54  ;;  %2448 = vmatprep.subr.bf16.mxu1 %v4814_v56  ;;  %v4917_v54 = vld [vmem:[#allocation6 + $0x640] ss:$16 sps:$4 sm:$0xff]  }
  0xec   :  { %v4890_v56 = vld [vmem:[#allocation6 + $0x400] ss:$16 sps:$4 sm:$0xff]  }
  0xed   :  { %4308 = vmatmul.mubr.msk.bf16.gmra.mxu0 %vm4307_vm4, %v5372_v62  ;;  %4324 = vmatmul.mubr.msk.bf16.gmra.mxu1 %vm4307_vm4, %v5372_v62 }
  0xee   :  { %2336 = vmatpush2.bf16.msra.mxu0 %v4809_v57  ;;  %2449 = vmatpush2.bf16.msra.mxu1 %v4812_v58  ;;  %v4934_v57 = vld [vmem:[#allocation6 + $0x624] ss:$16 sps:$4 sm:$0xff]   ;;  %v5601_v58 = vld [vmem:[#allocation3 + $0xe0] ss:$28 sps:$4 sm:$0xff]  }
  0xef   :  { %2337 = vmatprep.subr.bf16.mxu0 %v4817_v59  ;;  %2450 = vmatprep.subr.bf16.mxu1 %v4820_v60  ;;  %v5603_v59 = vld [vmem:[#allocation3 + $0xe8] ss:$28 sps:$4 sm:$0xff]  }
  0xf0   :  { %779 = vmatprep.mubr.bf16.mxu0 %v6472_v1  ;;  %892 = vmatprep.mubr.bf16.mxu1 %v6472_v1  ;;  %v4901_v60 = vld [vmem:[#allocation6 + $0x5e4] ss:$16 sps:$4 sm:$0xff]  }
  0xf2   :  { %2338 = vmatpush2.bf16.msra.mxu0 %v4815_v0  ;;  %2451 = vmatpush2.bf16.msra.mxu1 %v4818_v2  ;;  %v4932_v0 = vld [vmem:[#allocation6 + $0x620] ss:$16 sps:$4 sm:$0xff]   ;;  %v4907_v2 = vld [vmem:[#allocation6 + $0x5c4] ss:$16 sps:$4 sm:$0xff]  }
  0xf3   :  { %2339 = vmatprep.subr.bf16.mxu0 %v4823_v3  ;;  %2452 = vmatprep.subr.bf16.mxu1 %v4826_v4  ;;  %v5607_v3 = vld [vmem:[#allocation3 + $0x124] ss:$28 sps:$4 sm:$0xff]  }
  0xf4   :  { %v4947_v4 = vld [vmem:[#allocation6 + $0x600] ss:$16 sps:$4 sm:$0xff]  }
  0xf5   :  { %4310 = vmatmul.mubr.msk.bf16.gmra.mxu0 %vm4309_vm7, %v5372_v62  ;;  %4326 = vmatmul.mubr.msk.bf16.gmra.mxu1 %vm4309_vm7, %v5372_v62  ;;  %v5557_v62 = vld [vmem:[#allocation3 + $0x3c] ss:$28 sps:$4 sm:$0xff]  }
  0xf6   :  { %2340 = vmatpush2.bf16.msra.mxu0 %v4821_v5  ;;  %2453 = vmatpush2.bf16.msra.mxu1 %v4824_v6  ;;  %v4949_v5 = vld [vmem:[#allocation6 + $0x604] ss:$16 sps:$4 sm:$0xff]   ;;  %v4905_v6 = vld [vmem:[#allocation6 + $0x5c0] ss:$16 sps:$4 sm:$0xff]  }
  0xf7   :  { %2341 = vmatprep.subr.bf16.mxu0 %v4829_v7  ;;  %2454 = vmatprep.subr.bf16.mxu1 %v4832_v8  ;;  %v4962_v7 = vld [vmem:[#allocation6 + $0x2ec] ss:$16 sps:$4 sm:$0xff]   ;;  %v5613_v8 = vld [vmem:[#allocation3 + $0x118] ss:$28 sps:$4 sm:$0xff]  }
  0xf8   :  { %2343 = vmatprep.mubr.bf16.mxu0 %v5545_v9  ;;  %2456 = vmatprep.mubr.bf16.mxu1 %v5547_v10 }
  0xfa   :  { %2342 = vmatpush2.bf16.msra.mxu0 %v4827_v55  ;;  %2455 = vmatpush2.bf16.msra.mxu1 %v4830_v11  ;;  %v5615_v55 = vld [vmem:[#allocation3 + $0x120] ss:$28 sps:$4 sm:$0xff]   ;;  %v4916_v11 = vld [vmem:[#allocation6 + $0x5a4] ss:$16 sps:$4 sm:$0xff]  }
  0xfb   :  { %2537 = vmatprep.subr.bf16.mxu0 %v4841_v14  ;;  %2650 = vmatprep.subr.bf16.mxu1 %v4844_v15  ;;  %v4914_v14 = vld [vmem:[#allocation6 + $0x5a0] ss:$16 sps:$4 sm:$0xff]  }
  0xfc   :  { %v5617_v15 = vld [vmem:[#allocation3 + $0x154] ss:$28 sps:$4 sm:$0xff]  }
  0xfd   :  { %2344 = vmatmul.mubr.bf16.vlgmr.msra.gmra.mxu0 %v5551_v12  ;;  %2457 = vmatmul.mubr.bf16.vlgmr.msra.gmra.mxu1 %v5553_v13 }
  0xfe   :  { %2538 = vmatpush1.bf16.msra.mxu0 %v4839_v16  ;;  %2651 = vmatpush1.bf16.msra.mxu1 %v4842_v17  ;;  %v4922_v16 = vld [vmem:[#allocation6 + $0x584] ss:$16 sps:$4 sm:$0xff]   ;;  %v5619_v17 = vld [vmem:[#allocation3 + $0x15c] ss:$28 sps:$4 sm:$0xff]  }
  0xff   :  { %2539 = vmatprep.subr.bf16.mxu0 %v4847_v18  ;;  %2353 = vmatprep.mubr.bf16.mxu0 %v5557_v62  ;;  %v4920_v18 = vld [vmem:[#allocation6 + $0x580] ss:$16 sps:$4 sm:$0xff]  }
 0x100   :  { %2466 = vmatprep.mubr.bf16.mxu1 %v5559_v19  ;;  %2652 = vmatprep.subr.bf16.mxu1 %v4859_v22  ;;  %v5627_v22 = vld [vmem:[#allocation3 + $0x158] ss:$28 sps:$4 sm:$0xff]  }
 0x102   :  { %2540 = vmatpush1.bf16.msra.mxu0 %v4845_v20  ;;  %2653 = vmatpush1.bf16.msra.mxu1 %v4857_v21  ;;  %v4931_v20 = vld [vmem:[#allocation6 + $0x564] ss:$16 sps:$4 sm:$0xff]   ;;  %v5625_v21 = vld [vmem:[#allocation3 + $0x150] ss:$28 sps:$4 sm:$0xff]  }
 0x103   :  { %2541 = vmatprep.subr.bf16.mxu0 %v4856_v25  ;;  %2654 = vmatprep.subr.bf16.mxu1 %v4874_v26  ;;  %v4929_v25 = vld [vmem:[#allocation6 + $0x560] ss:$16 sps:$4 sm:$0xff]   ;;  %v5629_v26 = vld [vmem:[#allocation3 + $0x18c] ss:$28 sps:$4 sm:$0xff]  }
 0x105   :  { %2354 = vmatmul.mubr.bf16.gmra.mxu0 %v5564_v23  ;;  %2467 = vmatmul.mubr.bf16.gmra.mxu1 %v5566_v24 }
 0x106   :  { %2542 = vmatpush1.bf16.msra.mxu0 %v4854_v27  ;;  %2363 = vmatprep.mubr.bf16.mxu0 %v5569_v28  ;;  %v4937_v27 = vld [vmem:[#allocation6 + $0x544] ss:$16 sps:$4 sm:$0xff]  }
 0x107   :  { %2543 = vmatprep.subr.bf16.mxu0 %v4862_v29  ;;  %2476 = vmatprep.mubr.bf16.mxu1 %v5571_v30  ;;  %v5631_v29 = vld [vmem:[#allocation3 + $0x194] ss:$28 sps:$4 sm:$0xff]  }
 0x108   :  { %2655 = vmatpush1.bf16.msra.mxu1 %v4872_v31  ;;  %v4935_v31 = vld [vmem:[#allocation6 + $0x540] ss:$16 sps:$4 sm:$0xff]  }
 0x109   :  { %2656 = vmatprep.subr.bf16.mxu1 %v4889_v33  ;;  %v5637_v33 = vld [vmem:[#allocation3 + $0x188] ss:$28 sps:$4 sm:$0xff]  }
 0x10a   :  { %2544 = vmatpush1.bf16.msra.mxu0 %v4860_v32  ;;  %v4946_v32 = vld [vmem:[#allocation6 + $0x524] ss:$16 sps:$4 sm:$0xff]  }
 0x10b   :  { %2545 = vmatprep.subr.bf16.mxu0 %v4871_v36  ;;  %v5639_v36 = vld [vmem:[#allocation3 + $0x190] ss:$28 sps:$4 sm:$0xff]  }
 0x10c   :  { %2657 = vmatpush1.bf16.msra.mxu1 %v4887_v39  ;;  %v5641_v39 = vld [vmem:[#allocation3 + $0x14] ss:$28 sps:$4 sm:$0xff]  }
 0x10d   :  { %2364 = vmatmul.mubr.bf16.gmra.mxu0 %v5577_v34  ;;  %2477 = vmatmul.mubr.bf16.gmra.mxu1 %v5579_v35 }
 0x10e   :  { %2546 = vmatpush1.bf16.msra.mxu0 %v4869_v37  ;;  %2373 = vmatprep.mubr.bf16.mxu0 %v5581_v38  ;;  %v4944_v37 = vld [vmem:[#allocation6 + $0x520] ss:$16 sps:$4 sm:$0xff]  }
 0x10f   :  { %2547 = vmatprep.subr.bf16.mxu0 %v4877_v40  ;;  %2486 = vmatprep.mubr.bf16.mxu1 %v5583_v41  ;;  %v4952_v40 = vld [vmem:[#allocation6 + $0x504] ss:$16 sps:$4 sm:$0xff]  }
 0x110   :  { %2658 = vmatprep.subr.bf16.mxu1 %v4904_v43  ;;  %v4959_v43 = vld [vmem:[#allocation6 + $0xec] ss:$16 sps:$4 sm:$0xff]  }
 0x111   :  { %2659 = vmatpush1.bf16.msra.mxu1 %v4902_v42  ;;  %v4950_v42 = vld [vmem:[#allocation6 + $0x500] ss:$16 sps:$4 sm:$0xff]  }
 0x112   :  { %2548 = vmatpush1.bf16.msra.mxu0 %v4875_v44  ;;  %2660 = vmatprep.subr.bf16.mxu1 %v4919_v45  ;;  %v5647_v44 = vld [vmem:[#allocation3 + $0x10] ss:$28 sps:$4 sm:$0xff]   ;;  %v5649_v45 = vld [vmem:[#allocation3 + $0x18] ss:$28 sps:$4 sm:$0xff]  }
 0x113   :  { %2549 = vmatprep.subr.bf16.mxu0 %v4886_v48  ;;  %v4957_v48 = vld [vmem:[#allocation6 + $0xe8] ss:$16 sps:$4 sm:$0xff]  }
 0x115   :  { %2374 = vmatmul.mubr.bf16.gmra.mxu0 %v5589_v46  ;;  %2487 = vmatmul.mubr.bf16.gmra.mxu1 %v5591_v47 }
 0x116   :  { %2550 = vmatpush1.bf16.msra.mxu0 %v4884_v49  ;;  %2383 = vmatprep.mubr.bf16.mxu0 %v5593_v50  ;;  %v4960_v49 = vld [vmem:[#allocation6 + $0x2e8] ss:$16 sps:$4 sm:$0xff]  }
 0x117   :  { %2551 = vmatprep.subr.bf16.mxu0 %v4892_v51  ;;  %2496 = vmatprep.mubr.bf16.mxu1 %v5595_v52  ;;  %v4965_v51 = vld [vmem:[#allocation6 + $0xcc] ss:$16 sps:$4 sm:$0xff]  }
 0x118   :  { %2661 = vmatpush1.bf16.msra.mxu1 %v4917_v54  ;;  %v4968_v54 = vld [vmem:[#allocation6 + $0x2cc] ss:$16 sps:$4 sm:$0xff]  }
 0x119   :  { %2662 = vmatprep.subr.bf16.mxu1 %v4934_v57  ;;  %v4963_v57 = vld [vmem:[#allocation6 + $0xc8] ss:$16 sps:$4 sm:$0xff]  }
 0x11a   :  { %2552 = vmatpush1.bf16.msra.mxu0 %v4890_v56  ;;  %v5651_v56 = vld [vmem:[#allocation3 + $0x4c] ss:$28 sps:$4 sm:$0xff]  }
 0x11b   :  { %2553 = vmatprep.subr.bf16.mxu0 %v4901_v60  ;;  %v4966_v60 = vld [vmem:[#allocation6 + $0x2c8] ss:$16 sps:$4 sm:$0xff]  }
 0x11c   :  { %2663 = vmatpush1.bf16.msra.mxu1 %v4932_v0  ;;  %v4978_v0 = vld [vmem:[#allocation6 + $0x2ac] ss:$16 sps:$4 sm:$0xff]  }
 0x11d   :  { %2384 = vmatmul.mubr.bf16.gmra.mxu0 %v5601_v58  ;;  %2497 = vmatmul.mubr.bf16.gmra.mxu1 %v5603_v59 }
 0x11e   :  { %2554 = vmatpush2.bf16.msra.mxu0 %v4899_v61  ;;  %2393 = vmatprep.mubr.bf16.mxu0 %v5605_v63  ;;  %v4975_v61 = vld [vmem:[#allocation6 + $0xac] ss:$16 sps:$4 sm:$0xff]  }
 0x11f   :  { %2555 = vmatprep.subr.bf16.mxu0 %v4907_v2  ;;  %2506 = vmatprep.mubr.bf16.mxu1 %v5607_v3  ;;  %v5657_v2 = vld [vmem:[#allocation3 + $0x48] ss:$28 sps:$4 sm:$0xff]  }
 0x120   :  { %2664 = vmatprep.subr.bf16.mxu1 %v4949_v5  ;;  %v4973_v5 = vld [vmem:[#allocation6 + $0xa8] ss:$16 sps:$4 sm:$0xff]  }
 0x121   :  { %2665 = vmatpush1.bf16.msra.mxu1 %v4947_v4  ;;  %v5659_v4 = vld [vmem:[#allocation3 + $0x50] ss:$28 sps:$4 sm:$0xff]  }
 0x122   :  { %2556 = vmatpush2.bf16.msra.mxu0 %v4905_v6  ;;  %2876 = vmatprep.subr.bf16.mxu1 %v4962_v7  ;;  %v4976_v6 = vld [vmem:[#allocation6 + $0x2a8] ss:$16 sps:$4 sm:$0xff]   ;;  %v4981_v7 = vld [vmem:[#allocation6 + $0x8c] ss:$16 sps:$4 sm:$0xff]  }
 0x123   :  { %2557 = vmatprep.subr.bf16.mxu0 %v4916_v11  ;;  %v4984_v11 = vld [vmem:[#allocation6 + $0x28c] ss:$16 sps:$4 sm:$0xff]  }
 0x125   :  { %2394 = vmatmul.mubr.bf16.gmra.mxu0 %v5613_v8  ;;  %2507 = vmatmul.mubr.bf16.gmra.mxu1 %v5615_v55 }
 0x126   :  { %2558 = vmatpush2.bf16.msra.mxu0 %v4914_v14  ;;  %2403 = vmatprep.mubr.bf16.mxu0 %v5617_v15  ;;  %v5661_v14 = vld [vmem:[#allocation3 + $0x84] ss:$28 sps:$4 sm:$0xff]  }
 0x127   :  { %2559 = vmatprep.subr.bf16.mxu0 %v4922_v16  ;;  %2516 = vmatprep.mubr.bf16.mxu1 %v5619_v17  ;;  %v4979_v16 = vld [vmem:[#allocation6 + $0x88] ss:$16 sps:$4 sm:$0xff]  }
 0x12a   :  { %2560 = vmatpush2.bf16.msra.mxu0 %v4920_v18  ;;  %v4982_v18 = vld [vmem:[#allocation6 + $0x288] ss:$16 sps:$4 sm:$0xff]  }
 0x12b   :  { %2561 = vmatprep.subr.bf16.mxu0 %v4931_v20  ;;  %v4991_v20 = vld [vmem:[#allocation6 + $0x6c] ss:$16 sps:$4 sm:$0xff]  }
 0x12d   :  { %2404 = vmatmul.mubr.bf16.gmra.mxu0 %v5625_v21  ;;  %2517 = vmatmul.mubr.bf16.gmra.mxu1 %v5627_v22 }
 0x12e   :  { %2562 = vmatpush2.bf16.msra.mxu0 %v4929_v25  ;;  %2413 = vmatprep.mubr.bf16.mxu0 %v5629_v26  ;;  %v4994_v25 = vld [vmem:[#allocation6 + $0x26c] ss:$16 sps:$4 sm:$0xff]  }
 0x12f   :  { %2563 = vmatprep.subr.bf16.mxu0 %v4937_v27  ;;  %2526 = vmatprep.mubr.bf16.mxu1 %v5631_v29  ;;  %v5667_v27 = vld [vmem:[#allocation3 + $0x80] ss:$28 sps:$4 sm:$0xff]  }
 0x132   :  { %2564 = vmatpush2.bf16.msra.mxu0 %v4935_v31  ;;  %v5669_v31 = vld [vmem:[#allocation3 + $0x88] ss:$28 sps:$4 sm:$0xff]  }
 0x133   :  { %2565 = vmatprep.subr.bf16.mxu0 %v4946_v32  ;;  %v4989_v32 = vld [vmem:[#allocation6 + $0x68] ss:$16 sps:$4 sm:$0xff]  }
 0x135   :  { %2414 = vmatmul.mubr.bf16.gmra.mxu0 %v5637_v33  ;;  %2527 = vmatmul.mubr.bf16.gmra.mxu1 %v5639_v36 }
 0x136   :  { %2566 = vmatpush2.bf16.msra.mxu0 %v4944_v37  ;;  %2569 = vmatprep.mubr.bf16.mxu0 %v5641_v39  ;;  %v4992_v37 = vld [vmem:[#allocation6 + $0x268] ss:$16 sps:$4 sm:$0xff]  }
 0x137   :  { %2567 = vmatprep.subr.bf16.mxu0 %v4952_v40  ;;  %2682 = vmatprep.mubr.bf16.mxu1 %v6472_v1  ;;  %v4997_v40 = vld [vmem:[#allocation6 + $0x4c] ss:$16 sps:$4 sm:$0xff]  }
 0x13a   :  { %2568 = vmatpush2.bf16.msra.mxu0 %v4950_v42  ;;  %v5000_v42 = vld [vmem:[#allocation6 + $0x24c] ss:$16 sps:$4 sm:$0xff]  }
 0x13b   :  { %2763 = vmatprep.subr.bf16.mxu0 %v4959_v43  ;;  %v5671_v43 = vld [vmem:[#allocation3 + $0xbc] ss:$28 sps:$4 sm:$0xff]  }
 0x13d   :  { %2570 = vmatmul.mubr.bf16.vlgmr.msra.gmra.mxu0 %v5647_v44  ;;  %2683 = vmatmul.mubr.bf16.vlgmr.msra.gmra.mxu1 %v5649_v45 }
 0x13e   :  { %2764 = vmatpush1.bf16.msra.mxu0 %v4957_v48  ;;  %2877 = vmatpush1.bf16.msra.mxu1 %v4960_v49  ;;  %v4995_v48 = vld [vmem:[#allocation6 + $0x48] ss:$16 sps:$4 sm:$0xff]  }
 0x13f   :  { %2765 = vmatprep.subr.bf16.mxu0 %v4965_v51  ;;  %2878 = vmatprep.subr.bf16.mxu1 %v4968_v54  ;;  %v4998_v49 = vld [vmem:[#allocation6 + $0x248] ss:$16 sps:$4 sm:$0xff]   ;;  %v5007_v51 = vld [vmem:[#allocation6 + $0x2c] ss:$16 sps:$4 sm:$0xff]  }
 0x140   :  { %2579 = vmatprep.mubr.bf16.mxu0 %v5651_v56  ;;  %2692 = vmatprep.mubr.bf16.mxu1 %v6472_v1  ;;  %v5010_v54 = vld [vmem:[#allocation6 + $0x22c] ss:$16 sps:$4 sm:$0xff]  }
 0x142   :  { %2766 = vmatpush1.bf16.msra.mxu0 %v4963_v57  ;;  %2879 = vmatpush1.bf16.msra.mxu1 %v4966_v60  ;;  %v5677_v57 = vld [vmem:[#allocation3 + $0xb8] ss:$28 sps:$4 sm:$0xff]   ;;  %v5679_v60 = vld [vmem:[#allocation3 + $0xc0] ss:$28 sps:$4 sm:$0xff]  }
 0x143   :  { %2767 = vmatprep.subr.bf16.mxu0 %v4975_v61  ;;  %2880 = vmatprep.subr.bf16.mxu1 %v4978_v0  ;;  %v5005_v61 = vld [vmem:[#allocation6 + $0x28] ss:$16 sps:$4 sm:$0xff]  }
 0x144   :  { %v5008_v0 = vld [vmem:[#allocation6 + $0x228] ss:$16 sps:$4 sm:$0xff]  }
 0x145   :  { %2580 = vmatmul.mubr.bf16.gmra.mxu0 %v5657_v2  ;;  %2693 = vmatmul.mubr.bf16.gmra.mxu1 %v5659_v4 }
 0x146   :  { %2768 = vmatpush1.bf16.msra.mxu0 %v4973_v5  ;;  %2881 = vmatpush1.bf16.msra.mxu1 %v4976_v6  ;;  %v5013_v5 = vld [vmem:[#allocation6 + $0xc] ss:$16 sps:$4 sm:$0xff]  }
 0x147   :  { %2769 = vmatprep.subr.bf16.mxu0 %v4981_v7  ;;  %2882 = vmatprep.subr.bf16.mxu1 %v4984_v11  ;;  %v5016_v6 = vld [vmem:[#allocation6 + $0x20c] ss:$16 sps:$4 sm:$0xff]   ;;  %v5681_v7 = vld [vmem:[#allocation3 + $0xf4] ss:$28 sps:$4 sm:$0xff]   ;;  %v5011_v11 = vld [vmem:[#allocation6 + $0x8] ss:$16 sps:$4 sm:$0xff]  }
 0x148   :  { %2589 = vmatprep.mubr.bf16.mxu0 %v5661_v14  ;;  %2702 = vmatprep.mubr.bf16.mxu1 %v6472_v1 }
 0x14a   :  { %2770 = vmatpush1.bf16.msra.mxu0 %v4979_v16  ;;  %2883 = vmatpush1.bf16.msra.mxu1 %v4982_v18  ;;  %v5014_v16 = vld [vmem:[#allocation6 + $0x208] ss:$16 sps:$4 sm:$0xff]   ;;  %v5023_v18 = vld [vmem:[#allocation6 + $0x1ec] ss:$16 sps:$4 sm:$0xff]  }
 0x14b   :  { %2771 = vmatprep.subr.bf16.mxu0 %v4991_v20  ;;  %2884 = vmatprep.subr.bf16.mxu1 %v4994_v25  ;;  %v5026_v20 = vld [vmem:[#allocation6 + $0x3ec] ss:$16 sps:$4 sm:$0xff]  }
 0x14c   :  { %v5687_v25 = vld [vmem:[#allocation3 + $0xf0] ss:$28 sps:$4 sm:$0xff]  }
 0x14d   :  { %2590 = vmatmul.mubr.bf16.gmra.mxu0 %v5667_v27  ;;  %2703 = vmatmul.mubr.bf16.gmra.mxu1 %v5669_v31 }
 0x14e   :  { %2772 = vmatpush1.bf16.msra.mxu0 %v4989_v32  ;;  %2885 = vmatpush1.bf16.msra.mxu1 %v4992_v37  ;;  %v5689_v32 = vld [vmem:[#allocation3 + $0xf8] ss:$28 sps:$4 sm:$0xff]  }
 0x14f   :  { %2773 = vmatprep.subr.bf16.mxu0 %v4997_v40  ;;  %2886 = vmatprep.subr.bf16.mxu1 %v5000_v42  ;;  %v5021_v37 = vld [vmem:[#allocation6 + $0x1e8] ss:$16 sps:$4 sm:$0xff]   ;;  %v5029_v42 = vld [vmem:[#allocation6 + $0x1cc] ss:$16 sps:$4 sm:$0xff]  }
 0x150   :  { %2599 = vmatprep.mubr.bf16.mxu0 %v5671_v43  ;;  %2712 = vmatprep.mubr.bf16.mxu1 %v6472_v1  ;;  %v5024_v40 = vld [vmem:[#allocation6 + $0x3e8] ss:$16 sps:$4 sm:$0xff]  }
 0x152   :  { %2774 = vmatpush1.bf16.msra.mxu0 %v4995_v48  ;;  %2887 = vmatpush1.bf16.msra.mxu1 %v4998_v49  ;;  %v5032_v48 = vld [vmem:[#allocation6 + $0x3cc] ss:$16 sps:$4 sm:$0xff]  }
 0x153   :  { %2775 = vmatprep.subr.bf16.mxu0 %v5007_v51  ;;  %2888 = vmatprep.subr.bf16.mxu1 %v5010_v54  ;;  %v5691_v49 = vld [vmem:[#allocation3 + $0x12c] ss:$28 sps:$4 sm:$0xff]  }
 0x154   :  { %v5027_v51 = vld [vmem:[#allocation6 + $0x1c8] ss:$16 sps:$4 sm:$0xff]  }
 0x155   :  { %2600 = vmatmul.mubr.bf16.gmra.mxu0 %v5677_v57  ;;  %2713 = vmatmul.mubr.bf16.gmra.mxu1 %v5679_v60  ;;  %v5030_v54 = vld [vmem:[#allocation6 + $0x3c8] ss:$16 sps:$4 sm:$0xff]  }
 0x156   :  { %2776 = vmatpush1.bf16.msra.mxu0 %v5005_v61  ;;  %2889 = vmatpush1.bf16.msra.mxu1 %v5008_v0  ;;  %v5039_v61 = vld [vmem:[#allocation6 + $0x1ac] ss:$16 sps:$4 sm:$0xff]  }
 0x157   :  { %2777 = vmatprep.subr.bf16.mxu0 %v5013_v5  ;;  %2890 = vmatprep.subr.bf16.mxu1 %v5016_v6  ;;  %v5042_v0 = vld [vmem:[#allocation6 + $0x3ac] ss:$16 sps:$4 sm:$0xff]   ;;  %v5697_v5 = vld [vmem:[#allocation3 + $0x128] ss:$28 sps:$4 sm:$0xff]  }
 0x158   :  { %2609 = vmatprep.mubr.bf16.mxu0 %v5681_v7  ;;  %2722 = vmatprep.mubr.bf16.mxu1 %v6472_v1  ;;  %v5699_v6 = vld [vmem:[#allocation3 + $0x130] ss:$28 sps:$4 sm:$0xff]  }
 0x159   :  { %6486 = vst [vmem:[#allocation16_spill] sm:$0xff] %v5699_v6 }
 0x15a   :  { %2778 = vmatpush1.bf16.msra.mxu0 %v5011_v11  ;;  %2891 = vmatpush1.bf16.msra.mxu1 %v5014_v16  ;;  %v5037_v11 = vld [vmem:[#allocation6 + $0x1a8] ss:$16 sps:$4 sm:$0xff]  }
 0x15b   :  { %2779 = vmatprep.subr.bf16.mxu0 %v5023_v18  ;;  %2892 = vmatprep.subr.bf16.mxu1 %v5026_v20  ;;  %v5040_v16 = vld [vmem:[#allocation6 + $0x3a8] ss:$16 sps:$4 sm:$0xff]   ;;  %v5045_v18 = vld [vmem:[#allocation6 + $0x18c] ss:$16 sps:$4 sm:$0xff]  }
 0x15c   :  { %v5048_v20 = vld [vmem:[#allocation6 + $0x38c] ss:$16 sps:$4 sm:$0xff]  }
 0x15d   :  { %2610 = vmatmul.mubr.bf16.gmra.mxu0 %v5687_v25  ;;  %2723 = vmatmul.mubr.bf16.gmra.mxu1 %v5689_v32 }
 0x15e   :  { %2780 = vmatpush2.bf16.msra.mxu0 %v5021_v37  ;;  %2893 = vmatpush2.bf16.msra.mxu1 %v5024_v40  ;;  %v5701_v37 = vld [vmem:[#allocation3 + $0x164] ss:$28 sps:$4 sm:$0xff]   ;;  %v5043_v40 = vld [vmem:[#allocation6 + $0x188] ss:$16 sps:$4 sm:$0xff]  }
 0x15f   :  { %2781 = vmatprep.subr.bf16.mxu0 %v5029_v42  ;;  %2894 = vmatprep.subr.bf16.mxu1 %v5032_v48  ;;  %6487 = vst [vmem:[#allocation17_spill] sm:$0xff] %v5701_v37  ;;  %v5046_v42 = vld [vmem:[#allocation6 + $0x388] ss:$16 sps:$4 sm:$0xff]   ;;  %v5055_v48 = vld [vmem:[#allocation6 + $0x16c] ss:$16 sps:$4 sm:$0xff]  }
 0x160   :  { %2619 = vmatprep.mubr.bf16.mxu0 %v5691_v49  ;;  %2732 = vmatprep.mubr.bf16.mxu1 %v6472_v1 }
 0x162   :  { %2782 = vmatpush2.bf16.msra.mxu0 %v5027_v51  ;;  %2895 = vmatpush2.bf16.msra.mxu1 %v5030_v54  ;;  %v5058_v51 = vld [vmem:[#allocation6 + $0x36c] ss:$16 sps:$4 sm:$0xff]  }
 0x163   :  { %2783 = vmatprep.subr.bf16.mxu0 %v5039_v61  ;;  %2896 = vmatprep.subr.bf16.mxu1 %v5042_v0  ;;  %v5707_v54 = vld [vmem:[#allocation3 + $0x160] ss:$28 sps:$4 sm:$0xff]   ;;  %v5709_v61 = vld [vmem:[#allocation3 + $0x168] ss:$28 sps:$4 sm:$0xff]  }
 0x164   :  { %6488 = vst [vmem:[#allocation18_spill] sm:$0xff] %v5707_v54  ;;  %6489 = vst [vmem:[#allocation19_spill] sm:$0xff] %v5709_v61  ;;  %v5053_v0 = vld [vmem:[#allocation6 + $0x168] ss:$16 sps:$4 sm:$0xff]  }
 0x165   :  { %2620 = vmatmul.mubr.bf16.gmra.mxu0 %v5697_v5  ;;  %2733 = vmatmul.mubr.bf16.gmra.mxu1 %v5699_v6  ;;  %v5086_v6 = vld [vmem:[#allocation6 + $0x6ec] ss:$16 sps:$4 sm:$0xff]  }
 0x166   :  { %2784 = vmatpush2.bf16.msra.mxu0 %v5037_v11  ;;  %2897 = vmatpush2.bf16.msra.mxu1 %v5040_v16  ;;  %v5061_v11 = vld [vmem:[#allocation6 + $0x14c] ss:$16 sps:$4 sm:$0xff]  }
 0x167   :  { %2785 = vmatprep.subr.bf16.mxu0 %v5045_v18  ;;  %2898 = vmatprep.subr.bf16.mxu1 %v5048_v20  ;;  %v5064_v16 = vld [vmem:[#allocation6 + $0x34c] ss:$16 sps:$4 sm:$0xff]   ;;  %v5059_v20 = vld [vmem:[#allocation6 + $0x148] ss:$16 sps:$4 sm:$0xff]  }
 0x168   :  { %2629 = vmatprep.mubr.bf16.mxu0 %v5701_v37  ;;  %2742 = vmatprep.mubr.bf16.mxu1 %v6472_v1  ;;  %v5711_v18 = vld [vmem:[#allocation3 + $0x19c] ss:$28 sps:$4 sm:$0xff]  }
 0x169   :  { %6490 = vst [vmem:[#allocation20_spill] sm:$0xff] %v5711_v18  ;;  %v5062_v1 = vld [vmem:[#allocation6 + $0x348] ss:$16 sps:$4 sm:$0xff]   ;;  %v5719_v37 = vld [vmem:[#allocation3 + $0x1a0] ss:$28 sps:$4 sm:$0xff]  }
 0x16a   :  { %2786 = vmatpush2.bf16.msra.mxu0 %v5043_v40  ;;  %2899 = vmatpush2.bf16.msra.mxu1 %v5046_v42  ;;  %v5071_v40 = vld [vmem:[#allocation6 + $0x12c] ss:$16 sps:$4 sm:$0xff]  }
 0x16b   :  { %2787 = vmatprep.subr.bf16.mxu0 %v5055_v48  ;;  %2900 = vmatprep.subr.bf16.mxu1 %v5058_v51  ;;  %v5074_v42 = vld [vmem:[#allocation6 + $0x32c] ss:$16 sps:$4 sm:$0xff]   ;;  %v6491_v48 = vmov 0   ;;  %v5717_v51 = vld [vmem:[#allocation3 + $0x198] ss:$28 sps:$4 sm:$0xff]  }
 0x16d   :  { %2630 = vmatmul.mubr.bf16.gmra.mxu0 %v5707_v54  ;;  %2743 = vmatmul.mubr.bf16.gmra.mxu1 %v5709_v61  ;;  %v5069_v54 = vld [vmem:[#allocation6 + $0x128] ss:$16 sps:$4 sm:$0xff]  }
 0x16e   :  { %2788 = vmatpush2.bf16.msra.mxu0 %v5053_v0  ;;  %2901 = vmatpush2.bf16.msra.mxu1 %v5056_v53  ;;  %v5072_v61 = vld [vmem:[#allocation6 + $0x328] ss:$16 sps:$4 sm:$0xff]   ;;  %v5077_v53 = vld [vmem:[#allocation6 + $0x10c] ss:$16 sps:$4 sm:$0xff]  }
 0x16f   :  { %2789 = vmatprep.subr.bf16.mxu0 %v5061_v11  ;;  %2902 = vmatprep.subr.bf16.mxu1 %v5064_v16  ;;  %v5080_v0 = vld [vmem:[#allocation6 + $0x30c] ss:$16 sps:$4 sm:$0xff]   ;;  %v5075_v11 = vld [vmem:[#allocation6 + $0x108] ss:$16 sps:$4 sm:$0xff]  }
 0x170   :  { %2639 = vmatprep.mubr.bf16.mxu0 %v5711_v18  ;;  %2752 = vmatprep.mubr.bf16.mxu1 %v6491_v48  ;;  %v5078_v16 = vld [vmem:[#allocation6 + $0x308] ss:$16 sps:$4 sm:$0xff]   ;;  %v5083_v18 = vld [vmem:[#allocation6 + $0x4ec] ss:$16 sps:$4 sm:$0xff]  }
 0x172   :  { %2790 = vmatpush2.bf16.msra.mxu0 %v5059_v20  ;;  %2903 = vmatpush2.bf16.msra.mxu1 %v5062_v1  ;;  %v5081_v1 = vld [vmem:[#allocation6 + $0x4e8] ss:$16 sps:$4 sm:$0xff]  }
 0x173   :  { %2791 = vmatprep.subr.bf16.mxu0 %v5071_v40  ;;  %2904 = vmatprep.subr.bf16.mxu1 %v5074_v42  ;;  %v5084_v20 = vld [vmem:[#allocation6 + $0x6e8] ss:$16 sps:$4 sm:$0xff]   ;;  %v5089_v40 = vld [vmem:[#allocation6 + $0x4cc] ss:$16 sps:$4 sm:$0xff]  }
 0x174   :  { %v5095_v42 = vld [vmem:[#allocation6 + $0x6cc] ss:$16 sps:$4 sm:$0xff]  }
 0x175   :  { %2640 = vmatmul.mubr.bf16.gmra.mxu0 %v5717_v51  ;;  %2753 = vmatmul.mubr.bf16.gmra.mxu1 %v5719_v37 }
 0x176   :  { %2792 = vmatpush2.bf16.msra.mxu0 %v5069_v54  ;;  %2905 = vmatpush2.bf16.msra.mxu1 %v5072_v61 }
 0x177   :  { %2793 = vmatprep.subr.bf16.mxu0 %v5077_v53  ;;  %2906 = vmatprep.subr.bf16.mxu1 %v5080_v0 }
 0x178   :  { %2795 = vmatprep.mubr.bf16.mxu0 %v5545_v9  ;;  %2908 = vmatprep.mubr.bf16.mxu1 %v5547_v10  ;;  %v5087_v9 = vld [vmem:[#allocation6 + $0x4c8] ss:$16 sps:$4 sm:$0xff]  }
 0x179   :  { %v5093_v10 = vld [vmem:[#allocation6 + $0x6c8] ss:$16 sps:$4 sm:$0xff]  }
 0x17a   :  { %2794 = vmatpush2.bf16.msra.mxu0 %v5075_v11  ;;  %2907 = vmatpush2.bf16.msra.mxu1 %v5078_v16 }
 0x17b   :  { %2989 = vmatprep.subr.bf16.mxu0 %v5083_v18  ;;  %3102 = vmatprep.subr.bf16.mxu1 %v5086_v6  ;;  %v5092_v6 = vld [vmem:[#allocation6 + $0x4ac] ss:$16 sps:$4 sm:$0xff]  }
 0x17c   :  { %v5104_v18 = vld [vmem:[#allocation6 + $0x6ac] ss:$16 sps:$4 sm:$0xff]  }
 0x17d   :  { %v5725_v54 = vpop.f32.mrf.mxu0  ;;  %v5727_v61 = vpop.f32.mrf.mxu1  ;;  %2796 = vmatmul.mubr.bf16.vlgmr.msra.gmra.mxu0 %v5551_v12  ;;  %2909 = vmatmul.mubr.bf16.vlgmr.msra.gmra.mxu1 %v5553_v13  ;;  %v5090_v13 = vld [vmem:[#allocation6 + $0x4a8] ss:$16 sps:$4 sm:$0xff]  }
 0x17e   :  { %6492 = vst [vmem:[#allocation21_spill] sm:$0xff] %v5727_v61  ;;  %2990 = vmatpush1.bf16.msra.mxu0 %v5081_v1  ;;  %3103 = vmatpush1.bf16.msra.mxu1 %v5084_v20  ;;  %v5098_v20 = vld [vmem:[#allocation6 + $0x48c] ss:$16 sps:$4 sm:$0xff]  }
 0x17f   :  { %v5731_v53 = vpop.f32.mrf.mxu0  ;;  %v5733_v0 = vpop.f32.mrf.mxu1  ;;  %2991 = vmatprep.subr.bf16.mxu0 %v5089_v40  ;;  %2805 = vmatprep.mubr.bf16.mxu0 %v5557_v62  ;;  %v5102_v62 = vld [vmem:[#allocation6 + $0x6a8] ss:$16 sps:$4 sm:$0xff]  }
 0x180   :  { %6493 = vst [vmem:[#allocation22_spill] sm:$0xff] %v5733_v0  ;;  %2918 = vmatprep.mubr.bf16.mxu1 %v5559_v19  ;;  %3104 = vmatprep.subr.bf16.mxu1 %v5095_v42  ;;  %v5113_v19 = vld [vmem:[#allocation6 + $0x68c] ss:$16 sps:$4 sm:$0xff]   ;;  %v5096_v42 = vld [vmem:[#allocation6 + $0x488] ss:$16 sps:$4 sm:$0xff]  }
 0x181   :  { %v5737_v11 = vpop.f32.mrf.mxu0  ;;  %v5739_v12 = vpop.f32.mrf.mxu1 }
 0x182   :  { %6494 = vst [vmem:[#allocation23_spill] sm:$0xff] %v5739_v12  ;;  %2992 = vmatpush1.bf16.msra.mxu0 %v5087_v9  ;;  %3105 = vmatpush1.bf16.msra.mxu1 %v5093_v10  ;;  %v5107_v12 = vld [vmem:[#allocation6 + $0x44c] ss:$16 sps:$4 sm:$0xff]  }
 0x183   :  { %v5741_v16 = vpop.f32.mrf.mxu0  ;;  %v5743_v1 = vpop.f32.mrf.mxu1  ;;  %2993 = vmatprep.subr.bf16.mxu0 %v5092_v6  ;;  %3106 = vmatprep.subr.bf16.mxu1 %v5104_v18  ;;  %v5101_v6 = vld [vmem:[#allocation6 + $0x46c] ss:$16 sps:$4 sm:$0xff]   ;;  %v5111_v18 = vld [vmem:[#allocation6 + $0x688] ss:$16 sps:$4 sm:$0xff]  }
 0x184   :  { %6495 = vst [vmem:[#allocation24_spill] sm:$0xff] %v5743_v1 }
 0x185   :  { %v5745_v40 = vpop.f32.mrf.mxu0  ;;  %v5747_v0 = vpop.f32.mrf.mxu1  ;;  %2806 = vmatmul.mubr.bf16.gmra.mxu0 %v5564_v23  ;;  %2919 = vmatmul.mubr.bf16.gmra.mxu1 %v5566_v24  ;;  %v5099_v24 = vld [vmem:[#allocation6 + $0x468] ss:$16 sps:$4 sm:$0xff]  }
 0x186   :  { %6496 = vst [vmem:[#allocation25_spill] sm:$0xff] %v5747_v0  ;;  %2994 = vmatpush1.bf16.msra.mxu0 %v5090_v13  ;;  %2815 = vmatprep.mubr.bf16.mxu0 %v5569_v28 }
 0x187   :  { %v5752_v9 = vpop.f32.mrf.mxu0  ;;  %v5754_v10 = vpop.f32.mrf.mxu1  ;;  %2995 = vmatprep.subr.bf16.mxu0 %v5098_v20  ;;  %2928 = vmatprep.mubr.bf16.mxu1 %v5571_v30  ;;  %v5122_v20 = vld [vmem:[#allocation6 + $0x66c] ss:$16 sps:$4 sm:$0xff]  }
 0x188   :  { %6497 = vst [vmem:[#allocation26_spill] sm:$0xff] %v5754_v10  ;;  %3107 = vmatpush1.bf16.msra.mxu1 %v5102_v62  ;;  %v5120_v62 = vld [vmem:[#allocation6 + $0x668] ss:$16 sps:$4 sm:$0xff]  }
 0x189   :  { %v5757_v1 = vpop.f32.mrf.mxu0  ;;  %v5759_v23 = vpop.f32.mrf.mxu1  ;;  %3108 = vmatprep.subr.bf16.mxu1 %v5113_v19  ;;  %v5105_v19 = vld [vmem:[#allocation6 + $0x448] ss:$16 sps:$4 sm:$0xff]  }
 0x18a   :  { %6498 = vst [vmem:[#allocation27_spill] sm:$0xff] %v5759_v23  ;;  %2996 = vmatpush1.bf16.msra.mxu0 %v5096_v42  ;;  %v5131_v42 = vld [vmem:[#allocation6 + $0x64c] ss:$16 sps:$4 sm:$0xff]  }
 0x18b   :  { %v5761_v13 = vpop.f32.mrf.mxu0  ;;  %v5763_v28 = vpop.f32.mrf.mxu1  ;;  %2997 = vmatprep.subr.bf16.mxu0 %v5101_v6 }
 0x18c   :  { %6499 = vst [vmem:[#allocation28_spill] sm:$0xff] %v5763_v28  ;;  %3109 = vmatpush1.bf16.msra.mxu1 %v5111_v18  ;;  %v5110_v18 = vld [vmem:[#allocation6 + $0x42c] ss:$16 sps:$4 sm:$0xff]  }
 0x18d   :  { %v5765_v10 = vpop.f32.mrf.mxu0  ;;  %v5767_v30 = vpop.f32.mrf.mxu1  ;;  %2816 = vmatmul.mubr.bf16.gmra.mxu0 %v5577_v34  ;;  %2929 = vmatmul.mubr.bf16.gmra.mxu1 %v5579_v35  ;;  %v5108_v35 = vld [vmem:[#allocation6 + $0x428] ss:$16 sps:$4 sm:$0xff]  }
 0x18e   :  { %6500 = vst [vmem:[#allocation29_spill] sm:$0xff] %v5767_v30  ;;  %2998 = vmatpush1.bf16.msra.mxu0 %v5099_v24  ;;  %2825 = vmatprep.mubr.bf16.mxu0 %v5581_v38  ;;  %v5116_v30 = vld [vmem:[#allocation6 + $0x40c] ss:$16 sps:$4 sm:$0xff]  }
 0x18f   :  { %v5772_v23 = vpop.f32.mrf.mxu0  ;;  %v5774_v6 = vpop.f32.mrf.mxu1  ;;  %2999 = vmatprep.subr.bf16.mxu0 %v5107_v12  ;;  %2938 = vmatprep.mubr.bf16.mxu1 %v5583_v41 }
 0x190   :  { %6501 = vst [vmem:[#allocation30_spill] sm:$0xff] %v5774_v6  ;;  %3110 = vmatprep.subr.bf16.mxu1 %v5122_v20  ;;  %v5129_v6 = vld [vmem:[#allocation6 + $0x648] ss:$16 sps:$4 sm:$0xff]   ;;  %v5140_v20 = vld [vmem:[#allocation6 + $0x62c] ss:$16 sps:$4 sm:$0xff]  }
 0x191   :  { %v5777_v28 = vpop.f32.mrf.mxu0  ;;  %v5779_v34 = vpop.f32.mrf.mxu1  ;;  %3111 = vmatpush1.bf16.msra.mxu1 %v5120_v62  ;;  %v5114_v62 = vld [vmem:[#allocation6 + $0x408] ss:$16 sps:$4 sm:$0xff]  }
 0x192   :  { %6502 = vst [vmem:[#allocation31_spill] sm:$0xff] %v5779_v34  ;;  %3000 = vmatpush1.bf16.msra.mxu0 %v5105_v19  ;;  %3112 = vmatprep.subr.bf16.mxu1 %v5131_v42  ;;  %v5125_v34 = vld [vmem:[#allocation6 + $0x5cc] ss:$16 sps:$4 sm:$0xff]  }
 0x193   :  { %v5781_v24 = vpop.f32.mrf.mxu0  ;;  %v5783_v38 = vpop.f32.mrf.mxu1  ;;  %3001 = vmatprep.subr.bf16.mxu0 %v5110_v18  ;;  %v5119_v18 = vld [vmem:[#allocation6 + $0x5ec] ss:$16 sps:$4 sm:$0xff]  }
 0x194   :  { %6503 = vst [vmem:[#allocation32_spill] sm:$0xff] %v5783_v38  ;;  %v5138_v38 = vld [vmem:[#allocation6 + $0x628] ss:$16 sps:$4 sm:$0xff]  }
 0x195   :  { %v5785_v12 = vpop.f32.mrf.mxu0  ;;  %v5787_v41 = vpop.f32.mrf.mxu1  ;;  %2826 = vmatmul.mubr.bf16.gmra.mxu0 %v5589_v46  ;;  %2939 = vmatmul.mubr.bf16.gmra.mxu1 %v5591_v47  ;;  %v5117_v47 = vld [vmem:[#allocation6 + $0x5e8] ss:$16 sps:$4 sm:$0xff]  }
 0x196   :  { %6504 = vst [vmem:[#allocation33_spill] sm:$0xff] %v5787_v41  ;;  %3002 = vmatpush1.bf16.msra.mxu0 %v5108_v35  ;;  %2835 = vmatprep.mubr.bf16.mxu0 %v5593_v50 }
 0x197   :  { %v5792_v19 = vpop.f32.mrf.mxu0  ;;  %v5794_v42 = vpop.f32.mrf.mxu1  ;;  %3003 = vmatprep.subr.bf16.mxu0 %v5116_v30  ;;  %2948 = vmatprep.mubr.bf16.mxu1 %v5595_v52  ;;  %v5149_v30 = vld [vmem:[#allocation6 + $0x60c] ss:$16 sps:$4 sm:$0xff]  }
 0x198   :  { %6505 = vst [vmem:[#allocation34_spill] sm:$0xff] %v5794_v42  ;;  %3113 = vmatpush1.bf16.msra.mxu1 %v5129_v6  ;;  %v5147_v6 = vld [vmem:[#allocation6 + $0x608] ss:$16 sps:$4 sm:$0xff]  }
 0x199   :  { %v5797_v41 = vpop.f32.mrf.mxu0  ;;  %v5799_v46 = vpop.f32.mrf.mxu1  ;;  %3114 = vmatprep.subr.bf16.mxu1 %v5140_v20  ;;  %v5123_v20 = vld [vmem:[#allocation6 + $0x5c8] ss:$16 sps:$4 sm:$0xff]  }
 0x19a   :  { %6506 = vst [vmem:[#allocation35_spill] sm:$0xff] %v5799_v46  ;;  %3004 = vmatpush1.bf16.msra.mxu0 %v5114_v62 }
 0x19b   :  { %v5801_v35 = vpop.f32.mrf.mxu0  ;;  %v5803_v50 = vpop.f32.mrf.mxu1  ;;  %3005 = vmatprep.subr.bf16.mxu0 %v5119_v18 }
 0x19c   :  { %6507 = vst [vmem:[#allocation36_spill] sm:$0xff] %v5803_v50  ;;  %3115 = vmatpush1.bf16.msra.mxu1 %v5138_v38  ;;  %v5128_v38 = vld [vmem:[#allocation6 + $0x5ac] ss:$16 sps:$4 sm:$0xff]  }
 0x19d   :  { %v5805_v42 = vpop.f32.mrf.mxu0  ;;  %v5807_v52 = vpop.f32.mrf.mxu1  ;;  %2836 = vmatmul.mubr.bf16.gmra.mxu0 %v5601_v58  ;;  %2949 = vmatmul.mubr.bf16.gmra.mxu1 %v5603_v59  ;;  %v5126_v58 = vld [vmem:[#allocation6 + $0x5a8] ss:$16 sps:$4 sm:$0xff]  }
 0x19e   :  { %6508 = vst [vmem:[#allocation37_spill] sm:$0xff] %v5807_v52  ;;  %3006 = vmatpush2.bf16.msra.mxu0 %v5117_v47  ;;  %2845 = vmatprep.mubr.bf16.mxu0 %v5605_v63  ;;  %v5134_v63 = vld [vmem:[#allocation6 + $0x58c] ss:$16 sps:$4 sm:$0xff]  }
 0x19f   :  { %v5812_v62 = vpop.f32.mrf.mxu0  ;;  %v5814_v50 = vpop.f32.mrf.mxu1  ;;  %3007 = vmatprep.subr.bf16.mxu0 %v5125_v34  ;;  %2958 = vmatprep.mubr.bf16.mxu1 %v5607_v3  ;;  %v5132_v3 = vld [vmem:[#allocation6 + $0x588] ss:$16 sps:$4 sm:$0xff]  }
 0x1a0   :  { %6509 = vst [vmem:[#allocation38_spill] sm:$0xff] %v5814_v50  ;;  %3116 = vmatprep.subr.bf16.mxu1 %v5149_v30  ;;  %v5161_v50 = vld [vmem:[#allocation9 + $0x54] ss:$8 sps:$4 sm:$0xff]  }
 0x1a1   :  { %v5817_v18 = vpop.f32.mrf.mxu0  ;;  %v5819_v52 = vpop.f32.mrf.mxu1  ;;  %3117 = vmatpush1.bf16.msra.mxu1 %v5147_v6 }
 0x1a2   :  { %6510 = vst [vmem:[#allocation39_spill] sm:$0xff] %v5819_v52  ;;  %3008 = vmatpush2.bf16.msra.mxu0 %v5123_v20  ;;  %v5137_v20 = vld [vmem:[#allocation6 + $0x56c] ss:$16 sps:$4 sm:$0xff]  }
 0x1a3   :  { %v5821_v59 = vpop.f32.mrf.mxu0  ;;  %v5823_v47 = vpop.f32.mrf.mxu1  ;;  %3009 = vmatprep.subr.bf16.mxu0 %v5128_v38 }
 0x1a4   :  { %6511 = vst [vmem:[#allocation40_spill] sm:$0xff] %v5823_v47 }
 0x1a5   :  { %v5825_v46 = vpop.f32.mrf.mxu0  ;;  %v5827_v34 = vpop.f32.mrf.mxu1  ;;  %2846 = vmatmul.mubr.bf16.gmra.mxu0 %v5613_v8  ;;  %2959 = vmatmul.mubr.bf16.gmra.mxu1 %v5615_v55  ;;  %v5135_v8 = vld [vmem:[#allocation6 + $0x568] ss:$16 sps:$4 sm:$0xff]  }
 0x1a6   :  { %6512 = vst [vmem:[#allocation41_spill] sm:$0xff] %v5827_v34  ;;  %3010 = vmatpush2.bf16.msra.mxu0 %v5126_v58  ;;  %2855 = vmatprep.mubr.bf16.mxu0 %v5617_v15  ;;  %v5143_v15 = vld [vmem:[#allocation6 + $0x54c] ss:$16 sps:$4 sm:$0xff]  }
 0x1a7   :  { %v5832_v30 = vpop.f32.mrf.mxu0  ;;  %v5834_v6 = vpop.f32.mrf.mxu1  ;;  %3011 = vmatprep.subr.bf16.mxu0 %v5134_v63  ;;  %2968 = vmatprep.mubr.bf16.mxu1 %v5619_v17  ;;  %v5141_v17 = vld [vmem:[#allocation6 + $0x548] ss:$16 sps:$4 sm:$0xff]  }
 0x1a8   :  { %6513 = vst [vmem:[#allocation42_spill] sm:$0xff] %v5834_v6 }
 0x1a9   :  { %v5837_v38 = vpop.f32.mrf.mxu0  ;;  %v5839_v47 = vpop.f32.mrf.mxu1 }
 0x1aa   :  { %6514 = vst [vmem:[#allocation43_spill] sm:$0xff] %v5839_v47  ;;  %3012 = vmatpush2.bf16.msra.mxu0 %v5132_v3 }
 0x1ab   :  { %v5841_v34 = vpop.f32.mrf.mxu0  ;;  %v5843_v55 = vpop.f32.mrf.mxu1  ;;  %3013 = vmatprep.subr.bf16.mxu0 %v5137_v20  ;;  %v5146_v20 = vld [vmem:[#allocation6 + $0x52c] ss:$16 sps:$4 sm:$0xff]  }
 0x1ac   :  { %6515 = vst [vmem:[#allocation44_spill] sm:$0xff] %v5843_v55 }
 0x1ad   :  { %v5845_v58 = vpop.f32.mrf.mxu0  ;;  %v5847_v52 = vpop.f32.mrf.mxu1  ;;  %2856 = vmatmul.mubr.bf16.gmra.mxu0 %v5625_v21  ;;  %2969 = vmatmul.mubr.bf16.gmra.mxu1 %v5627_v22  ;;  %v5144_v21 = vld [vmem:[#allocation6 + $0x528] ss:$16 sps:$4 sm:$0xff]  }
 0x1ae   :  { %6516 = vst [vmem:[#allocation45_spill] sm:$0xff] %v5847_v52  ;;  %3014 = vmatpush2.bf16.msra.mxu0 %v5135_v8  ;;  %2865 = vmatprep.mubr.bf16.mxu0 %v5629_v26  ;;  %v5152_v26 = vld [vmem:[#allocation6 + $0x50c] ss:$16 sps:$4 sm:$0xff]  }
 0x1af   :  { %v5852_v63 = vpop.f32.mrf.mxu0  ;;  %v5854_v3 = vpop.f32.mrf.mxu1  ;;  %3015 = vmatprep.subr.bf16.mxu0 %v5143_v15  ;;  %2978 = vmatprep.mubr.bf16.mxu1 %v5631_v29  ;;  %v5150_v29 = vld [vmem:[#allocation6 + $0x508] ss:$16 sps:$4 sm:$0xff]  }
 0x1b0   :  { %6517 = vst [vmem:[#allocation46_spill] sm:$0xff] %v5854_v3 }
 0x1b1   :  { %v5857_v55 = vpop.f32.mrf.mxu0  ;;  %v5859_v47 = vpop.f32.mrf.mxu1 }
 0x1b2   :  { %6518 = vst [vmem:[#allocation47_spill] sm:$0xff] %v5859_v47  ;;  %3016 = vmatpush2.bf16.msra.mxu0 %v5141_v17 }
 0x1b3   :  { %v5861_v52 = vpop.f32.mrf.mxu0  ;;  %v5863_v22 = vpop.f32.mrf.mxu1  ;;  %3017 = vmatprep.subr.bf16.mxu0 %v5146_v20  ;;  %v5155_v20 = vld [vmem:[#allocation9 + $0x74] ss:$8 sps:$4 sm:$0xff]  }
 0x1b4   :  { %6519 = vst [vmem:[#allocation48_spill] sm:$0xff] %v5861_v52  ;;  %6520 = vst [vmem:[#allocation49_spill] sm:$0xff] %v5863_v22 }
 0x1b5   :  { %v5865_v8 = vpop.f32.mrf.mxu0  ;;  %v5867_v6 = vpop.f32.mrf.mxu1  ;;  %2866 = vmatmul.mubr.bf16.gmra.mxu0 %v5637_v33  ;;  %2979 = vmatmul.mubr.bf16.gmra.mxu1 %v5639_v36 }
 0x1b6   :  { %6521 = vst [vmem:[#allocation50_spill] sm:$0xff] %v5867_v6  ;;  %3018 = vmatpush2.bf16.msra.mxu0 %v5144_v21  ;;  %3021 = vmatprep.mubr.bf16.mxu0 %v5641_v39  ;;  %v5153_v21 = vld [vmem:[#allocation9 + $0x70] ss:$8 sps:$4 sm:$0xff]   ;;  %v5158_v39 = vld [vmem:[#allocation9 + $0x64] ss:$8 sps:$4 sm:$0xff]  }
 0x1b7   :  { %v5872_v15 = vpop.f32.mrf.mxu0  ;;  %v5874_v17 = vpop.f32.mrf.mxu1  ;;  %3019 = vmatprep.subr.bf16.mxu0 %v5152_v26  ;;  %3134 = vmatprep.mubr.bf16.mxu1 %v6491_v48 }
 0x1b8   :  { %6522 = vst [vmem:[#allocation51_spill] sm:$0xff] %v5874_v17  ;;  %v5156_v17 = vld [vmem:[#allocation9 + $0x60] ss:$8 sps:$4 sm:$0xff]  }
 0x1b9   :  { %v5877_v22 = vpop.f32.mrf.mxu0  ;;  %v5879_v47 = vpop.f32.mrf.mxu1 }
 0x1ba   :  { %6523 = vst [vmem:[#allocation52_spill] sm:$0xff] %v5879_v47  ;;  %3020 = vmatpush2.bf16.msra.mxu0 %v5150_v29 }
 0x1bb   :  { %v5881_v33 = vpop.f32.mrf.mxu0  ;;  %v5883_v36 = vpop.f32.mrf.mxu1  ;;  %3857 = vmatprep.subr.bf16.mxu0 %v5155_v20 }
 0x1bc   :  { %6524 = vst [vmem:[#allocation53_spill] sm:$0xff] %v5881_v33  ;;  %6525 = vst [vmem:[#allocation54_spill] sm:$0xff] %v5883_v36 }
 0x1bd   :  { %v2345_v6 = vpop.f32.mrf.mxu0  ;;  %v2458_v3 = vpop.f32.mrf.mxu1  ;;  %3022 = vmatmul.mubr.bf16.vlgmr.msra.gmra.mxu0 %v5647_v44  ;;  %3135 = vmatmul.mubr.bf16.vlgmr.msra.gmra.mxu1 %v5649_v45 }
 0x1be   :  { %v2346_v26 = vadd.f32 %v2345_v6, %v5725_v54  ;;  %3031 = vmatprep.mubr.bf16.mxu0 %v5651_v56  ;;  %3144 = vmatprep.mubr.bf16.mxu1 %v6491_v48  ;;  %v5159_v6 = vld [vmem:[#allocation9 + $0x50] ss:$8 sps:$4 sm:$0xff]  }
 0x1bf   :  { %v2347_v29 = vpop.f32.mrf.mxu0  ;;  %v2460_v47 = vpop.f32.mrf.mxu1  ;;  %3858 = vmatpush1.bf16.msra.mxu0 %v5153_v21  ;;  %v5164_v21 = vld [vmem:[#allocation9 + $0x44] ss:$8 sps:$4 sm:$0xff]  }
 0x1c0   :  { %v5890_v36 = vadd.f32 %v2458_v3, %v2346_v26  ;;  %v2348_v20 = vadd.f32 %v2347_v29, %v5731_v53  ;;  %3859 = vmatprep.subr.bf16.mxu0 %v5158_v39  ;;  %v5162_v29 = vld [vmem:[#allocation9 + $0x40] ss:$8 sps:$4 sm:$0xff]  }
 0x1c1   :  { %v5893_v0 = vpop.f32.mrf.mxu0  ;;  %v5895_v44 = vpop.f32.mrf.mxu1 }
 0x1c2   :  { %v5897_v45 = vadd.f32 %v2460_v47, %v2348_v20  ;;  %v5167_v20 = vld [vmem:[#allocation9 + $0x34] ss:$8 sps:$4 sm:$0xff]  }
 0x1c3   :  { %v5899_v54 = vpop.f32.mrf.mxu0  ;;  %v5901_v56 = vpop.f32.mrf.mxu1  ;;  %3860 = vmatpush1.bf16.msra.mxu0 %v5156_v17 }
 0x1c4   :  { %3861 = vmatprep.subr.bf16.mxu0 %v5161_v50 }
 0x1c5   :  { %v2355_v3 = vpop.f32.mrf.mxu0  ;;  %v2468_v26 = vpop.f32.mrf.mxu1  ;;  %3032 = vmatmul.mubr.bf16.gmra.mxu0 %v5657_v2  ;;  %3145 = vmatmul.mubr.bf16.gmra.mxu1 %v5659_v4 }
 0x1c6   :  { %v2356_v53 = vadd.f32 %v2355_v3, %v5745_v40  ;;  %3041 = vmatprep.mubr.bf16.mxu0 %v5661_v14  ;;  %3154 = vmatprep.mubr.bf16.mxu1 %v6491_v48  ;;  %v5165_v3 = vld [vmem:[#allocation9 + $0x30] ss:$8 sps:$4 sm:$0xff]  }
 0x1c7   :  { %v2357_v47 = vpop.f32.mrf.mxu0  ;;  %v2470_v39 = vpop.f32.mrf.mxu1  ;;  %3862 = vmatpush1.bf16.msra.mxu0 %v5159_v6 }
 0x1c8   :  { %v5908_v17 = vadd.f32 %v2468_v26, %v2356_v53  ;;  %v2358_v50 = vadd.f32 %v2357_v47, %v5752_v9  ;;  %3863 = vmatprep.subr.bf16.mxu0 %v5164_v21  ;;  %v5170_v26 = vld [vmem:[#allocation9 + $0x24] ss:$8 sps:$4 sm:$0xff]   ;;  %v5168_v47 = vld [vmem:[#allocation9 + $0x20] ss:$8 sps:$4 sm:$0xff]  }
 0x1c9   :  { %v2359_v61 = vpop.f32.mrf.mxu0  ;;  %v2472_v2 = vpop.f32.mrf.mxu1 }
 0x1ca   :  { %v5911_v33 = vadd.f32 %v2470_v39, %v2358_v50  ;;  %v2360_v4 = vadd.f32 %v2359_v61, %v5757_v1  ;;  %v5173_v50 = vld [vmem:[#allocation9 + $0x14] ss:$8 sps:$4 sm:$0xff]  }
 0x1cb   :  { %v5914_v40 = vpop.f32.mrf.mxu0  ;;  %v5916_v14 = vpop.f32.mrf.mxu1  ;;  %3864 = vmatpush1.bf16.msra.mxu0 %v5162_v29 }
 0x1cc   :  { %v5918_v6 = vadd.f32 %v2472_v2, %v2360_v4  ;;  %3865 = vmatprep.subr.bf16.mxu0 %v5167_v20  ;;  %v5203_v20 = vld [vmem:[#allocation9 + $0x174] ss:$8 sps:$4 sm:$0xff]  }
 0x1cd   :  { %v2365_v53 = vpop.f32.mrf.mxu0  ;;  %v2478_v9 = vpop.f32.mrf.mxu1  ;;  %3042 = vmatmul.mubr.bf16.gmra.mxu0 %v5667_v27  ;;  %3155 = vmatmul.mubr.bf16.gmra.mxu1 %v5669_v31  ;;  %v5201_v31 = vld [vmem:[#allocation9 + $0x170] ss:$8 sps:$4 sm:$0xff]  }
 0x1ce   :  { %v2366_v21 = vadd.f32 %v2365_v53, %v5765_v10  ;;  %3051 = vmatprep.mubr.bf16.mxu0 %v5671_v43  ;;  %3164 = vmatprep.mubr.bf16.mxu1 %v6491_v48 }
 0x1cf   :  { %v2367_v61 = vpop.f32.mrf.mxu0  ;;  %v2480_v1 = vpop.f32.mrf.mxu1  ;;  %3866 = vmatpush1.bf16.msra.mxu0 %v5165_v3  ;;  %3970 = vmatprep.subr.bf16.mxu1 %v5203_v20  ;;  %v5171_v3 = vld [vmem:[#allocation9 + $0x10] ss:$8 sps:$4 sm:$0xff]   ;;  %v5174_v20 = vld [vmem:[#allocation9] ss:$8 sps:$4 sm:$0xff]  }
 0x1d0   :  { %v5925_v39 = vadd.f32 %v2478_v9, %v2366_v21  ;;  %v2368_v29 = vadd.f32 %v2367_v61, %v5772_v23  ;;  %3867 = vmatprep.subr.bf16.mxu0 %v5170_v26  ;;  %3971 = vmatpush1.bf16.msra.mxu1 %v5201_v31  ;;  %v5176_v23 = vld [vmem:[#allocation9 + $0x4] ss:$8 sps:$4 sm:$0xff]  }
 0x1d1   :  { %v2369_v27 = vpop.f32.mrf.mxu0  ;;  %v2482_v2 = vpop.f32.mrf.mxu1  ;;  %v5206_v26 = vld [vmem:[#allocation9 + $0x164] ss:$8 sps:$4 sm:$0xff]  }
 0x1d2   :  { %v5928_v4 = vadd.f32 %v2480_v1, %v2368_v29  ;;  %v2370_v43 = vadd.f32 %v2369_v27, %v5777_v28  ;;  %v5204_v28 = vld [vmem:[#allocation9 + $0x160] ss:$8 sps:$4 sm:$0xff]   ;;  %3972 = vmatprep.subr.bf16.mxu1 %v5206_v26  ;;  %v5177_v26 = vld [vmem:[#allocation9 + $0xf0] ss:$8 sps:$4 sm:$0xff]  }
 0x1d3   :  { %v5931_v10 = vpop.f32.mrf.mxu0  ;;  %v5933_v53 = vpop.f32.mrf.mxu1  ;;  %3868 = vmatpush1.bf16.msra.mxu0 %v5168_v47 }
 0x1d4   :  { %v5935_v9 = vadd.f32 %v2482_v2, %v2370_v43  ;;  %3869 = vmatprep.subr.bf16.mxu0 %v5173_v50  ;;  %3973 = vmatpush1.bf16.msra.mxu1 %v5204_v28 }
 0x1d5   :  { %v2375_v21 = vpop.f32.mrf.mxu0  ;;  %v2488_v61 = vpop.f32.mrf.mxu1  ;;  %3052 = vmatmul.mubr.bf16.gmra.mxu0 %v5677_v57  ;;  %3165 = vmatmul.mubr.bf16.gmra.mxu1 %v5679_v60  ;;  %v5179_v57 = vld [vmem:[#allocation9 + $0xf4] ss:$8 sps:$4 sm:$0xff]  }
 0x1d6   :  { %v2376_v1 = vadd.f32 %v2375_v21, %v5785_v12  ;;  %3061 = vmatprep.mubr.bf16.mxu0 %v5681_v7  ;;  %3174 = vmatprep.mubr.bf16.mxu1 %v6491_v48  ;;  %v5209_v60 = vld [vmem:[#allocation9 + $0x154] ss:$8 sps:$4 sm:$0xff]   ;;  %v5207_v12 = vld [vmem:[#allocation9 + $0x150] ss:$8 sps:$4 sm:$0xff]  }
 0x1d7   :  { %v2377_v47 = vpop.f32.mrf.mxu0  ;;  %v2490_v29 = vpop.f32.mrf.mxu1  ;;  %3870 = vmatpush1.bf16.msra.mxu0 %v5171_v3  ;;  %3974 = vmatprep.subr.bf16.mxu1 %v5209_v60 }
 0x1d8   :  { %v5942_v50 = vadd.f32 %v2488_v61, %v2376_v1  ;;  %v2378_v27 = vadd.f32 %v2377_v47, %v5792_v19  ;;  %3871 = vmatprep.subr.bf16.mxu0 %v5176_v23  ;;  %v5182_v19 = vld [vmem:[#allocation9 + $0xe4] ss:$8 sps:$4 sm:$0xff]   ;;  %3975 = vmatpush1.bf16.msra.mxu1 %v5207_v12 }
 0x1d9   :  { %v2379_v2 = vpop.f32.mrf.mxu0  ;;  %v2492_v31 = vpop.f32.mrf.mxu1  ;;  %v5212_v23 = vld [vmem:[#allocation9 + $0x144] ss:$8 sps:$4 sm:$0xff]  }
 0x1da   :  { %v5945_v43 = vadd.f32 %v2490_v29, %v2378_v27  ;;  %v2380_v7 = vadd.f32 %v2379_v2, %v5797_v41  ;;  %v5210_v41 = vld [vmem:[#allocation9 + $0x140] ss:$8 sps:$4 sm:$0xff]   ;;  %3976 = vmatprep.subr.bf16.mxu1 %v5212_v23  ;;  %v5183_v23 = vld [vmem:[#allocation9 + $0xd0] ss:$8 sps:$4 sm:$0xff]  }
 0x1db   :  { %v5948_v21 = vpop.f32.mrf.mxu0  ;;  %v5950_v3 = vpop.f32.mrf.mxu1  ;;  %3872 = vmatpush1.bf16.msra.mxu0 %v5174_v20  ;;  %v5180_v27 = vld [vmem:[#allocation9 + $0xe0] ss:$8 sps:$4 sm:$0xff]  }
 0x1dc   :  { %v5952_v61 = vadd.f32 %v2492_v31, %v2380_v7  ;;  %3873 = vmatprep.subr.bf16.mxu0 %v5179_v57  ;;  %3977 = vmatpush1.bf16.msra.mxu1 %v5210_v41 }
 0x1dd   :  { %v2385_v28 = vpop.f32.mrf.mxu0  ;;  %v2498_v1 = vpop.f32.mrf.mxu1  ;;  %3062 = vmatmul.mubr.bf16.gmra.mxu0 %v5687_v25  ;;  %3175 = vmatmul.mubr.bf16.gmra.mxu1 %v5689_v32  ;;  %v5185_v25 = vld [vmem:[#allocation9 + $0xd4] ss:$8 sps:$4 sm:$0xff]  }
 0x1de   :  { %v2386_v47 = vadd.f32 %v2385_v28, %v5805_v42  ;;  %3071 = vmatprep.mubr.bf16.mxu0 %v5691_v49  ;;  %3184 = vmatprep.mubr.bf16.mxu1 %v6491_v48  ;;  %v5215_v32 = vld [vmem:[#allocation9 + $0x134] ss:$8 sps:$4 sm:$0xff]   ;;  %v5213_v42 = vld [vmem:[#allocation9 + $0x130] ss:$8 sps:$4 sm:$0xff]  }
 0x1df   :  { %v2387_v29 = vpop.f32.mrf.mxu0  ;;  %v2500_v20 = vpop.f32.mrf.mxu1  ;;  %3874 = vmatpush2.bf16.msra.mxu0 %v5177_v26  ;;  %3978 = vmatprep.subr.bf16.mxu1 %v5215_v32 }
 0x1e0   :  { %v5959_v57 = vadd.f32 %v2498_v1, %v2386_v47  ;;  %v2388_v60 = vadd.f32 %v2387_v29, %v5812_v62  ;;  %3875 = vmatprep.subr.bf16.mxu0 %v5182_v19  ;;  %v5188_v62 = vld [vmem:[#allocation9 + $0xc4] ss:$8 sps:$4 sm:$0xff]   ;;  %3979 = vmatpush1.bf16.msra.mxu1 %v5213_v42 }
 0x1e1   :  { %v2389_v2 = vpop.f32.mrf.mxu0  ;;  %v2502_v31 = vpop.f32.mrf.mxu1  ;;  %v5218_v19 = vld [vmem:[#allocation9 + $0x124] ss:$8 sps:$4 sm:$0xff]  }
 0x1e2   :  { %v5962_v12 = vadd.f32 %v2500_v20, %v2388_v60  ;;  %v2390_v49 = vadd.f32 %v2389_v2, %v5817_v18  ;;  %v6526_v47 = vld [vmem:[#allocation16_spill] sm:$0xff]  ;;  %v6527_v20 = vld [vmem:[#allocation17_spill] sm:$0xff]  ;;  %3980 = vmatprep.subr.bf16.mxu1 %v5218_v19 }
 0x1e3   :  { %v5965_v7 = vpop.f32.mrf.mxu0  ;;  %v5967_v26 = vpop.f32.mrf.mxu1  ;;  %3876 = vmatpush2.bf16.msra.mxu0 %v5180_v27  ;;  %v5216_v18 = vld [vmem:[#allocation9 + $0x120] ss:$8 sps:$4 sm:$0xff]   ;;  %v5189_v19 = vld [vmem:[#allocation9 + $0xb0] ss:$8 sps:$4 sm:$0xff]  }
 0x1e4   :  { %v5969_v28 = vadd.f32 %v2502_v31, %v2390_v49  ;;  %3877 = vmatprep.subr.bf16.mxu0 %v5185_v25  ;;  %v5186_v25 = vld [vmem:[#allocation9 + $0xc0] ss:$8 sps:$4 sm:$0xff]   ;;  %3981 = vmatpush1.bf16.msra.mxu1 %v5216_v18  ;;  %v5221_v31 = vld [vmem:[#allocation9 + $0x114] ss:$8 sps:$4 sm:$0xff]  }
 0x1e5   :  { %v2395_v1 = vpop.f32.mrf.mxu0  ;;  %v2508_v41 = vpop.f32.mrf.mxu1  ;;  %3072 = vmatmul.mubr.bf16.gmra.mxu0 %v5697_v5  ;;  %3185 = vmatmul.mubr.bf16.gmra.mxu1 %v6526_v47  ;;  %v5191_v5 = vld [vmem:[#allocation9 + $0xb4] ss:$8 sps:$4 sm:$0xff]  }
 0x1e6   :  { %v2396_v29 = vadd.f32 %v2395_v1, %v5825_v46  ;;  %3081 = vmatprep.mubr.bf16.mxu0 %v6527_v20  ;;  %3194 = vmatprep.mubr.bf16.mxu1 %v6491_v48  ;;  %v5219_v46 = vld [vmem:[#allocation9 + $0x110] ss:$8 sps:$4 sm:$0xff]  }
 0x1e7   :  { %v2397_v27 = vpop.f32.mrf.mxu0  ;;  %v2510_v60 = vpop.f32.mrf.mxu1  ;;  %3878 = vmatpush2.bf16.msra.mxu0 %v5183_v23  ;;  %3982 = vmatprep.subr.bf16.mxu1 %v5221_v31  ;;  %v6530_v31 = vld [vmem:[#allocation20_spill] sm:$0xff] }
 0x1e8   :  { %v5976_v32 = vadd.f32 %v2508_v41, %v2396_v29  ;;  %v2398_v2 = vadd.f32 %v2397_v27, %v5832_v30  ;;  %3879 = vmatprep.subr.bf16.mxu0 %v5188_v62  ;;  %v5194_v30 = vld [vmem:[#allocation9 + $0xa4] ss:$8 sps:$4 sm:$0xff]   ;;  %3983 = vmatpush1.bf16.msra.mxu1 %v5219_v46  ;;  %v6528_v27 = vld [vmem:[#allocation18_spill] sm:$0xff] }
 0x1e9   :  { %v2399_v42 = vpop.f32.mrf.mxu0  ;;  %v2512_v49 = vpop.f32.mrf.mxu1  ;;  %v5224_v62 = vld [vmem:[#allocation9 + $0x104] ss:$8 sps:$4 sm:$0xff]  }
 0x1ea   :  { %v5979_v1 = vadd.f32 %v2510_v60, %v2398_v2  ;;  %v2400_v47 = vadd.f32 %v2399_v42, %v5837_v38  ;;  %v6529_v60 = vld [vmem:[#allocation19_spill] sm:$0xff]  ;;  %3984 = vmatprep.subr.bf16.mxu1 %v5224_v62 }
 0x1eb   :  { %v5982_v20 = vpop.f32.mrf.mxu0  ;;  %v5984_v23 = vpop.f32.mrf.mxu1  ;;  %3880 = vmatpush2.bf16.msra.mxu0 %v5186_v25  ;;  %v5222_v38 = vld [vmem:[#allocation9 + $0x100] ss:$8 sps:$4 sm:$0xff]   ;;  %v5195_v62 = vld [vmem:[#allocation9 + $0x90] ss:$8 sps:$4 sm:$0xff]  }
 0x1ec   :  { %v5986_v41 = vadd.f32 %v2512_v49, %v2400_v47  ;;  %3881 = vmatprep.subr.bf16.mxu0 %v5191_v5  ;;  %v5192_v5 = vld [vmem:[#allocation9 + $0xa0] ss:$8 sps:$4 sm:$0xff]   ;;  %v5197_v47 = vld [vmem:[#allocation9 + $0x94] ss:$8 sps:$4 sm:$0xff]   ;;  %3985 = vmatpush1.bf16.msra.mxu1 %v5222_v38 }
 0x1ed   :  { %v2405_v18 = vpop.f32.mrf.mxu0  ;;  %v2518_v29 = vpop.f32.mrf.mxu1  ;;  %3082 = vmatmul.mubr.bf16.gmra.mxu0 %v6528_v27  ;;  %3195 = vmatmul.mubr.bf16.gmra.mxu1 %v6529_v60  ;;  %v5227_v27 = vld [vmem:[#allocation9 + $0x1f4] ss:$8 sps:$4 sm:$0xff]  }
 0x1ee   :  { %v2406_v2 = vadd.f32 %v2405_v18, %v5845_v58  ;;  %3091 = vmatprep.mubr.bf16.mxu0 %v6530_v31  ;;  %3204 = vmatprep.mubr.bf16.mxu1 %v6491_v48  ;;  %v5225_v58 = vld [vmem:[#allocation9 + $0x1f0] ss:$8 sps:$4 sm:$0xff]  }
 0x1ef   :  { %v2407_v25 = vpop.f32.mrf.mxu0  ;;  %v2520_v42 = vpop.f32.mrf.mxu1  ;;  %3882 = vmatpush2.bf16.msra.mxu0 %v5189_v19  ;;  %3986 = vmatprep.subr.bf16.mxu1 %v5227_v27 }
 0x1f0   :  { %v5993_v49 = vadd.f32 %v2518_v29, %v2406_v2  ;;  %v2408_v46 = vadd.f32 %v2407_v25, %v5852_v63  ;;  %3883 = vmatprep.subr.bf16.mxu0 %v5194_v30  ;;  %v5200_v63 = vld [vmem:[#allocation9 + $0x84] ss:$8 sps:$4 sm:$0xff]   ;;  %3987 = vmatpush2.bf16.msra.mxu1 %v5225_v58 }
 0x1f1   :  { %v2409_v60 = vpop.f32.mrf.mxu0  ;;  %v2522_v52 = vpop.f32.mrf.mxu1  ;;  %v5230_v30 = vld [vmem:[#allocation9 + $0x1e4] ss:$8 sps:$4 sm:$0xff]  }
 0x1f2   :  { %v5996_v18 = vadd.f32 %v2520_v42, %v2408_v46  ;;  %v2410_v48 = vadd.f32 %v2409_v60, %v5857_v55  ;;  %v5228_v55 = vld [vmem:[#allocation9 + $0x1e0] ss:$8 sps:$4 sm:$0xff]   ;;  %3988 = vmatprep.subr.bf16.mxu1 %v5230_v30 }
 0x1f3   :  { %v5999_v31 = vpop.f32.mrf.mxu0  ;;  %v6001_v19 = vpop.f32.mrf.mxu1  ;;  %3884 = vmatpush2.bf16.msra.mxu0 %v5192_v5  ;;  %v5198_v5 = vld [vmem:[#allocation9 + $0x80] ss:$8 sps:$4 sm:$0xff]  }
 0x1f4   :  { %6531 = vst [vmem:[#allocation16_spill] sm:$0xff] %v6001_v19  ;;  %v6003_v29 = vadd.f32 %v2522_v52, %v2410_v48  ;;  %3885 = vmatprep.subr.bf16.mxu0 %v5197_v47  ;;  %v6532_v52 = vlaneseq  ;;  %3989 = vmatpush2.bf16.msra.mxu1 %v5228_v55  ;;  %v5231_v48 = vld [vmem:[#allocation9 + $0x1d0] ss:$8 sps:$4 sm:$0xff]   ;;  %v5236_v55 = vld [vmem:[#allocation9 + $0x1c4] ss:$8 sps:$4 sm:$0xff]  }
 0x1f5   :  { %v2415_v38 = vpop.f32.mrf.mxu0  ;;  %v2528_v2 = vpop.f32.mrf.mxu1  ;;  %3092 = vmatmul.mubr.bf16.gmra.mxu0 %v5717_v51  ;;  %3205 = vmatmul.mubr.bf16.gmra.mxu1 %v5719_v37  ;;  %v5233_v51 = vld [vmem:[#allocation9 + $0x1d4] ss:$8 sps:$4 sm:$0xff]  }
 0x1f6   :  { %v2416_v25 = vadd.f32 %v2415_v38, %v5865_v8  ;;  %v6009_v27 = vshrl.u32 %v6532_v52, 7  ;;  %3990 = vmatprep.subr.bf16.mxu1 %v5233_v51 }
 0x1f7   :  { %v2417_v42 = vpop.f32.mrf.mxu0  ;;  %v2530_v46 = vpop.f32.mrf.mxu1  ;;  %3886 = vmatpush2.bf16.msra.mxu0 %v5195_v62  ;;  %v6020_v62 = vld [vmem:[%s6465_s4] sm:$0xf] }
 0x1f8   :  { %6533 = vst [vmem:[#allocation17_spill] sm:$0xff] %v6009_v27  ;;  %v6011_v47 = vadd.f32 %v2528_v2, %v2416_v25  ;;  %v2418_v60 = vadd.f32 %v2417_v42, %v5872_v15  ;;  %3887 = vmatprep.subr.bf16.mxu0 %v5200_v63  ;;  %6534 = vst [vmem:[#allocation18_spill] sm:$0xff] %v6020_v62  ;;  %v6027_v15 = vsub.s32 0, %v6009_v27  ;;  %v6483_v63 = vsub.s32 1, %v6009_v27 }
 0x1f9   :  { %v2419_v58 = vpop.f32.mrf.mxu0  ;;  %v2532_v37 = vpop.f32.mrf.mxu1  ;;  %v2350_v2 = vadd.f32 %v5893_v0, %v5737_v11  ;;  %3991 = vmatpush2.bf16.msra.mxu1 %v5231_v48 }
 0x1fa   :  { %v6014_v19 = vadd.f32 %v2530_v46, %v2418_v60  ;;  %v2420_v8 = vadd.f32 %v2419_v58, %v5877_v22  ;;  %6536 = vst [vmem:[#allocation20_spill] sm:$0xff] %v6027_v15  ;;  %v5234_v46 = vld [vmem:[#allocation9 + $0x1c0] ss:$8 sps:$4 sm:$0xff]   ;;  %v6036_v52 = vrot.slane %v6020_v62, %v6027_v15  ;;  %3992 = vmatprep.subr.bf16.mxu1 %v5236_v55 }
 0x1fb   :  { %v6022_v30 = vpop.f32.mrf.mxu0  ;;  %v6024_v38 = vpop.f32.mrf.mxu1  ;;  %3888 = vmatpush2.bf16.msra.mxu0 %v5198_v5  ;;  %v2352_v5 = vadd.f32 %v5899_v54, %v5741_v16  ;;  %v6044_v0 = vrot.slane %v6020_v62, %v6483_v63  ;;  %v2463_v11 = vadd.f32 %v5895_v44, %v2350_v2  ;;  %v5237_v16 = vld [vmem:[#allocation9 + $0x1b0] ss:$8 sps:$4 sm:$0xff]  }
 0x1fc   :  { %6535 = vst [vmem:[#allocation19_spill] sm:$0xff] %v6024_v38  ;;  %v6032_v22 = vadd.f32 %v2532_v37, %v2420_v8  ;;  %v5239_v8 = vld [vmem:[#allocation9 + $0x1b4] ss:$8 sps:$4 sm:$0xff]  }
 0x1fd   :  { %v2571_v25 = vpop.f32.mrf.mxu0  ;;  %v2684_v42 = vpop.f32.mrf.mxu1  ;;  %3993 = vmatpush2.bf16.msra.mxu1 %v5234_v46 }
 0x1fe   :  { %6537 = vst [vmem:[#allocation55_spill] sm:$0xff] %v6032_v22  ;;  %v2572_v60 = vadd.f32 %v2571_v25, %v5890_v36  ;;  %v2465_v36 = vadd.f32 %v5901_v56, %v2352_v5  ;;  %3994 = vmatprep.subr.bf16.mxu1 %v5239_v8  ;;  %v5245_v8 = vld [vmem:[#allocation9 + $0x194] ss:$8 sps:$4 sm:$0xff]  }
 0x1ff   :  { %v2573_v51 = vpop.f32.mrf.mxu0  ;;  %v2686_v58 = vpop.f32.mrf.mxu1 }
 0x200   :  { %v2685_v37 = vadd.f32 %v2684_v42, %v2572_v60  ;;  %v2574_v48 = vadd.f32 %v2573_v51, %v5897_v45  ;;  %v5242_v45 = vld [vmem:[#allocation9 + $0x1a4] ss:$8 sps:$4 sm:$0xff]   ;;  %v5240_v51 = vld [vmem:[#allocation9 + $0x1a0] ss:$8 sps:$4 sm:$0xff]  }
 0x201   :  { %v2575_v15 = vpop.f32.mrf.mxu0  ;;  %v2688_v38 = vpop.f32.mrf.mxu1  ;;  %3995 = vmatpush2.bf16.msra.mxu1 %v5237_v16 }
 0x202   :  { %v3237_v54 = vadd.f32 %v6036_v52, %v2685_v37  ;;  %v2687_v55 = vadd.f32 %v2686_v58, %v2574_v48  ;;  %v2576_v25 = vadd.f32 %v2575_v15, %v2463_v11  ;;  %3996 = vmatprep.subr.bf16.mxu1 %v5242_v45  ;;  %v2362_v15 = vadd.f32 %v5914_v40, %v5761_v13 }
 0x203   :  { %v2577_v27 = vpop.f32.mrf.mxu0  ;;  %v2690_v63 = vpop.f32.mrf.mxu1 }
 0x204   :  { %v3238_v62 = vadd.f32 %v6044_v0, %v2687_v55  ;;  %v2689_v44 = vadd.f32 %v2688_v38, %v2576_v25  ;;  %v2578_v2 = vadd.f32 %v2577_v27, %v2465_v36  ;;  %v3301_v42 = vmul.f32 0.2, %v3237_v54  ;;  %v5243_v25 = vld [vmem:[#allocation9 + $0x190] ss:$8 sps:$4 sm:$0xff]  }
 0x205   :  { %v2581_v46 = vpop.f32.mrf.mxu0  ;;  %v2694_v60 = vpop.f32.mrf.mxu1  ;;  %3997 = vmatpush2.bf16.msra.mxu1 %v5240_v51 }
 0x206   :  { %v3241_v22 = vadd.f32 %v6036_v52, %v2689_v44  ;;  %v2691_v56 = vadd.f32 %v2690_v63, %v2578_v2  ;;  %v3302_v5 = vmul.f32 0.2, %v3238_v62  ;;  %v2582_v58 = vadd.f32 %v2581_v46, %v5908_v17  ;;  %3998 = vmatprep.subr.bf16.mxu1 %v5245_v8 }
 0x207   :  { %v2583_v11 = vpop.f32.mrf.mxu0  ;;  %v2696_v37 = vpop.f32.mrf.mxu1  ;;  %v3365_v16 = vmax.f32 %v3237_v54, %v3301_v42  ;;  %v2475_v17 = vadd.f32 %v5916_v14, %v2362_v15  ;;  %v2372_v15 = vadd.f32 %v5931_v10, %v5781_v24 }
 0x208   :  { %v3305_v38 = vmul.f32 0.2, %v3241_v22  ;;  %v3242_v27 = vadd.f32 %v6044_v0, %v2691_v56  ;;  %v2584_v48 = vadd.f32 %v2583_v11, %v5911_v33  ;;  %v2695_v36 = vadd.f32 %v2694_v60, %v2582_v58  ;;  %v5248_v60 = vld [vmem:[#allocation9 + $0x184] ss:$8 sps:$4 sm:$0xff]  }
 0x209   :  { %v2585_v55 = vpop.f32.mrf.mxu0  ;;  %v2698_v63 = vpop.f32.mrf.mxu1  ;;  %v3366_v45 = vmax.f32 %v3238_v62, %v3302_v5  ;;  %3999 = vmatpush2.bf16.msra.mxu1 %v5243_v25 }
 0x20a   :  { %v3369_v44 = vmax.f32 %v3241_v22, %v3305_v38  ;;  %v3306_v2 = vmul.f32 0.2, %v3242_v27  ;;  %v2697_v13 = vadd.f32 %v2696_v37, %v2584_v48  ;;  %v2586_v40 = vadd.f32 %v2585_v55, %v5918_v6  ;;  %v5246_v6 = vld [vmem:[#allocation9 + $0x180] ss:$8 sps:$4 sm:$0xff]   ;;  %4000 = vmatprep.subr.bf16.mxu1 %v5248_v60 }
 0x20b   :  { %v3245_v46 = vadd.f32 %v6036_v52, %v2695_v36  ;;  %v2587_v56 = vpop.f32.mrf.mxu0  ;;  %v2700_v33 = vpop.f32.mrf.mxu1 }
 0x20c   :  { %v3429_v51 = vpack.c.bf16 %v3369_v44, %v3365_v16  ;;  %v3370_v11 = vmax.f32 %v3242_v27, %v3306_v2  ;;  %v3246_v54 = vadd.f32 %v6044_v0, %v2697_v13  ;;  %v2699_v42 = vadd.f32 %v2698_v63, %v2586_v40 }
 0x20d   :  { %v3309_v22 = vmul.f32 0.2, %v3245_v46  ;;  %v2588_v58 = vadd.f32 %v2587_v56, %v2475_v17  ;;  %v2591_v37 = vpop.f32.mrf.mxu0  ;;  %v2704_v38 = vpop.f32.mrf.mxu1  ;;  %4001 = vmatpush2.bf16.msra.mxu1 %v5246_v6  ;;  %v2485_v17 = vadd.f32 %v5933_v53, %v2372_v15  ;;  %v2382_v53 = vadd.f32 %v5948_v21, %v5801_v35 }
 0x20e   :  { %v3249_v48 = vadd.f32 %v6036_v52, %v2699_v42  ;;  %v2592_v14 = vadd.f32 %v2591_v37, %v5925_v39  ;;  %v3430_v62 = vpack.c.bf16 %v3370_v11, %v3366_v45  ;;  %v3310_v16 = vmul.f32 0.2, %v3246_v54 }
 0x20f   :  { %v2701_v5 = vadd.f32 %v2700_v33, %v2588_v58  ;;  %v2593_v27 = vpop.f32.mrf.mxu0  ;;  %v2706_v8 = vpop.f32.mrf.mxu1  ;;  %v3373_v25 = vmax.f32 %v3245_v46, %v3309_v22  ;;  %v2495_v21 = vadd.f32 %v5950_v3, %v2382_v53  ;;  %v2392_v3 = vadd.f32 %v5965_v7, %v5821_v59 }
 0x210   :  { %v3313_v36 = vmul.f32 0.2, %v3249_v48  ;;  %v2705_v55 = vadd.f32 %v2704_v38, %v2592_v14  ;;  %v2594_v63 = vadd.f32 %v2593_v27, %v5928_v4  ;;  %3889 = vmatprep.mubr.bf16.mxu0 %v3430_v62  ;;  %v3374_v4 = vmax.f32 %v3246_v54, %v3310_v16 }
 0x211   :  { %v3250_v44 = vadd.f32 %v6044_v0, %v2701_v5  ;;  %v2595_v2 = vpop.f32.mrf.mxu0  ;;  %v2708_v39 = vpop.f32.mrf.mxu1  ;;  %3890 = vmatmul.mubr.bf16.vlgmr.msra.gmra.mxu0 %v3429_v51  ;;  %v2505_v7 = vadd.f32 %v5967_v26, %v2392_v3  ;;  %v2402_v26 = vadd.f32 %v5982_v20, %v5841_v34 }
 0x212   :  { %v3377_v13 = vmax.f32 %v3249_v48, %v3313_v36  ;;  %v3253_v40 = vadd.f32 %v6036_v52, %v2705_v55  ;;  %v2707_v24 = vadd.f32 %v2706_v8, %v2594_v63  ;;  %v2596_v10 = vadd.f32 %v2595_v2, %v5935_v9 }
 0x213   :  { %v3314_v45 = vmul.f32 0.2, %v3250_v44  ;;  %v2597_v56 = vpop.f32.mrf.mxu0  ;;  %v2710_v33 = vpop.f32.mrf.mxu1  ;;  %v2515_v20 = vadd.f32 %v5984_v23, %v2402_v26 }
 0x214   :  { %v3433_v11 = vpack.c.bf16 %v3377_v13, %v3373_v25  ;;  %v2709_v42 = vadd.f32 %v2708_v39, %v2596_v10  ;;  %v3317_v60 = vmul.f32 0.2, %v3253_v40  ;;  %v3254_v22 = vadd.f32 %v6044_v0, %v2707_v24 }
 0x215   :  { %v3378_v46 = vmax.f32 %v3250_v44, %v3314_v45  ;;  %v2598_v58 = vadd.f32 %v2597_v56, %v2485_v17  ;;  %v2601_v51 = vpop.f32.mrf.mxu0  ;;  %v2714_v37 = vpop.f32.mrf.mxu1 }
 0x216   :  { %v3257_v38 = vadd.f32 %v6036_v52, %v2709_v42  ;;  %v2602_v6 = vadd.f32 %v2601_v51, %v5942_v50  ;;  %v3381_v27 = vmax.f32 %v3253_v40, %v3317_v60  ;;  %v3318_v8 = vmul.f32 0.2, %v3254_v22 }
 0x217   :  { %v2711_v9 = vadd.f32 %v2710_v33, %v2598_v58  ;;  %v2603_v48 = vpop.f32.mrf.mxu0  ;;  %v2716_v14 = vpop.f32.mrf.mxu1  ;;  %v3434_v54 = vpack.c.bf16 %v3378_v46, %v3374_v4 }
 0x218   :  { %v3321_v62 = vmul.f32 0.2, %v3257_v38  ;;  %v2715_v15 = vadd.f32 %v2714_v37, %v2602_v6  ;;  %v2604_v5 = vadd.f32 %v2603_v48, %v5945_v43  ;;  %v3382_v24 = vmax.f32 %v3254_v22, %v3318_v8 }
 0x219   :  { %v3258_v16 = vadd.f32 %v6044_v0, %v2711_v9  ;;  %3899 = vmatprep.mubr.bf16.mxu0 %v3434_v54  ;;  %v2605_v36 = vpop.f32.mrf.mxu0  ;;  %v2718_v55 = vpop.f32.mrf.mxu1 }
 0x21a   :  { %v3385_v63 = vmax.f32 %v3257_v38, %v3321_v62  ;;  %v3261_v50 = vadd.f32 %v6036_v52, %v2715_v15  ;;  %v2717_v25 = vadd.f32 %v2716_v14, %v2604_v5  ;;  %v2606_v35 = vadd.f32 %v2605_v36, %v5952_v61  ;;  %3900 = vmatmul.mubr.bf16.gmra.mxu0 %v3433_v11 }
 0x21b   :  { %v3322_v44 = vmul.f32 0.2, %v3258_v16  ;;  %v2607_v2 = vpop.f32.mrf.mxu0  ;;  %v2720_v39 = vpop.f32.mrf.mxu1 }
 0x21c   :  { %v3437_v43 = vpack.c.bf16 %v3385_v63, %v3381_v27  ;;  %v3262_v13 = vadd.f32 %v6044_v0, %v2717_v25  ;;  %v2719_v40 = vadd.f32 %v2718_v55, %v2606_v35  ;;  %v3325_v17 = vmul.f32 0.2, %v3261_v50 }
 0x21d   :  { %v3386_v10 = vmax.f32 %v3258_v16, %v3322_v44  ;;  %v2608_v45 = vadd.f32 %v2607_v2, %v2495_v21  ;;  %v2611_v56 = vpop.f32.mrf.mxu0  ;;  %v2724_v33 = vpop.f32.mrf.mxu1 }
 0x21e   :  { %v3265_v4 = vadd.f32 %v6036_v52, %v2719_v40  ;;  %v2612_v61 = vadd.f32 %v2611_v56, %v5959_v57  ;;  %v3326_v58 = vmul.f32 0.2, %v3262_v13  ;;  %v3389_v38 = vmax.f32 %v3261_v50, %v3325_v17 }
 0x21f   :  { %v2721_v11 = vadd.f32 %v2720_v39, %v2608_v45  ;;  %v2613_v42 = vpop.f32.mrf.mxu0  ;;  %v2726_v46 = vpop.f32.mrf.mxu1  ;;  %v3438_v60 = vpack.c.bf16 %v3386_v10, %v3382_v24 }
 0x220   :  { %v3329_v51 = vmul.f32 0.2, %v3265_v4  ;;  %v2725_v37 = vadd.f32 %v2724_v33, %v2612_v61  ;;  %v2614_v22 = vadd.f32 %v2613_v42, %v5962_v12  ;;  %v3390_v5 = vmax.f32 %v3262_v13, %v3326_v58 }
 0x221   :  { %v3266_v6 = vadd.f32 %v6044_v0, %v2721_v11  ;;  %3909 = vmatprep.mubr.bf16.mxu0 %v3438_v60  ;;  %v2615_v53 = vpop.f32.mrf.mxu0  ;;  %v2728_v9 = vpop.f32.mrf.mxu1 }
 0x222   :  { %v3393_v48 = vmax.f32 %v3265_v4, %v3329_v51  ;;  %v3269_v57 = vadd.f32 %v6036_v52, %v2725_v37  ;;  %v2727_v14 = vadd.f32 %v2726_v46, %v2614_v22  ;;  %v2616_v59 = vadd.f32 %v2615_v53, %v5969_v28  ;;  %3910 = vmatmul.mubr.bf16.gmra.mxu0 %v3437_v43 }
 0x223   :  { %v3330_v54 = vmul.f32 0.2, %v3266_v6  ;;  %v2617_v62 = vpop.f32.mrf.mxu0  ;;  %v2730_v15 = vpop.f32.mrf.mxu1 }
 0x224   :  { %v3441_v12 = vpack.c.bf16 %v3393_v48, %v3389_v38  ;;  %v2729_v27 = vadd.f32 %v2728_v9, %v2616_v59  ;;  %v3333_v16 = vmul.f32 0.2, %v3269_v57  ;;  %v3270_v36 = vadd.f32 %v6044_v0, %v2727_v14 }
 0x225   :  { %v3394_v8 = vmax.f32 %v3266_v6, %v3330_v54  ;;  %v2618_v55 = vadd.f32 %v2617_v62, %v2505_v7  ;;  %v2621_v63 = vpop.f32.mrf.mxu0  ;;  %v2734_v50 = vpop.f32.mrf.mxu1  ;;  %v6538_v6 = vld [vmem:[#allocation48_spill] sm:$0xff] }
 0x226   :  { %v3273_v25 = vadd.f32 %v6036_v52, %v2729_v27  ;;  %v2622_v28 = vadd.f32 %v2621_v63, %v5976_v32  ;;  %v3397_v40 = vmax.f32 %v3269_v57, %v3333_v16  ;;  %v3334_v24 = vmul.f32 0.2, %v3270_v36  ;;  %v6539_v16 = vld [vmem:[#allocation16_spill] sm:$0xff] }
 0x227   :  { %v2731_v35 = vadd.f32 %v2730_v15, %v2618_v55  ;;  %v2623_v21 = vpop.f32.mrf.mxu0  ;;  %v2736_v44 = vpop.f32.mrf.mxu1  ;;  %v3442_v2 = vpack.c.bf16 %v3394_v8, %v3390_v5  ;;  %v2412_v23 = vadd.f32 %v5999_v31, %v6538_v6 }
 0x228   :  { %v3337_v39 = vmul.f32 0.2, %v3273_v25  ;;  %v2735_v43 = vadd.f32 %v2734_v50, %v2622_v28  ;;  %v2624_v13 = vadd.f32 %v2623_v21, %v5979_v1  ;;  %v3398_v46 = vmax.f32 %v3270_v36, %v3334_v24 }
 0x229   :  { %v3274_v10 = vadd.f32 %v6044_v0, %v2731_v35  ;;  %3919 = vmatprep.mubr.bf16.mxu0 %v3442_v2  ;;  %v2625_v17 = vpop.f32.mrf.mxu0  ;;  %v2738_v45 = vpop.f32.mrf.mxu1  ;;  %v2525_v36 = vadd.f32 %v6539_v16, %v2412_v23 }
 0x22a   :  { %v3401_v56 = vmax.f32 %v3273_v25, %v3337_v39  ;;  %v3277_v32 = vadd.f32 %v6036_v52, %v2735_v43  ;;  %v2737_v33 = vadd.f32 %v2736_v44, %v2624_v13  ;;  %v2626_v34 = vadd.f32 %v2625_v17, %v5986_v41  ;;  %3920 = vmatmul.mubr.bf16.gmra.mxu0 %v3441_v12  ;;  %v6540_v13 = vld [vmem:[#allocation53_spill] sm:$0xff] }
 0x22b   :  { %v3338_v4 = vmul.f32 0.2, %v3274_v10  ;;  %v2627_v61 = vpop.f32.mrf.mxu0  ;;  %v2740_v3 = vpop.f32.mrf.mxu1 }
 0x22c   :  { %v3445_v1 = vpack.c.bf16 %v3401_v56, %v3397_v40  ;;  %v3278_v11 = vadd.f32 %v6044_v0, %v2737_v33  ;;  %v2739_v42 = vadd.f32 %v2738_v45, %v2626_v34  ;;  %v3341_v58 = vmul.f32 0.2, %v3277_v32 }
 0x22d   :  { %v3402_v60 = vmax.f32 %v3274_v10, %v3338_v4  ;;  %v2628_v51 = vadd.f32 %v2627_v61, %v2515_v20  ;;  %v2631_v37 = vpop.f32.mrf.mxu0  ;;  %v2744_v22 = vpop.f32.mrf.mxu1  ;;  %v2422_v40 = vadd.f32 %v6022_v30, %v6540_v13  ;;  %v6541_v30 = vld [vmem:[#allocation55_spill] sm:$0xff] }
 0x22e   :  { %v3281_v38 = vadd.f32 %v6036_v52, %v2739_v42  ;;  %v2632_v41 = vadd.f32 %v2631_v37, %v5993_v49  ;;  %v3342_v14 = vmul.f32 0.2, %v3278_v11  ;;  %v3405_v62 = vmax.f32 %v3277_v32, %v3341_v58 }
 0x22f   :  { %v2741_v53 = vadd.f32 %v2740_v3, %v2628_v51  ;;  %v2633_v9 = vpop.f32.mrf.mxu0  ;;  %v2746_v48 = vpop.f32.mrf.mxu1  ;;  %v3446_v57 = vpack.c.bf16 %v3402_v60, %v3398_v46  ;;  %v6542_v46 = vld [vmem:[#allocation19_spill] sm:$0xff] }
 0x230   :  { %v3345_v59 = vmul.f32 0.2, %v3281_v38  ;;  %v2745_v7 = vadd.f32 %v2744_v22, %v2632_v41  ;;  %v2634_v54 = vadd.f32 %v2633_v9, %v5996_v18  ;;  %v3406_v25 = vmax.f32 %v3278_v11, %v3342_v14  ;;  %v6543_v14 = vld [vmem:[#allocation21_spill] sm:$0xff] }
 0x231   :  { %v3282_v15 = vadd.f32 %v6044_v0, %v2741_v53  ;;  %3929 = vmatprep.mubr.bf16.mxu0 %v3446_v57  ;;  %v2635_v5 = vpop.f32.mrf.mxu0  ;;  %v2748_v12 = vpop.f32.mrf.mxu1  ;;  %v2535_v60 = vadd.f32 %v6542_v46, %v2422_v40  ;;  %v6546_v40 = vld [vmem:[#allocation26_spill] sm:$0xff] }
 0x232   :  { %v3409_v27 = vmax.f32 %v3281_v38, %v3345_v59  ;;  %v3285_v49 = vadd.f32 %v6036_v52, %v2745_v7  ;;  %v2747_v8 = vadd.f32 %v2746_v48, %v2634_v54  ;;  %v2636_v31 = vadd.f32 %v2635_v5, %v6003_v29  ;;  %3930 = vmatmul.mubr.bf16.gmra.mxu0 %v3445_v1 }
 0x233   :  { %v3346_v55 = vmul.f32 0.2, %v3282_v15  ;;  %v2637_v63 = vpop.f32.mrf.mxu0  ;;  %v2750_v50 = vpop.f32.mrf.mxu1 }
 0x234   :  { %v3449_v18 = vpack.c.bf16 %v3409_v27, %v3405_v62  ;;  %v2749_v28 = vadd.f32 %v2748_v12, %v2636_v31  ;;  %v3349_v35 = vmul.f32 0.2, %v3285_v49  ;;  %v3286_v21 = vadd.f32 %v6044_v0, %v2747_v8  ;;  %v6544_v27 = vld [vmem:[#allocation22_spill] sm:$0xff] }
 0x235   :  { %v3410_v26 = vmax.f32 %v3282_v15, %v3346_v55  ;;  %v2638_v44 = vadd.f32 %v2637_v63, %v2525_v36  ;;  %v2641_v2 = vpop.f32.mrf.mxu0  ;;  %v2754_v39 = vpop.f32.mrf.mxu1 }
 0x236   :  { %v3289_v43 = vadd.f32 %v6036_v52, %v2749_v28  ;;  %v2642_v29 = vadd.f32 %v2641_v2, %v6011_v47  ;;  %v3413_v34 = vmax.f32 %v3285_v49, %v3349_v35  ;;  %v3350_v20 = vmul.f32 0.2, %v3286_v21 }
 0x237   :  { %v2751_v24 = vadd.f32 %v2750_v50, %v2638_v44  ;;  %v2643_v10 = vpop.f32.mrf.mxu0  ;;  %v2756_v17 = vpop.f32.mrf.mxu1  ;;  %v3450_v45 = vpack.c.bf16 %v3410_v26, %v3406_v25  ;;  %v6545_v44 = vld [vmem:[#allocation25_spill] sm:$0xff] }
 0x238   :  { %v3353_v56 = vmul.f32 0.2, %v3289_v43  ;;  %v2755_v32 = vadd.f32 %v2754_v39, %v2642_v29  ;;  %v2644_v33 = vadd.f32 %v2643_v10, %v6014_v19  ;;  %v3414_v38 = vmax.f32 %v3286_v21, %v3350_v20 }
 0x239   :  { %v3290_v4 = vadd.f32 %v6044_v0, %v2751_v24  ;;  %3939 = vmatprep.mubr.bf16.mxu0 %v3450_v45  ;;  %v2645_v61 = vpop.f32.mrf.mxu0  ;;  %v2758_v3 = vpop.f32.mrf.mxu1 }
 0x23a   :  { %v3417_v1 = vmax.f32 %v3289_v43, %v3353_v56  ;;  %v3293_v47 = vadd.f32 %v6036_v52, %v2755_v32  ;;  %v2757_v11 = vadd.f32 %v2756_v17, %v2644_v33  ;;  %v2646_v42 = vadd.f32 %v2645_v61, %v6541_v30  ;;  %3940 = vmatmul.mubr.bf16.gmra.mxu0 %v3449_v18  ;;  %v6547_v56 = vld [vmem:[#allocation27_spill] sm:$0xff] }
 0x23b   :  { %v3354_v58 = vmul.f32 0.2, %v3290_v4  ;;  %v2647_v51 = vpop.f32.mrf.mxu0  ;;  %v2760_v37 = vpop.f32.mrf.mxu1 }
 0x23c   :  { %v3453_v19 = vpack.c.bf16 %v3417_v1, %v3413_v34  ;;  %v2759_v22 = vadd.f32 %v2758_v3, %v2646_v42  ;;  %v3294_v6 = vadd.f32 %v6044_v0, %v2757_v11  ;;  %v2648_v23 = vadd.f32 %v2647_v51, %v2535_v60  ;;  %v6548_v3 = vld [vmem:[#allocation29_spill] sm:$0xff]  ;;  %v6549_v42 = vld [vmem:[#allocation30_spill] sm:$0xff] }
 0x23d   :  { %v3418_v41 = vmax.f32 %v3290_v4, %v3354_v58  ;;  %v2797_v53 = vpop.f32.mrf.mxu0  ;;  %v2910_v9 = vpop.f32.mrf.mxu1  ;;  %v3357_v48 = vmul.f32 0.2, %v3293_v47 }
 0x23e   :  { %v3297_v57 = vadd.f32 %v6036_v52, %v2759_v22  ;;  %v2798_v59 = vadd.f32 %v2797_v53, %v6543_v14  ;;  %v2761_v7 = vadd.f32 %v2760_v37, %v2648_v23  ;;  %v3358_v8 = vmul.f32 0.2, %v3294_v6  ;;  %v6550_v37 = vld [vmem:[#allocation31_spill] sm:$0xff]  ;;  %v6551_v53 = vld [vmem:[#allocation33_spill] sm:$0xff] }
 0x23f   :  { %v2799_v54 = vpop.f32.mrf.mxu0  ;;  %v2912_v62 = vpop.f32.mrf.mxu1  ;;  %v3454_v15 = vpack.c.bf16 %v3418_v41, %v3414_v38  ;;  %v3421_v52 = vmax.f32 %v3293_v47, %v3357_v48 }
 0x240   :  { %v3361_v5 = vmul.f32 0.2, %v3297_v57  ;;  %v6123_v12 = vadd.f32 %v2910_v9, %v2798_v59  ;;  %v2800_v49 = vadd.f32 %v2799_v54, %v6544_v27  ;;  %v3298_v31 = vadd.f32 %v6044_v0, %v2761_v7  ;;  %v6552_v59 = vld [vmem:[#allocation34_spill] sm:$0xff] }
 0x241   :  { %3949 = vmatprep.mubr.bf16.mxu0 %v3454_v15  ;;  %v6127_v16 = vpop.f32.mrf.mxu0  ;;  %v6129_v36 = vpop.f32.mrf.mxu1  ;;  %v3422_v26 = vmax.f32 %v3294_v6, %v3358_v8 }
 0x242   :  { %v3425_v55 = vmax.f32 %v3297_v57, %v3361_v5  ;;  %v6131_v63 = vadd.f32 %v2912_v62, %v2800_v49  ;;  %3950 = vmatmul.mubr.bf16.gmra.mxu0 %v3453_v19  ;;  %v3362_v50 = vmul.f32 0.2, %v3298_v31  ;;  %v6553_v5 = vld [vmem:[#allocation35_spill] sm:$0xff] }
 0x243   :  { %v6133_v25 = vpop.f32.mrf.mxu0  ;;  %v6135_v18 = vpop.f32.mrf.mxu1 }
 0x244   :  { %v3457_v28 = vpack.c.bf16 %v3425_v55, %v3421_v52  ;;  %v3426_v35 = vmax.f32 %v3298_v31, %v3362_v50  ;;  %v6554_v50 = vld [vmem:[#allocation37_spill] sm:$0xff] }
 0x245   :  { %v2807_v21 = vpop.f32.mrf.mxu0  ;;  %v2920_v0 = vpop.f32.mrf.mxu1 }
 0x246   :  { %v2808_v2 = vadd.f32 %v2807_v21, %v6545_v44  ;;  %v3458_v29 = vpack.c.bf16 %v3426_v35, %v3422_v26 }
 0x247   :  { %v2809_v39 = vpop.f32.mrf.mxu0  ;;  %v2922_v43 = vpop.f32.mrf.mxu1 }
 0x248   :  { %v6138_v13 = vadd.f32 %v2920_v0, %v2808_v2  ;;  %v2810_v24 = vadd.f32 %v2809_v39, %v6546_v40  ;;  %3959 = vmatprep.mubr.bf16.mxu0 %v3458_v29  ;;  %v6555_v0 = vld [vmem:[#allocation38_spill] sm:$0xff]  ;;  %v6556_v29 = vld [vmem:[#allocation39_spill] sm:$0xff] }
 0x249   :  { %v2811_v10 = vpop.f32.mrf.mxu0  ;;  %v2924_v17 = vpop.f32.mrf.mxu1 }
 0x24a   :  { %v6141_v45 = vadd.f32 %v2922_v43, %v2810_v24  ;;  %v2812_v32 = vadd.f32 %v2811_v10, %v6547_v56  ;;  %3960 = vmatmul.mubr.bf16.gmra.mxu0 %v3457_v28 }
 0x24b   :  { %v6144_v33 = vpop.f32.mrf.mxu0  ;;  %v6146_v34 = vpop.f32.mrf.mxu1 }
 0x24c   :  { %v6148_v20 = vadd.f32 %v2924_v17, %v2812_v32 }
 0x24d   :  { %v2817_v4 = vpop.f32.mrf.mxu0  ;;  %v2930_v61 = vpop.f32.mrf.mxu1 }
 0x24e   :  { %v2818_v1 = vadd.f32 %v2817_v4, %v6548_v3  ;;  %v6557_v4 = vld [vmem:[#allocation41_spill] sm:$0xff] }
 0x24f   :  { %v2819_v47 = vpop.f32.mrf.mxu0  ;;  %v2932_v11 = vpop.f32.mrf.mxu1 }
 0x250   :  { %v6151_v30 = vadd.f32 %v2930_v61, %v2818_v1  ;;  %v2820_v46 = vadd.f32 %v2819_v47, %v6549_v42 }
 0x251   :  { %v2821_v60 = vpop.f32.mrf.mxu0  ;;  %v2934_v58 = vpop.f32.mrf.mxu1 }
 0x252   :  { %v6154_v51 = vadd.f32 %v2932_v11, %v2820_v46  ;;  %v2822_v19 = vadd.f32 %v2821_v60, %v6550_v37  ;;  %v6558_v11 = vld [vmem:[#allocation42_spill] sm:$0xff]  ;;  %v6559_v37 = vld [vmem:[#allocation43_spill] sm:$0xff] }
 0x253   :  { %v6157_v22 = vpop.f32.mrf.mxu0  ;;  %v6159_v38 = vpop.f32.mrf.mxu1 }
 0x254   :  { %v6161_v41 = vadd.f32 %v2934_v58, %v2822_v19 }
 0x255   :  { %v2827_v6 = vpop.f32.mrf.mxu0  ;;  %v2940_v23 = vpop.f32.mrf.mxu1 }
 0x256   :  { %v2828_v9 = vadd.f32 %v2827_v6, %v6551_v53 }
 0x257   :  { %v2829_v48 = vpop.f32.mrf.mxu0  ;;  %v2942_v57 = vpop.f32.mrf.mxu1 }
 0x258   :  { %v6164_v14 = vadd.f32 %v2940_v23, %v2828_v9  ;;  %v2830_v7 = vadd.f32 %v2829_v48, %v6552_v59 }
 0x259   :  { %v2831_v54 = vpop.f32.mrf.mxu0  ;;  %v2944_v62 = vpop.f32.mrf.mxu1 }
 0x25a   :  { %v6167_v15 = vadd.f32 %v2942_v57, %v2830_v7  ;;  %v2832_v27 = vadd.f32 %v2831_v54, %v6553_v5  ;;  %v6560_v57 = vld [vmem:[#allocation45_spill] sm:$0xff]  ;;  %v6561_v5 = vld [vmem:[#allocation46_spill] sm:$0xff] }
 0x25b   :  { %v6170_v49 = vpop.f32.mrf.mxu0  ;;  %v6172_v8 = vpop.f32.mrf.mxu1 }
 0x25c   :  { %v6174_v31 = vadd.f32 %v2944_v62, %v2832_v27 }
 0x25d   :  { %v2837_v52 = vpop.f32.mrf.mxu0  ;;  %v2950_v55 = vpop.f32.mrf.mxu1 }
 0x25e   :  { %v2838_v28 = vadd.f32 %v2837_v52, %v6554_v50 }
 0x25f   :  { %v2839_v26 = vpop.f32.mrf.mxu0  ;;  %v2952_v35 = vpop.f32.mrf.mxu1 }
 0x260   :  { %v6177_v21 = vadd.f32 %v2950_v55, %v2838_v28  ;;  %v2840_v44 = vadd.f32 %v2839_v26, %v6555_v0  ;;  %v6562_v28 = vld [vmem:[#allocation47_spill] sm:$0xff] }
 0x261   :  { %v2841_v2 = vpop.f32.mrf.mxu0  ;;  %v2954_v39 = vpop.f32.mrf.mxu1 }
 0x262   :  { %v6180_v43 = vadd.f32 %v2952_v35, %v2840_v44  ;;  %v2842_v40 = vadd.f32 %v2841_v2, %v6556_v29  ;;  %v6563_v29 = vld [vmem:[#allocation50_spill] sm:$0xff] }
 0x263   :  { %v6183_v24 = vpop.f32.mrf.mxu0  ;;  %v6185_v10 = vpop.f32.mrf.mxu1 }
 0x264   :  { %v6187_v17 = vadd.f32 %v2954_v39, %v2842_v40 }
 0x265   :  { %v2847_v56 = vpop.f32.mrf.mxu0  ;;  %v2960_v32 = vpop.f32.mrf.mxu1 }
 0x266   :  { %v2848_v61 = vadd.f32 %v2847_v56, %v6557_v4 }
 0x267   :  { %v2849_v3 = vpop.f32.mrf.mxu0  ;;  %v2962_v1 = vpop.f32.mrf.mxu1 }
 0x268   :  { %v6190_v47 = vadd.f32 %v2960_v32, %v2848_v61  ;;  %v2850_v42 = vadd.f32 %v2849_v3, %v6558_v11  ;;  %v6564_v61 = vld [vmem:[#allocation51_spill] sm:$0xff] }
 0x269   :  { %v2851_v46 = vpop.f32.mrf.mxu0  ;;  %v2964_v60 = vpop.f32.mrf.mxu1 }
 0x26a   :  { %v6193_v58 = vadd.f32 %v2962_v1, %v2850_v42  ;;  %v2852_v19 = vadd.f32 %v2851_v46, %v6559_v37  ;;  %v6565_v42 = vld [vmem:[#allocation17_spill] sm:$0xff]  ;;  %v6566_v37 = vld [vmem:[#allocation52_spill] sm:$0xff] }
 0x26b   :  { %v6196_v6 = vpop.f32.mrf.mxu0  ;;  %v6198_v23 = vpop.f32.mrf.mxu1  ;;  %v3227_v46 = vsub.s32 2, %v6565_v42 }
 0x26c   :  { %v6200_v53 = vadd.f32 %v2964_v60, %v2852_v19 }
 0x26d   :  { %v2857_v9 = vpop.f32.mrf.mxu0  ;;  %v2970_v48 = vpop.f32.mrf.mxu1 }
 0x26e   :  { %v2858_v59 = vadd.f32 %v2857_v9, %v6560_v57  ;;  %v3231_v57 = vsub.s32 3, %v6565_v42 }
 0x26f   :  { %v2859_v7 = vpop.f32.mrf.mxu0  ;;  %v2972_v54 = vpop.f32.mrf.mxu1 }
 0x270   :  { %v6203_v62 = vadd.f32 %v2970_v48, %v2858_v59  ;;  %v2860_v27 = vadd.f32 %v2859_v7, %v6561_v5  ;;  %v6567_v59 = vld [vmem:[#allocation23_spill] sm:$0xff] }
 0x271   :  { %v2861_v52 = vpop.f32.mrf.mxu0  ;;  %v2974_v55 = vpop.f32.mrf.mxu1  ;;  %v2802_v7 = vadd.f32 %v6127_v16, %v6567_v59 }
 0x272   :  { %v6206_v50 = vadd.f32 %v2972_v54, %v2860_v27  ;;  %v2862_v26 = vadd.f32 %v2861_v52, %v6562_v28  ;;  %v6568_v52 = vld [vmem:[#allocation18_spill] sm:$0xff]  ;;  %v6569_v28 = vld [vmem:[#allocation24_spill] sm:$0xff] }
 0x273   :  { %v6209_v35 = vpop.f32.mrf.mxu0  ;;  %v6211_v0 = vpop.f32.mrf.mxu1 }
 0x274   :  { %v6213_v44 = vadd.f32 %v2974_v55, %v2862_v26  ;;  %v6233_v55 = vrot.slane %v6568_v52, %v3227_v46  ;;  %v2804_v26 = vadd.f32 %v6133_v25, %v6569_v28 }
 0x275   :  { %v2867_v2 = vpop.f32.mrf.mxu0  ;;  %v2980_v39 = vpop.f32.mrf.mxu1 }
 0x276   :  { %v2868_v40 = vadd.f32 %v2867_v2, %v6563_v29 }
 0x277   :  { %v2869_v56 = vpop.f32.mrf.mxu0  ;;  %v2982_v32 = vpop.f32.mrf.mxu1 }
 0x278   :  { %v6216_v4 = vadd.f32 %v2980_v39, %v2868_v40  ;;  %v2870_v3 = vadd.f32 %v2869_v56, %v6564_v61  ;;  %v6239_v40 = vrot.slane %v6568_v52, %v3231_v57  ;;  %v2915_v56 = vadd.f32 %v6129_v36, %v2802_v7 }
 0x279   :  { %v2871_v1 = vpop.f32.mrf.mxu0  ;;  %v2984_v11 = vpop.f32.mrf.mxu1 }
 0x27a   :  { %v6220_v60 = vadd.f32 %v2982_v32, %v2870_v3  ;;  %v2872_v19 = vadd.f32 %v2871_v1, %v6566_v37  ;;  %v2917_v1 = vadd.f32 %v6135_v18, %v2804_v26 }
 0x27b   :  { %v6223_v9 = vpop.f32.mrf.mxu0  ;;  %v6225_v48 = vpop.f32.mrf.mxu1 }
 0x27c   :  { %v6230_v54 = vadd.f32 %v2984_v11, %v2872_v19 }
 0x27d   :  { %v3023_v5 = vpop.f32.mrf.mxu0  ;;  %v3136_v27 = vpop.f32.mrf.mxu1 }
 0x27e   :  { %v3024_v2 = vadd.f32 %v3023_v5, %v6123_v12 }
 0x27f   :  { %v3025_v39 = vpop.f32.mrf.mxu0  ;;  %v3138_v29 = vpop.f32.mrf.mxu1 }
 0x280   :  { %v3137_v16 = vadd.f32 %v3136_v27, %v3024_v2  ;;  %v3026_v32 = vadd.f32 %v3025_v39, %v6131_v63  ;;  %v6570_v27 = vld [vmem:[#allocation28_spill] sm:$0xff] }
 0x281   :  { %v3027_v61 = vpop.f32.mrf.mxu0  ;;  %v3140_v3 = vpop.f32.mrf.mxu1  ;;  %v2814_v28 = vadd.f32 %v6144_v33, %v6570_v27 }
 0x282   :  { %v3239_v11 = vadd.f32 %v6233_v55, %v3137_v16  ;;  %v3139_v46 = vadd.f32 %v3138_v29, %v3026_v32  ;;  %v3028_v25 = vadd.f32 %v3027_v61, %v2915_v56 }
 0x283   :  { %v3029_v37 = vpop.f32.mrf.mxu0  ;;  %v3142_v12 = vpop.f32.mrf.mxu1  ;;  %v2927_v33 = vadd.f32 %v6146_v34, %v2814_v28  ;;  %v6571_v34 = vld [vmem:[#allocation32_spill] sm:$0xff] }
 0x284   :  { %v3240_v19 = vadd.f32 %v6239_v40, %v3139_v46  ;;  %v3141_v59 = vadd.f32 %v3140_v3, %v3028_v25  ;;  %v3030_v57 = vadd.f32 %v3029_v37, %v2917_v1  ;;  %v3303_v5 = vmul.f32 0.2, %v3239_v11 }
 0x285   :  { %v3033_v52 = vpop.f32.mrf.mxu0  ;;  %v3146_v36 = vpop.f32.mrf.mxu1 }
 0x286   :  { %v3243_v7 = vadd.f32 %v6233_v55, %v3141_v59  ;;  %v3143_v63 = vadd.f32 %v3142_v12, %v3030_v57  ;;  %v3304_v18 = vmul.f32 0.2, %v3240_v19  ;;  %v3034_v26 = vadd.f32 %v3033_v52, %v6138_v13 }
 0x287   :  { %v3035_v2 = vpop.f32.mrf.mxu0  ;;  %v3148_v39 = vpop.f32.mrf.mxu1  ;;  %v3367_v32 = vmax.f32 %v3239_v11, %v3303_v5 }
 0x288   :  { %v3307_v29 = vmul.f32 0.2, %v3243_v7  ;;  %v3244_v56 = vadd.f32 %v6239_v40, %v3143_v63  ;;  %v3036_v16 = vadd.f32 %v3035_v2, %v6141_v45  ;;  %v3147_v61 = vadd.f32 %v3146_v36, %v3034_v26 }
 0x289   :  { %v3037_v3 = vpop.f32.mrf.mxu0  ;;  %v3150_v1 = vpop.f32.mrf.mxu1  ;;  %v3368_v59 = vmax.f32 %v3240_v19, %v3304_v18  ;;  %v2824_v19 = vadd.f32 %v6157_v22, %v6571_v34 }
 0x28a   :  { %v3371_v46 = vmax.f32 %v3243_v7, %v3307_v29  ;;  %v3308_v25 = vmul.f32 0.2, %v3244_v56  ;;  %v3149_v37 = vadd.f32 %v3148_v39, %v3036_v16  ;;  %v3038_v12 = vadd.f32 %v3037_v3, %v6148_v20 }
 0x28b   :  { %v3247_v13 = vadd.f32 %v6233_v55, %v3147_v61  ;;  %v3039_v57 = vpop.f32.mrf.mxu0  ;;  %v3152_v52 = vpop.f32.mrf.mxu1 }
 0x28c   :  { %v3431_v27 = vpack.c.bf16 %v3371_v46, %v3367_v32  ;;  %v3372_v63 = vmax.f32 %v3244_v56, %v3308_v25  ;;  %v3248_v45 = vadd.f32 %v6239_v40, %v3149_v37  ;;  %v3151_v11 = vadd.f32 %v3150_v1, %v3038_v12 }
 0x28d   :  { %v3311_v5 = vmul.f32 0.2, %v3247_v13  ;;  %v3040_v36 = vadd.f32 %v3039_v57, %v2927_v33  ;;  %v3043_v26 = vpop.f32.mrf.mxu0  ;;  %v3156_v7 = vpop.f32.mrf.mxu1  ;;  %v2937_v33 = vadd.f32 %v6159_v38, %v2824_v19 }
 0x28e   :  { %v3251_v2 = vadd.f32 %v6233_v55, %v3151_v11  ;;  %v3044_v20 = vadd.f32 %v3043_v26, %v6151_v30  ;;  %v3432_v39 = vpack.c.bf16 %v3372_v63, %v3368_v59  ;;  %v3312_v3 = vmul.f32 0.2, %v3248_v45 }
 0x28f   :  { %v3153_v28 = vadd.f32 %v3152_v52, %v3040_v36  ;;  %v3045_v18 = vpop.f32.mrf.mxu0  ;;  %v3158_v29 = vpop.f32.mrf.mxu1  ;;  %v3375_v61 = vmax.f32 %v3247_v13, %v3311_v5 }
 0x290   :  { %v3315_v16 = vmul.f32 0.2, %v3251_v2  ;;  %v3157_v56 = vadd.f32 %v3156_v7, %v3044_v20  ;;  %v3046_v32 = vadd.f32 %v3045_v18, %v6154_v51  ;;  %4002 = vmatprep.mubr.bf16.mxu1 %v3432_v39  ;;  %v3376_v11 = vmax.f32 %v3248_v45, %v3312_v3 }
 0x291   :  { %v3252_v1 = vadd.f32 %v6239_v40, %v3153_v28  ;;  %v3047_v46 = vpop.f32.mrf.mxu0  ;;  %v3160_v25 = vpop.f32.mrf.mxu1  ;;  %4003 = vmatmul.mubr.bf16.vlgmr.msra.gmra.mxu1 %v3431_v27 }
 0x292   :  { %v3379_v30 = vmax.f32 %v3251_v2, %v3315_v16  ;;  %v3255_v37 = vadd.f32 %v6233_v55, %v3157_v56  ;;  %v3159_v12 = vadd.f32 %v3158_v29, %v3046_v32  ;;  %v3048_v22 = vadd.f32 %v3047_v46, %v6161_v41  ;;  %v6572_v41 = vld [vmem:[#allocation36_spill] sm:$0xff] }
 0x293   :  { %v3316_v59 = vmul.f32 0.2, %v3252_v1  ;;  %v3049_v57 = vpop.f32.mrf.mxu0  ;;  %v3162_v52 = vpop.f32.mrf.mxu1  ;;  %v2834_v38 = vadd.f32 %v6170_v49, %v6572_v41 }
 0x294   :  { %v3435_v51 = vpack.c.bf16 %v3379_v30, %v3375_v61  ;;  %v3256_v13 = vadd.f32 %v6239_v40, %v3159_v12  ;;  %v3161_v63 = vadd.f32 %v3160_v25, %v3048_v22  ;;  %v3319_v36 = vmul.f32 0.2, %v3255_v37 }
 0x295   :  { %v3380_v5 = vmax.f32 %v3252_v1, %v3316_v59  ;;  %v3050_v26 = vadd.f32 %v3049_v57, %v2937_v33  ;;  %v3053_v27 = vpop.f32.mrf.mxu0  ;;  %v3166_v7 = vpop.f32.mrf.mxu1  ;;  %v2947_v25 = vadd.f32 %v6172_v8, %v2834_v38 }
 0x296   :  { %v3259_v2 = vadd.f32 %v6233_v55, %v3161_v63  ;;  %v3054_v20 = vadd.f32 %v3053_v27, %v6164_v14  ;;  %v3383_v16 = vmax.f32 %v3255_v37, %v3319_v36  ;;  %v3320_v56 = vmul.f32 0.2, %v3256_v13 }
 0x297   :  { %v3163_v39 = vadd.f32 %v3162_v52, %v3050_v26  ;;  %v3055_v34 = vpop.f32.mrf.mxu0  ;;  %v3168_v19 = vpop.f32.mrf.mxu1  ;;  %v3436_v28 = vpack.c.bf16 %v3380_v5, %v3376_v11 }
 0x298   :  { %v3323_v18 = vmul.f32 0.2, %v3259_v2  ;;  %v3167_v29 = vadd.f32 %v3166_v7, %v3054_v20  ;;  %v3056_v45 = vadd.f32 %v3055_v34, %v6167_v15  ;;  %v3384_v59 = vmax.f32 %v3256_v13, %v3320_v56 }
 0x299   :  { %v3260_v32 = vadd.f32 %v6239_v40, %v3163_v39  ;;  %4012 = vmatprep.mubr.bf16.mxu1 %v3436_v28  ;;  %v3057_v61 = vpop.f32.mrf.mxu0  ;;  %v3170_v3 = vpop.f32.mrf.mxu1 }
 0x29a   :  { %v3387_v1 = vmax.f32 %v3259_v2, %v3323_v18  ;;  %v3263_v14 = vadd.f32 %v6233_v55, %v3167_v29  ;;  %v3169_v46 = vadd.f32 %v3168_v19, %v3056_v45  ;;  %v3058_v49 = vadd.f32 %v3057_v61, %v6174_v31  ;;  %4013 = vmatmul.mubr.bf16.gmra.mxu1 %v3435_v51  ;;  %v6573_v51 = vld [vmem:[#allocation40_spill] sm:$0xff] }
 0x29b   :  { %v3324_v30 = vmul.f32 0.2, %v3260_v32  ;;  %v3059_v12 = vpop.f32.mrf.mxu0  ;;  %v3172_v22 = vpop.f32.mrf.mxu1  ;;  %v2844_v8 = vadd.f32 %v6183_v24, %v6573_v51 }
 0x29c   :  { %v3439_v15 = vpack.c.bf16 %v3387_v1, %v3383_v16  ;;  %v3264_v37 = vadd.f32 %v6239_v40, %v3169_v46  ;;  %v3171_v33 = vadd.f32 %v3170_v3, %v3058_v49  ;;  %v3327_v52 = vmul.f32 0.2, %v3263_v14 }
 0x29d   :  { %v3388_v57 = vmax.f32 %v3260_v32, %v3324_v30  ;;  %v3060_v63 = vadd.f32 %v3059_v12, %v2947_v25  ;;  %v3063_v11 = vpop.f32.mrf.mxu0  ;;  %v3176_v5 = vpop.f32.mrf.mxu1  ;;  %v2957_v45 = vadd.f32 %v6185_v10, %v2844_v8 }
 0x29e   :  { %v3267_v36 = vadd.f32 %v6233_v55, %v3171_v33  ;;  %v3064_v31 = vadd.f32 %v3063_v11, %v6177_v21  ;;  %v3391_v38 = vmax.f32 %v3263_v14, %v3327_v52  ;;  %v3328_v39 = vmul.f32 0.2, %v3264_v37 }
 0x29f   :  { %v3173_v26 = vadd.f32 %v3172_v22, %v3060_v63  ;;  %v3065_v27 = vpop.f32.mrf.mxu0  ;;  %v3178_v7 = vpop.f32.mrf.mxu1  ;;  %v3440_v2 = vpack.c.bf16 %v3388_v57, %v3384_v59  ;;  %v6574_v22 = vld [vmem:[#allocation44_spill] sm:$0xff] }
 0x2a0   :  { %v3331_v20 = vmul.f32 0.2, %v3267_v36  ;;  %v3177_v41 = vadd.f32 %v3176_v5, %v3064_v31  ;;  %v3066_v13 = vadd.f32 %v3065_v27, %v6180_v43  ;;  %v3392_v1 = vmax.f32 %v3264_v37, %v3328_v39 }
 0x2a1   :  { %v3268_v34 = vadd.f32 %v6239_v40, %v3173_v26  ;;  %4022 = vmatprep.mubr.bf16.mxu1 %v3440_v2  ;;  %v3067_v19 = vpop.f32.mrf.mxu0  ;;  %v3180_v28 = vpop.f32.mrf.mxu1  ;;  %v2854_v10 = vadd.f32 %v6196_v6, %v6574_v22 }
 0x2a2   :  { %v3395_v18 = vmax.f32 %v3267_v36, %v3331_v20  ;;  %v3271_v21 = vadd.f32 %v6233_v55, %v3177_v41  ;;  %v3179_v29 = vadd.f32 %v3178_v7, %v3066_v13  ;;  %v3068_v24 = vadd.f32 %v3067_v19, %v6187_v17  ;;  %4023 = vmatmul.mubr.bf16.gmra.mxu1 %v3439_v15 }
 0x2a3   :  { %v3332_v16 = vmul.f32 0.2, %v3268_v34  ;;  %v3069_v56 = vpop.f32.mrf.mxu0  ;;  %v3182_v32 = vpop.f32.mrf.mxu1  ;;  %v2967_v27 = vadd.f32 %v6198_v23, %v2854_v10 }
 0x2a4   :  { %v3443_v43 = vpack.c.bf16 %v3395_v18, %v3391_v38  ;;  %v3272_v61 = vadd.f32 %v6239_v40, %v3179_v29  ;;  %v3181_v3 = vadd.f32 %v3180_v28, %v3068_v24  ;;  %v3335_v46 = vmul.f32 0.2, %v3271_v21  ;;  %v6575_v29 = vld [vmem:[#allocation49_spill] sm:$0xff] }
 0x2a5   :  { %v3396_v14 = vmax.f32 %v3268_v34, %v3332_v16  ;;  %v3070_v49 = vadd.f32 %v3069_v56, %v2957_v45  ;;  %v3073_v25 = vpop.f32.mrf.mxu0  ;;  %v3186_v30 = vpop.f32.mrf.mxu1  ;;  %v2864_v23 = vadd.f32 %v6209_v35, %v6575_v29 }
 0x2a6   :  { %v3275_v12 = vadd.f32 %v6233_v55, %v3181_v3  ;;  %v3074_v17 = vadd.f32 %v3073_v25, %v6190_v47  ;;  %v3399_v11 = vmax.f32 %v3271_v21, %v3335_v46  ;;  %v3336_v5 = vmul.f32 0.2, %v3272_v61 }
 0x2a7   :  { %v3183_v15 = vadd.f32 %v3182_v32, %v3070_v49  ;;  %v3075_v33 = vpop.f32.mrf.mxu0  ;;  %v3188_v59 = vpop.f32.mrf.mxu1  ;;  %v3444_v57 = vpack.c.bf16 %v3396_v14, %v3392_v1 }
 0x2a8   :  { %v3339_v52 = vmul.f32 0.2, %v3275_v12  ;;  %v3187_v63 = vadd.f32 %v3186_v30, %v3074_v17  ;;  %v3076_v37 = vadd.f32 %v3075_v33, %v6193_v58  ;;  %v3400_v38 = vmax.f32 %v3272_v61, %v3336_v5 }
 0x2a9   :  { %v3276_v36 = vadd.f32 %v6239_v40, %v3183_v15  ;;  %4032 = vmatprep.mubr.bf16.mxu1 %v3444_v57  ;;  %v3077_v31 = vpop.f32.mrf.mxu0  ;;  %v3190_v51 = vpop.f32.mrf.mxu1 }
 0x2aa   :  { %v3403_v8 = vmax.f32 %v3275_v12, %v3339_v52  ;;  %v3279_v47 = vadd.f32 %v6233_v55, %v3187_v63  ;;  %v3189_v26 = vadd.f32 %v3188_v59, %v3076_v37  ;;  %v3078_v6 = vadd.f32 %v3077_v31, %v6200_v53  ;;  %4033 = vmatmul.mubr.bf16.gmra.mxu1 %v3443_v43 }
 0x2ab   :  { %v3340_v7 = vmul.f32 0.2, %v3276_v36  ;;  %v3079_v2 = vpop.f32.mrf.mxu0  ;;  %v3192_v20 = vpop.f32.mrf.mxu1  ;;  %v2977_v12 = vadd.f32 %v6211_v0, %v2864_v23 }
 0x2ac   :  { %v3447_v58 = vpack.c.bf16 %v3403_v8, %v3399_v11  ;;  %v3280_v41 = vadd.f32 %v6239_v40, %v3189_v26  ;;  %v3191_v13 = vadd.f32 %v3190_v51, %v3078_v6  ;;  %v3343_v34 = vmul.f32 0.2, %v3279_v47 }
 0x2ad   :  { %v3404_v39 = vmax.f32 %v3276_v36, %v3340_v7  ;;  %v3080_v19 = vadd.f32 %v3079_v2, %v2967_v27  ;;  %v3083_v28 = vpop.f32.mrf.mxu0  ;;  %v3196_v18 = vpop.f32.mrf.mxu1  ;;  %v6576_v36 = vld [vmem:[#allocation54_spill] sm:$0xff] }
 0x2ae   :  { %v3283_v21 = vadd.f32 %v6233_v55, %v3191_v13  ;;  %v3084_v53 = vadd.f32 %v3083_v28, %v6203_v62  ;;  %v3407_v3 = vmax.f32 %v3279_v47, %v3343_v34  ;;  %v3344_v1 = vmul.f32 0.2, %v3280_v41 }
 0x2af   :  { %v3193_v24 = vadd.f32 %v3192_v20, %v3080_v19  ;;  %v3085_v45 = vpop.f32.mrf.mxu0  ;;  %v3198_v16 = vpop.f32.mrf.mxu1  ;;  %v3448_v56 = vpack.c.bf16 %v3404_v39, %v3400_v38  ;;  %v2874_v0 = vadd.f32 %v6223_v9, %v6576_v36 }
 0x2b0   :  { %v3347_v32 = vmul.f32 0.2, %v3283_v21  ;;  %v3197_v43 = vadd.f32 %v3196_v18, %v3084_v53  ;;  %v3086_v61 = vadd.f32 %v3085_v45, %v6206_v50  ;;  %v3408_v59 = vmax.f32 %v3280_v41, %v3344_v1 }
 0x2b1   :  { %v3284_v14 = vadd.f32 %v6239_v40, %v3193_v24  ;;  %4042 = vmatprep.mubr.bf16.mxu1 %v3448_v56  ;;  %v3087_v46 = vpop.f32.mrf.mxu0  ;;  %v3200_v49 = vpop.f32.mrf.mxu1  ;;  %v2987_v39 = vadd.f32 %v6225_v48, %v2874_v0 }
 0x2b2   :  { %v3411_v25 = vmax.f32 %v3283_v21, %v3347_v32  ;;  %v3287_v62 = vadd.f32 %v6233_v55, %v3197_v43  ;;  %v3199_v30 = vadd.f32 %v3198_v16, %v3086_v61  ;;  %v3088_v35 = vadd.f32 %v3087_v46, %v6213_v44  ;;  %4043 = vmatmul.mubr.bf16.gmra.mxu1 %v3447_v58 }
 0x2b3   :  { %v3348_v17 = vmul.f32 0.2, %v3284_v14  ;;  %v3089_v22 = vpop.f32.mrf.mxu0  ;;  %v3202_v10 = vpop.f32.mrf.mxu1 }
 0x2b4   :  { %v3451_v50 = vpack.c.bf16 %v3411_v25, %v3407_v3  ;;  %v3288_v15 = vadd.f32 %v6239_v40, %v3199_v30  ;;  %v3201_v33 = vadd.f32 %v3200_v49, %v3088_v35  ;;  %v3351_v52 = vmul.f32 0.2, %v3287_v62 }
 0x2b5   :  { %v3412_v57 = vmax.f32 %v3284_v14, %v3348_v17  ;;  %v3090_v63 = vadd.f32 %v3089_v22, %v2977_v12  ;;  %v3093_v37 = vpop.f32.mrf.mxu0  ;;  %v3206_v11 = vpop.f32.mrf.mxu1  ;;  %v6577_v25 = vsub.s32 1, %v6565_v42 }
 0x2b6   :  { %v3291_v5 = vadd.f32 %v6233_v55, %v3201_v33  ;;  %v3094_v44 = vadd.f32 %v3093_v37, %v6216_v4  ;;  %v3415_v7 = vmax.f32 %v3287_v62, %v3351_v52  ;;  %v3352_v2 = vmul.f32 0.2, %v3288_v15 }
 0x2b7   :  { %v3203_v31 = vadd.f32 %v3202_v10, %v3090_v63  ;;  %v3095_v51 = vpop.f32.mrf.mxu0  ;;  %v3208_v8 = vpop.f32.mrf.mxu1  ;;  %v3452_v47 = vpack.c.bf16 %v3412_v57, %v3408_v59 }
 0x2b8   :  { %v3355_v26 = vmul.f32 0.2, %v3291_v5  ;;  %v3207_v6 = vadd.f32 %v3206_v11, %v3094_v44  ;;  %v3096_v27 = vadd.f32 %v3095_v51, %v6220_v60  ;;  %v3416_v21 = vmax.f32 %v3288_v15, %v3352_v2  ;;  %v6578_v51 = vld [vmem:[#allocation20_spill] sm:$0xff] }
 0x2b9   :  { %v3292_v20 = vadd.f32 %v6239_v40, %v3203_v31  ;;  %4052 = vmatprep.mubr.bf16.mxu1 %v3452_v47  ;;  %v3097_v58 = vpop.f32.mrf.mxu0  ;;  %v3210_v38 = vpop.f32.mrf.mxu1 }
 0x2ba   :  { %v3419_v41 = vmax.f32 %v3291_v5, %v3355_v26  ;;  %v3295_v4 = vadd.f32 %v6233_v55, %v3207_v6  ;;  %v3209_v13 = vadd.f32 %v3208_v8, %v3096_v27  ;;  %v3098_v9 = vadd.f32 %v3097_v58, %v6230_v54  ;;  %4053 = vmatmul.mubr.bf16.gmra.mxu1 %v3451_v50  ;;  %v6352_v58 = vld.sshfl [vmem:[%s6468_s7] sm:$0x11 pattern:$0x75316420]  ;;  %s5374_s7 = smov [#allocation11]  }
 0x2bb   :  { %v3356_v34 = vmul.f32 0.2, %v3292_v20  ;;  %v3099_v19 = vpop.f32.mrf.mxu0  ;;  %v3212_v45 = vpop.f32.mrf.mxu1  ;;  %v5373_v27 = vmov 1966171168   ;;  %s4252_s19 = sshll.u32 %s5374_s7, 4  ;;  %s4253_s19 = int_to_ptr.vmem [resolvable:$true] %s4252_s19 }
 0x2bc   :  { %v3455_v28 = vpack.c.bf16 %v3419_v41, %v3415_v7  ;;  %v3296_v60 = vadd.f32 %v6239_v40, %v3209_v13  ;;  %v3211_v18 = vadd.f32 %v3210_v38, %v3098_v9  ;;  %v3100_v29 = vadd.f32 %v3099_v19, %v2987_v39  ;;  %s5333_s20 = scalar_lea.vmem %s4253_s19, 16  ;;  %s5337_s21 = scalar_lea.vmem %s4253_s19, 32 }
 0x2bd   :  { %v3420_v53 = vmax.f32 %v3292_v20, %v3356_v34  ;;  %v3359_v23 = vmul.f32 0.2, %v3295_v4  ;;  %v4184_v7 = vunpack.c.l.s4 %v5373_v27  ;;  %v4182_v13 = vcombine.high %v6352_v58, %v6352_v58  ;;  %p5334_p6 = scmp.ne.s32.totalorder %s4253_s19, %s5333_s20  ;;  %p5338_p7 = scmp.lt.s32.totalorder %s4253_s19, %s4253_s19 }
 0x2be   :  { %v3299_v24 = vadd.f32 %v6233_v55, %v3211_v18  ;;  %v3213_v16 = vadd.f32 %v3212_v45, %v3100_v29  ;;  %v3360_v32 = vmul.f32 0.2, %v3296_v60  ;;  %v3525_v55 = vld [vmem:[%s6467_s6] sm:$0x3]  ;;  %p5339_p8 = scmp.lt.s32.totalorder %s5337_s21, %s5333_s20 }
 0x2bf   :  { %v3456_v56 = vpack.c.bf16 %v3420_v53, %v3416_v21  ;;  %v3423_v48 = vmax.f32 %v3295_v4, %v3359_v23  ;;  %v6323_v62 = vrot.slane %v3525_v55, %v6577_v25  ;;  %v6342_v8 = vrot.slane %v3525_v55, %v6578_v51 }
 0x2c0   :  { %v3363_v54 = vmul.f32 0.2, %v3299_v24  ;;  %v3300_v43 = vadd.f32 %v6239_v40, %v3213_v16  ;;  %v3424_v14 = vmax.f32 %v3296_v60, %v3360_v32  ;;  %v4185_v41 = vunpack.c.0.s8 %v4184_v7  ;;  %p5340_p9 = por %p5339_p8, %p5338_p7 }
 0x2c1   :  { %4062 = vmatprep.mubr.bf16.mxu1 %v3456_v56 }
 0x2c2   :  { %v3427_v61 = vmax.f32 %v3299_v24, %v3363_v54  ;;  %4063 = vmatmul.mubr.bf16.gmra.mxu1 %v3455_v28  ;;  %v3364_v3 = vmul.f32 0.2, %v3300_v43  ;;  %v6360_v34 = vsub.s32 %v4185_v41, %v6565_v42  ;;  %p5341_p10 = pnand %p5340_p9, %p5334_p6 }
 0x2c4   :  { %v3459_v1 = vpack.c.bf16 %v3427_v61, %v3423_v48  ;;  %v3428_v46 = vmax.f32 %v3300_v43, %v3364_v3  ;;  %v4196_v53 = vrot.slane %v4182_v13, %v6360_v34 }
 0x2c6   :  { %v3460_v49 = vpack.c.bf16 %v3428_v46, %v3424_v14  ;;  %4231 = vmatprep.mubr.bf16.mxu0 %v4196_v53 }
 0x2c8   :  { %4072 = vmatprep.mubr.bf16.mxu1 %v3460_v49 }
 0x2ca   :  { %4073 = vmatmul.mubr.bf16.gmra.mxu1 %v3459_v1 }
 0x2d1   :  { %v3891_v40 = vpop.f32.mrf.mxu0 }
 0x2d2   :  { %v3892_v26 = vadd.f32 %v3891_v40, %v6342_v8 }
 0x2d3   :  { %v3893_v30 = vpop.f32.mrf.mxu0 }
 0x2d4   :  { %v3894_v35 = vadd.f32 %v3893_v30, %v6323_v62 }
 0x2d5   :  { %v3895_v12 = vpop.f32.mrf.mxu0 }
 0x2d6   :  { %v3896_v9 = vadd.f32 %v3895_v12, %v6342_v8 }
 0x2d7   :  { %v3897_v17 = vpop.f32.mrf.mxu0 }
 0x2d8   :  { %v3898_v22 = vadd.f32 %v3897_v17, %v6323_v62 }
 0x2da   :  { %v3901_v10 = vpop.f32.mrf.mxu0 }
 0x2db   :  { %v3902_v16 = vadd.f32 %v3901_v10, %v6342_v8 }
 0x2dc   :  { %v3903_v50 = vpop.f32.mrf.mxu0 }
 0x2dd   :  { %v3904_v15 = vadd.f32 %v3903_v50, %v6323_v62 }
 0x2de   :  { %v3905_v33 = vpop.f32.mrf.mxu0 }
 0x2df   :  { %v3906_v46 = vadd.f32 %v3905_v33, %v6342_v8 }
 0x2e0   :  { %v3907_v59 = vpop.f32.mrf.mxu0 }
 0x2e1   :  { %v3908_v57 = vadd.f32 %v3907_v59, %v6323_v62 }
 0x2e2   :  { %v3911_v52 = vpop.f32.mrf.mxu0 }
 0x2e3   :  { %v3912_v17 = vadd.f32 %v3911_v52, %v6342_v8 }
 0x2e4   :  { %v3913_v63 = vpop.f32.mrf.mxu0 }
 0x2e5   :  { %v6330_v37 = vadd.f32 %v3913_v63, %v6323_v62 }
 0x2e6   :  { %v3915_v11 = vpop.f32.mrf.mxu0 }
 0x2e8   :  { %v3917_v5 = vpop.f32.mrf.mxu0 }
 0x2e9   :  { %v6333_v44 = vadd.f32 %v3917_v5, %v6323_v62 }
 0x2ea   :  { %v6335_v36 = vpop.f32.mrf.mxu0 }
 0x2ec   :  { %v6337_v0 = vpop.f32.mrf.mxu0 }
 0x2ee   :  { %v6339_v31 = vpop.f32.mrf.mxu0 }
 0x2f0   :  { %v6344_v47 = vpop.f32.mrf.mxu0 }
 0x2f2   :  { %v6347_v6 = vpop.f32.mrf.mxu0 }
 0x2f4   :  { %v6357_v38 = vpop.f32.mrf.mxu0 }
 0x2f6   :  { %v6365_v29 = vpop.f32.mrf.mxu0 }
 0x2f8   :  { %v6368_v48 = vpop.f32.mrf.mxu0 }
 0x351   :  { %v4004_v2 = vpop.f32.mrf.mxu1 }
 0x352   :  { %v4005_v20 = vadd.f32 %v4004_v2, %v3892_v26 }
 0x353   :  { %v4006_v4 = vpop.f32.mrf.mxu1 }
 0x354   :  { %v4007_v39 = vadd.f32 %v4006_v4, %v3894_v35  ;;  %v4083_v28 = vmul.f32 0.2, %v4005_v20  ;;  %v6375_v35 = vpop.f32.mrf.mxu0 }
 0x355   :  { %v4008_v19 = vpop.f32.mrf.mxu1 }
 0x356   :  { %v4009_v60 = vadd.f32 %v4008_v19, %v3896_v9  ;;  %v4084_v23 = vmul.f32 0.2, %v4007_v39  ;;  %v4115_v56 = vmax.f32 %v4005_v20, %v4083_v28  ;;  %v6379_v33 = vpop.f32.mrf.mxu0 }
 0x357   :  { %v4010_v21 = vpop.f32.mrf.mxu1 }
 0x358   :  { %v4085_v24 = vmul.f32 0.2, %v4009_v60  ;;  %v4011_v45 = vadd.f32 %v4010_v21, %v3898_v22  ;;  %v4116_v61 = vmax.f32 %v4007_v39, %v4084_v23  ;;  %v6386_v39 = vpop.f32.mrf.mxu0 }
 0x35a   :  { %v4117_v42 = vmax.f32 %v4009_v60, %v4085_v24  ;;  %v4086_v54 = vmul.f32 0.2, %v4011_v45  ;;  %v4014_v32 = vpop.f32.mrf.mxu1 }
 0x35b   :  { %v4015_v43 = vadd.f32 %v4014_v32, %v3902_v16  ;;  %v3947_v16 = vpop.f32.mrf.mxu0 }
 0x35c   :  { %v6370_v3 = vpack.c.bf16 %v4117_v42, %v4115_v56  ;;  %v4118_v1 = vmax.f32 %v4011_v45, %v4086_v54  ;;  %v4016_v14 = vpop.f32.mrf.mxu1  ;;  %v3926_v42 = vadd.f32 %v6339_v31, %v6342_v8 }
 0x35d   :  { %v4017_v49 = vadd.f32 %v4016_v14, %v3904_v15  ;;  %v4087_v40 = vmul.f32 0.2, %v4015_v43  ;;  %v3916_v15 = vadd.f32 %v3915_v11, %v6342_v8  ;;  %v3922_v11 = vadd.f32 %v6335_v36, %v6342_v8 }
 0x35e   :  { %v4018_v55 = vpop.f32.mrf.mxu1  ;;  %v6373_v25 = vpack.c.bf16 %v4118_v1, %v4116_v61 }
 0x35f   :  { %v4019_v30 = vadd.f32 %v4018_v55, %v3906_v46  ;;  %v4088_v22 = vmul.f32 0.2, %v4017_v49  ;;  %v4119_v63 = vmax.f32 %v4015_v43, %v4087_v40 }
 0x360   :  { %v4020_v12 = vpop.f32.mrf.mxu1 }
 0x361   :  { %v4089_v10 = vmul.f32 0.2, %v4019_v30  ;;  %v4021_v50 = vadd.f32 %v4020_v12, %v3908_v57  ;;  %v4120_v2 = vmax.f32 %v4017_v49, %v4088_v22 }
 0x362   :  { %v4024_v59 = vpop.f32.mrf.mxu1 }
 0x363   :  { %v4121_v5 = vmax.f32 %v4019_v30, %v4089_v10  ;;  %v4090_v26 = vmul.f32 0.2, %v4021_v50  ;;  %v4025_v27 = vadd.f32 %v4024_v59, %v3912_v17 }
 0x364   :  { %v4026_v7 = vpop.f32.mrf.mxu1 }
 0x365   :  { %v6381_v20 = vpack.c.bf16 %v4121_v5, %v4119_v63  ;;  %v4122_v41 = vmax.f32 %v4021_v50, %v4090_v26  ;;  %v4027_v4 = vadd.f32 %v4026_v7, %v6330_v37  ;;  %v4091_v13 = vmul.f32 0.2, %v4025_v27 }
 0x366   :  { %v4028_v52 = vpop.f32.mrf.mxu1 }
 0x367   :  { %v4029_v9 = vadd.f32 %v4028_v52, %v3916_v15  ;;  %v6384_v57 = vpack.c.bf16 %v4122_v41, %v4120_v2  ;;  %v4092_v28 = vmul.f32 0.2, %v4027_v4  ;;  %v4123_v23 = vmax.f32 %v4025_v27, %v4091_v13 }
 0x368   :  { %v4030_v19 = vpop.f32.mrf.mxu1 }
 0x369   :  { %v4093_v60 = vmul.f32 0.2, %v4029_v9  ;;  %v4031_v21 = vadd.f32 %v4030_v19, %v6333_v44  ;;  %v4124_v54 = vmax.f32 %v4027_v4, %v4092_v28  ;;  %v3951_v44 = vpop.f32.mrf.mxu0 }
 0x36a   :  { %v4034_v53 = vpop.f32.mrf.mxu1 }
 0x36b   :  { %v4125_v24 = vmax.f32 %v4029_v9, %v4093_v60  ;;  %v4094_v45 = vmul.f32 0.2, %v4031_v21  ;;  %v4035_v37 = vadd.f32 %v4034_v53, %v3922_v11  ;;  %v3953_v12 = vpop.f32.mrf.mxu0 }
 0x36c   :  { %v6391_v56 = vpop.f32.mrf.mxu1  ;;  %v3954_v53 = vadd.f32 %v3953_v12, %v6323_v62  ;;  %v3948_v12 = vadd.f32 %v3947_v16, %v6323_v62 }
 0x36d   :  { %v6395_v32 = vpack.c.bf16 %v4125_v24, %v4123_v23  ;;  %v4126_v43 = vmax.f32 %v4031_v21, %v4094_v45  ;;  %v4095_v61 = vmul.f32 0.2, %v4035_v37  ;;  %v3955_v10 = vpop.f32.mrf.mxu0 }
 0x36e   :  { %v4038_v36 = vpop.f32.mrf.mxu1 }
 0x36f   :  { %v4039_v1 = vadd.f32 %v4038_v36, %v3926_v42  ;;  %v6397_v14 = vpack.c.bf16 %v4126_v43, %v4124_v54  ;;  %v4127_v40 = vmax.f32 %v4035_v37, %v4095_v61  ;;  %v3957_v63 = vpop.f32.mrf.mxu0 }
 0x370   :  { %v6399_v46 = vpop.f32.mrf.mxu1  ;;  %v3958_v19 = vadd.f32 %v3957_v63, %v6323_v62  ;;  %v3956_v63 = vadd.f32 %v3955_v10, %v6342_v8 }
 0x371   :  { %v4097_v49 = vmul.f32 0.2, %v4039_v1  ;;  %v3961_v27 = vpop.f32.mrf.mxu0 }
 0x372   :  { %v6401_v55 = vpop.f32.mrf.mxu1  ;;  %v3962_v28 = vadd.f32 %v3961_v27, %v6342_v8 }
 0x373   :  { %v4129_v30 = vmax.f32 %v4039_v1, %v4097_v49  ;;  %v3963_v2 = vpop.f32.mrf.mxu0 }
 0x374   :  { %v6403_v17 = vpop.f32.mrf.mxu1  ;;  %v3964_v11 = vadd.f32 %v3963_v2, %v6323_v62 }
 0x375   :  { %v6405_v31 = vpack.c.bf16 %v4129_v30, %v4127_v40  ;;  %v3965_v52 = vpop.f32.mrf.mxu0 }
 0x376   :  { %v6407_v22 = vpop.f32.mrf.mxu1  ;;  %v3966_v23 = vadd.f32 %v3965_v52, %v6342_v8 }
 0x377   :  { %v3967_v60 = vpop.f32.mrf.mxu0 }
 0x378   :  { %v6409_v50 = vpop.f32.mrf.mxu1  ;;  %v3968_v54 = vadd.f32 %v3967_v60, %v6323_v62 }
 0x37a   :  { %v6411_v59 = vpop.f32.mrf.mxu1 }
 0x37c   :  { %v4056_v5 = vpop.f32.mrf.mxu1 }
 0x37e   :  { %v4058_v26 = vpop.f32.mrf.mxu1 }
 0x380   :  { %v4060_v15 = vpop.f32.mrf.mxu1 }
 0x382   :  { %v4064_v7 = vpop.f32.mrf.mxu1 }
 0x384   :  { %v4066_v41 = vpop.f32.mrf.mxu1 }
 0x385   :  { %v4067_v43 = vadd.f32 %v4066_v41, %v3954_v53 }
 0x386   :  { %v4068_v4 = vpop.f32.mrf.mxu1 }
 0x387   :  { %v4108_v2 = vmul.f32 0.2, %v4067_v43 }
 0x388   :  { %v4070_v13 = vpop.f32.mrf.mxu1 }
 0x389   :  { %v4071_v24 = vadd.f32 %v4070_v13, %v3958_v19  ;;  %v3944_v13 = vadd.f32 %v6379_v33, %v6323_v62  ;;  %v4069_v19 = vadd.f32 %v4068_v4, %v3956_v63  ;;  %v4140_v10 = vmax.f32 %v4067_v43, %v4108_v2 }
 0x38a   :  { %v4074_v9 = vpop.f32.mrf.mxu1  ;;  %v3946_v33 = vadd.f32 %v6386_v39, %v6342_v8  ;;  %v3924_v63 = vadd.f32 %v6337_v0, %v6323_v62 }
 0x38b   :  { %v4075_v37 = vadd.f32 %v4074_v9, %v3962_v28  ;;  %v4110_v1 = vmul.f32 0.2, %v4071_v24  ;;  %v3952_v9 = vadd.f32 %v3951_v44, %v6342_v8 }
 0x38c   :  { %v4076_v21 = vpop.f32.mrf.mxu1 }
 0x38d   :  { %v4077_v45 = vadd.f32 %v4076_v21, %v3964_v11  ;;  %v4111_v27 = vmul.f32 0.2, %v4075_v37  ;;  %v4061_v11 = vadd.f32 %v4060_v15, %v3948_v12  ;;  %v4142_v28 = vmax.f32 %v4071_v24, %v4110_v1 }
 0x38e   :  { %v4078_v42 = vpop.f32.mrf.mxu1  ;;  %v4065_v53 = vadd.f32 %v4064_v7, %v3952_v9  ;;  %v3938_v15 = vadd.f32 %v6368_v48, %v6323_v62  ;;  %v4059_v7 = vadd.f32 %v4058_v26, %v3946_v33 }
 0x38f   :  { %v4079_v36 = vadd.f32 %v4078_v42, %v3966_v23  ;;  %v4112_v49 = vmul.f32 0.2, %v4077_v45  ;;  %v4143_v23 = vmax.f32 %v4075_v37, %v4111_v27  ;;  %v4057_v42 = vadd.f32 %v4056_v5, %v3944_v13 }
 0x390   :  { %v4080_v61 = vpop.f32.mrf.mxu1  ;;  %v4106_v18 = vmul.f32 0.2, %v4061_v11  ;;  %v4161_v51 = vpack.c.bf16 %v4142_v28, %v4140_v10  ;;  %v4107_v44 = vmul.f32 0.2, %v4065_v53  ;;  %v3942_v5 = vadd.f32 %v6375_v35, %v6342_v8 }
 0x391   :  { %v4113_v40 = vmul.f32 0.2, %v4079_v36  ;;  %v4081_v30 = vadd.f32 %v4080_v61, %v3968_v54  ;;  %v4144_v60 = vmax.f32 %v4077_v45, %v4112_v49  ;;  %v4109_v61 = vmul.f32 0.2, %v4069_v19 }
 0x392   :  { %v4104_v4 = vmul.f32 0.2, %v4057_v42  ;;  %v3934_v45 = vadd.f32 %v6357_v38, %v6323_v62  ;;  %v4051_v37 = vadd.f32 %v6409_v50, %v3938_v15  ;;  %v4138_v43 = vmax.f32 %v4061_v11, %v4106_v18 }
 0x393   :  { %v4114_v52 = vmul.f32 0.2, %v4081_v30  ;;  %v4145_v41 = vmax.f32 %v4079_v36, %v4113_v40  ;;  %v4141_v24 = vmax.f32 %v4069_v19, %v4109_v61  ;;  %v4055_v39 = vadd.f32 %v6411_v59, %v3942_v5 }
 0x394   :  { %v4139_v36 = vmax.f32 %v4065_v53, %v4107_v44  ;;  %v4047_v1 = vadd.f32 %v6403_v17, %v3934_v45  ;;  %v4136_v49 = vmax.f32 %v4057_v42, %v4104_v4  ;;  %v4105_v48 = vmul.f32 0.2, %v4059_v7 }
 0x395   :  { %v4146_v21 = vmax.f32 %v4081_v30, %v4114_v52  ;;  %v4162_v16 = vpack.c.bf16 %v4145_v41, %v4143_v23  ;;  %v3936_v35 = vadd.f32 %v6365_v29, %v6342_v8  ;;  %v4103_v26 = vmul.f32 0.2, %v4055_v39 }
 0x396   :  { %v4160_v40 = vpack.c.bf16 %v4141_v24, %v4139_v36  ;;  %v4159_v30 = vpack.c.bf16 %v4138_v43, %v4136_v49  ;;  %v3928_v38 = vadd.f32 %v6344_v47, %v6323_v62  ;;  %v4100_v50 = vmul.f32 0.2, %v4047_v1 }
 0x397   :  { %v4163_v54 = vpack.c.bf16 %v4146_v21, %v4144_v60  ;;  %v3932_v18 = vadd.f32 %v6347_v6, %v6342_v8  ;;  %v4049_v17 = vadd.f32 %v6407_v22, %v3936_v35  ;;  %v4137_v59 = vmax.f32 %v4059_v7, %v4105_v48  ;;  %v6580_v60 = vld [vmem:[#allocation20_spill] sm:$0xff] }
 0x398   :  { %v4041_v27 = vadd.f32 %v6399_v46, %v3928_v38  ;;  %v4135_v2 = vmax.f32 %v4055_v39, %v4103_v26  ;;  %v4037_v52 = vadd.f32 %v6391_v56, %v3924_v63  ;;  %v4132_v47 = vmax.f32 %v4047_v1, %v4100_v50 }
 0x399   :  { %4199 = vmatprep.subr.bf16.mxu0 %v4163_v54  ;;  %v4045_v29 = vadd.f32 %v6401_v55, %v3932_v18  ;;  %v4101_v13 = vmul.f32 0.2, %v4049_v17  ;;  %v6579_v56 = vrot.slane %v6352_v58, %v6360_v34  ;;  %v4168_v55 = vpop.permute.xlu0 %4167 }
 0x39a   :  { %4200 = vmatpush1.bf16.xpose.msra.mxu0 %v4162_v16  ;;  %v4158_v9 = vpack.c.bf16 %v4137_v59, %v4135_v2  ;;  %v4098_v19 = vmul.f32 0.2, %v4041_v27  ;;  %v4096_v6 = vmul.f32 0.2, %v4037_v52  ;;  %v4173_v21 = vrot.slane %v4168_v55, %v6580_v60 }
 0x39b   :  { %4201 = vmatprep.subr.bf16.mxu0 %v4161_v51  ;;  %v4102_v51 = vmul.f32 0.2, %v4051_v37  ;;  %v4099_v8 = vmul.f32 0.2, %v4045_v29  ;;  %v4133_v22 = vmax.f32 %v4049_v17, %v4101_v13 }
 0x39c   :  { %v4130_v11 = vmax.f32 %v4041_v27, %v4098_v19  ;;  %v4128_v0 = vmax.f32 %v4037_v52, %v4096_v6 }
 0x39d   :  { %v4134_v12 = vmax.f32 %v4051_v37, %v4102_v51  ;;  %v4131_v62 = vmax.f32 %v4045_v29, %v4099_v8 }
 0x39e   :  { %v4155_v28 = vpack.c.bf16 %v4130_v11, %v4128_v0 }
 0x39f   :  { %v4157_v41 = vpack.c.bf16 %v4134_v12, %v4132_v47  ;;  %v4156_v46 = vpack.c.bf16 %v4133_v22, %v4131_v62 }
 0x3a2   :  { %4202 = vmatpush1.bf16.xpose.msra.mxu0 %v4160_v40 }
 0x3a3   :  { %4203 = vmatprep.subr.bf16.mxu0 %v4159_v30 }
 0x3aa   :  { %4204 = vmatpush1.bf16.xpose.msra.mxu0 %v4158_v9 }
 0x3ab   :  { %4205 = vmatprep.subr.bf16.mxu0 %v4157_v41 }
 0x3b2   :  { %4206 = vmatpush1.bf16.xpose.msra.mxu0 %v4156_v46 }
 0x3b3   :  { %4207 = vmatprep.subr.bf16.mxu0 %v4155_v28 }
 0x3ba   :  { %4208 = vmatpush1.bf16.xpose.msra.mxu0 %v6405_v31 }
 0x3bb   :  { %4209 = vmatprep.subr.bf16.mxu0 %v6397_v14 }
 0x3c2   :  { %4210 = vmatpush1.bf16.xpose.msra.mxu0 %v6395_v32 }
 0x3c3   :  { %4211 = vmatprep.subr.bf16.mxu0 %v6384_v57 }
 0x3ca   :  { %4212 = vmatpush1.bf16.xpose.msra.mxu0 %v6381_v20 }
 0x3cb   :  { %4213 = vmatprep.subr.bf16.mxu0 %v6373_v25 }
 0x3d2   :  { %4214 = vmatpush1.bf16.xpose.msra.mxu0 %v6370_v3 }
 0x3d9   :  { %4232 = vmatmul.mubr.bf16.vlgmr.msra.gmra.mxu0 %v6579_v56 }
 0x499   :  { %v4233_v31 = vpop.f32.mrf.mxu0 }
 0x49a   :  { %v4234_v53 = vadd.f32 %v4233_v31, %v4173_v21 }
 0x49b   :  { %v4235_v14 = vpop.f32.mrf.mxu0 }
 0x49c   :  { %v4672_v23 = vmul.f32 -1.442695, %v4234_v53 }
 0x49d   :  { %v4236_v32 = vpop.f32.mrf.mxu0 }
 0x49e   :  { %5249 = vpow2.f32 %v4672_v23 }
 0x49f   :  { %v4237_v57 = vpop.f32.mrf.mxu0 }
 0x4ab   :  { %v5250_v42 = vpop.eup %5249 }
 0x4ac   :  { %v4242_v20 = vadd.f32 1.0, %v5250_v42 }
 0x4ae   :  { %5251 = vrcp.f32 %v4242_v20 }
 0x4bb   :  { %v5252_v3 = vpop.eup %5251 }
 0x4bc   :  { %4245 = vst [vmem:[#allocation11] sm:$0x1] %v5252_v3 }
 0x4bd   :  { %5344 = shalt.err (!%p5341_p10)
}
 0x4be   :  { %4255 = dma.vmem_to_hbm [thread:$0]  %s4253_s19, 16, %s6470_s9, [#allocation5]  }
 0x4bf   :  { %5359 = dma.done.wait [#allocation5], 16  }
 0x4c0   :  { %5360 = vsyncadd [#allocation5], 4294967280 }
 0x4c1   :  { %4259 = vsyncpa [#allocation4], 1 }
 0x4c2   :  { %4260 = vsyncpa [#allocation7], 1 }
 0x4c3   :  { %4261 = vsyncpa [#allocation10], 1 }
 0x4c4   :  { %4262 = vsyncpa [#allocation5], 1 }

// kernel: tpu_custom_call.1
= control target key start
LH: loop header
LB: loop body
LE: loop exit
PB: predicated region body
PF: predicated region fallthrough
CT: control target
= control target key end

     0   :  { %s6461_s0 = inlined_call_operand.hbm [shape: bf16[128,896], index: 0, kind: input, shape index: {}]   ;;  %s6462_s1 = inlined_call_operand.vmem [shape: s32[128,1], index: 1, kind: input, shape index: {}]   ;;  %s6463_s2 = inlined_call_operand.hbm [shape: bf16[896,512], index: 2, kind: input, shape index: {}]   ;;  %s6464_s3 = inlined_call_operand.hbm [shape: bf16[128,512], index: 3, kind: input, shape index: {}]   ;;  %s6465_s4 = inlined_call_operand.vmem [shape: f32[1,512], index: 4, kind: input, shape index: {}]   ;;  %s6466_s5 = inlined_call_operand.hbm [shape: bf16[512,256], index: 5, kind: input, shape index: {}]   ;;  %s6467_s6 = inlined_call_operand.vmem [shape: f32[1,256], index: 6, kind: input, shape index: {}]   ;;  %s6468_s7 = inlined_call_operand.vmem [shape: bf16[1,256], index: 7, kind: input, shape index: {}]   ;;  %s6469_s8 = inlined_call_operand.<no memory space> [shape: f32[1,1], index: 8, kind: input, shape index: {}]   ;;  %s6470_s9 = inlined_call_operand.hbm [shape: f32[1,1,128], index: 9, kind: output, shape index: {}]  }
   0x1   :  { %v14_v0 = vstv %s6469_s8 }
   0x2   :  { %15 = vst [vmem:[#allocation2] sm:$0x1] %v14_v0 }
   0x3   :  { %16 = vsyncpa [#allocation4], 0 }
   0x4   :  { %17 = vsyncpa [#allocation7], 0 }
   0x5   :  { %18 = vsyncpa [#allocation10], 0 }
   0x6   :  { %19 = vsyncpa [#allocation5], 0  ;;  %s5361_s11 = smov [#allocation6]  }
   0x7   :  { %s39_s12 = sshll.u32 %s5361_s11, 4  ;;  %s40_s12 = int_to_ptr.vmem [resolvable:$true] %s39_s12 }
   0x8   :  { %s5261_s13 = scalar_lea.vmem %s40_s12, 28672  ;;  %p5266_p1 = scmp.lt.s32.totalorder %s40_s12, %s40_s12 }
   0x9   :  { %p5262_p0 = scmp.ne.s32.totalorder %s40_s12, %s5261_s13  ;;  %p5267_p2 = scmp.lt.s32.totalorder %s5261_s13, %s5261_s13 }
   0xb   :  { %p5268_p3 = por %p5267_p2, %p5266_p1 }
   0xd   :  { %p5269_p4 = pnand %p5268_p3, %p5262_p0 }
   0xf   :  { %5272 = shalt.err (!%p5269_p4)
}
  0x10   :  { %s5362_s14 = smov 256   ;;  %s5363_s15 = smov 16  }
  0x11   :  { %45 = dma.hbm_to_vmem [thread:$0]  %s6463_s2, 28672, %s40_s12, [#allocation7], %s5362_s14, %s5362_s14, %s5363_s15  }
  0x12   :  { %s5364_s17 = smov [#allocation3]  }
  0x13   :  { %s25_s18 = sshll.u32 %s5364_s17, 4  ;;  %s26_s18 = int_to_ptr.vmem [resolvable:$true] %s25_s18 }
  0x14   :  { %s5281_s19 = scalar_lea.vmem %s26_s18, 7168  ;;  %p5286_p6 = scmp.lt.s32.totalorder %s26_s18, %s26_s18 }
  0x15   :  { %p5282_p5 = scmp.ne.s32.totalorder %s26_s18, %s5281_s19  ;;  %p5287_p7 = scmp.lt.s32.totalorder %s5281_s19, %s5281_s19 }
  0x17   :  { %p5288_p8 = por %p5287_p7, %p5286_p6 }
  0x19   :  { %p5289_p9 = pnand %p5288_p8, %p5282_p5 }
  0x1b   :  { %5292 = shalt.err (!%p5289_p9)
}
  0x1c   :  { %s5365_s20 = smov 448   ;;  %s5366_s21 = smov 28  }
  0x1d   :  { %31 = dma.hbm_to_vmem [thread:$0]  %s6461_s0, 7168, %s26_s18, [#allocation4], %s5365_s20, %s5365_s20, %s5366_s21  }
  0x1e   :  { %s5367_s24 = smov [#allocation8]   ;;  %s5368_s26 = smov [#allocation9]  }
  0x1f   :  { %s51_s25 = sshll.u32 %s5367_s24, 4  ;;  %s65_s2 = sshll.u32 %s5368_s26, 4  ;;  %s52_s25 = int_to_ptr.vmem [resolvable:$true] %s51_s25  ;;  %s66_s2 = int_to_ptr.vmem [resolvable:$true] %s65_s2 }
  0x20   :  { %s5301_s27 = scalar_lea.vmem %s52_s25, 4096  ;;  %p5306_p11 = scmp.lt.s32.totalorder %s52_s25, %s52_s25 }
  0x21   :  { %p5302_p10 = scmp.ne.s32.totalorder %s52_s25, %s5301_s27  ;;  %p5307_p12 = scmp.lt.s32.totalorder %s5301_s27, %s5301_s27 }
  0x23   :  { %p5308_p13 = por %p5307_p12, %p5306_p11 }
  0x25   :  { %p5309_p0 = pnand %p5308_p13, %p5302_p10 }
  0x27   :  { %5312 = shalt.err (!%p5309_p0)
}
  0x28   :  { %57 = dma.hbm_to_vmem [thread:$0]  %s6464_s3, 4096, %s52_s25, [#allocation7], %s5362_s14, %s5362_s14, %s5363_s15  }
  0x29   :  { %s5321_s0 = scalar_lea.vmem %s66_s2, 8192  ;;  %p5326_p2 = scmp.lt.s32.totalorder %s66_s2, %s66_s2 }
  0x2a   :  { %p5322_p1 = scmp.ne.s32.totalorder %s66_s2, %s5321_s0  ;;  %p5327_p3 = scmp.lt.s32.totalorder %s5321_s0, %s5321_s0 }
  0x2c   :  { %p5328_p4 = por %p5327_p3, %p5326_p2 }
  0x2e   :  { %p5329_p5 = pnand %p5328_p4, %p5322_p1 }
  0x30   :  { %5332 = shalt.err (!%p5329_p5)
}
  0x31   :  { %s5369_s30 = smov 128   ;;  %s5370_s10 = smov 8  }
  0x32   :  { %71 = dma.hbm_to_vmem [thread:$0]  %s6466_s5, 8192, %s66_s2, [#allocation10], %s5369_s30, %s5369_s30, %s5370_s10  }
  0x33   :  { %5353 = dma.done.wait [#allocation4], 7168  }
  0x34   :  { %5354 = vsyncadd [#allocation4], 4294960128 }
  0x35   :  { %5355 = dma.done.wait [#allocation7], 32768  }
  0x36   :  { %5356 = vsyncadd [#allocation7], 4294934528 }
  0x37   :  { %5357 = dma.done.wait [#allocation10], 8192  }
  0x38   :  { %5358 = vsyncadd [#allocation10], 4294959104  ;;  %v6472_v1 = vmov 0   ;;  %v383_v2 = vld [vmem:[%s6462_s1 + $0x10] sm:$0xff]  ;;  %v381_v3 = vld [vmem:[%s6462_s1] sm:$0xff]  ;;  %v6471_v53 = vlaneseq }
  0x39   :  { %4688 = vset.pattern.permute.xlu1 %v6472_v1  ;;  %4687 = vset.pattern.permute.xlu0 %v6472_v1  ;;  %v384_v4 = vld [vmem:[%s6462_s1 + $0x18] sm:$0xff]  ;;  %v382_v5 = vld [vmem:[%s6462_s1 + $0x8] sm:$0xff]  ;;  %v385_v7 = vld [vmem:[%s6462_s1 + $0x20] sm:$0xff]  ;;  %v5372_v62 = vmov 1.0|1.0  }
  0x3a   :  { %709 = vmatprep.mubr.bf16.mxu0 %v6472_v1  ;;  %822 = vmatprep.mubr.bf16.mxu1 %v6472_v1  ;;  %v386_v6 = vld [vmem:[%s6462_s1 + $0x28] sm:$0xff]  ;;  %v4693_v10 = vld [vmem:[#allocation8 + $0xe0] ss:$16 sps:$4 sm:$0xff]   ;;  %v388_v11 = vld [vmem:[%s6462_s1 + $0x38] sm:$0xff]  ;;  %v5499_v55 = vand.u32 127, %v6471_v53 }
  0x3b   :  { %404 = vperm.xlu1 %4688, %v383_v2   ;;  %398 = vperm.xlu0 %4687, %v381_v3   ;;  %v4689_v8 = vld [vmem:[#allocation8 + $0xe4] ss:$16 sps:$4 sm:$0xff]   ;;  %v4691_v9 = vld [vmem:[#allocation8 + $0xec] ss:$16 sps:$4 sm:$0xff]   ;;  %v4694_v13 = vld [vmem:[#allocation8 + $0xe8] ss:$16 sps:$4 sm:$0xff]  }
  0x3c   :  { %v387_v12 = vld [vmem:[%s6462_s1 + $0x30] sm:$0xff]  ;;  %677 = vmatprep.subr.bf16.mxu0 %v4689_v8  ;;  %790 = vmatprep.subr.bf16.mxu1 %v4691_v9  ;;  %v4700_v17 = vld [vmem:[#allocation8 + $0xc8] ss:$16 sps:$4 sm:$0xff]   ;;  %v389_v21 = vld [vmem:[%s6462_s1 + $0x40] sm:$0xff] }
  0x3d   :  { %v4695_v14 = vld [vmem:[#allocation8 + $0xc4] ss:$16 sps:$4 sm:$0xff]   ;;  %678 = vmatpush1.bf16.msra.mxu0 %v4693_v10  ;;  %v4697_v15 = vld [vmem:[#allocation8 + $0xcc] ss:$16 sps:$4 sm:$0xff]   ;;  %v4699_v16 = vld [vmem:[#allocation8 + $0xc0] ss:$16 sps:$4 sm:$0xff]   ;;  %791 = vmatpush1.bf16.msra.mxu1 %v4694_v13 }
  0x3e   :  { %679 = vmatprep.subr.bf16.mxu0 %v4695_v14  ;;  %v4701_v18 = vld [vmem:[#allocation8 + $0xa4] ss:$16 sps:$4 sm:$0xff]   ;;  %792 = vmatprep.subr.bf16.mxu1 %v4697_v15  ;;  %v4703_v19 = vld [vmem:[#allocation8 + $0xac] ss:$16 sps:$4 sm:$0xff]   ;;  %v4705_v22 = vld [vmem:[#allocation8 + $0xa0] ss:$16 sps:$4 sm:$0xff]  }
  0x3f   :  { %407 = vperm.xlu1 %4688, %v384_v4   ;;  %401 = vperm.xlu0 %4687, %v382_v5   ;;  %v390_v20 = vld [vmem:[%s6462_s1 + $0x48] sm:$0xff]  ;;  %v392_v26 = vld [vmem:[%s6462_s1 + $0x58] sm:$0xff]  ;;  %v391_v27 = vld [vmem:[%s6462_s1 + $0x50] sm:$0xff] }
  0x40   :  { %v4706_v23 = vld [vmem:[#allocation8 + $0xa8] ss:$16 sps:$4 sm:$0xff]   ;;  %v4707_v24 = vld [vmem:[#allocation8 + $0x84] ss:$16 sps:$4 sm:$0xff]   ;;  %v4709_v25 = vld [vmem:[#allocation8 + $0x8c] ss:$16 sps:$4 sm:$0xff]  }
  0x41   :  { %680 = vmatpush1.bf16.msra.mxu0 %v4699_v16  ;;  %793 = vmatpush1.bf16.msra.mxu1 %v4700_v17  ;;  %v4711_v28 = vld [vmem:[#allocation8 + $0x80] ss:$16 sps:$4 sm:$0xff]   ;;  %v4712_v29 = vld [vmem:[#allocation8 + $0x88] ss:$16 sps:$4 sm:$0xff]   ;;  %v4713_v30 = vld [vmem:[#allocation8 + $0x64] ss:$16 sps:$4 sm:$0xff]  }
  0x42   :  { %681 = vmatprep.subr.bf16.mxu0 %v4701_v18  ;;  %794 = vmatprep.subr.bf16.mxu1 %v4703_v19  ;;  %v4715_v31 = vld [vmem:[#allocation8 + $0x6c] ss:$16 sps:$4 sm:$0xff]   ;;  %v4717_v34 = vld [vmem:[#allocation8 + $0x60] ss:$16 sps:$4 sm:$0xff]   ;;  %v4718_v35 = vld [vmem:[#allocation8 + $0x68] ss:$16 sps:$4 sm:$0xff]  }
  0x43   :  { %413 = vperm.xlu1 %4688, %v386_v6   ;;  %410 = vperm.xlu0 %4687, %v385_v7   ;;  %v394_v32 = vld [vmem:[%s6462_s1 + $0x68] sm:$0xff]  ;;  %v393_v33 = vld [vmem:[%s6462_s1 + $0x60] sm:$0xff]  ;;  %v396_v38 = vld [vmem:[%s6462_s1 + $0x78] sm:$0xff] }
  0x44   :  { %v4719_v36 = vld [vmem:[#allocation8 + $0x44] ss:$16 sps:$4 sm:$0xff]   ;;  %v4721_v37 = vld [vmem:[#allocation8 + $0x4c] ss:$16 sps:$4 sm:$0xff]   ;;  %v4723_v40 = vld [vmem:[#allocation8 + $0x40] ss:$16 sps:$4 sm:$0xff]  }
  0x45   :  { %682 = vmatpush1.bf16.msra.mxu0 %v4705_v22  ;;  %795 = vmatpush1.bf16.msra.mxu1 %v4706_v23  ;;  %v395_v39 = vld [vmem:[%s6462_s1 + $0x70] sm:$0xff]  ;;  %v4724_v41 = vld [vmem:[#allocation8 + $0x48] ss:$16 sps:$4 sm:$0xff]   ;;  %v4164_v44 = vld [vmem:[#allocation2] sm:$0x1] }
  0x46   :  { %683 = vmatprep.subr.bf16.mxu0 %v4707_v24  ;;  %796 = vmatprep.subr.bf16.mxu1 %v4709_v25  ;;  %v4725_v42 = vld [vmem:[#allocation8 + $0x24] ss:$16 sps:$4 sm:$0xff]   ;;  %v4727_v43 = vld [vmem:[#allocation8 + $0x2c] ss:$16 sps:$4 sm:$0xff]   ;;  %v4729_v45 = vld [vmem:[#allocation8 + $0x20] ss:$16 sps:$4 sm:$0xff]  }
  0x47   :  { %419 = vperm.xlu1 %4688, %v388_v11   ;;  %416 = vperm.xlu0 %4687, %v387_v12   ;;  %v4730_v46 = vld [vmem:[#allocation8 + $0x28] ss:$16 sps:$4 sm:$0xff]   ;;  %v4731_v47 = vld [vmem:[#allocation8 + $0x4] ss:$16 sps:$4 sm:$0xff]   ;;  %v4733_v48 = vld [vmem:[#allocation8 + $0xc] ss:$16 sps:$4 sm:$0xff]  }
  0x48   :  { %v4735_v49 = vld [vmem:[#allocation8] ss:$16 sps:$4 sm:$0xff]   ;;  %v4736_v50 = vld [vmem:[#allocation8 + $0x8] ss:$16 sps:$4 sm:$0xff]   ;;  %v4739_v51 = vld [vmem:[#allocation6 + $0xe4] ss:$16 sps:$4 sm:$0xff]  }
  0x49   :  { %684 = vmatpush1.bf16.msra.mxu0 %v4711_v28  ;;  %797 = vmatpush1.bf16.msra.mxu1 %v4712_v29  ;;  %v4742_v52 = vld [vmem:[#allocation6 + $0x2e4] ss:$16 sps:$4 sm:$0xff]   ;;  %v4737_v58 = vld [vmem:[#allocation6 + $0xe0] ss:$16 sps:$4 sm:$0xff]   ;;  %v5056_v53 = vld [vmem:[#allocation6 + $0x368] ss:$16 sps:$4 sm:$0xff]  }
  0x4a   :  { %685 = vmatprep.subr.bf16.mxu0 %v4713_v30  ;;  %798 = vmatprep.subr.bf16.mxu1 %v4715_v31  ;;  %v4740_v59 = vld [vmem:[#allocation6 + $0x2e0] ss:$16 sps:$4 sm:$0xff]   ;;  %v4745_v60 = vld [vmem:[#allocation6 + $0xc4] ss:$16 sps:$4 sm:$0xff]  }
  0x4b   :  { %425 = vperm.xlu1 %4688, %v390_v20   ;;  %422 = vperm.xlu0 %4687, %v389_v21   ;;  %v4748_v61 = vld [vmem:[#allocation6 + $0x2c4] ss:$16 sps:$4 sm:$0xff]   ;;  %v4743_v63 = vld [vmem:[#allocation6 + $0xc0] ss:$16 sps:$4 sm:$0xff]  }
  0x4c   :  { %v4746_v0 = vld [vmem:[#allocation6 + $0x2c0] ss:$16 sps:$4 sm:$0xff]   ;;  %v4751_v2 = vld [vmem:[#allocation6 + $0xa4] ss:$16 sps:$4 sm:$0xff]  }
  0x4d   :  { %686 = vmatpush1.bf16.msra.mxu0 %v4717_v34  ;;  %799 = vmatpush1.bf16.msra.mxu1 %v4718_v35  ;;  %v4754_v3 = vld [vmem:[#allocation6 + $0x2a4] ss:$16 sps:$4 sm:$0xff]   ;;  %v4749_v5 = vld [vmem:[#allocation6 + $0xa0] ss:$16 sps:$4 sm:$0xff]  }
  0x4e   :  { %687 = vmatprep.subr.bf16.mxu0 %v4719_v36  ;;  %800 = vmatprep.subr.bf16.mxu1 %v4721_v37  ;;  %v4752_v6 = vld [vmem:[#allocation6 + $0x2a0] ss:$16 sps:$4 sm:$0xff]   ;;  %v4757_v7 = vld [vmem:[#allocation6 + $0x84] ss:$16 sps:$4 sm:$0xff]  }
  0x4f   :  { %431 = vperm.xlu1 %4688, %v392_v26   ;;  %428 = vperm.xlu0 %4687, %v391_v27   ;;  %v4760_v8 = vld [vmem:[#allocation6 + $0x284] ss:$16 sps:$4 sm:$0xff]   ;;  %v4755_v11 = vld [vmem:[#allocation6 + $0x80] ss:$16 sps:$4 sm:$0xff]  }
  0x50   :  { %v4758_v12 = vld [vmem:[#allocation6 + $0x280] ss:$16 sps:$4 sm:$0xff]   ;;  %v4763_v13 = vld [vmem:[#allocation6 + $0x64] ss:$16 sps:$4 sm:$0xff]  }
  0x51   :  { %688 = vmatpush1.bf16.msra.mxu0 %v4723_v40  ;;  %801 = vmatpush1.bf16.msra.mxu1 %v4724_v41  ;;  %v4766_v14 = vld [vmem:[#allocation6 + $0x264] ss:$16 sps:$4 sm:$0xff]   ;;  %v4761_v15 = vld [vmem:[#allocation6 + $0x60] ss:$16 sps:$4 sm:$0xff]  }
  0x52   :  { %689 = vmatprep.subr.bf16.mxu0 %v4725_v42  ;;  %802 = vmatprep.subr.bf16.mxu1 %v4727_v43  ;;  %v4764_v16 = vld [vmem:[#allocation6 + $0x260] ss:$16 sps:$4 sm:$0xff]   ;;  %v4769_v17 = vld [vmem:[#allocation6 + $0x44] ss:$16 sps:$4 sm:$0xff]  }
  0x53   :  { %437 = vperm.xlu1 %4688, %v394_v32   ;;  %434 = vperm.xlu0 %4687, %v393_v33   ;;  %v4772_v18 = vld [vmem:[#allocation6 + $0x244] ss:$16 sps:$4 sm:$0xff]   ;;  %v4767_v21 = vld [vmem:[#allocation6 + $0x40] ss:$16 sps:$4 sm:$0xff]  }
  0x54   :  { %v4770_v22 = vld [vmem:[#allocation6 + $0x240] ss:$16 sps:$4 sm:$0xff]   ;;  %v4775_v23 = vld [vmem:[#allocation6 + $0x24] ss:$16 sps:$4 sm:$0xff]  }
  0x55   :  { %690 = vmatpush1.bf16.msra.mxu0 %v4729_v45  ;;  %803 = vmatpush1.bf16.msra.mxu1 %v4730_v46  ;;  %v4778_v24 = vld [vmem:[#allocation6 + $0x224] ss:$16 sps:$4 sm:$0xff]   ;;  %v4773_v25 = vld [vmem:[#allocation6 + $0x20] ss:$16 sps:$4 sm:$0xff]  }
  0x56   :  { %691 = vmatprep.subr.bf16.mxu0 %v4731_v47  ;;  %804 = vmatprep.subr.bf16.mxu1 %v4733_v48  ;;  %v4776_v26 = vld [vmem:[#allocation6 + $0x220] ss:$16 sps:$4 sm:$0xff]   ;;  %v4781_v27 = vld [vmem:[#allocation6 + $0x4] ss:$16 sps:$4 sm:$0xff]  }
  0x57   :  { %443 = vperm.xlu1 %4688, %v396_v38   ;;  %440 = vperm.xlu0 %4687, %v395_v39   ;;  %v4784_v28 = vld [vmem:[#allocation6 + $0x204] ss:$16 sps:$4 sm:$0xff]   ;;  %v4779_v31 = vld [vmem:[#allocation6] ss:$16 sps:$4 sm:$0xff]  }
  0x58   :  { %v4782_v32 = vld [vmem:[#allocation6 + $0x200] ss:$16 sps:$4 sm:$0xff]   ;;  %v4787_v33 = vld [vmem:[#allocation6 + $0x1e4] ss:$16 sps:$4 sm:$0xff]  }
  0x59   :  { %692 = vmatpush1.bf16.msra.mxu0 %v4735_v49  ;;  %805 = vmatpush1.bf16.msra.mxu1 %v4736_v50  ;;  %v4790_v34 = vld [vmem:[#allocation6 + $0x3e4] ss:$16 sps:$4 sm:$0xff]   ;;  %v4785_v35 = vld [vmem:[#allocation6 + $0x1e0] ss:$16 sps:$4 sm:$0xff]  }
  0x5a   :  { %2311 = vmatprep.subr.bf16.mxu0 %v4739_v51  ;;  %2424 = vmatprep.subr.bf16.mxu1 %v4742_v52  ;;  %v4788_v36 = vld [vmem:[#allocation6 + $0x3e0] ss:$16 sps:$4 sm:$0xff]   ;;  %v4793_v37 = vld [vmem:[#allocation6 + $0x1c4] ss:$16 sps:$4 sm:$0xff]  }
  0x5b   :  { %4167 = vperm.xlu0 %4687, %v4164_v44   ;;  %v4796_v38 = vld [vmem:[#allocation6 + $0x3c4] ss:$16 sps:$4 sm:$0xff]   ;;  %v4791_v41 = vld [vmem:[#allocation6 + $0x1c0] ss:$16 sps:$4 sm:$0xff]  }
  0x5c   :  { %v4794_v42 = vld [vmem:[#allocation6 + $0x3c0] ss:$16 sps:$4 sm:$0xff]   ;;  %v4799_v43 = vld [vmem:[#allocation6 + $0x1a4] ss:$16 sps:$4 sm:$0xff]  }
  0x5d   :  { %v4802_v44 = vld [vmem:[#allocation6 + $0x3a4] ss:$16 sps:$4 sm:$0xff]   ;;  %v4797_v45 = vld [vmem:[#allocation6 + $0x1a0] ss:$16 sps:$4 sm:$0xff]  }
  0x5e   :  { %v4800_v46 = vld [vmem:[#allocation6 + $0x3a0] ss:$16 sps:$4 sm:$0xff]   ;;  %v4805_v47 = vld [vmem:[#allocation6 + $0x184] ss:$16 sps:$4 sm:$0xff]  }
  0x5f   :  { %v4808_v48 = vld [vmem:[#allocation6 + $0x384] ss:$16 sps:$4 sm:$0xff]   ;;  %v4803_v51 = vld [vmem:[#allocation6 + $0x180] ss:$16 sps:$4 sm:$0xff]  }
  0x60   :  { %v4806_v52 = vld [vmem:[#allocation6 + $0x380] ss:$16 sps:$4 sm:$0xff]  }
  0xb6   :  { %v399_v54 = vpop.permute.xlu0 %398  ;;  %v405_v57 = vpop.permute.xlu1 %404 }
  0xb7   :  { %vm445_vm1 = vcmp.eq.s32.totalorder %v5499_v55, %v399_v54  ;;  %vm447_vm3 = vcmp.eq.s32.totalorder %v5499_v55, %v405_v57  ;;  %v4811_v54 = vld [vmem:[#allocation6 + $0x164] ss:$16 sps:$4 sm:$0xff]   ;;  %v4809_v57 = vld [vmem:[#allocation6 + $0x160] ss:$16 sps:$4 sm:$0xff]  }
  0xba   :  { %v402_v56 = vpop.permute.xlu0 %401  ;;  %v408_v4 = vpop.permute.xlu1 %407 }
  0xbb   :  { %vm446_vm0 = vcmp.eq.s32.totalorder %v5499_v55, %v402_v56  ;;  %vm448_vm4 = vcmp.eq.s32.totalorder %v5499_v55, %v408_v4  ;;  %v4814_v56 = vld [vmem:[#allocation6 + $0x364] ss:$16 sps:$4 sm:$0xff]  }
  0xbc   :  { %vm4295_vm2 = vmpackc.low %vm446_vm0, %vm445_vm1  ;;  %v4826_v4 = vld [vmem:[#allocation6 + $0x324] ss:$16 sps:$4 sm:$0xff]  }
  0xbd   :  { %4296 = vmatmul.mubr.msk.bf16.vlgmr.msra.gmra.mxu0 %vm4295_vm2, %v5372_v62  ;;  %4312 = vmatmul.mubr.msk.bf16.vlgmr.msra.gmra.mxu1 %vm4295_vm2, %v5372_v62  ;;  %vm4297_vm5 = vmpackc.low %vm448_vm4, %vm447_vm3 }
  0xbe   :  { %2312 = vmatpush1.bf16.msra.mxu0 %v4737_v58  ;;  %2425 = vmatpush1.bf16.msra.mxu1 %v4740_v59  ;;  %v414_v9 = vpop.permute.xlu1 %413  ;;  %v411_v10 = vpop.permute.xlu0 %410  ;;  %v4812_v58 = vld [vmem:[#allocation6 + $0x360] ss:$16 sps:$4 sm:$0xff]   ;;  %v4817_v59 = vld [vmem:[#allocation6 + $0x144] ss:$16 sps:$4 sm:$0xff]  }
  0xbf   :  { %2313 = vmatprep.subr.bf16.mxu0 %v4745_v60  ;;  %2426 = vmatprep.subr.bf16.mxu1 %v4748_v61  ;;  %vm450_vm6 = vcmp.eq.s32.totalorder %v5499_v55, %v414_v9  ;;  %vm449_vm7 = vcmp.eq.s32.totalorder %v5499_v55, %v411_v10  ;;  %v4820_v60 = vld [vmem:[#allocation6 + $0x344] ss:$16 sps:$4 sm:$0xff]   ;;  %v5547_v10 = vld [vmem:[#allocation3 + $0xc] ss:$28 sps:$4 sm:$0xff]  }
  0xc0   :  { %719 = vmatprep.mubr.bf16.mxu0 %v6472_v1  ;;  %832 = vmatprep.mubr.bf16.mxu1 %v6472_v1  ;;  %vm4299_vm8 = vmpackc.low %vm450_vm6, %vm449_vm7  ;;  %v5545_v9 = vld [vmem:[#allocation3 + $0x4] ss:$28 sps:$4 sm:$0xff]  }
  0xc2   :  { %2314 = vmatpush1.bf16.msra.mxu0 %v4743_v63  ;;  %2427 = vmatpush1.bf16.msra.mxu1 %v4746_v0  ;;  %v420_v19 = vpop.permute.xlu1 %419  ;;  %v417_v20 = vpop.permute.xlu0 %416  ;;  %v4815_v0 = vld [vmem:[#allocation6 + $0x140] ss:$16 sps:$4 sm:$0xff]  }
  0xc3   :  { %2315 = vmatprep.subr.bf16.mxu0 %v4751_v2  ;;  %2428 = vmatprep.subr.bf16.mxu1 %v4754_v3  ;;  %vm452_vm9 = vcmp.eq.s32.totalorder %v5499_v55, %v420_v19  ;;  %vm451_vm10 = vcmp.eq.s32.totalorder %v5499_v55, %v417_v20  ;;  %v4818_v2 = vld [vmem:[#allocation6 + $0x340] ss:$16 sps:$4 sm:$0xff]   ;;  %v4823_v3 = vld [vmem:[#allocation6 + $0x124] ss:$16 sps:$4 sm:$0xff]  }
  0xc4   :  { %vm4301_vm11 = vmpackc.low %vm452_vm9, %vm451_vm10  ;;  %v5559_v19 = vld [vmem:[#allocation3 + $0x44] ss:$28 sps:$4 sm:$0xff]  }
  0xc5   :  { %4298 = vmatmul.mubr.msk.bf16.gmra.mxu0 %vm4297_vm5, %v5372_v62  ;;  %4314 = vmatmul.mubr.msk.bf16.gmra.mxu1 %vm4297_vm5, %v5372_v62  ;;  %v4845_v20 = vld [vmem:[#allocation6 + $0x4c0] ss:$16 sps:$4 sm:$0xff]  }
  0xc6   :  { %2316 = vmatpush1.bf16.msra.mxu0 %v4749_v5  ;;  %2429 = vmatpush1.bf16.msra.mxu1 %v4752_v6  ;;  %v426_v29 = vpop.permute.xlu1 %425  ;;  %v423_v30 = vpop.permute.xlu0 %422  ;;  %v4821_v5 = vld [vmem:[#allocation6 + $0x120] ss:$16 sps:$4 sm:$0xff]  }
  0xc7   :  { %2317 = vmatprep.subr.bf16.mxu0 %v4757_v7  ;;  %2430 = vmatprep.subr.bf16.mxu1 %v4760_v8  ;;  %vm454_vm12 = vcmp.eq.s32.totalorder %v5499_v55, %v426_v29  ;;  %vm453_vm13 = vcmp.eq.s32.totalorder %v5499_v55, %v423_v30  ;;  %v4824_v6 = vld [vmem:[#allocation6 + $0x320] ss:$16 sps:$4 sm:$0xff]   ;;  %v4829_v7 = vld [vmem:[#allocation6 + $0x104] ss:$16 sps:$4 sm:$0xff]   ;;  %v5571_v30 = vld [vmem:[#allocation3 + $0x7c] ss:$28 sps:$4 sm:$0xff]  }
  0xc8   :  { %729 = vmatprep.mubr.bf16.mxu0 %v6472_v1  ;;  %842 = vmatprep.mubr.bf16.mxu1 %v6472_v1  ;;  %vm4303_vm14 = vmpackc.low %vm454_vm12, %vm453_vm13  ;;  %v4832_v8 = vld [vmem:[#allocation6 + $0x304] ss:$16 sps:$4 sm:$0xff]  }
  0xc9   :  { %v4862_v29 = vld [vmem:[#allocation6 + $0x484] ss:$16 sps:$4 sm:$0xff]  }
  0xca   :  { %2318 = vmatpush1.bf16.msra.mxu0 %v4755_v11  ;;  %2431 = vmatpush1.bf16.msra.mxu1 %v4758_v12  ;;  %v432_v39 = vpop.permute.xlu1 %431  ;;  %v429_v40 = vpop.permute.xlu0 %428  ;;  %v4830_v11 = vld [vmem:[#allocation6 + $0x300] ss:$16 sps:$4 sm:$0xff]  }
  0xcb   :  { %2319 = vmatprep.subr.bf16.mxu0 %v4763_v13  ;;  %2432 = vmatprep.subr.bf16.mxu1 %v4766_v14  ;;  %vm456_vm15 = vcmp.eq.s32.totalorder %v5499_v55, %v432_v39  ;;  %vm455_vm0 = vcmp.eq.s32.totalorder %v5499_v55, %v429_v40  ;;  %v5551_v12 = vld [vmem:[#allocation3] ss:$28 sps:$4 sm:$0xff]   ;;  %v5553_v13 = vld [vmem:[#allocation3 + $0x8] ss:$28 sps:$4 sm:$0xff]  }
  0xcc   :  { %vm4305_vm1 = vmpackc.low %vm456_vm15, %vm455_vm0  ;;  %v4841_v14 = vld [vmem:[#allocation6 + $0x4e4] ss:$16 sps:$4 sm:$0xff]   ;;  %v4887_v39 = vld [vmem:[#allocation6 + $0x680] ss:$16 sps:$4 sm:$0xff]  }
  0xcd   :  { %4300 = vmatmul.mubr.msk.bf16.gmra.mxu0 %vm4299_vm8, %v5372_v62  ;;  %4316 = vmatmul.mubr.msk.bf16.gmra.mxu1 %vm4299_vm8, %v5372_v62  ;;  %v4877_v40 = vld [vmem:[#allocation6 + $0x444] ss:$16 sps:$4 sm:$0xff]  }
  0xce   :  { %2320 = vmatpush1.bf16.msra.mxu0 %v4761_v15  ;;  %2433 = vmatpush1.bf16.msra.mxu1 %v4764_v16  ;;  %v438_v49 = vpop.permute.xlu1 %437  ;;  %v435_v50 = vpop.permute.xlu0 %434  ;;  %v4844_v15 = vld [vmem:[#allocation6 + $0x6e4] ss:$16 sps:$4 sm:$0xff]   ;;  %v4839_v16 = vld [vmem:[#allocation6 + $0x4e0] ss:$16 sps:$4 sm:$0xff]  }
  0xcf   :  { %2321 = vmatprep.subr.bf16.mxu0 %v4769_v17  ;;  %2434 = vmatprep.subr.bf16.mxu1 %v4772_v18  ;;  %vm458_vm2 = vcmp.eq.s32.totalorder %v5499_v55, %v438_v49  ;;  %vm457_vm3 = vcmp.eq.s32.totalorder %v5499_v55, %v435_v50  ;;  %v4842_v17 = vld [vmem:[#allocation6 + $0x6e0] ss:$16 sps:$4 sm:$0xff]   ;;  %v4847_v18 = vld [vmem:[#allocation6 + $0x4c4] ss:$16 sps:$4 sm:$0xff]  }
  0xd0   :  { %739 = vmatprep.mubr.bf16.mxu0 %v6472_v1  ;;  %852 = vmatprep.mubr.bf16.mxu1 %v6472_v1  ;;  %vm4307_vm4 = vmpackc.low %vm458_vm2, %vm457_vm3  ;;  %v4884_v49 = vld [vmem:[#allocation6 + $0x420] ss:$16 sps:$4 sm:$0xff]  }
  0xd1   :  { %v5593_v50 = vld [vmem:[#allocation3 + $0xe4] ss:$28 sps:$4 sm:$0xff]  }
  0xd2   :  { %2322 = vmatpush1.bf16.msra.mxu0 %v4767_v21  ;;  %2435 = vmatpush1.bf16.msra.mxu1 %v4770_v22  ;;  %v444_v61 = vpop.permute.xlu1 %443  ;;  %v441_v63 = vpop.permute.xlu0 %440  ;;  %v4857_v21 = vld [vmem:[#allocation6 + $0x6c0] ss:$16 sps:$4 sm:$0xff]   ;;  %v4859_v22 = vld [vmem:[#allocation6 + $0x6c4] ss:$16 sps:$4 sm:$0xff]  }
  0xd3   :  { %2323 = vmatprep.subr.bf16.mxu0 %v4775_v23  ;;  %2436 = vmatprep.subr.bf16.mxu1 %v4778_v24  ;;  %vm460_vm5 = vcmp.eq.s32.totalorder %v5499_v55, %v444_v61  ;;  %vm459_vm6 = vcmp.eq.s32.totalorder %v5499_v55, %v441_v63  ;;  %v4827_v55 = vld [vmem:[#allocation6 + $0x100] ss:$16 sps:$4 sm:$0xff]   ;;  %v5564_v23 = vld [vmem:[#allocation3 + $0x38] ss:$28 sps:$4 sm:$0xff]  }
  0xd4   :  { %vm4309_vm7 = vmpackc.low %vm460_vm5, %vm459_vm6  ;;  %v5566_v24 = vld [vmem:[#allocation3 + $0x40] ss:$28 sps:$4 sm:$0xff]  }
  0xd5   :  { %4302 = vmatmul.mubr.msk.bf16.gmra.mxu0 %vm4301_vm11, %v5372_v62  ;;  %4318 = vmatmul.mubr.msk.bf16.gmra.mxu1 %vm4301_vm11, %v5372_v62  ;;  %v4899_v61 = vld [vmem:[#allocation6 + $0x5e0] ss:$16 sps:$4 sm:$0xff]   ;;  %v5605_v63 = vld [vmem:[#allocation3 + $0x11c] ss:$28 sps:$4 sm:$0xff]  }
  0xd6   :  { %2324 = vmatpush1.bf16.msra.mxu0 %v4773_v25  ;;  %2437 = vmatpush1.bf16.msra.mxu1 %v4776_v26  ;;  %v4856_v25 = vld [vmem:[#allocation6 + $0x4a4] ss:$16 sps:$4 sm:$0xff]  }
  0xd7   :  { %2325 = vmatprep.subr.bf16.mxu0 %v4781_v27  ;;  %2438 = vmatprep.subr.bf16.mxu1 %v4784_v28  ;;  %v4874_v26 = vld [vmem:[#allocation6 + $0x6a4] ss:$16 sps:$4 sm:$0xff]   ;;  %v4854_v27 = vld [vmem:[#allocation6 + $0x4a0] ss:$16 sps:$4 sm:$0xff]  }
  0xd8   :  { %749 = vmatprep.mubr.bf16.mxu0 %v6472_v1  ;;  %862 = vmatprep.mubr.bf16.mxu1 %v6472_v1  ;;  %v5569_v28 = vld [vmem:[#allocation3 + $0x74] ss:$28 sps:$4 sm:$0xff]  }
  0xda   :  { %2326 = vmatpush1.bf16.msra.mxu0 %v4779_v31  ;;  %2439 = vmatpush1.bf16.msra.mxu1 %v4782_v32  ;;  %v4872_v31 = vld [vmem:[#allocation6 + $0x6a0] ss:$16 sps:$4 sm:$0xff]  }
  0xdb   :  { %2327 = vmatprep.subr.bf16.mxu0 %v4787_v33  ;;  %2440 = vmatprep.subr.bf16.mxu1 %v4790_v34  ;;  %v4860_v32 = vld [vmem:[#allocation6 + $0x480] ss:$16 sps:$4 sm:$0xff]   ;;  %v4889_v33 = vld [vmem:[#allocation6 + $0x684] ss:$16 sps:$4 sm:$0xff]  }
  0xdc   :  { %v5577_v34 = vld [vmem:[#allocation3 + $0x70] ss:$28 sps:$4 sm:$0xff]  }
  0xdd   :  { %4304 = vmatmul.mubr.msk.bf16.gmra.mxu0 %vm4303_vm14, %v5372_v62  ;;  %4320 = vmatmul.mubr.msk.bf16.gmra.mxu1 %vm4303_vm14, %v5372_v62 }
  0xde   :  { %2328 = vmatpush2.bf16.msra.mxu0 %v4785_v35  ;;  %2441 = vmatpush2.bf16.msra.mxu1 %v4788_v36  ;;  %v5579_v35 = vld [vmem:[#allocation3 + $0x78] ss:$28 sps:$4 sm:$0xff]  }
  0xdf   :  { %2329 = vmatprep.subr.bf16.mxu0 %v4793_v37  ;;  %2442 = vmatprep.subr.bf16.mxu1 %v4796_v38  ;;  %v4871_v36 = vld [vmem:[#allocation6 + $0x464] ss:$16 sps:$4 sm:$0xff]   ;;  %v4869_v37 = vld [vmem:[#allocation6 + $0x460] ss:$16 sps:$4 sm:$0xff]   ;;  %v5581_v38 = vld [vmem:[#allocation3 + $0xac] ss:$28 sps:$4 sm:$0xff]  }
  0xe0   :  { %759 = vmatprep.mubr.bf16.mxu0 %v6472_v1  ;;  %872 = vmatprep.mubr.bf16.mxu1 %v6472_v1 }
  0xe2   :  { %2330 = vmatpush2.bf16.msra.mxu0 %v4791_v41  ;;  %2443 = vmatpush2.bf16.msra.mxu1 %v4794_v42  ;;  %v5583_v41 = vld [vmem:[#allocation3 + $0xb4] ss:$28 sps:$4 sm:$0xff]  }
  0xe3   :  { %2331 = vmatprep.subr.bf16.mxu0 %v4799_v43  ;;  %2444 = vmatprep.subr.bf16.mxu1 %v4802_v44  ;;  %v4902_v42 = vld [vmem:[#allocation6 + $0x660] ss:$16 sps:$4 sm:$0xff]   ;;  %v4904_v43 = vld [vmem:[#allocation6 + $0x664] ss:$16 sps:$4 sm:$0xff]  }
  0xe4   :  { %v4875_v44 = vld [vmem:[#allocation6 + $0x440] ss:$16 sps:$4 sm:$0xff]  }
  0xe5   :  { %4306 = vmatmul.mubr.msk.bf16.gmra.mxu0 %vm4305_vm1, %v5372_v62  ;;  %4322 = vmatmul.mubr.msk.bf16.gmra.mxu1 %vm4305_vm1, %v5372_v62 }
  0xe6   :  { %2332 = vmatpush2.bf16.msra.mxu0 %v4797_v45  ;;  %2445 = vmatpush2.bf16.msra.mxu1 %v4800_v46  ;;  %v4919_v45 = vld [vmem:[#allocation6 + $0x644] ss:$16 sps:$4 sm:$0xff]  }
  0xe7   :  { %2333 = vmatprep.subr.bf16.mxu0 %v4805_v47  ;;  %2446 = vmatprep.subr.bf16.mxu1 %v4808_v48  ;;  %v5589_v46 = vld [vmem:[#allocation3 + $0xa8] ss:$28 sps:$4 sm:$0xff]   ;;  %v5591_v47 = vld [vmem:[#allocation3 + $0xb0] ss:$28 sps:$4 sm:$0xff]  }
  0xe8   :  { %769 = vmatprep.mubr.bf16.mxu0 %v6472_v1  ;;  %882 = vmatprep.mubr.bf16.mxu1 %v6472_v1  ;;  %v4886_v48 = vld [vmem:[#allocation6 + $0x424] ss:$16 sps:$4 sm:$0xff]  }
  0xea   :  { %2334 = vmatpush2.bf16.msra.mxu0 %v4803_v51  ;;  %2447 = vmatpush2.bf16.msra.mxu1 %v4806_v52  ;;  %v4892_v51 = vld [vmem:[#allocation6 + $0x404] ss:$16 sps:$4 sm:$0xff]   ;;  %v5595_v52 = vld [vmem:[#allocation3 + $0xec] ss:$28 sps:$4 sm:$0xff]  }
  0xeb   :  { %2335 = vmatprep.subr.bf16.mxu0 %v4811_v54  ;;  %2448 = vmatprep.subr.bf16.mxu1 %v4814_v56  ;;  %v4917_v54 = vld [vmem:[#allocation6 + $0x640] ss:$16 sps:$4 sm:$0xff]  }
  0xec   :  { %v4890_v56 = vld [vmem:[#allocation6 + $0x400] ss:$16 sps:$4 sm:$0xff]  }
  0xed   :  { %4308 = vmatmul.mubr.msk.bf16.gmra.mxu0 %vm4307_vm4, %v5372_v62  ;;  %4324 = vmatmul.mubr.msk.bf16.gmra.mxu1 %vm4307_vm4, %v5372_v62 }
  0xee   :  { %2336 = vmatpush2.bf16.msra.mxu0 %v4809_v57  ;;  %2449 = vmatpush2.bf16.msra.mxu1 %v4812_v58  ;;  %v4934_v57 = vld [vmem:[#allocation6 + $0x624] ss:$16 sps:$4 sm:$0xff]   ;;  %v5601_v58 = vld [vmem:[#allocation3 + $0xe0] ss:$28 sps:$4 sm:$0xff]  }
  0xef   :  { %2337 = vmatprep.subr.bf16.mxu0 %v4817_v59  ;;  %2450 = vmatprep.subr.bf16.mxu1 %v4820_v60  ;;  %v5603_v59 = vld [vmem:[#allocation3 + $0xe8] ss:$28 sps:$4 sm:$0xff]  }
  0xf0   :  { %779 = vmatprep.mubr.bf16.mxu0 %v6472_v1  ;;  %892 = vmatprep.mubr.bf16.mxu1 %v6472_v1  ;;  %v4901_v60 = vld [vmem:[#allocation6 + $0x5e4] ss:$16 sps:$4 sm:$0xff]  }
  0xf2   :  { %2338 = vmatpush2.bf16.msra.mxu0 %v4815_v0  ;;  %2451 = vmatpush2.bf16.msra.mxu1 %v4818_v2  ;;  %v4932_v0 = vld [vmem:[#allocation6 + $0x620] ss:$16 sps:$4 sm:$0xff]   ;;  %v4907_v2 = vld [vmem:[#allocation6 + $0x5c4] ss:$16 sps:$4 sm:$0xff]  }
  0xf3   :  { %2339 = vmatprep.subr.bf16.mxu0 %v4823_v3  ;;  %2452 = vmatprep.subr.bf16.mxu1 %v4826_v4  ;;  %v5607_v3 = vld [vmem:[#allocation3 + $0x124] ss:$28 sps:$4 sm:$0xff]  }
  0xf4   :  { %v4947_v4 = vld [vmem:[#allocation6 + $0x600] ss:$16 sps:$4 sm:$0xff]  }
  0xf5   :  { %4310 = vmatmul.mubr.msk.bf16.gmra.mxu0 %vm4309_vm7, %v5372_v62  ;;  %4326 = vmatmul.mubr.msk.bf16.gmra.mxu1 %vm4309_vm7, %v5372_v62  ;;  %v5557_v62 = vld [vmem:[#allocation3 + $0x3c] ss:$28 sps:$4 sm:$0xff]  }
  0xf6   :  { %2340 = vmatpush2.bf16.msra.mxu0 %v4821_v5  ;;  %2453 = vmatpush2.bf16.msra.mxu1 %v4824_v6  ;;  %v4949_v5 = vld [vmem:[#allocation6 + $0x604] ss:$16 sps:$4 sm:$0xff]   ;;  %v4905_v6 = vld [vmem:[#allocation6 + $0x5c0] ss:$16 sps:$4 sm:$0xff]  }
  0xf7   :  { %2341 = vmatprep.subr.bf16.mxu0 %v4829_v7  ;;  %2454 = vmatprep.subr.bf16.mxu1 %v4832_v8  ;;  %v4962_v7 = vld [vmem:[#allocation6 + $0x2ec] ss:$16 sps:$4 sm:$0xff]   ;;  %v5613_v8 = vld [vmem:[#allocation3 + $0x118] ss:$28 sps:$4 sm:$0xff]  }
  0xf8   :  { %2343 = vmatprep.mubr.bf16.mxu0 %v5545_v9  ;;  %2456 = vmatprep.mubr.bf16.mxu1 %v5547_v10 }
  0xfa   :  { %2342 = vmatpush2.bf16.msra.mxu0 %v4827_v55  ;;  %2455 = vmatpush2.bf16.msra.mxu1 %v4830_v11  ;;  %v5615_v55 = vld [vmem:[#allocation3 + $0x120] ss:$28 sps:$4 sm:$0xff]   ;;  %v4916_v11 = vld [vmem:[#allocation6 + $0x5a4] ss:$16 sps:$4 sm:$0xff]  }
  0xfb   :  { %2537 = vmatprep.subr.bf16.mxu0 %v4841_v14  ;;  %2650 = vmatprep.subr.bf16.mxu1 %v4844_v15  ;;  %v4914_v14 = vld [vmem:[#allocation6 + $0x5a0] ss:$16 sps:$4 sm:$0xff]  }
  0xfc   :  { %v5617_v15 = vld [vmem:[#allocation3 + $0x154] ss:$28 sps:$4 sm:$0xff]  }
  0xfd   :  { %2344 = vmatmul.mubr.bf16.vlgmr.msra.gmra.mxu0 %v5551_v12  ;;  %2457 = vmatmul.mubr.bf16.vlgmr.msra.gmra.mxu1 %v5553_v13 }
  0xfe   :  { %2538 = vmatpush1.bf16.msra.mxu0 %v4839_v16  ;;  %2651 = vmatpush1.bf16.msra.mxu1 %v4842_v17  ;;  %v4922_v16 = vld [vmem:[#allocation6 + $0x584] ss:$16 sps:$4 sm:$0xff]   ;;  %v5619_v17 = vld [vmem:[#allocation3 + $0x15c] ss:$28 sps:$4 sm:$0xff]  }
  0xff   :  { %2539 = vmatprep.subr.bf16.mxu0 %v4847_v18  ;;  %2353 = vmatprep.mubr.bf16.mxu0 %v5557_v62  ;;  %v4920_v18 = vld [vmem:[#allocation6 + $0x580] ss:$16 sps:$4 sm:$0xff]  }
 0x100   :  { %2466 = vmatprep.mubr.bf16.mxu1 %v5559_v19  ;;  %2652 = vmatprep.subr.bf16.mxu1 %v4859_v22  ;;  %v5627_v22 = vld [vmem:[#allocation3 + $0x158] ss:$28 sps:$4 sm:$0xff]  }
 0x102   :  { %2540 = vmatpush1.bf16.msra.mxu0 %v4845_v20  ;;  %2653 = vmatpush1.bf16.msra.mxu1 %v4857_v21  ;;  %v4931_v20 = vld [vmem:[#allocation6 + $0x564] ss:$16 sps:$4 sm:$0xff]   ;;  %v5625_v21 = vld [vmem:[#allocation3 + $0x150] ss:$28 sps:$4 sm:$0xff]  }
 0x103   :  { %2541 = vmatprep.subr.bf16.mxu0 %v4856_v25  ;;  %2654 = vmatprep.subr.bf16.mxu1 %v4874_v26  ;;  %v4929_v25 = vld [vmem:[#allocation6 + $0x560] ss:$16 sps:$4 sm:$0xff]   ;;  %v5629_v26 = vld [vmem:[#allocation3 + $0x18c] ss:$28 sps:$4 sm:$0xff]  }
 0x105   :  { %2354 = vmatmul.mubr.bf16.gmra.mxu0 %v5564_v23  ;;  %2467 = vmatmul.mubr.bf16.gmra.mxu1 %v5566_v24 }
 0x106   :  { %2542 = vmatpush1.bf16.msra.mxu0 %v4854_v27  ;;  %2363 = vmatprep.mubr.bf16.mxu0 %v5569_v28  ;;  %v4937_v27 = vld [vmem:[#allocation6 + $0x544] ss:$16 sps:$4 sm:$0xff]  }
 0x107   :  { %2543 = vmatprep.subr.bf16.mxu0 %v4862_v29  ;;  %2476 = vmatprep.mubr.bf16.mxu1 %v5571_v30  ;;  %v5631_v29 = vld [vmem:[#allocation3 + $0x194] ss:$28 sps:$4 sm:$0xff]  }
 0x108   :  { %2655 = vmatpush1.bf16.msra.mxu1 %v4872_v31  ;;  %v4935_v31 = vld [vmem:[#allocation6 + $0x540] ss:$16 sps:$4 sm:$0xff]  }
 0x109   :  { %2656 = vmatprep.subr.bf16.mxu1 %v4889_v33  ;;  %v5637_v33 = vld [vmem:[#allocation3 + $0x188] ss:$28 sps:$4 sm:$0xff]  }
 0x10a   :  { %2544 = vmatpush1.bf16.msra.mxu0 %v4860_v32  ;;  %v4946_v32 = vld [vmem:[#allocation6 + $0x524] ss:$16 sps:$4 sm:$0xff]  }
 0x10b   :  { %2545 = vmatprep.subr.bf16.mxu0 %v4871_v36  ;;  %v5639_v36 = vld [vmem:[#allocation3 + $0x190] ss:$28 sps:$4 sm:$0xff]  }
 0x10c   :  { %2657 = vmatpush1.bf16.msra.mxu1 %v4887_v39  ;;  %v5641_v39 = vld [vmem:[#allocation3 + $0x14] ss:$28 sps:$4 sm:$0xff]  }
 0x10d   :  { %2364 = vmatmul.mubr.bf16.gmra.mxu0 %v5577_v34  ;;  %2477 = vmatmul.mubr.bf16.gmra.mxu1 %v5579_v35 }
 0x10e   :  { %2546 = vmatpush1.bf16.msra.mxu0 %v4869_v37  ;;  %2373 = vmatprep.mubr.bf16.mxu0 %v5581_v38  ;;  %v4944_v37 = vld [vmem:[#allocation6 + $0x520] ss:$16 sps:$4 sm:$0xff]  }
 0x10f   :  { %2547 = vmatprep.subr.bf16.mxu0 %v4877_v40  ;;  %2486 = vmatprep.mubr.bf16.mxu1 %v5583_v41  ;;  %v4952_v40 = vld [vmem:[#allocation6 + $0x504] ss:$16 sps:$4 sm:$0xff]  }
 0x110   :  { %2658 = vmatprep.subr.bf16.mxu1 %v4904_v43  ;;  %v4959_v43 = vld [vmem:[#allocation6 + $0xec] ss:$16 sps:$4 sm:$0xff]  }
 0x111   :  { %2659 = vmatpush1.bf16.msra.mxu1 %v4902_v42  ;;  %v4950_v42 = vld [vmem:[#allocation6 + $0x500] ss:$16 sps:$4 sm:$0xff]  }
 0x112   :  { %2548 = vmatpush1.bf16.msra.mxu0 %v4875_v44  ;;  %2660 = vmatprep.subr.bf16.mxu1 %v4919_v45  ;;  %v5647_v44 = vld [vmem:[#allocation3 + $0x10] ss:$28 sps:$4 sm:$0xff]   ;;  %v5649_v45 = vld [vmem:[#allocation3 + $0x18] ss:$28 sps:$4 sm:$0xff]  }
 0x113   :  { %2549 = vmatprep.subr.bf16.mxu0 %v4886_v48  ;;  %v4957_v48 = vld [vmem:[#allocation6 + $0xe8] ss:$16 sps:$4 sm:$0xff]  }
 0x115   :  { %2374 = vmatmul.mubr.bf16.gmra.mxu0 %v5589_v46  ;;  %2487 = vmatmul.mubr.bf16.gmra.mxu1 %v5591_v47 }
 0x116   :  { %2550 = vmatpush1.bf16.msra.mxu0 %v4884_v49  ;;  %2383 = vmatprep.mubr.bf16.mxu0 %v5593_v50  ;;  %v4960_v49 = vld [vmem:[#allocation6 + $0x2e8] ss:$16 sps:$4 sm:$0xff]  }
 0x117   :  { %2551 = vmatprep.subr.bf16.mxu0 %v4892_v51  ;;  %2496 = vmatprep.mubr.bf16.mxu1 %v5595_v52  ;;  %v4965_v51 = vld [vmem:[#allocation6 + $0xcc] ss:$16 sps:$4 sm:$0xff]  }
 0x118   :  { %2661 = vmatpush1.bf16.msra.mxu1 %v4917_v54  ;;  %v4968_v54 = vld [vmem:[#allocation6 + $0x2cc] ss:$16 sps:$4 sm:$0xff]  }
 0x119   :  { %2662 = vmatprep.subr.bf16.mxu1 %v4934_v57  ;;  %v4963_v57 = vld [vmem:[#allocation6 + $0xc8] ss:$16 sps:$4 sm:$0xff]  }
 0x11a   :  { %2552 = vmatpush1.bf16.msra.mxu0 %v4890_v56  ;;  %v5651_v56 = vld [vmem:[#allocation3 + $0x4c] ss:$28 sps:$4 sm:$0xff]  }
 0x11b   :  { %2553 = vmatprep.subr.bf16.mxu0 %v4901_v60  ;;  %v4966_v60 = vld [vmem:[#allocation6 + $0x2c8] ss:$16 sps:$4 sm:$0xff]  }
 0x11c   :  { %2663 = vmatpush1.bf16.msra.mxu1 %v4932_v0  ;;  %v4978_v0 = vld [vmem:[#allocation6 + $0x2ac] ss:$16 sps:$4 sm:$0xff]  }
 0x11d   :  { %2384 = vmatmul.mubr.bf16.gmra.mxu0 %v5601_v58  ;;  %2497 = vmatmul.mubr.bf16.gmra.mxu1 %v5603_v59 }
 0x11e   :  { %2554 = vmatpush2.bf16.msra.mxu0 %v4899_v61  ;;  %2393 = vmatprep.mubr.bf16.mxu0 %v5605_v63  ;;  %v4975_v61 = vld [vmem:[#allocation6 + $0xac] ss:$16 sps:$4 sm:$0xff]  }
 0x11f   :  { %2555 = vmatprep.subr.bf16.mxu0 %v4907_v2  ;;  %2506 = vmatprep.mubr.bf16.mxu1 %v5607_v3  ;;  %v5657_v2 = vld [vmem:[#allocation3 + $0x48] ss:$28 sps:$4 sm:$0xff]  }
 0x120   :  { %2664 = vmatprep.subr.bf16.mxu1 %v4949_v5  ;;  %v4973_v5 = vld [vmem:[#allocation6 + $0xa8] ss:$16 sps:$4 sm:$0xff]  }
 0x121   :  { %2665 = vmatpush1.bf16.msra.mxu1 %v4947_v4  ;;  %v5659_v4 = vld [vmem:[#allocation3 + $0x50] ss:$28 sps:$4 sm:$0xff]  }
 0x122   :  { %2556 = vmatpush2.bf16.msra.mxu0 %v4905_v6  ;;  %2876 = vmatprep.subr.bf16.mxu1 %v4962_v7  ;;  %v4976_v6 = vld [vmem:[#allocation6 + $0x2a8] ss:$16 sps:$4 sm:$0xff]   ;;  %v4981_v7 = vld [vmem:[#allocation6 + $0x8c] ss:$16 sps:$4 sm:$0xff]  }
 0x123   :  { %2557 = vmatprep.subr.bf16.mxu0 %v4916_v11  ;;  %v4984_v11 = vld [vmem:[#allocation6 + $0x28c] ss:$16 sps:$4 sm:$0xff]  }
 0x125   :  { %2394 = vmatmul.mubr.bf16.gmra.mxu0 %v5613_v8  ;;  %2507 = vmatmul.mubr.bf16.gmra.mxu1 %v5615_v55 }
 0x126   :  { %2558 = vmatpush2.bf16.msra.mxu0 %v4914_v14  ;;  %2403 = vmatprep.mubr.bf16.mxu0 %v5617_v15  ;;  %v5661_v14 = vld [vmem:[#allocation3 + $0x84] ss:$28 sps:$4 sm:$0xff]  }
 0x127   :  { %2559 = vmatprep.subr.bf16.mxu0 %v4922_v16  ;;  %2516 = vmatprep.mubr.bf16.mxu1 %v5619_v17  ;;  %v4979_v16 = vld [vmem:[#allocation6 + $0x88] ss:$16 sps:$4 sm:$0xff]  }
 0x12a   :  { %2560 = vmatpush2.bf16.msra.mxu0 %v4920_v18  ;;  %v4982_v18 = vld [vmem:[#allocation6 + $0x288] ss:$16 sps:$4 sm:$0xff]  }
 0x12b   :  { %2561 = vmatprep.subr.bf16.mxu0 %v4931_v20  ;;  %v4991_v20 = vld [vmem:[#allocation6 + $0x6c] ss:$16 sps:$4 sm:$0xff]  }
 0x12d   :  { %2404 = vmatmul.mubr.bf16.gmra.mxu0 %v5625_v21  ;;  %2517 = vmatmul.mubr.bf16.gmra.mxu1 %v5627_v22 }
 0x12e   :  { %2562 = vmatpush2.bf16.msra.mxu0 %v4929_v25  ;;  %2413 = vmatprep.mubr.bf16.mxu0 %v5629_v26  ;;  %v4994_v25 = vld [vmem:[#allocation6 + $0x26c] ss:$16 sps:$4 sm:$0xff]  }
 0x12f   :  { %2563 = vmatprep.subr.bf16.mxu0 %v4937_v27  ;;  %2526 = vmatprep.mubr.bf16.mxu1 %v5631_v29  ;;  %v5667_v27 = vld [vmem:[#allocation3 + $0x80] ss:$28 sps:$4 sm:$0xff]  }
 0x132   :  { %2564 = vmatpush2.bf16.msra.mxu0 %v4935_v31  ;;  %v5669_v31 = vld [vmem:[#allocation3 + $0x88] ss:$28 sps:$4 sm:$0xff]  }
 0x133   :  { %2565 = vmatprep.subr.bf16.mxu0 %v4946_v32  ;;  %v4989_v32 = vld [vmem:[#allocation6 + $0x68] ss:$16 sps:$4 sm:$0xff]  }
 0x135   :  { %2414 = vmatmul.mubr.bf16.gmra.mxu0 %v5637_v33  ;;  %2527 = vmatmul.mubr.bf16.gmra.mxu1 %v5639_v36 }
 0x136   :  { %2566 = vmatpush2.bf16.msra.mxu0 %v4944_v37  ;;  %2569 = vmatprep.mubr.bf16.mxu0 %v5641_v39  ;;  %v4992_v37 = vld [vmem:[#allocation6 + $0x268] ss:$16 sps:$4 sm:$0xff]  }
 0x137   :  { %2567 = vmatprep.subr.bf16.mxu0 %v4952_v40  ;;  %2682 = vmatprep.mubr.bf16.mxu1 %v6472_v1  ;;  %v4997_v40 = vld [vmem:[#allocation6 + $0x4c] ss:$16 sps:$4 sm:$0xff]  }
 0x13a   :  { %2568 = vmatpush2.bf16.msra.mxu0 %v4950_v42  ;;  %v5000_v42 = vld [vmem:[#allocation6 + $0x24c] ss:$16 sps:$4 sm:$0xff]  }
 0x13b   :  { %2763 = vmatprep.subr.bf16.mxu0 %v4959_v43  ;;  %v5671_v43 = vld [vmem:[#allocation3 + $0xbc] ss:$28 sps:$4 sm:$0xff]  }
 0x13d   :  { %2570 = vmatmul.mubr.bf16.vlgmr.msra.gmra.mxu0 %v5647_v44  ;;  %2683 = vmatmul.mubr.bf16.vlgmr.msra.gmra.mxu1 %v5649_v45 }
 0x13e   :  { %2764 = vmatpush1.bf16.msra.mxu0 %v4957_v48  ;;  %2877 = vmatpush1.bf16.msra.mxu1 %v4960_v49  ;;  %v4995_v48 = vld [vmem:[#allocation6 + $0x48] ss:$16 sps:$4 sm:$0xff]  }
 0x13f   :  { %2765 = vmatprep.subr.bf16.mxu0 %v4965_v51  ;;  %2878 = vmatprep.subr.bf16.mxu1 %v4968_v54  ;;  %v4998_v49 = vld [vmem:[#allocation6 + $0x248] ss:$16 sps:$4 sm:$0xff]   ;;  %v5007_v51 = vld [vmem:[#allocation6 + $0x2c] ss:$16 sps:$4 sm:$0xff]  }
 0x140   :  { %2579 = vmatprep.mubr.bf16.mxu0 %v5651_v56  ;;  %2692 = vmatprep.mubr.bf16.mxu1 %v6472_v1  ;;  %v5010_v54 = vld [vmem:[#allocation6 + $0x22c] ss:$16 sps:$4 sm:$0xff]  }
 0x142   :  { %2766 = vmatpush1.bf16.msra.mxu0 %v4963_v57  ;;  %2879 = vmatpush1.bf16.msra.mxu1 %v4966_v60  ;;  %v5677_v57 = vld [vmem:[#allocation3 + $0xb8] ss:$28 sps:$4 sm:$0xff]   ;;  %v5679_v60 = vld [vmem:[#allocation3 + $0xc0] ss:$28 sps:$4 sm:$0xff]  }
 0x143   :  { %2767 = vmatprep.subr.bf16.mxu0 %v4975_v61  ;;  %2880 = vmatprep.subr.bf16.mxu1 %v4978_v0  ;;  %v5005_v61 = vld [vmem:[#allocation6 + $0x28] ss:$16 sps:$4 sm:$0xff]  }
 0x144   :  { %v5008_v0 = vld [vmem:[#allocation6 + $0x228] ss:$16 sps:$4 sm:$0xff]  }
 0x145   :  { %2580 = vmatmul.mubr.bf16.gmra.mxu0 %v5657_v2  ;;  %2693 = vmatmul.mubr.bf16.gmra.mxu1 %v5659_v4 }
 0x146   :  { %2768 = vmatpush1.bf16.msra.mxu0 %v4973_v5  ;;  %2881 = vmatpush1.bf16.msra.mxu1 %v4976_v6  ;;  %v5013_v5 = vld [vmem:[#allocation6 + $0xc] ss:$16 sps:$4 sm:$0xff]  }
 0x147   :  { %2769 = vmatprep.subr.bf16.mxu0 %v4981_v7  ;;  %2882 = vmatprep.subr.bf16.mxu1 %v4984_v11  ;;  %v5016_v6 = vld [vmem:[#allocation6 + $0x20c] ss:$16 sps:$4 sm:$0xff]   ;;  %v5681_v7 = vld [vmem:[#allocation3 + $0xf4] ss:$28 sps:$4 sm:$0xff]   ;;  %v5011_v11 = vld [vmem:[#allocation6 + $0x8] ss:$16 sps:$4 sm:$0xff]  }
 0x148   :  { %2589 = vmatprep.mubr.bf16.mxu0 %v5661_v14  ;;  %2702 = vmatprep.mubr.bf16.mxu1 %v6472_v1 }
 0x14a   :  { %2770 = vmatpush1.bf16.msra.mxu0 %v4979_v16  ;;  %2883 = vmatpush1.bf16.msra.mxu1 %v4982_v18  ;;  %v5014_v16 = vld [vmem:[#allocation6 + $0x208] ss:$16 sps:$4 sm:$0xff]   ;;  %v5023_v18 = vld [vmem:[#allocation6 + $0x1ec] ss:$16 sps:$4 sm:$0xff]  }
 0x14b   :  { %2771 = vmatprep.subr.bf16.mxu0 %v4991_v20  ;;  %2884 = vmatprep.subr.bf16.mxu1 %v4994_v25  ;;  %v5026_v20 = vld [vmem:[#allocation6 + $0x3ec] ss:$16 sps:$4 sm:$0xff]  }
 0x14c   :  { %v5687_v25 = vld [vmem:[#allocation3 + $0xf0] ss:$28 sps:$4 sm:$0xff]  }
 0x14d   :  { %2590 = vmatmul.mubr.bf16.gmra.mxu0 %v5667_v27  ;;  %2703 = vmatmul.mubr.bf16.gmra.mxu1 %v5669_v31 }
 0x14e   :  { %2772 = vmatpush1.bf16.msra.mxu0 %v4989_v32  ;;  %2885 = vmatpush1.bf16.msra.mxu1 %v4992_v37  ;;  %v5689_v32 = vld [vmem:[#allocation3 + $0xf8] ss:$28 sps:$4 sm:$0xff]  }
 0x14f   :  { %2773 = vmatprep.subr.bf16.mxu0 %v4997_v40  ;;  %2886 = vmatprep.subr.bf16.mxu1 %v5000_v42  ;;  %v5021_v37 = vld [vmem:[#allocation6 + $0x1e8] ss:$16 sps:$4 sm:$0xff]   ;;  %v5029_v42 = vld [vmem:[#allocation6 + $0x1cc] ss:$16 sps:$4 sm:$0xff]  }
 0x150   :  { %2599 = vmatprep.mubr.bf16.mxu0 %v5671_v43  ;;  %2712 = vmatprep.mubr.bf16.mxu1 %v6472_v1  ;;  %v5024_v40 = vld [vmem:[#allocation6 + $0x3e8] ss:$16 sps:$4 sm:$0xff]  }
 0x152   :  { %2774 = vmatpush1.bf16.msra.mxu0 %v4995_v48  ;;  %2887 = vmatpush1.bf16.msra.mxu1 %v4998_v49  ;;  %v5032_v48 = vld [vmem:[#allocation6 + $0x3cc] ss:$16 sps:$4 sm:$0xff]  }
 0x153   :  { %2775 = vmatprep.subr.bf16.mxu0 %v5007_v51  ;;  %2888 = vmatprep.subr.bf16.mxu1 %v5010_v54  ;;  %v5691_v49 = vld [vmem:[#allocation3 + $0x12c] ss:$28 sps:$4 sm:$0xff]  }
 0x154   :  { %v5027_v51 = vld [vmem:[#allocation6 + $0x1c8] ss:$16 sps:$4 sm:$0xff]  }
 0x155   :  { %2600 = vmatmul.mubr.bf16.gmra.mxu0 %v5677_v57  ;;  %2713 = vmatmul.mubr.bf16.gmra.mxu1 %v5679_v60  ;;  %v5030_v54 = vld [vmem:[#allocation6 + $0x3c8] ss:$16 sps:$4 sm:$0xff]  }
 0x156   :  { %2776 = vmatpush1.bf16.msra.mxu0 %v5005_v61  ;;  %2889 = vmatpush1.bf16.msra.mxu1 %v5008_v0  ;;  %v5039_v61 = vld [vmem:[#allocation6 + $0x1ac] ss:$16 sps:$4 sm:$0xff]  }
 0x157   :  { %2777 = vmatprep.subr.bf16.mxu0 %v5013_v5  ;;  %2890 = vmatprep.subr.bf16.mxu1 %v5016_v6  ;;  %v5042_v0 = vld [vmem:[#allocation6 + $0x3ac] ss:$16 sps:$4 sm:$0xff]   ;;  %v5697_v5 = vld [vmem:[#allocation3 + $0x128] ss:$28 sps:$4 sm:$0xff]  }
 0x158   :  { %2609 = vmatprep.mubr.bf16.mxu0 %v5681_v7  ;;  %2722 = vmatprep.mubr.bf16.mxu1 %v6472_v1  ;;  %v5699_v6 = vld [vmem:[#allocation3 + $0x130] ss:$28 sps:$4 sm:$0xff]  }
 0x159   :  { %6486 = vst [vmem:[#allocation16_spill] sm:$0xff] %v5699_v6 }
 0x15a   :  { %2778 = vmatpush1.bf16.msra.mxu0 %v5011_v11  ;;  %2891 = vmatpush1.bf16.msra.mxu1 %v5014_v16  ;;  %v5037_v11 = vld [vmem:[#allocation6 + $0x1a8] ss:$16 sps:$4 sm:$0xff]  }
 0x15b   :  { %2779 = vmatprep.subr.bf16.mxu0 %v5023_v18  ;;  %2892 = vmatprep.subr.bf16.mxu1 %v5026_v20  ;;  %v5040_v16 = vld [vmem:[#allocation6 + $0x3a8] ss:$16 sps:$4 sm:$0xff]   ;;  %v5045_v18 = vld [vmem:[#allocation6 + $0x18c] ss:$16 sps:$4 sm:$0xff]  }
 0x15c   :  { %v5048_v20 = vld [vmem:[#allocation6 + $0x38c] ss:$16 sps:$4 sm:$0xff]  }
 0x15d   :  { %2610 = vmatmul.mubr.bf16.gmra.mxu0 %v5687_v25  ;;  %2723 = vmatmul.mubr.bf16.gmra.mxu1 %v5689_v32 }
 0x15e   :  { %2780 = vmatpush2.bf16.msra.mxu0 %v5021_v37  ;;  %2893 = vmatpush2.bf16.msra.mxu1 %v5024_v40  ;;  %v5701_v37 = vld [vmem:[#allocation3 + $0x164] ss:$28 sps:$4 sm:$0xff]   ;;  %v5043_v40 = vld [vmem:[#allocation6 + $0x188] ss:$16 sps:$4 sm:$0xff]  }
 0x15f   :  { %2781 = vmatprep.subr.bf16.mxu0 %v5029_v42  ;;  %2894 = vmatprep.subr.bf16.mxu1 %v5032_v48  ;;  %6487 = vst [vmem:[#allocation17_spill] sm:$0xff] %v5701_v37  ;;  %v5046_v42 = vld [vmem:[#allocation6 + $0x388] ss:$16 sps:$4 sm:$0xff]   ;;  %v5055_v48 = vld [vmem:[#allocation6 + $0x16c] ss:$16 sps:$4 sm:$0xff]  }
 0x160   :  { %2619 = vmatprep.mubr.bf16.mxu0 %v5691_v49  ;;  %2732 = vmatprep.mubr.bf16.mxu1 %v6472_v1 }
 0x162   :  { %2782 = vmatpush2.bf16.msra.mxu0 %v5027_v51  ;;  %2895 = vmatpush2.bf16.msra.mxu1 %v5030_v54  ;;  %v5058_v51 = vld [vmem:[#allocation6 + $0x36c] ss:$16 sps:$4 sm:$0xff]  }
 0x163   :  { %2783 = vmatprep.subr.bf16.mxu0 %v5039_v61  ;;  %2896 = vmatprep.subr.bf16.mxu1 %v5042_v0  ;;  %v5707_v54 = vld [vmem:[#allocation3 + $0x160] ss:$28 sps:$4 sm:$0xff]   ;;  %v5709_v61 = vld [vmem:[#allocation3 + $0x168] ss:$28 sps:$4 sm:$0xff]  }
 0x164   :  { %6488 = vst [vmem:[#allocation18_spill] sm:$0xff] %v5707_v54  ;;  %6489 = vst [vmem:[#allocation19_spill] sm:$0xff] %v5709_v61  ;;  %v5053_v0 = vld [vmem:[#allocation6 + $0x168] ss:$16 sps:$4 sm:$0xff]  }
 0x165   :  { %2620 = vmatmul.mubr.bf16.gmra.mxu0 %v5697_v5  ;;  %2733 = vmatmul.mubr.bf16.gmra.mxu1 %v5699_v6  ;;  %v5086_v6 = vld [vmem:[#allocation6 + $0x6ec] ss:$16 sps:$4 sm:$0xff]  }
 0x166   :  { %2784 = vmatpush2.bf16.msra.mxu0 %v5037_v11  ;;  %2897 = vmatpush2.bf16.msra.mxu1 %v5040_v16  ;;  %v5061_v11 = vld [vmem:[#allocation6 + $0x14c] ss:$16 sps:$4 sm:$0xff]  }
 0x167   :  { %2785 = vmatprep.subr.bf16.mxu0 %v5045_v18  ;;  %2898 = vmatprep.subr.bf16.mxu1 %v5048_v20  ;;  %v5064_v16 = vld [vmem:[#allocation6 + $0x34c] ss:$16 sps:$4 sm:$0xff]   ;;  %v5059_v20 = vld [vmem:[#allocation6 + $0x148] ss:$16 sps:$4 sm:$0xff]  }
 0x168   :  { %2629 = vmatprep.mubr.bf16.mxu0 %v5701_v37  ;;  %2742 = vmatprep.mubr.bf16.mxu1 %v6472_v1  ;;  %v5711_v18 = vld [vmem:[#allocation3 + $0x19c] ss:$28 sps:$4 sm:$0xff]  }
 0x169   :  { %6490 = vst [vmem:[#allocation20_spill] sm:$0xff] %v5711_v18  ;;  %v5062_v1 = vld [vmem:[#allocation6 + $0x348] ss:$16 sps:$4 sm:$0xff]   ;;  %v5719_v37 = vld [vmem:[#allocation3 + $0x1a0] ss:$28 sps:$4 sm:$0xff]  }
 0x16a   :  { %2786 = vmatpush2.bf16.msra.mxu0 %v5043_v40  ;;  %2899 = vmatpush2.bf16.msra.mxu1 %v5046_v42  ;;  %v5071_v40 = vld [vmem:[#allocation6 + $0x12c] ss:$16 sps:$4 sm:$0xff]  }
 0x16b   :  { %2787 = vmatprep.subr.bf16.mxu0 %v5055_v48  ;;  %2900 = vmatprep.subr.bf16.mxu1 %v5058_v51  ;;  %v5074_v42 = vld [vmem:[#allocation6 + $0x32c] ss:$16 sps:$4 sm:$0xff]   ;;  %v6491_v48 = vmov 0   ;;  %v5717_v51 = vld [vmem:[#allocation3 + $0x198] ss:$28 sps:$4 sm:$0xff]  }
 0x16d   :  { %2630 = vmatmul.mubr.bf16.gmra.mxu0 %v5707_v54  ;;  %2743 = vmatmul.mubr.bf16.gmra.mxu1 %v5709_v61  ;;  %v5069_v54 = vld [vmem:[#allocation6 + $0x128] ss:$16 sps:$4 sm:$0xff]  }
 0x16e   :  { %2788 = vmatpush2.bf16.msra.mxu0 %v5053_v0  ;;  %2901 = vmatpush2.bf16.msra.mxu1 %v5056_v53  ;;  %v5072_v61 = vld [vmem:[#allocation6 + $0x328] ss:$16 sps:$4 sm:$0xff]   ;;  %v5077_v53 = vld [vmem:[#allocation6 + $0x10c] ss:$16 sps:$4 sm:$0xff]  }
 0x16f   :  { %2789 = vmatprep.subr.bf16.mxu0 %v5061_v11  ;;  %2902 = vmatprep.subr.bf16.mxu1 %v5064_v16  ;;  %v5080_v0 = vld [vmem:[#allocation6 + $0x30c] ss:$16 sps:$4 sm:$0xff]   ;;  %v5075_v11 = vld [vmem:[#allocation6 + $0x108] ss:$16 sps:$4 sm:$0xff]  }
 0x170   :  { %2639 = vmatprep.mubr.bf16.mxu0 %v5711_v18  ;;  %2752 = vmatprep.mubr.bf16.mxu1 %v6491_v48  ;;  %v5078_v16 = vld [vmem:[#allocation6 + $0x308] ss:$16 sps:$4 sm:$0xff]   ;;  %v5083_v18 = vld [vmem:[#allocation6 + $0x4ec] ss:$16 sps:$4 sm:$0xff]  }
 0x172   :  { %2790 = vmatpush2.bf16.msra.mxu0 %v5059_v20  ;;  %2903 = vmatpush2.bf16.msra.mxu1 %v5062_v1  ;;  %v5081_v1 = vld [vmem:[#allocation6 + $0x4e8] ss:$16 sps:$4 sm:$0xff]  }
 0x173   :  { %2791 = vmatprep.subr.bf16.mxu0 %v5071_v40  ;;  %2904 = vmatprep.subr.bf16.mxu1 %v5074_v42  ;;  %v5084_v20 = vld [vmem:[#allocation6 + $0x6e8] ss:$16 sps:$4 sm:$0xff]   ;;  %v5089_v40 = vld [vmem:[#allocation6 + $0x4cc] ss:$16 sps:$4 sm:$0xff]  }
 0x174   :  { %v5095_v42 = vld [vmem:[#allocation6 + $0x6cc] ss:$16 sps:$4 sm:$0xff]  }
 0x175   :  { %2640 = vmatmul.mubr.bf16.gmra.mxu0 %v5717_v51  ;;  %2753 = vmatmul.mubr.bf16.gmra.mxu1 %v5719_v37 }
 0x176   :  { %2792 = vmatpush2.bf16.msra.mxu0 %v5069_v54  ;;  %2905 = vmatpush2.bf16.msra.mxu1 %v5072_v61 }
 0x177   :  { %2793 = vmatprep.subr.bf16.mxu0 %v5077_v53  ;;  %2906 = vmatprep.subr.bf16.mxu1 %v5080_v0 }
 0x178   :  { %2795 = vmatprep.mubr.bf16.mxu0 %v5545_v9  ;;  %2908 = vmatprep.mubr.bf16.mxu1 %v5547_v10  ;;  %v5087_v9 = vld [vmem:[#allocation6 + $0x4c8] ss:$16 sps:$4 sm:$0xff]  }
 0x179   :  { %v5093_v10 = vld [vmem:[#allocation6 + $0x6c8] ss:$16 sps:$4 sm:$0xff]  }
 0x17a   :  { %2794 = vmatpush2.bf16.msra.mxu0 %v5075_v11  ;;  %2907 = vmatpush2.bf16.msra.mxu1 %v5078_v16 }
 0x17b   :  { %2989 = vmatprep.subr.bf16.mxu0 %v5083_v18  ;;  %3102 = vmatprep.subr.bf16.mxu1 %v5086_v6  ;;  %v5092_v6 = vld [vmem:[#allocation6 + $0x4ac] ss:$16 sps:$4 sm:$0xff]  }
 0x17c   :  { %v5104_v18 = vld [vmem:[#allocation6 + $0x6ac] ss:$16 sps:$4 sm:$0xff]  }
 0x17d   :  { %v5725_v54 = vpop.f32.mrf.mxu0  ;;  %v5727_v61 = vpop.f32.mrf.mxu1  ;;  %2796 = vmatmul.mubr.bf16.vlgmr.msra.gmra.mxu0 %v5551_v12  ;;  %2909 = vmatmul.mubr.bf16.vlgmr.msra.gmra.mxu1 %v5553_v13  ;;  %v5090_v13 = vld [vmem:[#allocation6 + $0x4a8] ss:$16 sps:$4 sm:$0xff]  }
 0x17e   :  { %6492 = vst [vmem:[#allocation21_spill] sm:$0xff] %v5727_v61  ;;  %2990 = vmatpush1.bf16.msra.mxu0 %v5081_v1  ;;  %3103 = vmatpush1.bf16.msra.mxu1 %v5084_v20  ;;  %v5098_v20 = vld [vmem:[#allocation6 + $0x48c] ss:$16 sps:$4 sm:$0xff]  }
 0x17f   :  { %v5731_v53 = vpop.f32.mrf.mxu0  ;;  %v5733_v0 = vpop.f32.mrf.mxu1  ;;  %2991 = vmatprep.subr.bf16.mxu0 %v5089_v40  ;;  %2805 = vmatprep.mubr.bf16.mxu0 %v5557_v62  ;;  %v5102_v62 = vld [vmem:[#allocation6 + $0x6a8] ss:$16 sps:$4 sm:$0xff]  }
 0x180   :  { %6493 = vst [vmem:[#allocation22_spill] sm:$0xff] %v5733_v0  ;;  %2918 = vmatprep.mubr.bf16.mxu1 %v5559_v19  ;;  %3104 = vmatprep.subr.bf16.mxu1 %v5095_v42  ;;  %v5113_v19 = vld [vmem:[#allocation6 + $0x68c] ss:$16 sps:$4 sm:$0xff]   ;;  %v5096_v42 = vld [vmem:[#allocation6 + $0x488] ss:$16 sps:$4 sm:$0xff]  }
 0x181   :  { %v5737_v11 = vpop.f32.mrf.mxu0  ;;  %v5739_v12 = vpop.f32.mrf.mxu1 }
 0x182   :  { %6494 = vst [vmem:[#allocation23_spill] sm:$0xff] %v5739_v12  ;;  %2992 = vmatpush1.bf16.msra.mxu0 %v5087_v9  ;;  %3105 = vmatpush1.bf16.msra.mxu1 %v5093_v10  ;;  %v5107_v12 = vld [vmem:[#allocation6 + $0x44c] ss:$16 sps:$4 sm:$0xff]  }
 0x183   :  { %v5741_v16 = vpop.f32.mrf.mxu0  ;;  %v5743_v1 = vpop.f32.mrf.mxu1  ;;  %2993 = vmatprep.subr.bf16.mxu0 %v5092_v6  ;;  %3106 = vmatprep.subr.bf16.mxu1 %v5104_v18  ;;  %v5101_v6 = vld [vmem:[#allocation6 + $0x46c] ss:$16 sps:$4 sm:$0xff]   ;;  %v5111_v18 = vld [vmem:[#allocation6 + $0x688] ss:$16 sps:$4 sm:$0xff]  }
 0x184   :  { %6495 = vst [vmem:[#allocation24_spill] sm:$0xff] %v5743_v1 }
 0x185   :  { %v5745_v40 = vpop.f32.mrf.mxu0  ;;  %v5747_v0 = vpop.f32.mrf.mxu1  ;;  %2806 = vmatmul.mubr.bf16.gmra.mxu0 %v5564_v23  ;;  %2919 = vmatmul.mubr.bf16.gmra.mxu1 %v5566_v24  ;;  %v5099_v24 = vld [vmem:[#allocation6 + $0x468] ss:$16 sps:$4 sm:$0xff]  }
 0x186   :  { %6496 = vst [vmem:[#allocation25_spill] sm:$0xff] %v5747_v0  ;;  %2994 = vmatpush1.bf16.msra.mxu0 %v5090_v13  ;;  %2815 = vmatprep.mubr.bf16.mxu0 %v5569_v28 }
 0x187   :  { %v5752_v9 = vpop.f32.mrf.mxu0  ;;  %v5754_v10 = vpop.f32.mrf.mxu1  ;;  %2995 = vmatprep.subr.bf16.mxu0 %v5098_v20  ;;  %2928 = vmatprep.mubr.bf16.mxu1 %v5571_v30  ;;  %v5122_v20 = vld [vmem:[#allocation6 + $0x66c] ss:$16 sps:$4 sm:$0xff]  }
 0x188   :  { %6497 = vst [vmem:[#allocation26_spill] sm:$0xff] %v5754_v10  ;;  %3107 = vmatpush1.bf16.msra.mxu1 %v5102_v62  ;;  %v5120_v62 = vld [vmem:[#allocation6 + $0x668] ss:$16 sps:$4 sm:$0xff]  }
 0x189   :  { %v5757_v1 = vpop.f32.mrf.mxu0  ;;  %v5759_v23 = vpop.f32.mrf.mxu1  ;;  %3108 = vmatprep.subr.bf16.mxu1 %v5113_v19  ;;  %v5105_v19 = vld [vmem:[#allocation6 + $0x448] ss:$16 sps:$4 sm:$0xff]  }
 0x18a   :  { %6498 = vst [vmem:[#allocation27_spill] sm:$0xff] %v5759_v23  ;;  %2996 = vmatpush1.bf16.msra.mxu0 %v5096_v42  ;;  %v5131_v42 = vld [vmem:[#allocation6 + $0x64c] ss:$16 sps:$4 sm:$0xff]  }
 0x18b   :  { %v5761_v13 = vpop.f32.mrf.mxu0  ;;  %v5763_v28 = vpop.f32.mrf.mxu1  ;;  %2997 = vmatprep.subr.bf16.mxu0 %v5101_v6 }
 0x18c   :  { %6499 = vst [vmem:[#allocation28_spill] sm:$0xff] %v5763_v28  ;;  %3109 = vmatpush1.bf16.msra.mxu1 %v5111_v18  ;;  %v5110_v18 = vld [vmem:[#allocation6 + $0x42c] ss:$16 sps:$4 sm:$0xff]  }
 0x18d   :  { %v5765_v10 = vpop.f32.mrf.mxu0  ;;  %v5767_v30 = vpop.f32.mrf.mxu1  ;;  %2816 = vmatmul.mubr.bf16.gmra.mxu0 %v5577_v34  ;;  %2929 = vmatmul.mubr.bf16.gmra.mxu1 %v5579_v35  ;;  %v5108_v35 = vld [vmem:[#allocation6 + $0x428] ss:$16 sps:$4 sm:$0xff]  }
 0x18e   :  { %6500 = vst [vmem:[#allocation29_spill] sm:$0xff] %v5767_v30  ;;  %2998 = vmatpush1.bf16.msra.mxu0 %v5099_v24  ;;  %2825 = vmatprep.mubr.bf16.mxu0 %v5581_v38  ;;  %v5116_v30 = vld [vmem:[#allocation6 + $0x40c] ss:$16 sps:$4 sm:$0xff]  }
 0x18f   :  { %v5772_v23 = vpop.f32.mrf.mxu0  ;;  %v5774_v6 = vpop.f32.mrf.mxu1  ;;  %2999 = vmatprep.subr.bf16.mxu0 %v5107_v12  ;;  %2938 = vmatprep.mubr.bf16.mxu1 %v5583_v41 }
 0x190   :  { %6501 = vst [vmem:[#allocation30_spill] sm:$0xff] %v5774_v6  ;;  %3110 = vmatprep.subr.bf16.mxu1 %v5122_v20  ;;  %v5129_v6 = vld [vmem:[#allocation6 + $0x648] ss:$16 sps:$4 sm:$0xff]   ;;  %v5140_v20 = vld [vmem:[#allocation6 + $0x62c] ss:$16 sps:$4 sm:$0xff]  }
 0x191   :  { %v5777_v28 = vpop.f32.mrf.mxu0  ;;  %v5779_v34 = vpop.f32.mrf.mxu1  ;;  %3111 = vmatpush1.bf16.msra.mxu1 %v5120_v62  ;;  %v5114_v62 = vld [vmem:[#allocation6 + $0x408] ss:$16 sps:$4 sm:$0xff]  }
 0x192   :  { %6502 = vst [vmem:[#allocation31_spill] sm:$0xff] %v5779_v34  ;;  %3000 = vmatpush1.bf16.msra.mxu0 %v5105_v19  ;;  %3112 = vmatprep.subr.bf16.mxu1 %v5131_v42  ;;  %v5125_v34 = vld [vmem:[#allocation6 + $0x5cc] ss:$16 sps:$4 sm:$0xff]  }
 0x193   :  { %v5781_v24 = vpop.f32.mrf.mxu0  ;;  %v5783_v38 = vpop.f32.mrf.mxu1  ;;  %3001 = vmatprep.subr.bf16.mxu0 %v5110_v18  ;;  %v5119_v18 = vld [vmem:[#allocation6 + $0x5ec] ss:$16 sps:$4 sm:$0xff]  }
 0x194   :  { %6503 = vst [vmem:[#allocation32_spill] sm:$0xff] %v5783_v38  ;;  %v5138_v38 = vld [vmem:[#allocation6 + $0x628] ss:$16 sps:$4 sm:$0xff]  }
 0x195   :  { %v5785_v12 = vpop.f32.mrf.mxu0  ;;  %v5787_v41 = vpop.f32.mrf.mxu1  ;;  %2826 = vmatmul.mubr.bf16.gmra.mxu0 %v5589_v46  ;;  %2939 = vmatmul.mubr.bf16.gmra.mxu1 %v5591_v47  ;;  %v5117_v47 = vld [vmem:[#allocation6 + $0x5e8] ss:$16 sps:$4 sm:$0xff]  }
 0x196   :  { %6504 = vst [vmem:[#allocation33_spill] sm:$0xff] %v5787_v41  ;;  %3002 = vmatpush1.bf16.msra.mxu0 %v5108_v35  ;;  %2835 = vmatprep.mubr.bf16.mxu0 %v5593_v50 }
 0x197   :  { %v5792_v19 = vpop.f32.mrf.mxu0  ;;  %v5794_v42 = vpop.f32.mrf.mxu1  ;;  %3003 = vmatprep.subr.bf16.mxu0 %v5116_v30  ;;  %2948 = vmatprep.mubr.bf16.mxu1 %v5595_v52  ;;  %v5149_v30 = vld [vmem:[#allocation6 + $0x60c] ss:$16 sps:$4 sm:$0xff]  }
 0x198   :  { %6505 = vst [vmem:[#allocation34_spill] sm:$0xff] %v5794_v42  ;;  %3113 = vmatpush1.bf16.msra.mxu1 %v5129_v6  ;;  %v5147_v6 = vld [vmem:[#allocation6 + $0x608] ss:$16 sps:$4 sm:$0xff]  }
 0x199   :  { %v5797_v41 = vpop.f32.mrf.mxu0  ;;  %v5799_v46 = vpop.f32.mrf.mxu1  ;;  %3114 = vmatprep.subr.bf16.mxu1 %v5140_v20  ;;  %v5123_v20 = vld [vmem:[#allocation6 + $0x5c8] ss:$16 sps:$4 sm:$0xff]  }
 0x19a   :  { %6506 = vst [vmem:[#allocation35_spill] sm:$0xff] %v5799_v46  ;;  %3004 = vmatpush1.bf16.msra.mxu0 %v5114_v62 }
 0x19b   :  { %v5801_v35 = vpop.f32.mrf.mxu0  ;;  %v5803_v50 = vpop.f32.mrf.mxu1  ;;  %3005 = vmatprep.subr.bf16.mxu0 %v5119_v18 }
 0x19c   :  { %6507 = vst [vmem:[#allocation36_spill] sm:$0xff] %v5803_v50  ;;  %3115 = vmatpush1.bf16.msra.mxu1 %v5138_v38  ;;  %v5128_v38 = vld [vmem:[#allocation6 + $0x5ac] ss:$16 sps:$4 sm:$0xff]  }
 0x19d   :  { %v5805_v42 = vpop.f32.mrf.mxu0  ;;  %v5807_v52 = vpop.f32.mrf.mxu1  ;;  %2836 = vmatmul.mubr.bf16.gmra.mxu0 %v5601_v58  ;;  %2949 = vmatmul.mubr.bf16.gmra.mxu1 %v5603_v59  ;;  %v5126_v58 = vld [vmem:[#allocation6 + $0x5a8] ss:$16 sps:$4 sm:$0xff]  }
 0x19e   :  { %6508 = vst [vmem:[#allocation37_spill] sm:$0xff] %v5807_v52  ;;  %3006 = vmatpush2.bf16.msra.mxu0 %v5117_v47  ;;  %2845 = vmatprep.mubr.bf16.mxu0 %v5605_v63  ;;  %v5134_v63 = vld [vmem:[#allocation6 + $0x58c] ss:$16 sps:$4 sm:$0xff]  }
 0x19f   :  { %v5812_v62 = vpop.f32.mrf.mxu0  ;;  %v5814_v50 = vpop.f32.mrf.mxu1  ;;  %3007 = vmatprep.subr.bf16.mxu0 %v5125_v34  ;;  %2958 = vmatprep.mubr.bf16.mxu1 %v5607_v3  ;;  %v5132_v3 = vld [vmem:[#allocation6 + $0x588] ss:$16 sps:$4 sm:$0xff]  }
 0x1a0   :  { %6509 = vst [vmem:[#allocation38_spill] sm:$0xff] %v5814_v50  ;;  %3116 = vmatprep.subr.bf16.mxu1 %v5149_v30  ;;  %v5161_v50 = vld [vmem:[#allocation9 + $0x54] ss:$8 sps:$4 sm:$0xff]  }
 0x1a1   :  { %v5817_v18 = vpop.f32.mrf.mxu0  ;;  %v5819_v52 = vpop.f32.mrf.mxu1  ;;  %3117 = vmatpush1.bf16.msra.mxu1 %v5147_v6 }
 0x1a2   :  { %6510 = vst [vmem:[#allocation39_spill] sm:$0xff] %v5819_v52  ;;  %3008 = vmatpush2.bf16.msra.mxu0 %v5123_v20  ;;  %v5137_v20 = vld [vmem:[#allocation6 + $0x56c] ss:$16 sps:$4 sm:$0xff]  }
 0x1a3   :  { %v5821_v59 = vpop.f32.mrf.mxu0  ;;  %v5823_v47 = vpop.f32.mrf.mxu1  ;;  %3009 = vmatprep.subr.bf16.mxu0 %v5128_v38 }
 0x1a4   :  { %6511 = vst [vmem:[#allocation40_spill] sm:$0xff] %v5823_v47 }
 0x1a5   :  { %v5825_v46 = vpop.f32.mrf.mxu0  ;;  %v5827_v34 = vpop.f32.mrf.mxu1  ;;  %2846 = vmatmul.mubr.bf16.gmra.mxu0 %v5613_v8  ;;  %2959 = vmatmul.mubr.bf16.gmra.mxu1 %v5615_v55  ;;  %v5135_v8 = vld [vmem:[#allocation6 + $0x568] ss:$16 sps:$4 sm:$0xff]  }
 0x1a6   :  { %6512 = vst [vmem:[#allocation41_spill] sm:$0xff] %v5827_v34  ;;  %3010 = vmatpush2.bf16.msra.mxu0 %v5126_v58  ;;  %2855 = vmatprep.mubr.bf16.mxu0 %v5617_v15  ;;  %v5143_v15 = vld [vmem:[#allocation6 + $0x54c] ss:$16 sps:$4 sm:$0xff]  }
 0x1a7   :  { %v5832_v30 = vpop.f32.mrf.mxu0  ;;  %v5834_v6 = vpop.f32.mrf.mxu1  ;;  %3011 = vmatprep.subr.bf16.mxu0 %v5134_v63  ;;  %2968 = vmatprep.mubr.bf16.mxu1 %v5619_v17  ;;  %v5141_v17 = vld [vmem:[#allocation6 + $0x548] ss:$16 sps:$4 sm:$0xff]  }
 0x1a8   :  { %6513 = vst [vmem:[#allocation42_spill] sm:$0xff] %v5834_v6 }
 0x1a9   :  { %v5837_v38 = vpop.f32.mrf.mxu0  ;;  %v5839_v47 = vpop.f32.mrf.mxu1 }
 0x1aa   :  { %6514 = vst [vmem:[#allocation43_spill] sm:$0xff] %v5839_v47  ;;  %3012 = vmatpush2.bf16.msra.mxu0 %v5132_v3 }
 0x1ab   :  { %v5841_v34 = vpop.f32.mrf.mxu0  ;;  %v5843_v55 = vpop.f32.mrf.mxu1  ;;  %3013 = vmatprep.subr.bf16.mxu0 %v5137_v20  ;;  %v5146_v20 = vld [vmem:[#allocation6 + $0x52c] ss:$16 sps:$4 sm:$0xff]  }
 0x1ac   :  { %6515 = vst [vmem:[#allocation44_spill] sm:$0xff] %v5843_v55 }
 0x1ad   :  { %v5845_v58 = vpop.f32.mrf.mxu0  ;;  %v5847_v52 = vpop.f32.mrf.mxu1  ;;  %2856 = vmatmul.mubr.bf16.gmra.mxu0 %v5625_v21  ;;  %2969 = vmatmul.mubr.bf16.gmra.mxu1 %v5627_v22  ;;  %v5144_v21 = vld [vmem:[#allocation6 + $0x528] ss:$16 sps:$4 sm:$0xff]  }
 0x1ae   :  { %6516 = vst [vmem:[#allocation45_spill] sm:$0xff] %v5847_v52  ;;  %3014 = vmatpush2.bf16.msra.mxu0 %v5135_v8  ;;  %2865 = vmatprep.mubr.bf16.mxu0 %v5629_v26  ;;  %v5152_v26 = vld [vmem:[#allocation6 + $0x50c] ss:$16 sps:$4 sm:$0xff]  }
 0x1af   :  { %v5852_v63 = vpop.f32.mrf.mxu0  ;;  %v5854_v3 = vpop.f32.mrf.mxu1  ;;  %3015 = vmatprep.subr.bf16.mxu0 %v5143_v15  ;;  %2978 = vmatprep.mubr.bf16.mxu1 %v5631_v29  ;;  %v5150_v29 = vld [vmem:[#allocation6 + $0x508] ss:$16 sps:$4 sm:$0xff]  }
 0x1b0   :  { %6517 = vst [vmem:[#allocation46_spill] sm:$0xff] %v5854_v3 }
 0x1b1   :  { %v5857_v55 = vpop.f32.mrf.mxu0  ;;  %v5859_v47 = vpop.f32.mrf.mxu1 }
 0x1b2   :  { %6518 = vst [vmem:[#allocation47_spill] sm:$0xff] %v5859_v47  ;;  %3016 = vmatpush2.bf16.msra.mxu0 %v5141_v17 }
 0x1b3   :  { %v5861_v52 = vpop.f32.mrf.mxu0  ;;  %v5863_v22 = vpop.f32.mrf.mxu1  ;;  %3017 = vmatprep.subr.bf16.mxu0 %v5146_v20  ;;  %v5155_v20 = vld [vmem:[#allocation9 + $0x74] ss:$8 sps:$4 sm:$0xff]  }
 0x1b4   :  { %6519 = vst [vmem:[#allocation48_spill] sm:$0xff] %v5861_v52  ;;  %6520 = vst [vmem:[#allocation49_spill] sm:$0xff] %v5863_v22 }
 0x1b5   :  { %v5865_v8 = vpop.f32.mrf.mxu0  ;;  %v5867_v6 = vpop.f32.mrf.mxu1  ;;  %2866 = vmatmul.mubr.bf16.gmra.mxu0 %v5637_v33  ;;  %2979 = vmatmul.mubr.bf16.gmra.mxu1 %v5639_v36 }
 0x1b6   :  { %6521 = vst [vmem:[#allocation50_spill] sm:$0xff] %v5867_v6  ;;  %3018 = vmatpush2.bf16.msra.mxu0 %v5144_v21  ;;  %3021 = vmatprep.mubr.bf16.mxu0 %v5641_v39  ;;  %v5153_v21 = vld [vmem:[#allocation9 + $0x70] ss:$8 sps:$4 sm:$0xff]   ;;  %v5158_v39 = vld [vmem:[#allocation9 + $0x64] ss:$8 sps:$4 sm:$0xff]  }
 0x1b7   :  { %v5872_v15 = vpop.f32.mrf.mxu0  ;;  %v5874_v17 = vpop.f32.mrf.mxu1  ;;  %3019 = vmatprep.subr.bf16.mxu0 %v5152_v26  ;;  %3134 = vmatprep.mubr.bf16.mxu1 %v6491_v48 }
 0x1b8   :  { %6522 = vst [vmem:[#allocation51_spill] sm:$0xff] %v5874_v17  ;;  %v5156_v17 = vld [vmem:[#allocation9 + $0x60] ss:$8 sps:$4 sm:$0xff]  }
 0x1b9   :  { %v5877_v22 = vpop.f32.mrf.mxu0  ;;  %v5879_v47 = vpop.f32.mrf.mxu1 }
 0x1ba   :  { %6523 = vst [vmem:[#allocation52_spill] sm:$0xff] %v5879_v47  ;;  %3020 = vmatpush2.bf16.msra.mxu0 %v5150_v29 }
 0x1bb   :  { %v5881_v33 = vpop.f32.mrf.mxu0  ;;  %v5883_v36 = vpop.f32.mrf.mxu1  ;;  %3857 = vmatprep.subr.bf16.mxu0 %v5155_v20 }
 0x1bc   :  { %6524 = vst [vmem:[#allocation53_spill] sm:$0xff] %v5881_v33  ;;  %6525 = vst [vmem:[#allocation54_spill] sm:$0xff] %v5883_v36 }
 0x1bd   :  { %v2345_v6 = vpop.f32.mrf.mxu0  ;;  %v2458_v3 = vpop.f32.mrf.mxu1  ;;  %3022 = vmatmul.mubr.bf16.vlgmr.msra.gmra.mxu0 %v5647_v44  ;;  %3135 = vmatmul.mubr.bf16.vlgmr.msra.gmra.mxu1 %v5649_v45 }
 0x1be   :  { %v2346_v26 = vadd.f32 %v2345_v6, %v5725_v54  ;;  %3031 = vmatprep.mubr.bf16.mxu0 %v5651_v56  ;;  %3144 = vmatprep.mubr.bf16.mxu1 %v6491_v48  ;;  %v5159_v6 = vld [vmem:[#allocation9 + $0x50] ss:$8 sps:$4 sm:$0xff]  }
 0x1bf   :  { %v2347_v29 = vpop.f32.mrf.mxu0  ;;  %v2460_v47 = vpop.f32.mrf.mxu1  ;;  %3858 = vmatpush1.bf16.msra.mxu0 %v5153_v21  ;;  %v5164_v21 = vld [vmem:[#allocation9 + $0x44] ss:$8 sps:$4 sm:$0xff]  }
 0x1c0   :  { %v5890_v36 = vadd.f32 %v2458_v3, %v2346_v26  ;;  %v2348_v20 = vadd.f32 %v2347_v29, %v5731_v53  ;;  %3859 = vmatprep.subr.bf16.mxu0 %v5158_v39  ;;  %v5162_v29 = vld [vmem:[#allocation9 + $0x40] ss:$8 sps:$4 sm:$0xff]  }
 0x1c1   :  { %v5893_v0 = vpop.f32.mrf.mxu0  ;;  %v5895_v44 = vpop.f32.mrf.mxu1 }
 0x1c2   :  { %v5897_v45 = vadd.f32 %v2460_v47, %v2348_v20  ;;  %v5167_v20 = vld [vmem:[#allocation9 + $0x34] ss:$8 sps:$4 sm:$0xff]  }
 0x1c3   :  { %v5899_v54 = vpop.f32.mrf.mxu0  ;;  %v5901_v56 = vpop.f32.mrf.mxu1  ;;  %3860 = vmatpush1.bf16.msra.mxu0 %v5156_v17 }
 0x1c4   :  { %3861 = vmatprep.subr.bf16.mxu0 %v5161_v50 }
 0x1c5   :  { %v2355_v3 = vpop.f32.mrf.mxu0  ;;  %v2468_v26 = vpop.f32.mrf.mxu1  ;;  %3032 = vmatmul.mubr.bf16.gmra.mxu0 %v5657_v2  ;;  %3145 = vmatmul.mubr.bf16.gmra.mxu1 %v5659_v4 }
 0x1c6   :  { %v2356_v53 = vadd.f32 %v2355_v3, %v5745_v40  ;;  %3041 = vmatprep.mubr.bf16.mxu0 %v5661_v14  ;;  %3154 = vmatprep.mubr.bf16.mxu1 %v6491_v48  ;;  %v5165_v3 = vld [vmem:[#allocation9 + $0x30] ss:$8 sps:$4 sm:$0xff]  }
 0x1c7   :  { %v2357_v47 = vpop.f32.mrf.mxu0  ;;  %v2470_v39 = vpop.f32.mrf.mxu1  ;;  %3862 = vmatpush1.bf16.msra.mxu0 %v5159_v6 }
 0x1c8   :  { %v5908_v17 = vadd.f32 %v2468_v26, %v2356_v53  ;;  %v2358_v50 = vadd.f32 %v2357_v47, %v5752_v9  ;;  %3863 = vmatprep.subr.bf16.mxu0 %v5164_v21  ;;  %v5170_v26 = vld [vmem:[#allocation9 + $0x24] ss:$8 sps:$4 sm:$0xff]   ;;  %v5168_v47 = vld [vmem:[#allocation9 + $0x20] ss:$8 sps:$4 sm:$0xff]  }
 0x1c9   :  { %v2359_v61 = vpop.f32.mrf.mxu0  ;;  %v2472_v2 = vpop.f32.mrf.mxu1 }
 0x1ca   :  { %v5911_v33 = vadd.f32 %v2470_v39, %v2358_v50  ;;  %v2360_v4 = vadd.f32 %v2359_v61, %v5757_v1  ;;  %v5173_v50 = vld [vmem:[#allocation9 + $0x14] ss:$8 sps:$4 sm:$0xff]  }
 0x1cb   :  { %v5914_v40 = vpop.f32.mrf.mxu0  ;;  %v5916_v14 = vpop.f32.mrf.mxu1  ;;  %3864 = vmatpush1.bf16.msra.mxu0 %v5162_v29 }
 0x1cc   :  { %v5918_v6 = vadd.f32 %v2472_v2, %v2360_v4  ;;  %3865 = vmatprep.subr.bf16.mxu0 %v5167_v20  ;;  %v5203_v20 = vld [vmem:[#allocation9 + $0x174] ss:$8 sps:$4 sm:$0xff]  }
 0x1cd   :  { %v2365_v53 = vpop.f32.mrf.mxu0  ;;  %v2478_v9 = vpop.f32.mrf.mxu1  ;;  %3042 = vmatmul.mubr.bf16.gmra.mxu0 %v5667_v27  ;;  %3155 = vmatmul.mubr.bf16.gmra.mxu1 %v5669_v31  ;;  %v5201_v31 = vld [vmem:[#allocation9 + $0x170] ss:$8 sps:$4 sm:$0xff]  }
 0x1ce   :  { %v2366_v21 = vadd.f32 %v2365_v53, %v5765_v10  ;;  %3051 = vmatprep.mubr.bf16.mxu0 %v5671_v43  ;;  %3164 = vmatprep.mubr.bf16.mxu1 %v6491_v48 }
 0x1cf   :  { %v2367_v61 = vpop.f32.mrf.mxu0  ;;  %v2480_v1 = vpop.f32.mrf.mxu1  ;;  %3866 = vmatpush1.bf16.msra.mxu0 %v5165_v3  ;;  %3970 = vmatprep.subr.bf16.mxu1 %v5203_v20  ;;  %v5171_v3 = vld [vmem:[#allocation9 + $0x10] ss:$8 sps:$4 sm:$0xff]   ;;  %v5174_v20 = vld [vmem:[#allocation9] ss:$8 sps:$4 sm:$0xff]  }
 0x1d0   :  { %v5925_v39 = vadd.f32 %v2478_v9, %v2366_v21  ;;  %v2368_v29 = vadd.f32 %v2367_v61, %v5772_v23  ;;  %3867 = vmatprep.subr.bf16.mxu0 %v5170_v26  ;;  %3971 = vmatpush1.bf16.msra.mxu1 %v5201_v31  ;;  %v5176_v23 = vld [vmem:[#allocation9 + $0x4] ss:$8 sps:$4 sm:$0xff]  }
 0x1d1   :  { %v2369_v27 = vpop.f32.mrf.mxu0  ;;  %v2482_v2 = vpop.f32.mrf.mxu1  ;;  %v5206_v26 = vld [vmem:[#allocation9 + $0x164] ss:$8 sps:$4 sm:$0xff]  }
 0x1d2   :  { %v5928_v4 = vadd.f32 %v2480_v1, %v2368_v29  ;;  %v2370_v43 = vadd.f32 %v2369_v27, %v5777_v28  ;;  %v5204_v28 = vld [vmem:[#allocation9 + $0x160] ss:$8 sps:$4 sm:$0xff]   ;;  %3972 = vmatprep.subr.bf16.mxu1 %v5206_v26  ;;  %v5177_v26 = vld [vmem:[#allocation9 + $0xf0] ss:$8 sps:$4 sm:$0xff]  }
 0x1d3   :  { %v5931_v10 = vpop.f32.mrf.mxu0  ;;  %v5933_v53 = vpop.f32.mrf.mxu1  ;;  %3868 = vmatpush1.bf16.msra.mxu0 %v5168_v47 }
 0x1d4   :  { %v5935_v9 = vadd.f32 %v2482_v2, %v2370_v43  ;;  %3869 = vmatprep.subr.bf16.mxu0 %v5173_v50  ;;  %3973 = vmatpush1.bf16.msra.mxu1 %v5204_v28 }
 0x1d5   :  { %v2375_v21 = vpop.f32.mrf.mxu0  ;;  %v2488_v61 = vpop.f32.mrf.mxu1  ;;  %3052 = vmatmul.mubr.bf16.gmra.mxu0 %v5677_v57  ;;  %3165 = vmatmul.mubr.bf16.gmra.mxu1 %v5679_v60  ;;  %v5179_v57 = vld [vmem:[#allocation9 + $0xf4] ss:$8 sps:$4 sm:$0xff]  }
 0x1d6   :  { %v2376_v1 = vadd.f32 %v2375_v21, %v5785_v12  ;;  %3061 = vmatprep.mubr.bf16.mxu0 %v5681_v7  ;;  %3174 = vmatprep.mubr.bf16.mxu1 %v6491_v48  ;;  %v5209_v60 = vld [vmem:[#allocation9 + $0x154] ss:$8 sps:$4 sm:$0xff]   ;;  %v5207_v12 = vld [vmem:[#allocation9 + $0x150] ss:$8 sps:$4 sm:$0xff]  }
 0x1d7   :  { %v2377_v47 = vpop.f32.mrf.mxu0  ;;  %v2490_v29 = vpop.f32.mrf.mxu1  ;;  %3870 = vmatpush1.bf16.msra.mxu0 %v5171_v3  ;;  %3974 = vmatprep.subr.bf16.mxu1 %v5209_v60 }
 0x1d8   :  { %v5942_v50 = vadd.f32 %v2488_v61, %v2376_v1  ;;  %v2378_v27 = vadd.f32 %v2377_v47, %v5792_v19  ;;  %3871 = vmatprep.subr.bf16.mxu0 %v5176_v23  ;;  %v5182_v19 = vld [vmem:[#allocation9 + $0xe4] ss:$8 sps:$4 sm:$0xff]   ;;  %3975 = vmatpush1.bf16.msra.mxu1 %v5207_v12 }
 0x1d9   :  { %v2379_v2 = vpop.f32.mrf.mxu0  ;;  %v2492_v31 = vpop.f32.mrf.mxu1  ;;  %v5212_v23 = vld [vmem:[#allocation9 + $0x144] ss:$8 sps:$4 sm:$0xff]  }
 0x1da   :  { %v5945_v43 = vadd.f32 %v2490_v29, %v2378_v27  ;;  %v2380_v7 = vadd.f32 %v2379_v2, %v5797_v41  ;;  %v5210_v41 = vld [vmem:[#allocation9 + $0x140] ss:$8 sps:$4 sm:$0xff]   ;;  %3976 = vmatprep.subr.bf16.mxu1 %v5212_v23  ;;  %v5183_v23 = vld [vmem:[#allocation9 + $0xd0] ss:$8 sps:$4 sm:$0xff]  }
 0x1db   :  { %v5948_v21 = vpop.f32.mrf.mxu0  ;;  %v5950_v3 = vpop.f32.mrf.mxu1  ;;  %3872 = vmatpush1.bf16.msra.mxu0 %v5174_v20  ;;  %v5180_v27 = vld [vmem:[#allocation9 + $0xe0] ss:$8 sps:$4 sm:$0xff]  }
 0x1dc   :  { %v5952_v61 = vadd.f32 %v2492_v31, %v2380_v7  ;;  %3873 = vmatprep.subr.bf16.mxu0 %v5179_v57  ;;  %3977 = vmatpush1.bf16.msra.mxu1 %v5210_v41 }
 0x1dd   :  { %v2385_v28 = vpop.f32.mrf.mxu0  ;;  %v2498_v1 = vpop.f32.mrf.mxu1  ;;  %3062 = vmatmul.mubr.bf16.gmra.mxu0 %v5687_v25  ;;  %3175 = vmatmul.mubr.bf16.gmra.mxu1 %v5689_v32  ;;  %v5185_v25 = vld [vmem:[#allocation9 + $0xd4] ss:$8 sps:$4 sm:$0xff]  }
 0x1de   :  { %v2386_v47 = vadd.f32 %v2385_v28, %v5805_v42  ;;  %3071 = vmatprep.mubr.bf16.mxu0 %v5691_v49  ;;  %3184 = vmatprep.mubr.bf16.mxu1 %v6491_v48  ;;  %v5215_v32 = vld [vmem:[#allocation9 + $0x134] ss:$8 sps:$4 sm:$0xff]   ;;  %v5213_v42 = vld [vmem:[#allocation9 + $0x130] ss:$8 sps:$4 sm:$0xff]  }
 0x1df   :  { %v2387_v29 = vpop.f32.mrf.mxu0  ;;  %v2500_v20 = vpop.f32.mrf.mxu1  ;;  %3874 = vmatpush2.bf16.msra.mxu0 %v5177_v26  ;;  %3978 = vmatprep.subr.bf16.mxu1 %v5215_v32 }
 0x1e0   :  { %v5959_v57 = vadd.f32 %v2498_v1, %v2386_v47  ;;  %v2388_v60 = vadd.f32 %v2387_v29, %v5812_v62  ;;  %3875 = vmatprep.subr.bf16.mxu0 %v5182_v19  ;;  %v5188_v62 = vld [vmem:[#allocation9 + $0xc4] ss:$8 sps:$4 sm:$0xff]   ;;  %3979 = vmatpush1.bf16.msra.mxu1 %v5213_v42 }
 0x1e1   :  { %v2389_v2 = vpop.f32.mrf.mxu0  ;;  %v2502_v31 = vpop.f32.mrf.mxu1  ;;  %v5218_v19 = vld [vmem:[#allocation9 + $0x124] ss:$8 sps:$4 sm:$0xff]  }
 0x1e2   :  { %v5962_v12 = vadd.f32 %v2500_v20, %v2388_v60  ;;  %v2390_v49 = vadd.f32 %v2389_v2, %v5817_v18  ;;  %v6526_v47 = vld [vmem:[#allocation16_spill] sm:$0xff]  ;;  %v6527_v20 = vld [vmem:[#allocation17_spill] sm:$0xff]  ;;  %3980 = vmatprep.subr.bf16.mxu1 %v5218_v19 }
 0x1e3   :  { %v5965_v7 = vpop.f32.mrf.mxu0  ;;  %v5967_v26 = vpop.f32.mrf.mxu1  ;;  %3876 = vmatpush2.bf16.msra.mxu0 %v5180_v27  ;;  %v5216_v18 = vld [vmem:[#allocation9 + $0x120] ss:$8 sps:$4 sm:$0xff]   ;;  %v5189_v19 = vld [vmem:[#allocation9 + $0xb0] ss:$8 sps:$4 sm:$0xff]  }
 0x1e4   :  { %v5969_v28 = vadd.f32 %v2502_v31, %v2390_v49  ;;  %3877 = vmatprep.subr.bf16.mxu0 %v5185_v25  ;;  %v5186_v25 = vld [vmem:[#allocation9 + $0xc0] ss:$8 sps:$4 sm:$0xff]   ;;  %3981 = vmatpush1.bf16.msra.mxu1 %v5216_v18  ;;  %v5221_v31 = vld [vmem:[#allocation9 + $0x114] ss:$8 sps:$4 sm:$0xff]  }
 0x1e5   :  { %v2395_v1 = vpop.f32.mrf.mxu0  ;;  %v2508_v41 = vpop.f32.mrf.mxu1  ;;  %3072 = vmatmul.mubr.bf16.gmra.mxu0 %v5697_v5  ;;  %3185 = vmatmul.mubr.bf16.gmra.mxu1 %v6526_v47  ;;  %v5191_v5 = vld [vmem:[#allocation9 + $0xb4] ss:$8 sps:$4 sm:$0xff]  }
 0x1e6   :  { %v2396_v29 = vadd.f32 %v2395_v1, %v5825_v46  ;;  %3081 = vmatprep.mubr.bf16.mxu0 %v6527_v20  ;;  %3194 = vmatprep.mubr.bf16.mxu1 %v6491_v48  ;;  %v5219_v46 = vld [vmem:[#allocation9 + $0x110] ss:$8 sps:$4 sm:$0xff]  }
 0x1e7   :  { %v2397_v27 = vpop.f32.mrf.mxu0  ;;  %v2510_v60 = vpop.f32.mrf.mxu1  ;;  %3878 = vmatpush2.bf16.msra.mxu0 %v5183_v23  ;;  %3982 = vmatprep.subr.bf16.mxu1 %v5221_v31  ;;  %v6530_v31 = vld [vmem:[#allocation20_spill] sm:$0xff] }
 0x1e8   :  { %v5976_v32 = vadd.f32 %v2508_v41, %v2396_v29  ;;  %v2398_v2 = vadd.f32 %v2397_v27, %v5832_v30  ;;  %3879 = vmatprep.subr.bf16.mxu0 %v5188_v62  ;;  %v5194_v30 = vld [vmem:[#allocation9 + $0xa4] ss:$8 sps:$4 sm:$0xff]   ;;  %3983 = vmatpush1.bf16.msra.mxu1 %v5219_v46  ;;  %v6528_v27 = vld [vmem:[#allocation18_spill] sm:$0xff] }
 0x1e9   :  { %v2399_v42 = vpop.f32.mrf.mxu0  ;;  %v2512_v49 = vpop.f32.mrf.mxu1  ;;  %v5224_v62 = vld [vmem:[#allocation9 + $0x104] ss:$8 sps:$4 sm:$0xff]  }
 0x1ea   :  { %v5979_v1 = vadd.f32 %v2510_v60, %v2398_v2  ;;  %v2400_v47 = vadd.f32 %v2399_v42, %v5837_v38  ;;  %v6529_v60 = vld [vmem:[#allocation19_spill] sm:$0xff]  ;;  %3984 = vmatprep.subr.bf16.mxu1 %v5224_v62 }
 0x1eb   :  { %v5982_v20 = vpop.f32.mrf.mxu0  ;;  %v5984_v23 = vpop.f32.mrf.mxu1  ;;  %3880 = vmatpush2.bf16.msra.mxu0 %v5186_v25  ;;  %v5222_v38 = vld [vmem:[#allocation9 + $0x100] ss:$8 sps:$4 sm:$0xff]   ;;  %v5195_v62 = vld [vmem:[#allocation9 + $0x90] ss:$8 sps:$4 sm:$0xff]  }
 0x1ec   :  { %v5986_v41 = vadd.f32 %v2512_v49, %v2400_v47  ;;  %3881 = vmatprep.subr.bf16.mxu0 %v5191_v5  ;;  %v5192_v5 = vld [vmem:[#allocation9 + $0xa0] ss:$8 sps:$4 sm:$0xff]   ;;  %v5197_v47 = vld [vmem:[#allocation9 + $0x94] ss:$8 sps:$4 sm:$0xff]   ;;  %3985 = vmatpush1.bf16.msra.mxu1 %v5222_v38 }
 0x1ed   :  { %v2405_v18 = vpop.f32.mrf.mxu0  ;;  %v2518_v29 = vpop.f32.mrf.mxu1  ;;  %3082 = vmatmul.mubr.bf16.gmra.mxu0 %v6528_v27  ;;  %3195 = vmatmul.mubr.bf16.gmra.mxu1 %v6529_v60  ;;  %v5227_v27 = vld [vmem:[#allocation9 + $0x1f4] ss:$8 sps:$4 sm:$0xff]  }
 0x1ee   :  { %v2406_v2 = vadd.f32 %v2405_v18, %v5845_v58  ;;  %3091 = vmatprep.mubr.bf16.mxu0 %v6530_v31  ;;  %3204 = vmatprep.mubr.bf16.mxu1 %v6491_v48  ;;  %v5225_v58 = vld [vmem:[#allocation9 + $0x1f0] ss:$8 sps:$4 sm:$0xff]  }
 0x1ef   :  { %v2407_v25 = vpop.f32.mrf.mxu0  ;;  %v2520_v42 = vpop.f32.mrf.mxu1  ;;  %3882 = vmatpush2.bf16.msra.mxu0 %v5189_v19  ;;  %3986 = vmatprep.subr.bf16.mxu1 %v5227_v27 }
 0x1f0   :  { %v5993_v49 = vadd.f32 %v2518_v29, %v2406_v2  ;;  %v2408_v46 = vadd.f32 %v2407_v25, %v5852_v63  ;;  %3883 = vmatprep.subr.bf16.mxu0 %v5194_v30  ;;  %v5200_v63 = vld [vmem:[#allocation9 + $0x84] ss:$8 sps:$4 sm:$0xff]   ;;  %3987 = vmatpush2.bf16.msra.mxu1 %v5225_v58 }
 0x1f1   :  { %v2409_v60 = vpop.f32.mrf.mxu0  ;;  %v2522_v52 = vpop.f32.mrf.mxu1  ;;  %v5230_v30 = vld [vmem:[#allocation9 + $0x1e4] ss:$8 sps:$4 sm:$0xff]  }
 0x1f2   :  { %v5996_v18 = vadd.f32 %v2520_v42, %v2408_v46  ;;  %v2410_v48 = vadd.f32 %v2409_v60, %v5857_v55  ;;  %v5228_v55 = vld [vmem:[#allocation9 + $0x1e0] ss:$8 sps:$4 sm:$0xff]   ;;  %3988 = vmatprep.subr.bf16.mxu1 %v5230_v30 }
 0x1f3   :  { %v5999_v31 = vpop.f32.mrf.mxu0  ;;  %v6001_v19 = vpop.f32.mrf.mxu1  ;;  %3884 = vmatpush2.bf16.msra.mxu0 %v5192_v5  ;;  %v5198_v5 = vld [vmem:[#allocation9 + $0x80] ss:$8 sps:$4 sm:$0xff]  }
 0x1f4   :  { %6531 = vst [vmem:[#allocation16_spill] sm:$0xff] %v6001_v19  ;;  %v6003_v29 = vadd.f32 %v2522_v52, %v2410_v48  ;;  %3885 = vmatprep.subr.bf16.mxu0 %v5197_v47  ;;  %v6532_v52 = vlaneseq  ;;  %3989 = vmatpush2.bf16.msra.mxu1 %v5228_v55  ;;  %v5231_v48 = vld [vmem:[#allocation9 + $0x1d0] ss:$8 sps:$4 sm:$0xff]   ;;  %v5236_v55 = vld [vmem:[#allocation9 + $0x1c4] ss:$8 sps:$4 sm:$0xff]  }
 0x1f5   :  { %v2415_v38 = vpop.f32.mrf.mxu0  ;;  %v2528_v2 = vpop.f32.mrf.mxu1  ;;  %3092 = vmatmul.mubr.bf16.gmra.mxu0 %v5717_v51  ;;  %3205 = vmatmul.mubr.bf16.gmra.mxu1 %v5719_v37  ;;  %v5233_v51 = vld [vmem:[#allocation9 + $0x1d4] ss:$8 sps:$4 sm:$0xff]  }
 0x1f6   :  { %v2416_v25 = vadd.f32 %v2415_v38, %v5865_v8  ;;  %v6009_v27 = vshrl.u32 %v6532_v52, 7  ;;  %3990 = vmatprep.subr.bf16.mxu1 %v5233_v51 }
 0x1f7   :  { %v2417_v42 = vpop.f32.mrf.mxu0  ;;  %v2530_v46 = vpop.f32.mrf.mxu1  ;;  %3886 = vmatpush2.bf16.msra.mxu0 %v5195_v62  ;;  %v6020_v62 = vld [vmem:[%s6465_s4] sm:$0xf] }
 0x1f8   :  { %6533 = vst [vmem:[#allocation17_spill] sm:$0xff] %v6009_v27  ;;  %v6011_v47 = vadd.f32 %v2528_v2, %v2416_v25  ;;  %v2418_v60 = vadd.f32 %v2417_v42, %v5872_v15  ;;  %3887 = vmatprep.subr.bf16.mxu0 %v5200_v63  ;;  %6534 = vst [vmem:[#allocation18_spill] sm:$0xff] %v6020_v62  ;;  %v6027_v15 = vsub.s32 0, %v6009_v27  ;;  %v6483_v63 = vsub.s32 1, %v6009_v27 }
 0x1f9   :  { %v2419_v58 = vpop.f32.mrf.mxu0  ;;  %v2532_v37 = vpop.f32.mrf.mxu1  ;;  %v2350_v2 = vadd.f32 %v5893_v0, %v5737_v11  ;;  %3991 = vmatpush2.bf16.msra.mxu1 %v5231_v48 }
 0x1fa   :  { %v6014_v19 = vadd.f32 %v2530_v46, %v2418_v60  ;;  %v2420_v8 = vadd.f32 %v2419_v58, %v5877_v22  ;;  %6536 = vst [vmem:[#allocation20_spill] sm:$0xff] %v6027_v15  ;;  %v5234_v46 = vld [vmem:[#allocation9 + $0x1c0] ss:$8 sps:$4 sm:$0xff]   ;;  %v6036_v52 = vrot.slane %v6020_v62, %v6027_v15  ;;  %3992 = vmatprep.subr.bf16.mxu1 %v5236_v55 }
 0x1fb   :  { %v6022_v30 = vpop.f32.mrf.mxu0  ;;  %v6024_v38 = vpop.f32.mrf.mxu1  ;;  %3888 = vmatpush2.bf16.msra.mxu0 %v5198_v5  ;;  %v2352_v5 = vadd.f32 %v5899_v54, %v5741_v16  ;;  %v6044_v0 = vrot.slane %v6020_v62, %v6483_v63  ;;  %v2463_v11 = vadd.f32 %v5895_v44, %v2350_v2  ;;  %v5237_v16 = vld [vmem:[#allocation9 + $0x1b0] ss:$8 sps:$4 sm:$0xff]  }
 0x1fc   :  { %6535 = vst [vmem:[#allocation19_spill] sm:$0xff] %v6024_v38  ;;  %v6032_v22 = vadd.f32 %v2532_v37, %v2420_v8  ;;  %v5239_v8 = vld [vmem:[#allocation9 + $0x1b4] ss:$8 sps:$4 sm:$0xff]  }
 0x1fd   :  { %v2571_v25 = vpop.f32.mrf.mxu0  ;;  %v2684_v42 = vpop.f32.mrf.mxu1  ;;  %3993 = vmatpush2.bf16.msra.mxu1 %v5234_v46 }
 0x1fe   :  { %6537 = vst [vmem:[#allocation55_spill] sm:$0xff] %v6032_v22  ;;  %v2572_v60 = vadd.f32 %v2571_v25, %v5890_v36  ;;  %v2465_v36 = vadd.f32 %v5901_v56, %v2352_v5  ;;  %3994 = vmatprep.subr.bf16.mxu1 %v5239_v8  ;;  %v5245_v8 = vld [vmem:[#allocation9 + $0x194] ss:$8 sps:$4 sm:$0xff]  }
 0x1ff   :  { %v2573_v51 = vpop.f32.mrf.mxu0  ;;  %v2686_v58 = vpop.f32.mrf.mxu1 }
 0x200   :  { %v2685_v37 = vadd.f32 %v2684_v42, %v2572_v60  ;;  %v2574_v48 = vadd.f32 %v2573_v51, %v5897_v45  ;;  %v5242_v45 = vld [vmem:[#allocation9 + $0x1a4] ss:$8 sps:$4 sm:$0xff]   ;;  %v5240_v51 = vld [vmem:[#allocation9 + $0x1a0] ss:$8 sps:$4 sm:$0xff]  }
 0x201   :  { %v2575_v15 = vpop.f32.mrf.mxu0  ;;  %v2688_v38 = vpop.f32.mrf.mxu1  ;;  %3995 = vmatpush2.bf16.msra.mxu1 %v5237_v16 }
 0x202   :  { %v3237_v54 = vadd.f32 %v6036_v52, %v2685_v37  ;;  %v2687_v55 = vadd.f32 %v2686_v58, %v2574_v48  ;;  %v2576_v25 = vadd.f32 %v2575_v15, %v2463_v11  ;;  %3996 = vmatprep.subr.bf16.mxu1 %v5242_v45  ;;  %v2362_v15 = vadd.f32 %v5914_v40, %v5761_v13 }
 0x203   :  { %v2577_v27 = vpop.f32.mrf.mxu0  ;;  %v2690_v63 = vpop.f32.mrf.mxu1 }
 0x204   :  { %v3238_v62 = vadd.f32 %v6044_v0, %v2687_v55  ;;  %v2689_v44 = vadd.f32 %v2688_v38, %v2576_v25  ;;  %v2578_v2 = vadd.f32 %v2577_v27, %v2465_v36  ;;  %v3301_v42 = vmul.f32 0.2, %v3237_v54  ;;  %v5243_v25 = vld [vmem:[#allocation9 + $0x190] ss:$8 sps:$4 sm:$0xff]  }
 0x205   :  { %v2581_v46 = vpop.f32.mrf.mxu0  ;;  %v2694_v60 = vpop.f32.mrf.mxu1  ;;  %3997 = vmatpush2.bf16.msra.mxu1 %v5240_v51 }
 0x206   :  { %v3241_v22 = vadd.f32 %v6036_v52, %v2689_v44  ;;  %v2691_v56 = vadd.f32 %v2690_v63, %v2578_v2  ;;  %v3302_v5 = vmul.f32 0.2, %v3238_v62  ;;  %v2582_v58 = vadd.f32 %v2581_v46, %v5908_v17  ;;  %3998 = vmatprep.subr.bf16.mxu1 %v5245_v8 }
 0x207   :  { %v2583_v11 = vpop.f32.mrf.mxu0  ;;  %v2696_v37 = vpop.f32.mrf.mxu1  ;;  %v3365_v16 = vmax.f32 %v3237_v54, %v3301_v42  ;;  %v2475_v17 = vadd.f32 %v5916_v14, %v2362_v15  ;;  %v2372_v15 = vadd.f32 %v5931_v10, %v5781_v24 }
 0x208   :  { %v3305_v38 = vmul.f32 0.2, %v3241_v22  ;;  %v3242_v27 = vadd.f32 %v6044_v0, %v2691_v56  ;;  %v2584_v48 = vadd.f32 %v2583_v11, %v5911_v33  ;;  %v2695_v36 = vadd.f32 %v2694_v60, %v2582_v58  ;;  %v5248_v60 = vld [vmem:[#allocation9 + $0x184] ss:$8 sps:$4 sm:$0xff]  }
 0x209   :  { %v2585_v55 = vpop.f32.mrf.mxu0  ;;  %v2698_v63 = vpop.f32.mrf.mxu1  ;;  %v3366_v45 = vmax.f32 %v3238_v62, %v3302_v5  ;;  %3999 = vmatpush2.bf16.msra.mxu1 %v5243_v25 }
 0x20a   :  { %v3369_v44 = vmax.f32 %v3241_v22, %v3305_v38  ;;  %v3306_v2 = vmul.f32 0.2, %v3242_v27  ;;  %v2697_v13 = vadd.f32 %v2696_v37, %v2584_v48  ;;  %v2586_v40 = vadd.f32 %v2585_v55, %v5918_v6  ;;  %v5246_v6 = vld [vmem:[#allocation9 + $0x180] ss:$8 sps:$4 sm:$0xff]   ;;  %4000 = vmatprep.subr.bf16.mxu1 %v5248_v60 }
 0x20b   :  { %v3245_v46 = vadd.f32 %v6036_v52, %v2695_v36  ;;  %v2587_v56 = vpop.f32.mrf.mxu0  ;;  %v2700_v33 = vpop.f32.mrf.mxu1 }
 0x20c   :  { %v3429_v51 = vpack.c.bf16 %v3369_v44, %v3365_v16  ;;  %v3370_v11 = vmax.f32 %v3242_v27, %v3306_v2  ;;  %v3246_v54 = vadd.f32 %v6044_v0, %v2697_v13  ;;  %v2699_v42 = vadd.f32 %v2698_v63, %v2586_v40 }
 0x20d   :  { %v3309_v22 = vmul.f32 0.2, %v3245_v46  ;;  %v2588_v58 = vadd.f32 %v2587_v56, %v2475_v17  ;;  %v2591_v37 = vpop.f32.mrf.mxu0  ;;  %v2704_v38 = vpop.f32.mrf.mxu1  ;;  %4001 = vmatpush2.bf16.msra.mxu1 %v5246_v6  ;;  %v2485_v17 = vadd.f32 %v5933_v53, %v2372_v15  ;;  %v2382_v53 = vadd.f32 %v5948_v21, %v5801_v35 }
 0x20e   :  { %v3249_v48 = vadd.f32 %v6036_v52, %v2699_v42  ;;  %v2592_v14 = vadd.f32 %v2591_v37, %v5925_v39  ;;  %v3430_v62 = vpack.c.bf16 %v3370_v11, %v3366_v45  ;;  %v3310_v16 = vmul.f32 0.2, %v3246_v54 }
 0x20f   :  { %v2701_v5 = vadd.f32 %v2700_v33, %v2588_v58  ;;  %v2593_v27 = vpop.f32.mrf.mxu0  ;;  %v2706_v8 = vpop.f32.mrf.mxu1  ;;  %v3373_v25 = vmax.f32 %v3245_v46, %v3309_v22  ;;  %v2495_v21 = vadd.f32 %v5950_v3, %v2382_v53  ;;  %v2392_v3 = vadd.f32 %v5965_v7, %v5821_v59 }
 0x210   :  { %v3313_v36 = vmul.f32 0.2, %v3249_v48  ;;  %v2705_v55 = vadd.f32 %v2704_v38, %v2592_v14  ;;  %v2594_v63 = vadd.f32 %v2593_v27, %v5928_v4  ;;  %3889 = vmatprep.mubr.bf16.mxu0 %v3430_v62  ;;  %v3374_v4 = vmax.f32 %v3246_v54, %v3310_v16 }
 0x211   :  { %v3250_v44 = vadd.f32 %v6044_v0, %v2701_v5  ;;  %v2595_v2 = vpop.f32.mrf.mxu0  ;;  %v2708_v39 = vpop.f32.mrf.mxu1  ;;  %3890 = vmatmul.mubr.bf16.vlgmr.msra.gmra.mxu0 %v3429_v51  ;;  %v2505_v7 = vadd.f32 %v5967_v26, %v2392_v3  ;;  %v2402_v26 = vadd.f32 %v5982_v20, %v5841_v34 }
 0x212   :  { %v3377_v13 = vmax.f32 %v3249_v48, %v3313_v36  ;;  %v3253_v40 = vadd.f32 %v6036_v52, %v2705_v55  ;;  %v2707_v24 = vadd.f32 %v2706_v8, %v2594_v63  ;;  %v2596_v10 = vadd.f32 %v2595_v2, %v5935_v9 }
 0x213   :  { %v3314_v45 = vmul.f32 0.2, %v3250_v44  ;;  %v2597_v56 = vpop.f32.mrf.mxu0  ;;  %v2710_v33 = vpop.f32.mrf.mxu1  ;;  %v2515_v20 = vadd.f32 %v5984_v23, %v2402_v26 }
 0x214   :  { %v3433_v11 = vpack.c.bf16 %v3377_v13, %v3373_v25  ;;  %v2709_v42 = vadd.f32 %v2708_v39, %v2596_v10  ;;  %v3317_v60 = vmul.f32 0.2, %v3253_v40  ;;  %v3254_v22 = vadd.f32 %v6044_v0, %v2707_v24 }
 0x215   :  { %v3378_v46 = vmax.f32 %v3250_v44, %v3314_v45  ;;  %v2598_v58 = vadd.f32 %v2597_v56, %v2485_v17  ;;  %v2601_v51 = vpop.f32.mrf.mxu0  ;;  %v2714_v37 = vpop.f32.mrf.mxu1 }
 0x216   :  { %v3257_v38 = vadd.f32 %v6036_v52, %v2709_v42  ;;  %v2602_v6 = vadd.f32 %v2601_v51, %v5942_v50  ;;  %v3381_v27 = vmax.f32 %v3253_v40, %v3317_v60  ;;  %v3318_v8 = vmul.f32 0.2, %v3254_v22 }
 0x217   :  { %v2711_v9 = vadd.f32 %v2710_v33, %v2598_v58  ;;  %v2603_v48 = vpop.f32.mrf.mxu0  ;;  %v2716_v14 = vpop.f32.mrf.mxu1  ;;  %v3434_v54 = vpack.c.bf16 %v3378_v46, %v3374_v4 }
 0x218   :  { %v3321_v62 = vmul.f32 0.2, %v3257_v38  ;;  %v2715_v15 = vadd.f32 %v2714_v37, %v2602_v6  ;;  %v2604_v5 = vadd.f32 %v2603_v48, %v5945_v43  ;;  %v3382_v24 = vmax.f32 %v3254_v22, %v3318_v8 }
 0x219   :  { %v3258_v16 = vadd.f32 %v6044_v0, %v2711_v9  ;;  %3899 = vmatprep.mubr.bf16.mxu0 %v3434_v54  ;;  %v2605_v36 = vpop.f32.mrf.mxu0  ;;  %v2718_v55 = vpop.f32.mrf.mxu1 }
 0x21a   :  { %v3385_v63 = vmax.f32 %v3257_v38, %v3321_v62  ;;  %v3261_v50 = vadd.f32 %v6036_v52, %v2715_v15  ;;  %v2717_v25 = vadd.f32 %v2716_v14, %v2604_v5  ;;  %v2606_v35 = vadd.f32 %v2605_v36, %v5952_v61  ;;  %3900 = vmatmul.mubr.bf16.gmra.mxu0 %v3433_v11 }
 0x21b   :  { %v3322_v44 = vmul.f32 0.2, %v3258_v16  ;;  %v2607_v2 = vpop.f32.mrf.mxu0  ;;  %v2720_v39 = vpop.f32.mrf.mxu1 }
 0x21c   :  { %v3437_v43 = vpack.c.bf16 %v3385_v63, %v3381_v27  ;;  %v3262_v13 = vadd.f32 %v6044_v0, %v2717_v25  ;;  %v2719_v40 = vadd.f32 %v2718_v55, %v2606_v35  ;;  %v3325_v17 = vmul.f32 0.2, %v3261_v50 }
 0x21d   :  { %v3386_v10 = vmax.f32 %v3258_v16, %v3322_v44  ;;  %v2608_v45 = vadd.f32 %v2607_v2, %v2495_v21  ;;  %v2611_v56 = vpop.f32.mrf.mxu0  ;;  %v2724_v33 = vpop.f32.mrf.mxu1 }
 0x21e   :  { %v3265_v4 = vadd.f32 %v6036_v52, %v2719_v40  ;;  %v2612_v61 = vadd.f32 %v2611_v56, %v5959_v57  ;;  %v3326_v58 = vmul.f32 0.2, %v3262_v13  ;;  %v3389_v38 = vmax.f32 %v3261_v50, %v3325_v17 }
 0x21f   :  { %v2721_v11 = vadd.f32 %v2720_v39, %v2608_v45  ;;  %v2613_v42 = vpop.f32.mrf.mxu0  ;;  %v2726_v46 = vpop.f32.mrf.mxu1  ;;  %v3438_v60 = vpack.c.bf16 %v3386_v10, %v3382_v24 }
 0x220   :  { %v3329_v51 = vmul.f32 0.2, %v3265_v4  ;;  %v2725_v37 = vadd.f32 %v2724_v33, %v2612_v61  ;;  %v2614_v22 = vadd.f32 %v2613_v42, %v5962_v12  ;;  %v3390_v5 = vmax.f32 %v3262_v13, %v3326_v58 }
 0x221   :  { %v3266_v6 = vadd.f32 %v6044_v0, %v2721_v11  ;;  %3909 = vmatprep.mubr.bf16.mxu0 %v3438_v60  ;;  %v2615_v53 = vpop.f32.mrf.mxu0  ;;  %v2728_v9 = vpop.f32.mrf.mxu1 }
 0x222   :  { %v3393_v48 = vmax.f32 %v3265_v4, %v3329_v51  ;;  %v3269_v57 = vadd.f32 %v6036_v52, %v2725_v37  ;;  %v2727_v14 = vadd.f32 %v2726_v46, %v2614_v22  ;;  %v2616_v59 = vadd.f32 %v2615_v53, %v5969_v28  ;;  %3910 = vmatmul.mubr.bf16.gmra.mxu0 %v3437_v43 }
 0x223   :  { %v3330_v54 = vmul.f32 0.2, %v3266_v6  ;;  %v2617_v62 = vpop.f32.mrf.mxu0  ;;  %v2730_v15 = vpop.f32.mrf.mxu1 }
 0x224   :  { %v3441_v12 = vpack.c.bf16 %v3393_v48, %v3389_v38  ;;  %v2729_v27 = vadd.f32 %v2728_v9, %v2616_v59  ;;  %v3333_v16 = vmul.f32 0.2, %v3269_v57  ;;  %v3270_v36 = vadd.f32 %v6044_v0, %v2727_v14 }
 0x225   :  { %v3394_v8 = vmax.f32 %v3266_v6, %v3330_v54  ;;  %v2618_v55 = vadd.f32 %v2617_v62, %v2505_v7  ;;  %v2621_v63 = vpop.f32.mrf.mxu0  ;;  %v2734_v50 = vpop.f32.mrf.mxu1  ;;  %v6538_v6 = vld [vmem:[#allocation48_spill] sm:$0xff] }
 0x226   :  { %v3273_v25 = vadd.f32 %v6036_v52, %v2729_v27  ;;  %v2622_v28 = vadd.f32 %v2621_v63, %v5976_v32  ;;  %v3397_v40 = vmax.f32 %v3269_v57, %v3333_v16  ;;  %v3334_v24 = vmul.f32 0.2, %v3270_v36  ;;  %v6539_v16 = vld [vmem:[#allocation16_spill] sm:$0xff] }
 0x227   :  { %v2731_v35 = vadd.f32 %v2730_v15, %v2618_v55  ;;  %v2623_v21 = vpop.f32.mrf.mxu0  ;;  %v2736_v44 = vpop.f32.mrf.mxu1  ;;  %v3442_v2 = vpack.c.bf16 %v3394_v8, %v3390_v5  ;;  %v2412_v23 = vadd.f32 %v5999_v31, %v6538_v6 }
 0x228   :  { %v3337_v39 = vmul.f32 0.2, %v3273_v25  ;;  %v2735_v43 = vadd.f32 %v2734_v50, %v2622_v28  ;;  %v2624_v13 = vadd.f32 %v2623_v21, %v5979_v1  ;;  %v3398_v46 = vmax.f32 %v3270_v36, %v3334_v24 }
 0x229   :  { %v3274_v10 = vadd.f32 %v6044_v0, %v2731_v35  ;;  %3919 = vmatprep.mubr.bf16.mxu0 %v3442_v2  ;;  %v2625_v17 = vpop.f32.mrf.mxu0  ;;  %v2738_v45 = vpop.f32.mrf.mxu1  ;;  %v2525_v36 = vadd.f32 %v6539_v16, %v2412_v23 }
 0x22a   :  { %v3401_v56 = vmax.f32 %v3273_v25, %v3337_v39  ;;  %v3277_v32 = vadd.f32 %v6036_v52, %v2735_v43  ;;  %v2737_v33 = vadd.f32 %v2736_v44, %v2624_v13  ;;  %v2626_v34 = vadd.f32 %v2625_v17, %v5986_v41  ;;  %3920 = vmatmul.mubr.bf16.gmra.mxu0 %v3441_v12  ;;  %v6540_v13 = vld [vmem:[#allocation53_spill] sm:$0xff] }
 0x22b   :  { %v3338_v4 = vmul.f32 0.2, %v3274_v10  ;;  %v2627_v61 = vpop.f32.mrf.mxu0  ;;  %v2740_v3 = vpop.f32.mrf.mxu1 }
 0x22c   :  { %v3445_v1 = vpack.c.bf16 %v3401_v56, %v3397_v40  ;;  %v3278_v11 = vadd.f32 %v6044_v0, %v2737_v33  ;;  %v2739_v42 = vadd.f32 %v2738_v45, %v2626_v34  ;;  %v3341_v58 = vmul.f32 0.2, %v3277_v32 }
 0x22d   :  { %v3402_v60 = vmax.f32 %v3274_v10, %v3338_v4  ;;  %v2628_v51 = vadd.f32 %v2627_v61, %v2515_v20  ;;  %v2631_v37 = vpop.f32.mrf.mxu0  ;;  %v2744_v22 = vpop.f32.mrf.mxu1  ;;  %v2422_v40 = vadd.f32 %v6022_v30, %v6540_v13  ;;  %v6541_v30 = vld [vmem:[#allocation55_spill] sm:$0xff] }
 0x22e   :  { %v3281_v38 = vadd.f32 %v6036_v52, %v2739_v42  ;;  %v2632_v41 = vadd.f32 %v2631_v37, %v5993_v49  ;;  %v3342_v14 = vmul.f32 0.2, %v3278_v11  ;;  %v3405_v62 = vmax.f32 %v3277_v32, %v3341_v58 }
 0x22f   :  { %v2741_v53 = vadd.f32 %v2740_v3, %v2628_v51  ;;  %v2633_v9 = vpop.f32.mrf.mxu0  ;;  %v2746_v48 = vpop.f32.mrf.mxu1  ;;  %v3446_v57 = vpack.c.bf16 %v3402_v60, %v3398_v46  ;;  %v6542_v46 = vld [vmem:[#allocation19_spill] sm:$0xff] }
 0x230   :  { %v3345_v59 = vmul.f32 0.2, %v3281_v38  ;;  %v2745_v7 = vadd.f32 %v2744_v22, %v2632_v41  ;;  %v2634_v54 = vadd.f32 %v2633_v9, %v5996_v18  ;;  %v3406_v25 = vmax.f32 %v3278_v11, %v3342_v14  ;;  %v6543_v14 = vld [vmem:[#allocation21_spill] sm:$0xff] }
 0x231   :  { %v3282_v15 = vadd.f32 %v6044_v0, %v2741_v53  ;;  %3929 = vmatprep.mubr.bf16.mxu0 %v3446_v57  ;;  %v2635_v5 = vpop.f32.mrf.mxu0  ;;  %v2748_v12 = vpop.f32.mrf.mxu1  ;;  %v2535_v60 = vadd.f32 %v6542_v46, %v2422_v40  ;;  %v6546_v40 = vld [vmem:[#allocation26_spill] sm:$0xff] }
 0x232   :  { %v3409_v27 = vmax.f32 %v3281_v38, %v3345_v59  ;;  %v3285_v49 = vadd.f32 %v6036_v52, %v2745_v7  ;;  %v2747_v8 = vadd.f32 %v2746_v48, %v2634_v54  ;;  %v2636_v31 = vadd.f32 %v2635_v5, %v6003_v29  ;;  %3930 = vmatmul.mubr.bf16.gmra.mxu0 %v3445_v1 }
 0x233   :  { %v3346_v55 = vmul.f32 0.2, %v3282_v15  ;;  %v2637_v63 = vpop.f32.mrf.mxu0  ;;  %v2750_v50 = vpop.f32.mrf.mxu1 }
 0x234   :  { %v3449_v18 = vpack.c.bf16 %v3409_v27, %v3405_v62  ;;  %v2749_v28 = vadd.f32 %v2748_v12, %v2636_v31  ;;  %v3349_v35 = vmul.f32 0.2, %v3285_v49  ;;  %v3286_v21 = vadd.f32 %v6044_v0, %v2747_v8  ;;  %v6544_v27 = vld [vmem:[#allocation22_spill] sm:$0xff] }
 0x235   :  { %v3410_v26 = vmax.f32 %v3282_v15, %v3346_v55  ;;  %v2638_v44 = vadd.f32 %v2637_v63, %v2525_v36  ;;  %v2641_v2 = vpop.f32.mrf.mxu0  ;;  %v2754_v39 = vpop.f32.mrf.mxu1 }
 0x236   :  { %v3289_v43 = vadd.f32 %v6036_v52, %v2749_v28  ;;  %v2642_v29 = vadd.f32 %v2641_v2, %v6011_v47  ;;  %v3413_v34 = vmax.f32 %v3285_v49, %v3349_v35  ;;  %v3350_v20 = vmul.f32 0.2, %v3286_v21 }
 0x237   :  { %v2751_v24 = vadd.f32 %v2750_v50, %v2638_v44  ;;  %v2643_v10 = vpop.f32.mrf.mxu0  ;;  %v2756_v17 = vpop.f32.mrf.mxu1  ;;  %v3450_v45 = vpack.c.bf16 %v3410_v26, %v3406_v25  ;;  %v6545_v44 = vld [vmem:[#allocation25_spill] sm:$0xff] }
 0x238   :  { %v3353_v56 = vmul.f32 0.2, %v3289_v43  ;;  %v2755_v32 = vadd.f32 %v2754_v39, %v2642_v29  ;;  %v2644_v33 = vadd.f32 %v2643_v10, %v6014_v19  ;;  %v3414_v38 = vmax.f32 %v3286_v21, %v3350_v20 }
 0x239   :  { %v3290_v4 = vadd.f32 %v6044_v0, %v2751_v24  ;;  %3939 = vmatprep.mubr.bf16.mxu0 %v3450_v45  ;;  %v2645_v61 = vpop.f32.mrf.mxu0  ;;  %v2758_v3 = vpop.f32.mrf.mxu1 }
 0x23a   :  { %v3417_v1 = vmax.f32 %v3289_v43, %v3353_v56  ;;  %v3293_v47 = vadd.f32 %v6036_v52, %v2755_v32  ;;  %v2757_v11 = vadd.f32 %v2756_v17, %v2644_v33  ;;  %v2646_v42 = vadd.f32 %v2645_v61, %v6541_v30  ;;  %3940 = vmatmul.mubr.bf16.gmra.mxu0 %v3449_v18  ;;  %v6547_v56 = vld [vmem:[#allocation27_spill] sm:$0xff] }
 0x23b   :  { %v3354_v58 = vmul.f32 0.2, %v3290_v4  ;;  %v2647_v51 = vpop.f32.mrf.mxu0  ;;  %v2760_v37 = vpop.f32.mrf.mxu1 }
 0x23c   :  { %v3453_v19 = vpack.c.bf16 %v3417_v1, %v3413_v34  ;;  %v2759_v22 = vadd.f32 %v2758_v3, %v2646_v42  ;;  %v3294_v6 = vadd.f32 %v6044_v0, %v2757_v11  ;;  %v2648_v23 = vadd.f32 %v2647_v51, %v2535_v60  ;;  %v6548_v3 = vld [vmem:[#allocation29_spill] sm:$0xff]  ;;  %v6549_v42 = vld [vmem:[#allocation30_spill] sm:$0xff] }
 0x23d   :  { %v3418_v41 = vmax.f32 %v3290_v4, %v3354_v58  ;;  %v2797_v53 = vpop.f32.mrf.mxu0  ;;  %v2910_v9 = vpop.f32.mrf.mxu1  ;;  %v3357_v48 = vmul.f32 0.2, %v3293_v47 }
 0x23e   :  { %v3297_v57 = vadd.f32 %v6036_v52, %v2759_v22  ;;  %v2798_v59 = vadd.f32 %v2797_v53, %v6543_v14  ;;  %v2761_v7 = vadd.f32 %v2760_v37, %v2648_v23  ;;  %v3358_v8 = vmul.f32 0.2, %v3294_v6  ;;  %v6550_v37 = vld [vmem:[#allocation31_spill] sm:$0xff]  ;;  %v6551_v53 = vld [vmem:[#allocation33_spill] sm:$0xff] }
 0x23f   :  { %v2799_v54 = vpop.f32.mrf.mxu0  ;;  %v2912_v62 = vpop.f32.mrf.mxu1  ;;  %v3454_v15 = vpack.c.bf16 %v3418_v41, %v3414_v38  ;;  %v3421_v52 = vmax.f32 %v3293_v47, %v3357_v48 }
 0x240   :  { %v3361_v5 = vmul.f32 0.2, %v3297_v57  ;;  %v6123_v12 = vadd.f32 %v2910_v9, %v2798_v59  ;;  %v2800_v49 = vadd.f32 %v2799_v54, %v6544_v27  ;;  %v3298_v31 = vadd.f32 %v6044_v0, %v2761_v7  ;;  %v6552_v59 = vld [vmem:[#allocation34_spill] sm:$0xff] }
 0x241   :  { %3949 = vmatprep.mubr.bf16.mxu0 %v3454_v15  ;;  %v6127_v16 = vpop.f32.mrf.mxu0  ;;  %v6129_v36 = vpop.f32.mrf.mxu1  ;;  %v3422_v26 = vmax.f32 %v3294_v6, %v3358_v8 }
 0x242   :  { %v3425_v55 = vmax.f32 %v3297_v57, %v3361_v5  ;;  %v6131_v63 = vadd.f32 %v2912_v62, %v2800_v49  ;;  %3950 = vmatmul.mubr.bf16.gmra.mxu0 %v3453_v19  ;;  %v3362_v50 = vmul.f32 0.2, %v3298_v31  ;;  %v6553_v5 = vld [vmem:[#allocation35_spill] sm:$0xff] }
 0x243   :  { %v6133_v25 = vpop.f32.mrf.mxu0  ;;  %v6135_v18 = vpop.f32.mrf.mxu1 }
 0x244   :  { %v3457_v28 = vpack.c.bf16 %v3425_v55, %v3421_v52  ;;  %v3426_v35 = vmax.f32 %v3298_v31, %v3362_v50  ;;  %v6554_v50 = vld [vmem:[#allocation37_spill] sm:$0xff] }
 0x245   :  { %v2807_v21 = vpop.f32.mrf.mxu0  ;;  %v2920_v0 = vpop.f32.mrf.mxu1 }
 0x246   :  { %v2808_v2 = vadd.f32 %v2807_v21, %v6545_v44  ;;  %v3458_v29 = vpack.c.bf16 %v3426_v35, %v3422_v26 }
 0x247   :  { %v2809_v39 = vpop.f32.mrf.mxu0  ;;  %v2922_v43 = vpop.f32.mrf.mxu1 }
 0x248   :  { %v6138_v13 = vadd.f32 %v2920_v0, %v2808_v2  ;;  %v2810_v24 = vadd.f32 %v2809_v39, %v6546_v40  ;;  %3959 = vmatprep.mubr.bf16.mxu0 %v3458_v29  ;;  %v6555_v0 = vld [vmem:[#allocation38_spill] sm:$0xff]  ;;  %v6556_v29 = vld [vmem:[#allocation39_spill] sm:$0xff] }
 0x249   :  { %v2811_v10 = vpop.f32.mrf.mxu0  ;;  %v2924_v17 = vpop.f32.mrf.mxu1 }
 0x24a   :  { %v6141_v45 = vadd.f32 %v2922_v43, %v2810_v24  ;;  %v2812_v32 = vadd.f32 %v2811_v10, %v6547_v56  ;;  %3960 = vmatmul.mubr.bf16.gmra.mxu0 %v3457_v28 }
 0x24b   :  { %v6144_v33 = vpop.f32.mrf.mxu0  ;;  %v6146_v34 = vpop.f32.mrf.mxu1 }
 0x24c   :  { %v6148_v20 = vadd.f32 %v2924_v17, %v2812_v32 }
 0x24d   :  { %v2817_v4 = vpop.f32.mrf.mxu0  ;;  %v2930_v61 = vpop.f32.mrf.mxu1 }
 0x24e   :  { %v2818_v1 = vadd.f32 %v2817_v4, %v6548_v3  ;;  %v6557_v4 = vld [vmem:[#allocation41_spill] sm:$0xff] }
 0x24f   :  { %v2819_v47 = vpop.f32.mrf.mxu0  ;;  %v2932_v11 = vpop.f32.mrf.mxu1 }
 0x250   :  { %v6151_v30 = vadd.f32 %v2930_v61, %v2818_v1  ;;  %v2820_v46 = vadd.f32 %v2819_v47, %v6549_v42 }
 0x251   :  { %v2821_v60 = vpop.f32.mrf.mxu0  ;;  %v2934_v58 = vpop.f32.mrf.mxu1 }
 0x252   :  { %v6154_v51 = vadd.f32 %v2932_v11, %v2820_v46  ;;  %v2822_v19 = vadd.f32 %v2821_v60, %v6550_v37  ;;  %v6558_v11 = vld [vmem:[#allocation42_spill] sm:$0xff]  ;;  %v6559_v37 = vld [vmem:[#allocation43_spill] sm:$0xff] }
 0x253   :  { %v6157_v22 = vpop.f32.mrf.mxu0  ;;  %v6159_v38 = vpop.f32.mrf.mxu1 }
 0x254   :  { %v6161_v41 = vadd.f32 %v2934_v58, %v2822_v19 }
 0x255   :  { %v2827_v6 = vpop.f32.mrf.mxu0  ;;  %v2940_v23 = vpop.f32.mrf.mxu1 }
 0x256   :  { %v2828_v9 = vadd.f32 %v2827_v6, %v6551_v53 }
 0x257   :  { %v2829_v48 = vpop.f32.mrf.mxu0  ;;  %v2942_v57 = vpop.f32.mrf.mxu1 }
 0x258   :  { %v6164_v14 = vadd.f32 %v2940_v23, %v2828_v9  ;;  %v2830_v7 = vadd.f32 %v2829_v48, %v6552_v59 }
 0x259   :  { %v2831_v54 = vpop.f32.mrf.mxu0  ;;  %v2944_v62 = vpop.f32.mrf.mxu1 }
 0x25a   :  { %v6167_v15 = vadd.f32 %v2942_v57, %v2830_v7  ;;  %v2832_v27 = vadd.f32 %v2831_v54, %v6553_v5  ;;  %v6560_v57 = vld [vmem:[#allocation45_spill] sm:$0xff]  ;;  %v6561_v5 = vld [vmem:[#allocation46_spill] sm:$0xff] }
 0x25b   :  { %v6170_v49 = vpop.f32.mrf.mxu0  ;;  %v6172_v8 = vpop.f32.mrf.mxu1 }
 0x25c   :  { %v6174_v31 = vadd.f32 %v2944_v62, %v2832_v27 }
 0x25d   :  { %v2837_v52 = vpop.f32.mrf.mxu0  ;;  %v2950_v55 = vpop.f32.mrf.mxu1 }
 0x25e   :  { %v2838_v28 = vadd.f32 %v2837_v52, %v6554_v50 }
 0x25f   :  { %v2839_v26 = vpop.f32.mrf.mxu0  ;;  %v2952_v35 = vpop.f32.mrf.mxu1 }
 0x260   :  { %v6177_v21 = vadd.f32 %v2950_v55, %v2838_v28  ;;  %v2840_v44 = vadd.f32 %v2839_v26, %v6555_v0  ;;  %v6562_v28 = vld [vmem:[#allocation47_spill] sm:$0xff] }
 0x261   :  { %v2841_v2 = vpop.f32.mrf.mxu0  ;;  %v2954_v39 = vpop.f32.mrf.mxu1 }
 0x262   :  { %v6180_v43 = vadd.f32 %v2952_v35, %v2840_v44  ;;  %v2842_v40 = vadd.f32 %v2841_v2, %v6556_v29  ;;  %v6563_v29 = vld [vmem:[#allocation50_spill] sm:$0xff] }
 0x263   :  { %v6183_v24 = vpop.f32.mrf.mxu0  ;;  %v6185_v10 = vpop.f32.mrf.mxu1 }
 0x264   :  { %v6187_v17 = vadd.f32 %v2954_v39, %v2842_v40 }
 0x265   :  { %v2847_v56 = vpop.f32.mrf.mxu0  ;;  %v2960_v32 = vpop.f32.mrf.mxu1 }
 0x266   :  { %v2848_v61 = vadd.f32 %v2847_v56, %v6557_v4 }
 0x267   :  { %v2849_v3 = vpop.f32.mrf.mxu0  ;;  %v2962_v1 = vpop.f32.mrf.mxu1 }
 0x268   :  { %v6190_v47 = vadd.f32 %v2960_v32, %v2848_v61  ;;  %v2850_v42 = vadd.f32 %v2849_v3, %v6558_v11  ;;  %v6564_v61 = vld [vmem:[#allocation51_spill] sm:$0xff] }
 0x269   :  { %v2851_v46 = vpop.f32.mrf.mxu0  ;;  %v2964_v60 = vpop.f32.mrf.mxu1 }
 0x26a   :  { %v6193_v58 = vadd.f32 %v2962_v1, %v2850_v42  ;;  %v2852_v19 = vadd.f32 %v2851_v46, %v6559_v37  ;;  %v6565_v42 = vld [vmem:[#allocation17_spill] sm:$0xff]  ;;  %v6566_v37 = vld [vmem:[#allocation52_spill] sm:$0xff] }
 0x26b   :  { %v6196_v6 = vpop.f32.mrf.mxu0  ;;  %v6198_v23 = vpop.f32.mrf.mxu1  ;;  %v3227_v46 = vsub.s32 2, %v6565_v42 }
 0x26c   :  { %v6200_v53 = vadd.f32 %v2964_v60, %v2852_v19 }
 0x26d   :  { %v2857_v9 = vpop.f32.mrf.mxu0  ;;  %v2970_v48 = vpop.f32.mrf.mxu1 }
 0x26e   :  { %v2858_v59 = vadd.f32 %v2857_v9, %v6560_v57  ;;  %v3231_v57 = vsub.s32 3, %v6565_v42 }
 0x26f   :  { %v2859_v7 = vpop.f32.mrf.mxu0  ;;  %v2972_v54 = vpop.f32.mrf.mxu1 }
 0x270   :  { %v6203_v62 = vadd.f32 %v2970_v48, %v2858_v59  ;;  %v2860_v27 = vadd.f32 %v2859_v7, %v6561_v5  ;;  %v6567_v59 = vld [vmem:[#allocation23_spill] sm:$0xff] }
 0x271   :  { %v2861_v52 = vpop.f32.mrf.mxu0  ;;  %v2974_v55 = vpop.f32.mrf.mxu1  ;;  %v2802_v7 = vadd.f32 %v6127_v16, %v6567_v59 }
 0x272   :  { %v6206_v50 = vadd.f32 %v2972_v54, %v2860_v27  ;;  %v2862_v26 = vadd.f32 %v2861_v52, %v6562_v28  ;;  %v6568_v52 = vld [vmem:[#allocation18_spill] sm:$0xff]  ;;  %v6569_v28 = vld [vmem:[#allocation24_spill] sm:$0xff] }
 0x273   :  { %v6209_v35 = vpop.f32.mrf.mxu0  ;;  %v6211_v0 = vpop.f32.mrf.mxu1 }
 0x274   :  { %v6213_v44 = vadd.f32 %v2974_v55, %v2862_v26  ;;  %v6233_v55 = vrot.slane %v6568_v52, %v3227_v46  ;;  %v2804_v26 = vadd.f32 %v6133_v25, %v6569_v28 }
 0x275   :  { %v2867_v2 = vpop.f32.mrf.mxu0  ;;  %v2980_v39 = vpop.f32.mrf.mxu1 }
 0x276   :  { %v2868_v40 = vadd.f32 %v2867_v2, %v6563_v29 }
 0x277   :  { %v2869_v56 = vpop.f32.mrf.mxu0  ;;  %v2982_v32 = vpop.f32.mrf.mxu1 }
 0x278   :  { %v6216_v4 = vadd.f32 %v2980_v39, %v2868_v40  ;;  %v2870_v3 = vadd.f32 %v2869_v56, %v6564_v61  ;;  %v6239_v40 = vrot.slane %v6568_v52, %v3231_v57  ;;  %v2915_v56 = vadd.f32 %v6129_v36, %v2802_v7 }
 0x279   :  { %v2871_v1 = vpop.f32.mrf.mxu0  ;;  %v2984_v11 = vpop.f32.mrf.mxu1 }
 0x27a   :  { %v6220_v60 = vadd.f32 %v2982_v32, %v2870_v3  ;;  %v2872_v19 = vadd.f32 %v2871_v1, %v6566_v37  ;;  %v2917_v1 = vadd.f32 %v6135_v18, %v2804_v26 }
 0x27b   :  { %v6223_v9 = vpop.f32.mrf.mxu0  ;;  %v6225_v48 = vpop.f32.mrf.mxu1 }
 0x27c   :  { %v6230_v54 = vadd.f32 %v2984_v11, %v2872_v19 }
 0x27d   :  { %v3023_v5 = vpop.f32.mrf.mxu0  ;;  %v3136_v27 = vpop.f32.mrf.mxu1 }
 0x27e   :  { %v3024_v2 = vadd.f32 %v3023_v5, %v6123_v12 }
 0x27f   :  { %v3025_v39 = vpop.f32.mrf.mxu0  ;;  %v3138_v29 = vpop.f32.mrf.mxu1 }
 0x280   :  { %v3137_v16 = vadd.f32 %v3136_v27, %v3024_v2  ;;  %v3026_v32 = vadd.f32 %v3025_v39, %v6131_v63  ;;  %v6570_v27 = vld [vmem:[#allocation28_spill] sm:$0xff] }
 0x281   :  { %v3027_v61 = vpop.f32.mrf.mxu0  ;;  %v3140_v3 = vpop.f32.mrf.mxu1  ;;  %v2814_v28 = vadd.f32 %v6144_v33, %v6570_v27 }
 0x282   :  { %v3239_v11 = vadd.f32 %v6233_v55, %v3137_v16  ;;  %v3139_v46 = vadd.f32 %v3138_v29, %v3026_v32  ;;  %v3028_v25 = vadd.f32 %v3027_v61, %v2915_v56 }
 0x283   :  { %v3029_v37 = vpop.f32.mrf.mxu0  ;;  %v3142_v12 = vpop.f32.mrf.mxu1  ;;  %v2927_v33 = vadd.f32 %v6146_v34, %v2814_v28  ;;  %v6571_v34 = vld [vmem:[#allocation32_spill] sm:$0xff] }
 0x284   :  { %v3240_v19 = vadd.f32 %v6239_v40, %v3139_v46  ;;  %v3141_v59 = vadd.f32 %v3140_v3, %v3028_v25  ;;  %v3030_v57 = vadd.f32 %v3029_v37, %v2917_v1  ;;  %v3303_v5 = vmul.f32 0.2, %v3239_v11 }
 0x285   :  { %v3033_v52 = vpop.f32.mrf.mxu0  ;;  %v3146_v36 = vpop.f32.mrf.mxu1 }
 0x286   :  { %v3243_v7 = vadd.f32 %v6233_v55, %v3141_v59  ;;  %v3143_v63 = vadd.f32 %v3142_v12, %v3030_v57  ;;  %v3304_v18 = vmul.f32 0.2, %v3240_v19  ;;  %v3034_v26 = vadd.f32 %v3033_v52, %v6138_v13 }
 0x287   :  { %v3035_v2 = vpop.f32.mrf.mxu0  ;;  %v3148_v39 = vpop.f32.mrf.mxu1  ;;  %v3367_v32 = vmax.f32 %v3239_v11, %v3303_v5 }
 0x288   :  { %v3307_v29 = vmul.f32 0.2, %v3243_v7  ;;  %v3244_v56 = vadd.f32 %v6239_v40, %v3143_v63  ;;  %v3036_v16 = vadd.f32 %v3035_v2, %v6141_v45  ;;  %v3147_v61 = vadd.f32 %v3146_v36, %v3034_v26 }
 0x289   :  { %v3037_v3 = vpop.f32.mrf.mxu0  ;;  %v3150_v1 = vpop.f32.mrf.mxu1  ;;  %v3368_v59 = vmax.f32 %v3240_v19, %v3304_v18  ;;  %v2824_v19 = vadd.f32 %v6157_v22, %v6571_v34 }
 0x28a   :  { %v3371_v46 = vmax.f32 %v3243_v7, %v3307_v29  ;;  %v3308_v25 = vmul.f32 0.2, %v3244_v56  ;;  %v3149_v37 = vadd.f32 %v3148_v39, %v3036_v16  ;;  %v3038_v12 = vadd.f32 %v3037_v3, %v6148_v20 }
 0x28b   :  { %v3247_v13 = vadd.f32 %v6233_v55, %v3147_v61  ;;  %v3039_v57 = vpop.f32.mrf.mxu0  ;;  %v3152_v52 = vpop.f32.mrf.mxu1 }
 0x28c   :  { %v3431_v27 = vpack.c.bf16 %v3371_v46, %v3367_v32  ;;  %v3372_v63 = vmax.f32 %v3244_v56, %v3308_v25  ;;  %v3248_v45 = vadd.f32 %v6239_v40, %v3149_v37  ;;  %v3151_v11 = vadd.f32 %v3150_v1, %v3038_v12 }
 0x28d   :  { %v3311_v5 = vmul.f32 0.2, %v3247_v13  ;;  %v3040_v36 = vadd.f32 %v3039_v57, %v2927_v33  ;;  %v3043_v26 = vpop.f32.mrf.mxu0  ;;  %v3156_v7 = vpop.f32.mrf.mxu1  ;;  %v2937_v33 = vadd.f32 %v6159_v38, %v2824_v19 }
 0x28e   :  { %v3251_v2 = vadd.f32 %v6233_v55, %v3151_v11  ;;  %v3044_v20 = vadd.f32 %v3043_v26, %v6151_v30  ;;  %v3432_v39 = vpack.c.bf16 %v3372_v63, %v3368_v59  ;;  %v3312_v3 = vmul.f32 0.2, %v3248_v45 }
 0x28f   :  { %v3153_v28 = vadd.f32 %v3152_v52, %v3040_v36  ;;  %v3045_v18 = vpop.f32.mrf.mxu0  ;;  %v3158_v29 = vpop.f32.mrf.mxu1  ;;  %v3375_v61 = vmax.f32 %v3247_v13, %v3311_v5 }
 0x290   :  { %v3315_v16 = vmul.f32 0.2, %v3251_v2  ;;  %v3157_v56 = vadd.f32 %v3156_v7, %v3044_v20  ;;  %v3046_v32 = vadd.f32 %v3045_v18, %v6154_v51  ;;  %4002 = vmatprep.mubr.bf16.mxu1 %v3432_v39  ;;  %v3376_v11 = vmax.f32 %v3248_v45, %v3312_v3 }
 0x291   :  { %v3252_v1 = vadd.f32 %v6239_v40, %v3153_v28  ;;  %v3047_v46 = vpop.f32.mrf.mxu0  ;;  %v3160_v25 = vpop.f32.mrf.mxu1  ;;  %4003 = vmatmul.mubr.bf16.vlgmr.msra.gmra.mxu1 %v3431_v27 }
 0x292   :  { %v3379_v30 = vmax.f32 %v3251_v2, %v3315_v16  ;;  %v3255_v37 = vadd.f32 %v6233_v55, %v3157_v56  ;;  %v3159_v12 = vadd.f32 %v3158_v29, %v3046_v32  ;;  %v3048_v22 = vadd.f32 %v3047_v46, %v6161_v41  ;;  %v6572_v41 = vld [vmem:[#allocation36_spill] sm:$0xff] }
 0x293   :  { %v3316_v59 = vmul.f32 0.2, %v3252_v1  ;;  %v3049_v57 = vpop.f32.mrf.mxu0  ;;  %v3162_v52 = vpop.f32.mrf.mxu1  ;;  %v2834_v38 = vadd.f32 %v6170_v49, %v6572_v41 }
 0x294   :  { %v3435_v51 = vpack.c.bf16 %v3379_v30, %v3375_v61  ;;  %v3256_v13 = vadd.f32 %v6239_v40, %v3159_v12  ;;  %v3161_v63 = vadd.f32 %v3160_v25, %v3048_v22  ;;  %v3319_v36 = vmul.f32 0.2, %v3255_v37 }
 0x295   :  { %v3380_v5 = vmax.f32 %v3252_v1, %v3316_v59  ;;  %v3050_v26 = vadd.f32 %v3049_v57, %v2937_v33  ;;  %v3053_v27 = vpop.f32.mrf.mxu0  ;;  %v3166_v7 = vpop.f32.mrf.mxu1  ;;  %v2947_v25 = vadd.f32 %v6172_v8, %v2834_v38 }
 0x296   :  { %v3259_v2 = vadd.f32 %v6233_v55, %v3161_v63  ;;  %v3054_v20 = vadd.f32 %v3053_v27, %v6164_v14  ;;  %v3383_v16 = vmax.f32 %v3255_v37, %v3319_v36  ;;  %v3320_v56 = vmul.f32 0.2, %v3256_v13 }
 0x297   :  { %v3163_v39 = vadd.f32 %v3162_v52, %v3050_v26  ;;  %v3055_v34 = vpop.f32.mrf.mxu0  ;;  %v3168_v19 = vpop.f32.mrf.mxu1  ;;  %v3436_v28 = vpack.c.bf16 %v3380_v5, %v3376_v11 }
 0x298   :  { %v3323_v18 = vmul.f32 0.2, %v3259_v2  ;;  %v3167_v29 = vadd.f32 %v3166_v7, %v3054_v20  ;;  %v3056_v45 = vadd.f32 %v3055_v34, %v6167_v15  ;;  %v3384_v59 = vmax.f32 %v3256_v13, %v3320_v56 }
 0x299   :  { %v3260_v32 = vadd.f32 %v6239_v40, %v3163_v39  ;;  %4012 = vmatprep.mubr.bf16.mxu1 %v3436_v28  ;;  %v3057_v61 = vpop.f32.mrf.mxu0  ;;  %v3170_v3 = vpop.f32.mrf.mxu1 }
 0x29a   :  { %v3387_v1 = vmax.f32 %v3259_v2, %v3323_v18  ;;  %v3263_v14 = vadd.f32 %v6233_v55, %v3167_v29  ;;  %v3169_v46 = vadd.f32 %v3168_v19, %v3056_v45  ;;  %v3058_v49 = vadd.f32 %v3057_v61, %v6174_v31  ;;  %4013 = vmatmul.mubr.bf16.gmra.mxu1 %v3435_v51  ;;  %v6573_v51 = vld [vmem:[#allocation40_spill] sm:$0xff] }
 0x29b   :  { %v3324_v30 = vmul.f32 0.2, %v3260_v32  ;;  %v3059_v12 = vpop.f32.mrf.mxu0  ;;  %v3172_v22 = vpop.f32.mrf.mxu1  ;;  %v2844_v8 = vadd.f32 %v6183_v24, %v6573_v51 }
 0x29c   :  { %v3439_v15 = vpack.c.bf16 %v3387_v1, %v3383_v16  ;;  %v3264_v37 = vadd.f32 %v6239_v40, %v3169_v46  ;;  %v3171_v33 = vadd.f32 %v3170_v3, %v3058_v49  ;;  %v3327_v52 = vmul.f32 0.2, %v3263_v14 }
 0x29d   :  { %v3388_v57 = vmax.f32 %v3260_v32, %v3324_v30  ;;  %v3060_v63 = vadd.f32 %v3059_v12, %v2947_v25  ;;  %v3063_v11 = vpop.f32.mrf.mxu0  ;;  %v3176_v5 = vpop.f32.mrf.mxu1  ;;  %v2957_v45 = vadd.f32 %v6185_v10, %v2844_v8 }
 0x29e   :  { %v3267_v36 = vadd.f32 %v6233_v55, %v3171_v33  ;;  %v3064_v31 = vadd.f32 %v3063_v11, %v6177_v21  ;;  %v3391_v38 = vmax.f32 %v3263_v14, %v3327_v52  ;;  %v3328_v39 = vmul.f32 0.2, %v3264_v37 }
 0x29f   :  { %v3173_v26 = vadd.f32 %v3172_v22, %v3060_v63  ;;  %v3065_v27 = vpop.f32.mrf.mxu0  ;;  %v3178_v7 = vpop.f32.mrf.mxu1  ;;  %v3440_v2 = vpack.c.bf16 %v3388_v57, %v3384_v59  ;;  %v6574_v22 = vld [vmem:[#allocation44_spill] sm:$0xff] }
 0x2a0   :  { %v3331_v20 = vmul.f32 0.2, %v3267_v36  ;;  %v3177_v41 = vadd.f32 %v3176_v5, %v3064_v31  ;;  %v3066_v13 = vadd.f32 %v3065_v27, %v6180_v43  ;;  %v3392_v1 = vmax.f32 %v3264_v37, %v3328_v39 }
 0x2a1   :  { %v3268_v34 = vadd.f32 %v6239_v40, %v3173_v26  ;;  %4022 = vmatprep.mubr.bf16.mxu1 %v3440_v2  ;;  %v3067_v19 = vpop.f32.mrf.mxu0  ;;  %v3180_v28 = vpop.f32.mrf.mxu1  ;;  %v2854_v10 = vadd.f32 %v6196_v6, %v6574_v22 }
 0x2a2   :  { %v3395_v18 = vmax.f32 %v3267_v36, %v3331_v20  ;;  %v3271_v21 = vadd.f32 %v6233_v55, %v3177_v41  ;;  %v3179_v29 = vadd.f32 %v3178_v7, %v3066_v13  ;;  %v3068_v24 = vadd.f32 %v3067_v19, %v6187_v17  ;;  %4023 = vmatmul.mubr.bf16.gmra.mxu1 %v3439_v15 }
 0x2a3   :  { %v3332_v16 = vmul.f32 0.2, %v3268_v34  ;;  %v3069_v56 = vpop.f32.mrf.mxu0  ;;  %v3182_v32 = vpop.f32.mrf.mxu1  ;;  %v2967_v27 = vadd.f32 %v6198_v23, %v2854_v10 }
 0x2a4   :  { %v3443_v43 = vpack.c.bf16 %v3395_v18, %v3391_v38  ;;  %v3272_v61 = vadd.f32 %v6239_v40, %v3179_v29  ;;  %v3181_v3 = vadd.f32 %v3180_v28, %v3068_v24  ;;  %v3335_v46 = vmul.f32 0.2, %v3271_v21  ;;  %v6575_v29 = vld [vmem:[#allocation49_spill] sm:$0xff] }
 0x2a5   :  { %v3396_v14 = vmax.f32 %v3268_v34, %v3332_v16  ;;  %v3070_v49 = vadd.f32 %v3069_v56, %v2957_v45  ;;  %v3073_v25 = vpop.f32.mrf.mxu0  ;;  %v3186_v30 = vpop.f32.mrf.mxu1  ;;  %v2864_v23 = vadd.f32 %v6209_v35, %v6575_v29 }
 0x2a6   :  { %v3275_v12 = vadd.f32 %v6233_v55, %v3181_v3  ;;  %v3074_v17 = vadd.f32 %v3073_v25, %v6190_v47  ;;  %v3399_v11 = vmax.f32 %v3271_v21, %v3335_v46  ;;  %v3336_v5 = vmul.f32 0.2, %v3272_v61 }
 0x2a7   :  { %v3183_v15 = vadd.f32 %v3182_v32, %v3070_v49  ;;  %v3075_v33 = vpop.f32.mrf.mxu0  ;;  %v3188_v59 = vpop.f32.mrf.mxu1  ;;  %v3444_v57 = vpack.c.bf16 %v3396_v14, %v3392_v1 }
 0x2a8   :  { %v3339_v52 = vmul.f32 0.2, %v3275_v12  ;;  %v3187_v63 = vadd.f32 %v3186_v30, %v3074_v17  ;;  %v3076_v37 = vadd.f32 %v3075_v33, %v6193_v58  ;;  %v3400_v38 = vmax.f32 %v3272_v61, %v3336_v5 }
 0x2a9   :  { %v3276_v36 = vadd.f32 %v6239_v40, %v3183_v15  ;;  %4032 = vmatprep.mubr.bf16.mxu1 %v3444_v57  ;;  %v3077_v31 = vpop.f32.mrf.mxu0  ;;  %v3190_v51 = vpop.f32.mrf.mxu1 }
 0x2aa   :  { %v3403_v8 = vmax.f32 %v3275_v12, %v3339_v52  ;;  %v3279_v47 = vadd.f32 %v6233_v55, %v3187_v63  ;;  %v3189_v26 = vadd.f32 %v3188_v59, %v3076_v37  ;;  %v3078_v6 = vadd.f32 %v3077_v31, %v6200_v53  ;;  %4033 = vmatmul.mubr.bf16.gmra.mxu1 %v3443_v43 }
 0x2ab   :  { %v3340_v7 = vmul.f32 0.2, %v3276_v36  ;;  %v3079_v2 = vpop.f32.mrf.mxu0  ;;  %v3192_v20 = vpop.f32.mrf.mxu1  ;;  %v2977_v12 = vadd.f32 %v6211_v0, %v2864_v23 }
 0x2ac   :  { %v3447_v58 = vpack.c.bf16 %v3403_v8, %v3399_v11  ;;  %v3280_v41 = vadd.f32 %v6239_v40, %v3189_v26  ;;  %v3191_v13 = vadd.f32 %v3190_v51, %v3078_v6  ;;  %v3343_v34 = vmul.f32 0.2, %v3279_v47 }
 0x2ad   :  { %v3404_v39 = vmax.f32 %v3276_v36, %v3340_v7  ;;  %v3080_v19 = vadd.f32 %v3079_v2, %v2967_v27  ;;  %v3083_v28 = vpop.f32.mrf.mxu0  ;;  %v3196_v18 = vpop.f32.mrf.mxu1  ;;  %v6576_v36 = vld [vmem:[#allocation54_spill] sm:$0xff] }
 0x2ae   :  { %v3283_v21 = vadd.f32 %v6233_v55, %v3191_v13  ;;  %v3084_v53 = vadd.f32 %v3083_v28, %v6203_v62  ;;  %v3407_v3 = vmax.f32 %v3279_v47, %v3343_v34  ;;  %v3344_v1 = vmul.f32 0.2, %v3280_v41 }
 0x2af   :  { %v3193_v24 = vadd.f32 %v3192_v20, %v3080_v19  ;;  %v3085_v45 = vpop.f32.mrf.mxu0  ;;  %v3198_v16 = vpop.f32.mrf.mxu1  ;;  %v3448_v56 = vpack.c.bf16 %v3404_v39, %v3400_v38  ;;  %v2874_v0 = vadd.f32 %v6223_v9, %v6576_v36 }
 0x2b0   :  { %v3347_v32 = vmul.f32 0.2, %v3283_v21  ;;  %v3197_v43 = vadd.f32 %v3196_v18, %v3084_v53  ;;  %v3086_v61 = vadd.f32 %v3085_v45, %v6206_v50  ;;  %v3408_v59 = vmax.f32 %v3280_v41, %v3344_v1 }
 0x2b1   :  { %v3284_v14 = vadd.f32 %v6239_v40, %v3193_v24  ;;  %4042 = vmatprep.mubr.bf16.mxu1 %v3448_v56  ;;  %v3087_v46 = vpop.f32.mrf.mxu0  ;;  %v3200_v49 = vpop.f32.mrf.mxu1  ;;  %v2987_v39 = vadd.f32 %v6225_v48, %v2874_v0 }
 0x2b2   :  { %v3411_v25 = vmax.f32 %v3283_v21, %v3347_v32  ;;  %v3287_v62 = vadd.f32 %v6233_v55, %v3197_v43  ;;  %v3199_v30 = vadd.f32 %v3198_v16, %v3086_v61  ;;  %v3088_v35 = vadd.f32 %v3087_v46, %v6213_v44  ;;  %4043 = vmatmul.mubr.bf16.gmra.mxu1 %v3447_v58 }
 0x2b3   :  { %v3348_v17 = vmul.f32 0.2, %v3284_v14  ;;  %v3089_v22 = vpop.f32.mrf.mxu0  ;;  %v3202_v10 = vpop.f32.mrf.mxu1 }
 0x2b4   :  { %v3451_v50 = vpack.c.bf16 %v3411_v25, %v3407_v3  ;;  %v3288_v15 = vadd.f32 %v6239_v40, %v3199_v30  ;;  %v3201_v33 = vadd.f32 %v3200_v49, %v3088_v35  ;;  %v3351_v52 = vmul.f32 0.2, %v3287_v62 }
 0x2b5   :  { %v3412_v57 = vmax.f32 %v3284_v14, %v3348_v17  ;;  %v3090_v63 = vadd.f32 %v3089_v22, %v2977_v12  ;;  %v3093_v37 = vpop.f32.mrf.mxu0  ;;  %v3206_v11 = vpop.f32.mrf.mxu1  ;;  %v6577_v25 = vsub.s32 1, %v6565_v42 }
 0x2b6   :  { %v3291_v5 = vadd.f32 %v6233_v55, %v3201_v33  ;;  %v3094_v44 = vadd.f32 %v3093_v37, %v6216_v4  ;;  %v3415_v7 = vmax.f32 %v3287_v62, %v3351_v52  ;;  %v3352_v2 = vmul.f32 0.2, %v3288_v15 }
 0x2b7   :  { %v3203_v31 = vadd.f32 %v3202_v10, %v3090_v63  ;;  %v3095_v51 = vpop.f32.mrf.mxu0  ;;  %v3208_v8 = vpop.f32.mrf.mxu1  ;;  %v3452_v47 = vpack.c.bf16 %v3412_v57, %v3408_v59 }
 0x2b8   :  { %v3355_v26 = vmul.f32 0.2, %v3291_v5  ;;  %v3207_v6 = vadd.f32 %v3206_v11, %v3094_v44  ;;  %v3096_v27 = vadd.f32 %v3095_v51, %v6220_v60  ;;  %v3416_v21 = vmax.f32 %v3288_v15, %v3352_v2  ;;  %v6578_v51 = vld [vmem:[#allocation20_spill] sm:$0xff] }
 0x2b9   :  { %v3292_v20 = vadd.f32 %v6239_v40, %v3203_v31  ;;  %4052 = vmatprep.mubr.bf16.mxu1 %v3452_v47  ;;  %v3097_v58 = vpop.f32.mrf.mxu0  ;;  %v3210_v38 = vpop.f32.mrf.mxu1 }
 0x2ba   :  { %v3419_v41 = vmax.f32 %v3291_v5, %v3355_v26  ;;  %v3295_v4 = vadd.f32 %v6233_v55, %v3207_v6  ;;  %v3209_v13 = vadd.f32 %v3208_v8, %v3096_v27  ;;  %v3098_v9 = vadd.f32 %v3097_v58, %v6230_v54  ;;  %4053 = vmatmul.mubr.bf16.gmra.mxu1 %v3451_v50  ;;  %v6352_v58 = vld.sshfl [vmem:[%s6468_s7] sm:$0x11 pattern:$0x75316420]  ;;  %s5374_s7 = smov [#allocation11]  }
 0x2bb   :  { %v3356_v34 = vmul.f32 0.2, %v3292_v20  ;;  %v3099_v19 = vpop.f32.mrf.mxu0  ;;  %v3212_v45 = vpop.f32.mrf.mxu1  ;;  %v5373_v27 = vmov 1966171168   ;;  %s4252_s19 = sshll.u32 %s5374_s7, 4  ;;  %s4253_s19 = int_to_ptr.vmem [resolvable:$true] %s4252_s19 }
 0x2bc   :  { %v3455_v28 = vpack.c.bf16 %v3419_v41, %v3415_v7  ;;  %v3296_v60 = vadd.f32 %v6239_v40, %v3209_v13  ;;  %v3211_v18 = vadd.f32 %v3210_v38, %v3098_v9  ;;  %v3100_v29 = vadd.f32 %v3099_v19, %v2987_v39  ;;  %s5333_s20 = scalar_lea.vmem %s4253_s19, 16  ;;  %s5337_s21 = scalar_lea.vmem %s4253_s19, 32 }
 0x2bd   :  { %v3420_v53 = vmax.f32 %v3292_v20, %v3356_v34  ;;  %v3359_v23 = vmul.f32 0.2, %v3295_v4  ;;  %v4184_v7 = vunpack.c.l.s4 %v5373_v27  ;;  %v4182_v13 = vcombine.high %v6352_v58, %v6352_v58  ;;  %p5334_p6 = scmp.ne.s32.totalorder %s4253_s19, %s5333_s20  ;;  %p5338_p7 = scmp.lt.s32.totalorder %s4253_s19, %s4253_s19 }
 0x2be   :  { %v3299_v24 = vadd.f32 %v6233_v55, %v3211_v18  ;;  %v3213_v16 = vadd.f32 %v3212_v45, %v3100_v29  ;;  %v3360_v32 = vmul.f32 0.2, %v3296_v60  ;;  %v3525_v55 = vld [vmem:[%s6467_s6] sm:$0x3]  ;;  %p5339_p8 = scmp.lt.s32.totalorder %s5337_s21, %s5333_s20 }
 0x2bf   :  { %v3456_v56 = vpack.c.bf16 %v3420_v53, %v3416_v21  ;;  %v3423_v48 = vmax.f32 %v3295_v4, %v3359_v23  ;;  %v6323_v62 = vrot.slane %v3525_v55, %v6577_v25  ;;  %v6342_v8 = vrot.slane %v3525_v55, %v6578_v51 }
 0x2c0   :  { %v3363_v54 = vmul.f32 0.2, %v3299_v24  ;;  %v3300_v43 = vadd.f32 %v6239_v40, %v3213_v16  ;;  %v3424_v14 = vmax.f32 %v3296_v60, %v3360_v32  ;;  %v4185_v41 = vunpack.c.0.s8 %v4184_v7  ;;  %p5340_p9 = por %p5339_p8, %p5338_p7 }
 0x2c1   :  { %4062 = vmatprep.mubr.bf16.mxu1 %v3456_v56 }
 0x2c2   :  { %v3427_v61 = vmax.f32 %v3299_v24, %v3363_v54  ;;  %4063 = vmatmul.mubr.bf16.gmra.mxu1 %v3455_v28  ;;  %v3364_v3 = vmul.f32 0.2, %v3300_v43  ;;  %v6360_v34 = vsub.s32 %v4185_v41, %v6565_v42  ;;  %p5341_p10 = pnand %p5340_p9, %p5334_p6 }
 0x2c4   :  { %v3459_v1 = vpack.c.bf16 %v3427_v61, %v3423_v48  ;;  %v3428_v46 = vmax.f32 %v3300_v43, %v3364_v3  ;;  %v4196_v53 = vrot.slane %v4182_v13, %v6360_v34 }
 0x2c6   :  { %v3460_v49 = vpack.c.bf16 %v3428_v46, %v3424_v14  ;;  %4231 = vmatprep.mubr.bf16.mxu0 %v4196_v53 }
 0x2c8   :  { %4072 = vmatprep.mubr.bf16.mxu1 %v3460_v49 }
 0x2ca   :  { %4073 = vmatmul.mubr.bf16.gmra.mxu1 %v3459_v1 }
 0x2d1   :  { %v3891_v40 = vpop.f32.mrf.mxu0 }
 0x2d2   :  { %v3892_v26 = vadd.f32 %v3891_v40, %v6342_v8 }
 0x2d3   :  { %v3893_v30 = vpop.f32.mrf.mxu0 }
 0x2d4   :  { %v3894_v35 = vadd.f32 %v3893_v30, %v6323_v62 }
 0x2d5   :  { %v3895_v12 = vpop.f32.mrf.mxu0 }
 0x2d6   :  { %v3896_v9 = vadd.f32 %v3895_v12, %v6342_v8 }
 0x2d7   :  { %v3897_v17 = vpop.f32.mrf.mxu0 }
 0x2d8   :  { %v3898_v22 = vadd.f32 %v3897_v17, %v6323_v62 }
 0x2da   :  { %v3901_v10 = vpop.f32.mrf.mxu0 }
 0x2db   :  { %v3902_v16 = vadd.f32 %v3901_v10, %v6342_v8 }
 0x2dc   :  { %v3903_v50 = vpop.f32.mrf.mxu0 }
 0x2dd   :  { %v3904_v15 = vadd.f32 %v3903_v50, %v6323_v62 }
 0x2de   :  { %v3905_v33 = vpop.f32.mrf.mxu0 }
 0x2df   :  { %v3906_v46 = vadd.f32 %v3905_v33, %v6342_v8 }
 0x2e0   :  { %v3907_v59 = vpop.f32.mrf.mxu0 }
 0x2e1   :  { %v3908_v57 = vadd.f32 %v3907_v59, %v6323_v62 }
 0x2e2   :  { %v3911_v52 = vpop.f32.mrf.mxu0 }
 0x2e3   :  { %v3912_v17 = vadd.f32 %v3911_v52, %v6342_v8 }
 0x2e4   :  { %v3913_v63 = vpop.f32.mrf.mxu0 }
 0x2e5   :  { %v6330_v37 = vadd.f32 %v3913_v63, %v6323_v62 }
 0x2e6   :  { %v3915_v11 = vpop.f32.mrf.mxu0 }
 0x2e8   :  { %v3917_v5 = vpop.f32.mrf.mxu0 }
 0x2e9   :  { %v6333_v44 = vadd.f32 %v3917_v5, %v6323_v62 }
 0x2ea   :  { %v6335_v36 = vpop.f32.mrf.mxu0 }
 0x2ec   :  { %v6337_v0 = vpop.f32.mrf.mxu0 }
 0x2ee   :  { %v6339_v31 = vpop.f32.mrf.mxu0 }
 0x2f0   :  { %v6344_v47 = vpop.f32.mrf.mxu0 }
 0x2f2   :  { %v6347_v6 = vpop.f32.mrf.mxu0 }
 0x2f4   :  { %v6357_v38 = vpop.f32.mrf.mxu0 }
 0x2f6   :  { %v6365_v29 = vpop.f32.mrf.mxu0 }
 0x2f8   :  { %v6368_v48 = vpop.f32.mrf.mxu0 }
 0x351   :  { %v4004_v2 = vpop.f32.mrf.mxu1 }
 0x352   :  { %v4005_v20 = vadd.f32 %v4004_v2, %v3892_v26 }
 0x353   :  { %v4006_v4 = vpop.f32.mrf.mxu1 }
 0x354   :  { %v4007_v39 = vadd.f32 %v4006_v4, %v3894_v35  ;;  %v4083_v28 = vmul.f32 0.2, %v4005_v20  ;;  %v6375_v35 = vpop.f32.mrf.mxu0 }
 0x355   :  { %v4008_v19 = vpop.f32.mrf.mxu1 }
 0x356   :  { %v4009_v60 = vadd.f32 %v4008_v19, %v3896_v9  ;;  %v4084_v23 = vmul.f32 0.2, %v4007_v39  ;;  %v4115_v56 = vmax.f32 %v4005_v20, %v4083_v28  ;;  %v6379_v33 = vpop.f32.mrf.mxu0 }
 0x357   :  { %v4010_v21 = vpop.f32.mrf.mxu1 }
 0x358   :  { %v4085_v24 = vmul.f32 0.2, %v4009_v60  ;;  %v4011_v45 = vadd.f32 %v4010_v21, %v3898_v22  ;;  %v4116_v61 = vmax.f32 %v4007_v39, %v4084_v23  ;;  %v6386_v39 = vpop.f32.mrf.mxu0 }
 0x35a   :  { %v4117_v42 = vmax.f32 %v4009_v60, %v4085_v24  ;;  %v4086_v54 = vmul.f32 0.2, %v4011_v45  ;;  %v4014_v32 = vpop.f32.mrf.mxu1 }
 0x35b   :  { %v4015_v43 = vadd.f32 %v4014_v32, %v3902_v16  ;;  %v3947_v16 = vpop.f32.mrf.mxu0 }
 0x35c   :  { %v6370_v3 = vpack.c.bf16 %v4117_v42, %v4115_v56  ;;  %v4118_v1 = vmax.f32 %v4011_v45, %v4086_v54  ;;  %v4016_v14 = vpop.f32.mrf.mxu1  ;;  %v3926_v42 = vadd.f32 %v6339_v31, %v6342_v8 }
 0x35d   :  { %v4017_v49 = vadd.f32 %v4016_v14, %v3904_v15  ;;  %v4087_v40 = vmul.f32 0.2, %v4015_v43  ;;  %v3916_v15 = vadd.f32 %v3915_v11, %v6342_v8  ;;  %v3922_v11 = vadd.f32 %v6335_v36, %v6342_v8 }
 0x35e   :  { %v4018_v55 = vpop.f32.mrf.mxu1  ;;  %v6373_v25 = vpack.c.bf16 %v4118_v1, %v4116_v61 }
 0x35f   :  { %v4019_v30 = vadd.f32 %v4018_v55, %v3906_v46  ;;  %v4088_v22 = vmul.f32 0.2, %v4017_v49  ;;  %v4119_v63 = vmax.f32 %v4015_v43, %v4087_v40 }
 0x360   :  { %v4020_v12 = vpop.f32.mrf.mxu1 }
 0x361   :  { %v4089_v10 = vmul.f32 0.2, %v4019_v30  ;;  %v4021_v50 = vadd.f32 %v4020_v12, %v3908_v57  ;;  %v4120_v2 = vmax.f32 %v4017_v49, %v4088_v22 }
 0x362   :  { %v4024_v59 = vpop.f32.mrf.mxu1 }
 0x363   :  { %v4121_v5 = vmax.f32 %v4019_v30, %v4089_v10  ;;  %v4090_v26 = vmul.f32 0.2, %v4021_v50  ;;  %v4025_v27 = vadd.f32 %v4024_v59, %v3912_v17 }
 0x364   :  { %v4026_v7 = vpop.f32.mrf.mxu1 }
 0x365   :  { %v6381_v20 = vpack.c.bf16 %v4121_v5, %v4119_v63  ;;  %v4122_v41 = vmax.f32 %v4021_v50, %v4090_v26  ;;  %v4027_v4 = vadd.f32 %v4026_v7, %v6330_v37  ;;  %v4091_v13 = vmul.f32 0.2, %v4025_v27 }
 0x366   :  { %v4028_v52 = vpop.f32.mrf.mxu1 }
 0x367   :  { %v4029_v9 = vadd.f32 %v4028_v52, %v3916_v15  ;;  %v6384_v57 = vpack.c.bf16 %v4122_v41, %v4120_v2  ;;  %v4092_v28 = vmul.f32 0.2, %v4027_v4  ;;  %v4123_v23 = vmax.f32 %v4025_v27, %v4091_v13 }
 0x368   :  { %v4030_v19 = vpop.f32.mrf.mxu1 }
 0x369   :  { %v4093_v60 = vmul.f32 0.2, %v4029_v9  ;;  %v4031_v21 = vadd.f32 %v4030_v19, %v6333_v44  ;;  %v4124_v54 = vmax.f32 %v4027_v4, %v4092_v28  ;;  %v3951_v44 = vpop.f32.mrf.mxu0 }
 0x36a   :  { %v4034_v53 = vpop.f32.mrf.mxu1 }
 0x36b   :  { %v4125_v24 = vmax.f32 %v4029_v9, %v4093_v60  ;;  %v4094_v45 = vmul.f32 0.2, %v4031_v21  ;;  %v4035_v37 = vadd.f32 %v4034_v53, %v3922_v11  ;;  %v3953_v12 = vpop.f32.mrf.mxu0 }
 0x36c   :  { %v6391_v56 = vpop.f32.mrf.mxu1  ;;  %v3954_v53 = vadd.f32 %v3953_v12, %v6323_v62  ;;  %v3948_v12 = vadd.f32 %v3947_v16, %v6323_v62 }
 0x36d   :  { %v6395_v32 = vpack.c.bf16 %v4125_v24, %v4123_v23  ;;  %v4126_v43 = vmax.f32 %v4031_v21, %v4094_v45  ;;  %v4095_v61 = vmul.f32 0.2, %v4035_v37  ;;  %v3955_v10 = vpop.f32.mrf.mxu0 }
 0x36e   :  { %v4038_v36 = vpop.f32.mrf.mxu1 }
 0x36f   :  { %v4039_v1 = vadd.f32 %v4038_v36, %v3926_v42  ;;  %v6397_v14 = vpack.c.bf16 %v4126_v43, %v4124_v54  ;;  %v4127_v40 = vmax.f32 %v4035_v37, %v4095_v61  ;;  %v3957_v63 = vpop.f32.mrf.mxu0 }
 0x370   :  { %v6399_v46 = vpop.f32.mrf.mxu1  ;;  %v3958_v19 = vadd.f32 %v3957_v63, %v6323_v62  ;;  %v3956_v63 = vadd.f32 %v3955_v10, %v6342_v8 }
 0x371   :  { %v4097_v49 = vmul.f32 0.2, %v4039_v1  ;;  %v3961_v27 = vpop.f32.mrf.mxu0 }
 0x372   :  { %v6401_v55 = vpop.f32.mrf.mxu1  ;;  %v3962_v28 = vadd.f32 %v3961_v27, %v6342_v8 }
 0x373   :  { %v4129_v30 = vmax.f32 %v4039_v1, %v4097_v49  ;;  %v3963_v2 = vpop.f32.mrf.mxu0 }
 0x374   :  { %v6403_v17 = vpop.f32.mrf.mxu1  ;;  %v3964_v11 = vadd.f32 %v3963_v2, %v6323_v62 }
 0x375   :  { %v6405_v31 = vpack.c.bf16 %v4129_v30, %v4127_v40  ;;  %v3965_v52 = vpop.f32.mrf.mxu0 }
 0x376   :  { %v6407_v22 = vpop.f32.mrf.mxu1  ;;  %v3966_v23 = vadd.f32 %v3965_v52, %v6342_v8 }
 0x377   :  { %v3967_v60 = vpop.f32.mrf.mxu0 }
 0x378   :  { %v6409_v50 = vpop.f32.mrf.mxu1  ;;  %v3968_v54 = vadd.f32 %v3967_v60, %v6323_v62 }
 0x37a   :  { %v6411_v59 = vpop.f32.mrf.mxu1 }
 0x37c   :  { %v4056_v5 = vpop.f32.mrf.mxu1 }
 0x37e   :  { %v4058_v26 = vpop.f32.mrf.mxu1 }
 0x380   :  { %v4060_v15 = vpop.f32.mrf.mxu1 }
 0x382   :  { %v4064_v7 = vpop.f32.mrf.mxu1 }
 0x384   :  { %v4066_v41 = vpop.f32.mrf.mxu1 }
 0x385   :  { %v4067_v43 = vadd.f32 %v4066_v41, %v3954_v53 }
 0x386   :  { %v4068_v4 = vpop.f32.mrf.mxu1 }
 0x387   :  { %v4108_v2 = vmul.f32 0.2, %v4067_v43 }
 0x388   :  { %v4070_v13 = vpop.f32.mrf.mxu1 }
 0x389   :  { %v4071_v24 = vadd.f32 %v4070_v13, %v3958_v19  ;;  %v3944_v13 = vadd.f32 %v6379_v33, %v6323_v62  ;;  %v4069_v19 = vadd.f32 %v4068_v4, %v3956_v63  ;;  %v4140_v10 = vmax.f32 %v4067_v43, %v4108_v2 }
 0x38a   :  { %v4074_v9 = vpop.f32.mrf.mxu1  ;;  %v3946_v33 = vadd.f32 %v6386_v39, %v6342_v8  ;;  %v3924_v63 = vadd.f32 %v6337_v0, %v6323_v62 }
 0x38b   :  { %v4075_v37 = vadd.f32 %v4074_v9, %v3962_v28  ;;  %v4110_v1 = vmul.f32 0.2, %v4071_v24  ;;  %v3952_v9 = vadd.f32 %v3951_v44, %v6342_v8 }
 0x38c   :  { %v4076_v21 = vpop.f32.mrf.mxu1 }
 0x38d   :  { %v4077_v45 = vadd.f32 %v4076_v21, %v3964_v11  ;;  %v4111_v27 = vmul.f32 0.2, %v4075_v37  ;;  %v4061_v11 = vadd.f32 %v4060_v15, %v3948_v12  ;;  %v4142_v28 = vmax.f32 %v4071_v24, %v4110_v1 }
 0x38e   :  { %v4078_v42 = vpop.f32.mrf.mxu1  ;;  %v4065_v53 = vadd.f32 %v4064_v7, %v3952_v9  ;;  %v3938_v15 = vadd.f32 %v6368_v48, %v6323_v62  ;;  %v4059_v7 = vadd.f32 %v4058_v26, %v3946_v33 }
 0x38f   :  { %v4079_v36 = vadd.f32 %v4078_v42, %v3966_v23  ;;  %v4112_v49 = vmul.f32 0.2, %v4077_v45  ;;  %v4143_v23 = vmax.f32 %v4075_v37, %v4111_v27  ;;  %v4057_v42 = vadd.f32 %v4056_v5, %v3944_v13 }
 0x390   :  { %v4080_v61 = vpop.f32.mrf.mxu1  ;;  %v4106_v18 = vmul.f32 0.2, %v4061_v11  ;;  %v4161_v51 = vpack.c.bf16 %v4142_v28, %v4140_v10  ;;  %v4107_v44 = vmul.f32 0.2, %v4065_v53  ;;  %v3942_v5 = vadd.f32 %v6375_v35, %v6342_v8 }
 0x391   :  { %v4113_v40 = vmul.f32 0.2, %v4079_v36  ;;  %v4081_v30 = vadd.f32 %v4080_v61, %v3968_v54  ;;  %v4144_v60 = vmax.f32 %v4077_v45, %v4112_v49  ;;  %v4109_v61 = vmul.f32 0.2, %v4069_v19 }
 0x392   :  { %v4104_v4 = vmul.f32 0.2, %v4057_v42  ;;  %v3934_v45 = vadd.f32 %v6357_v38, %v6323_v62  ;;  %v4051_v37 = vadd.f32 %v6409_v50, %v3938_v15  ;;  %v4138_v43 = vmax.f32 %v4061_v11, %v4106_v18 }
 0x393   :  { %v4114_v52 = vmul.f32 0.2, %v4081_v30  ;;  %v4145_v41 = vmax.f32 %v4079_v36, %v4113_v40  ;;  %v4141_v24 = vmax.f32 %v4069_v19, %v4109_v61  ;;  %v4055_v39 = vadd.f32 %v6411_v59, %v3942_v5 }
 0x394   :  { %v4139_v36 = vmax.f32 %v4065_v53, %v4107_v44  ;;  %v4047_v1 = vadd.f32 %v6403_v17, %v3934_v45  ;;  %v4136_v49 = vmax.f32 %v4057_v42, %v4104_v4  ;;  %v4105_v48 = vmul.f32 0.2, %v4059_v7 }
 0x395   :  { %v4146_v21 = vmax.f32 %v4081_v30, %v4114_v52  ;;  %v4162_v16 = vpack.c.bf16 %v4145_v41, %v4143_v23  ;;  %v3936_v35 = vadd.f32 %v6365_v29, %v6342_v8  ;;  %v4103_v26 = vmul.f32 0.2, %v4055_v39 }
 0x396   :  { %v4160_v40 = vpack.c.bf16 %v4141_v24, %v4139_v36  ;;  %v4159_v30 = vpack.c.bf16 %v4138_v43, %v4136_v49  ;;  %v3928_v38 = vadd.f32 %v6344_v47, %v6323_v62  ;;  %v4100_v50 = vmul.f32 0.2, %v4047_v1 }
 0x397   :  { %v4163_v54 = vpack.c.bf16 %v4146_v21, %v4144_v60  ;;  %v3932_v18 = vadd.f32 %v6347_v6, %v6342_v8  ;;  %v4049_v17 = vadd.f32 %v6407_v22, %v3936_v35  ;;  %v4137_v59 = vmax.f32 %v4059_v7, %v4105_v48  ;;  %v6580_v60 = vld [vmem:[#allocation20_spill] sm:$0xff] }
 0x398   :  { %v4041_v27 = vadd.f32 %v6399_v46, %v3928_v38  ;;  %v4135_v2 = vmax.f32 %v4055_v39, %v4103_v26  ;;  %v4037_v52 = vadd.f32 %v6391_v56, %v3924_v63  ;;  %v4132_v47 = vmax.f32 %v4047_v1, %v4100_v50 }
 0x399   :  { %4199 = vmatprep.subr.bf16.mxu0 %v4163_v54  ;;  %v4045_v29 = vadd.f32 %v6401_v55, %v3932_v18  ;;  %v4101_v13 = vmul.f32 0.2, %v4049_v17  ;;  %v6579_v56 = vrot.slane %v6352_v58, %v6360_v34  ;;  %v4168_v55 = vpop.permute.xlu0 %4167 }
 0x39a   :  { %4200 = vmatpush1.bf16.xpose.msra.mxu0 %v4162_v16  ;;  %v4158_v9 = vpack.c.bf16 %v4137_v59, %v4135_v2  ;;  %v4098_v19 = vmul.f32 0.2, %v4041_v27  ;;  %v4096_v6 = vmul.f32 0.2, %v4037_v52  ;;  %v4173_v21 = vrot.slane %v4168_v55, %v6580_v60 }
 0x39b   :  { %4201 = vmatprep.subr.bf16.mxu0 %v4161_v51  ;;  %v4102_v51 = vmul.f32 0.2, %v4051_v37  ;;  %v4099_v8 = vmul.f32 0.2, %v4045_v29  ;;  %v4133_v22 = vmax.f32 %v4049_v17, %v4101_v13 }
 0x39c   :  { %v4130_v11 = vmax.f32 %v4041_v27, %v4098_v19  ;;  %v4128_v0 = vmax.f32 %v4037_v52, %v4096_v6 }
 0x39d   :  { %v4134_v12 = vmax.f32 %v4051_v37, %v4102_v51  ;;  %v4131_v62 = vmax.f32 %v4045_v29, %v4099_v8 }
 0x39e   :  { %v4155_v28 = vpack.c.bf16 %v4130_v11, %v4128_v0 }
 0x39f   :  { %v4157_v41 = vpack.c.bf16 %v4134_v12, %v4132_v47  ;;  %v4156_v46 = vpack.c.bf16 %v4133_v22, %v4131_v62 }
 0x3a2   :  { %4202 = vmatpush1.bf16.xpose.msra.mxu0 %v4160_v40 }
 0x3a3   :  { %4203 = vmatprep.subr.bf16.mxu0 %v4159_v30 }
 0x3aa   :  { %4204 = vmatpush1.bf16.xpose.msra.mxu0 %v4158_v9 }
 0x3ab   :  { %4205 = vmatprep.subr.bf16.mxu0 %v4157_v41 }
 0x3b2   :  { %4206 = vmatpush1.bf16.xpose.msra.mxu0 %v4156_v46 }
 0x3b3   :  { %4207 = vmatprep.subr.bf16.mxu0 %v4155_v28 }
 0x3ba   :  { %4208 = vmatpush1.bf16.xpose.msra.mxu0 %v6405_v31 }
 0x3bb   :  { %4209 = vmatprep.subr.bf16.mxu0 %v6397_v14 }
 0x3c2   :  { %4210 = vmatpush1.bf16.xpose.msra.mxu0 %v6395_v32 }
 0x3c3   :  { %4211 = vmatprep.subr.bf16.mxu0 %v6384_v57 }
 0x3ca   :  { %4212 = vmatpush1.bf16.xpose.msra.mxu0 %v6381_v20 }
 0x3cb   :  { %4213 = vmatprep.subr.bf16.mxu0 %v6373_v25 }
 0x3d2   :  { %4214 = vmatpush1.bf16.xpose.msra.mxu0 %v6370_v3 }
 0x3d9   :  { %4232 = vmatmul.mubr.bf16.vlgmr.msra.gmra.mxu0 %v6579_v56 }
 0x499   :  { %v4233_v31 = vpop.f32.mrf.mxu0 }
 0x49a   :  { %v4234_v53 = vadd.f32 %v4233_v31, %v4173_v21 }
 0x49b   :  { %v4235_v14 = vpop.f32.mrf.mxu0 }
 0x49c   :  { %v4672_v23 = vmul.f32 -1.442695, %v4234_v53 }
 0x49d   :  { %v4236_v32 = vpop.f32.mrf.mxu0 }
 0x49e   :  { %5249 = vpow2.f32 %v4672_v23 }
 0x49f   :  { %v4237_v57 = vpop.f32.mrf.mxu0 }
 0x4ab   :  { %v5250_v42 = vpop.eup %5249 }
 0x4ac   :  { %v4242_v20 = vadd.f32 1.0, %v5250_v42 }
 0x4ae   :  { %5251 = vrcp.f32 %v4242_v20 }
 0x4bb   :  { %v5252_v3 = vpop.eup %5251 }
 0x4bc   :  { %4245 = vst [vmem:[#allocation11] sm:$0x1] %v5252_v3 }
 0x4bd   :  { %5344 = shalt.err (!%p5341_p10)
}
 0x4be   :  { %4255 = dma.vmem_to_hbm [thread:$0]  %s4253_s19, 16, %s6470_s9, [#allocation5]  }
 0x4bf   :  { %5359 = dma.done.wait [#allocation5], 16  }
 0x4c0   :  { %5360 = vsyncadd [#allocation5], 4294967280 }
 0x4c1   :  { %4259 = vsyncpa [#allocation4], 1 }
 0x4c2   :  { %4260 = vsyncpa [#allocation7], 1 }
 0x4c3   :  { %4261 = vsyncpa [#allocation10], 1 }
 0x4c4   :  { %4262 = vsyncpa [#allocation5], 1 }

</bundles_post_ra>
